<compile_context>
chip_gen: v6e
topology: v6e:2x2x1
jax: 0.10.0
libtpu: 0.0.40
codegen_flags: <defaults>
</compile_context>

<pallas_src>
import functools
import numpy as np

import jax
import jax.numpy as jnp
from jax import lax
from jax.experimental import pallas as pl
from jax.experimental.pallas import tpu as pltpu


# ----------------------------------------------------------------------------
# Pallas kernel
# ----------------------------------------------------------------------------
def _vrnn_kernel(n_layers, h_dim, y_dim, z_dim, b_real,
                 y_ref, u_ref, eps_ref, *refs):
    """y_ref/u_ref/eps_ref: [T, Bp, *]. refs = fused param refs + loss out ref."""
    loss_ref = refs[-1]
    p = refs[:-1]
    (phi_y_w1, phi_y_b1, phi_y_w2, phi_y_b2,
     phi_u_w1, phi_u_b1, phi_u_w2, phi_u_b2,
     phi_z_w1, phi_z_b1, phi_z_w2, phi_z_b2,
     enc_w1, enc_b1, enc_w2, enc_b2, enc_head_w, enc_head_b,
     prior_w1, prior_b1, prior_w2, prior_b2, prior_head_w, prior_head_b,
     dec_w1, dec_b1, dec_w2, dec_b2, dec_head_w, dec_head_b,
     dec_mean_w2, dec_mean_b2) = p[:32]
    gru_w = p[32:]                               # n_layers fused (in_l+H, 4H) refs

    T, Bp = y_ref.shape[0], y_ref.shape[1]
    H, Z, Y = h_dim, z_dim, y_dim
    LOG2PI = jnp.float32(np.log(2.0 * np.pi))

    def matmul(x, w_ref, b_ref=None):
        out = jnp.dot(x, w_ref[...], preferred_element_type=jnp.float32)
        if b_ref is not None:
            out = out + b_ref[...]               # bias already (Bp, dim): plain add
        return out

    def mlp2(x, w1, b1, w2, b2):
        return matmul(jnp.maximum(matmul(x, w1, b1), 0.0), w2, b2)

    def step(t, carry):
        h, logp_acc, kl_acc = carry
        y_t, u_t, eps_t = y_ref[t], u_ref[t], eps_ref[t]
        h_last = h[n_layers - 1]

        # feature extractors
        phi_y_t = mlp2(y_t, phi_y_w1, phi_y_b1, phi_y_w2, phi_y_b2)
        phi_u_t = mlp2(u_t, phi_u_w1, phi_u_b1, phi_u_w2, phi_u_b2)

        # encoder + fused mean|logvar head
        enc_t = jnp.maximum(
            mlp2(jnp.concatenate([phi_y_t, h_last], axis=1),
                 enc_w1, enc_b1, enc_w2, enc_b2), 0.0)
        enc_head = matmul(enc_t, enc_head_w, enc_head_b)          # (Bp, 2Z)
        enc_mean_t = enc_head[:, :Z]
        enc_logvar_t = jnp.maximum(enc_head[:, Z:], 0.0)

        # prior + fused mean|logvar head
        prior_t = mlp2(h_last, prior_w1, prior_b1, prior_w2, prior_b2)
        prior_head = matmul(prior_t, prior_head_w, prior_head_b)  # (Bp, 2Z)
        prior_mean_t = prior_head[:, :Z]
        prior_logvar_t = jnp.maximum(prior_head[:, Z:], 0.0)

        # reparameterized sample and phi_z
        z_t = enc_mean_t + eps_t * jnp.exp(0.5 * enc_logvar_t)
        phi_z_t = mlp2(z_t, phi_z_w1, phi_z_b1, phi_z_w2, phi_z_b2)

        # decoder + fused logvar | mean-hidden head
        dec_t = jnp.maximum(
            mlp2(jnp.concatenate([phi_z_t, h_last], axis=1),
                 dec_w1, dec_b1, dec_w2, dec_b2), 0.0)
        dec_head = matmul(dec_t, dec_head_w, dec_head_b)          # (Bp, Y+H)
        dec_logvar_t = jnp.maximum(dec_head[:, :Y], 0.0)
        dec_mean_t = matmul(jnp.maximum(dec_head[:, Y:], 0.0),
                            dec_mean_w2, dec_mean_b2)

        # per-element log-prob and KL, accumulated as vectors (reduce once at end)
        logp = (-0.5 * LOG2PI - 0.5 * dec_logvar_t
                - 0.5 * (y_t - dec_mean_t) ** 2 * jnp.exp(-dec_logvar_t))
        kl = (prior_logvar_t - enc_logvar_t - 1.0
              + (jnp.exp(enc_logvar_t) + (enc_mean_t - prior_mean_t) ** 2)
              * jnp.exp(-prior_logvar_t))

        # GRU: one fused matmul per layer -> [gi_r+gh_r | gi_z+gh_z | gi_n | gh_n]
        layer_in = jnp.concatenate([phi_u_t, phi_z_t], axis=1)    # (Bp, 2H)
        new_h = []
        for l in range(n_layers):
            g = jnp.dot(jnp.concatenate([layer_in, h[l]], axis=1), gru_w[l][...],
                        preferred_element_type=jnp.float32)       # (Bp, 4H)
            r = jax.nn.sigmoid(g[:, :H])
            zg = jax.nn.sigmoid(g[:, H:2 * H])
            n = jnp.tanh(g[:, 2 * H:3 * H] + r * g[:, 3 * H:])
            h_l = (1.0 - zg) * n + zg * h[l]
            new_h.append(h_l)
            layer_in = h_l
        return tuple(new_h), logp_acc + logp, kl_acc + kl

    carry = (tuple(jnp.zeros((Bp, H), jnp.float32) for _ in range(n_layers)),
             jnp.zeros((Bp, Y), jnp.float32),
             jnp.zeros((Bp, Z), jnp.float32))

    if T <= 16:                                  # fully unroll small static T
        for t in range(T):
            carry = step(t, carry)
    else:                                        # partial unroll for longer sequences
        carry = lax.fori_loop(0, T, step, carry, unroll=4)

    _, logp_acc, kl_acc = carry

    # mask padded batch rows, reduce once
    row_y = lax.broadcasted_iota(jnp.int32, (Bp, Y), 0)
    row_z = lax.broadcasted_iota(jnp.int32, (Bp, Z), 0)
    logp_sum = jnp.sum(jnp.where(row_y < b_real, logp_acc, 0.0))
    kl_sum = jnp.sum(jnp.where(row_z < b_real, kl_acc, 0.0))
    loss_ref[0, 0] = -logp_sum + 0.5 * kl_sum


# ----------------------------------------------------------------------------
# Parameter fusion + wrapper
# ----------------------------------------------------------------------------
def _fuse_params(p, n_layers, h_dim, b_pad):
    """Fuse same-input heads, broadcast biases to (b_pad, dim), fuse GRU gi/gh."""
    H = h_dim
    f32 = jnp.float32

    def bb(b):
        b = jnp.asarray(b, f32).reshape(1, -1)
        return jnp.broadcast_to(b, (b_pad, b.shape[-1]))

    flat = [
        p['phi_y_w1'], bb(p['phi_y_b1']), p['phi_y_w2'], bb(p['phi_y_b2']),
        p['phi_u_w1'], bb(p['phi_u_b1']), p['phi_u_w2'], bb(p['phi_u_b2']),
        p['phi_z_w1'], bb(p['phi_z_b1']), p['phi_z_w2'], bb(p['phi_z_b2']),
        p['enc_w1'], bb(p['enc_b1']), p['enc_w2'], bb(p['enc_b2']),
        jnp.concatenate([p['enc_mean_w'], p['enc_logvar_w']], axis=1),
        bb(jnp.concatenate([p['enc_mean_b'], p['enc_logvar_b']], axis=0)),
        p['prior_w1'], bb(p['prior_b1']), p['prior_w2'], bb(p['prior_b2']),
        jnp.concatenate([p['prior_mean_w'], p['prior_logvar_w']], axis=1),
        bb(jnp.concatenate([p['prior_mean_b'], p['prior_logvar_b']], axis=0)),
        p['dec_w1'], bb(p['dec_b1']), p['dec_w2'], bb(p['dec_b2']),
        jnp.concatenate([p['dec_logvar_w'], p['dec_mean_w1']], axis=1),
        bb(jnp.concatenate([p['dec_logvar_b'], p['dec_mean_b1']], axis=0)),
        p['dec_mean_w2'], bb(p['dec_mean_b2']),
    ]
    # GRU fused weights: columns [r (ih+hh) | z (ih+hh) | n_ih | n_hh]
    for l in range(n_layers):
        wih, whh = p['gru_wih'][l], p['gru_whh'][l]       # (in_l, 3H), (H, 3H)
        in_l = wih.shape[0]
        top = jnp.concatenate(
            [wih[:, :2 * H], wih[:, 2 * H:], jnp.zeros((in_l, H), f32)], axis=1)
        bot = jnp.concatenate(
            [whh[:, :2 * H], jnp.zeros((H, H), f32), whh[:, 2 * H:]], axis=1)
        flat.append(jnp.concatenate([top, bot], axis=0))  # (in_l + H, 4H)
    return [jnp.asarray(a, f32) for a in flat]


def vrnn_gauss_loss(u, y, eps, params, n_layers, h_dim):
    """u: (B, u_dim, T), y: (B, y_dim, T) as in the PyTorch module; eps: (T, B, z_dim)."""
    B, y_dim, T = y.shape
    z_dim = eps.shape[-1]
    b_pad = ((B + 7) // 8) * 8

    y_tm = jnp.transpose(y, (2, 0, 1)).astype(jnp.float32)   # [T, B, y_dim]
    u_tm = jnp.transpose(u, (2, 0, 1)).astype(jnp.float32)   # [T, B, u_dim]
    eps_tm = eps.astype(jnp.float32)
    if b_pad != B:
        padding = ((0, 0), (0, b_pad - B), (0, 0))
        y_tm = jnp.pad(y_tm, padding)
        u_tm = jnp.pad(u_tm, padding)
        eps_tm = jnp.pad(eps_tm, padding)

    flat = _fuse_params(params, n_layers, h_dim, b_pad)
    kernel = functools.partial(_vrnn_kernel, n_layers, h_dim, y_dim, z_dim, B)
    n_in = 3 + len(flat)
    loss = pl.pallas_call(
        kernel,
        out_shape=jax.ShapeDtypeStruct((1, 1), jnp.float32),
        in_specs=[pl.BlockSpec(memory_space=pltpu.MemorySpace.VMEM)] * n_in,
        out_specs=pl.BlockSpec(memory_space=pltpu.MemorySpace.SMEM),
    )(y_tm, u_tm, eps_tm, *flat)
    return loss[0, 0]


# ----------------------------------------------------------------------------
# Pure-JAX reference (unfused, mirrors the PyTorch module math)
# ----------------------------------------------------------------------------
def reference_loss(u, y, eps, p, n_layers, h_dim):
    y_tm = jnp.transpose(y, (2, 0, 1)).astype(jnp.float32)
    u_tm = jnp.transpose(u, (2, 0, 1)).astype(jnp.float32)
    T, B, _ = y_tm.shape
    H = h_dim
    LOG2PI = float(np.log(2.0 * np.pi))

    def lin(x, w, b):
        return x @ w + b

    def relu(x):
        return jnp.maximum(x, 0.0)

    h = [jnp.zeros((B, H), jnp.float32) for _ in range(n_layers)]
    loss = jnp.float32(0.0)
    for t in range(T):
        y_t, u_t, eps_t = y_tm[t], u_tm[t], eps[t]
        h_last = h[-1]
        phi_y_t = lin(relu(lin(y_t, p['phi_y_w1'], p['phi_y_b1'])), p['phi_y_w2'], p['phi_y_b2'])
        phi_u_t = lin(relu(lin(u_t, p['phi_u_w1'], p['phi_u_b1'])), p['phi_u_w2'], p['phi_u_b2'])
        enc_t = relu(lin(relu(lin(jnp.concatenate([phi_y_t, h_last], 1),
                                  p['enc_w1'], p['enc_b1'])), p['enc_w2'], p['enc_b2']))
        enc_mean_t = lin(enc_t, p['enc_mean_w'], p['enc_mean_b'])
        enc_logvar_t = relu(lin(enc_t, p['enc_logvar_w'], p['enc_logvar_b']))
        prior_t = lin(relu(lin(h_last, p['prior_w1'], p['prior_b1'])), p['prior_w2'], p['prior_b2'])
        prior_mean_t = lin(prior_t, p['prior_mean_w'], p['prior_mean_b'])
        prior_logvar_t = relu(lin(prior_t, p['prior_logvar_w'], p['prior_logvar_b']))
        z_t = enc_mean_t + eps_t * jnp.exp(0.5 * enc_logvar_t)
        phi_z_t = lin(relu(lin(z_t, p['phi_z_w1'], p['phi_z_b1'])), p['phi_z_w2'], p['phi_z_b2'])
        dec_t = relu(lin(relu(lin(jnp.concatenate([phi_z_t, h_last], 1),
                                  p['dec_w1'], p['dec_b1'])), p['dec_w2'], p['dec_b2']))
        dec_mean_t = lin(relu(lin(dec_t, p['dec_mean_w1'], p['dec_mean_b1'])),
                         p['dec_mean_w2'], p['dec_mean_b2'])
        dec_logvar_t = relu(lin(dec_t, p['dec_logvar_w'], p['dec_logvar_b']))

        logp = (-0.5 * LOG2PI - 0.5 * dec_logvar_t
                - 0.5 * (y_t - dec_mean_t) ** 2 * jnp.exp(-dec_logvar_t))
        loss_pred = jnp.sum(logp)
        kld = 0.5 * jnp.sum(prior_logvar_t - enc_logvar_t - 1.0
                            + (jnp.exp(enc_logvar_t) + (enc_mean_t - prior_mean_t) ** 2)
                            / jnp.exp(prior_logvar_t))

        layer_in = jnp.concatenate([phi_u_t, phi_z_t], 1)
        new_h = []
        for l in range(n_layers):
            gi = layer_in @ p['gru_wih'][l]
            gh = h[l] @ p['gru_whh'][l]
            r = jax.nn.sigmoid(gi[:, :H] + gh[:, :H])
            zg = jax.nn.sigmoid(gi[:, H:2 * H] + gh[:, H:2 * H])
            n = jnp.tanh(gi[:, 2 * H:] + r * gh[:, 2 * H:])
            h_l = (1.0 - zg) * n + zg * h[l]
            new_h.append(h_l)
            layer_in = h_l
        h = new_h
        loss = loss + (-loss_pred + kld)
    return loss


# ----------------------------------------------------------------------------
# Deterministic parameter construction (shapes per the module __init__)
# ----------------------------------------------------------------------------
def init_params(key, y_dim, u_dim, h_dim, z_dim, n_layers):
    keys = iter(jax.random.split(key, 128))

    def w(shape, scale=0.1):
        return scale * jax.random.normal(next(keys), shape, dtype=jnp.float32)

    p = dict(
        phi_y_w1=w((y_dim, h_dim)), phi_y_b1=w((h_dim,), 0.05),
        phi_y_w2=w((h_dim, h_dim)), phi_y_b2=w((h_dim,), 0.05),
        phi_u_w1=w((u_dim, h_dim)), phi_u_b1=w((h_dim,), 0.05),
        phi_u_w2=w((h_dim, h_dim)), phi_u_b2=w((h_dim,), 0.05),
        phi_z_w1=w((z_dim, h_dim)), phi_z_b1=w((h_dim,), 0.05),
        phi_z_w2=w((h_dim, h_dim)), phi_z_b2=w((h_dim,), 0.05),
        enc_w1=w((2 * h_dim, h_dim)), enc_b1=w((h_dim,), 0.05),
        enc_w2=w((h_dim, h_dim)), enc_b2=w((h_dim,), 0.05),
        enc_mean_w=w((h_dim, z_dim)), enc_mean_b=w((z_dim,), 0.05),
        enc_logvar_w=w((h_dim, z_dim)), enc_logvar_b=w((z_dim,), 0.05),
        prior_w1=w((h_dim, h_dim)), prior_b1=w((h_dim,), 0.05),
        prior_w2=w((h_dim, h_dim)), prior_b2=w((h_dim,), 0.05),
        prior_mean_w=w((h_dim, z_dim)), prior_mean_b=w((z_dim,), 0.05),
        prior_logvar_w=w((h_dim, z_dim)), prior_logvar_b=w((z_dim,), 0.05),
        dec_w1=w((2 * h_dim, h_dim)), dec_b1=w((h_dim,), 0.05),
        dec_w2=w((h_dim, h_dim)), dec_b2=w((h_dim,), 0.05),
        dec_mean_w1=w((h_dim, h_dim)), dec_mean_b1=w((h_dim,), 0.05),
        dec_mean_w2=w((h_dim, y_dim)), dec_mean_b2=w((y_dim,), 0.05),
        dec_logvar_w=w((h_dim, y_dim)), dec_logvar_b=w((y_dim,), 0.05),
    )
    # GRU (input 2h, hidden h, n_layers, bias=False), stored transposed (in, 3h).
    # PyTorch gate ordering [r, z, n]. Layers > 0 take an H-wide input (no padding).
    p['gru_wih'] = [w((2 * h_dim if l == 0 else h_dim, 3 * h_dim)) for l in range(n_layers)]
    p['gru_whh'] = [w((h_dim, 3 * h_dim)) for l in range(n_layers)]
    return p


if __name__ == "__main__":
    B, y_dim, u_dim, h_dim, z_dim, T, n_layers = 4, 3, 2, 32, 4, 8, 2

    key = jax.random.PRNGKey(0)
    ku, ky, keps, kp = jax.random.split(key, 4)
    u = jax.random.normal(ku, (B, u_dim, T), jnp.float32)
    y = jax.random.normal(ky, (B, y_dim, T), jnp.float32)
    eps = jax.random.normal(keps, (T, B, z_dim), jnp.float32)   # rsample noise
    params = init_params(kp, y_dim, u_dim, h_dim, z_dim, n_layers)

    loss = jax.block_until_ready(vrnn_gauss_loss(u, y, eps, params, n_layers, h_dim))
    ref = jax.block_until_ready(reference_loss(u, y, eps, params, n_layers, h_dim))
    np.testing.assert_allclose(np.asarray(loss), np.asarray(ref), rtol=2e-3, atol=2e-3)
    print("KERNEL_OK")
</pallas_src>

<mosaic_0001>
module attributes {stable_mosaic.version = 11 : i64} {
  func.func @_vrnn_kernel(%arg0: memref<8x8x3xf32, #tpu.memory_space<vmem>>, %arg1: memref<8x8x2xf32, #tpu.memory_space<vmem>>, %arg2: memref<8x8x4xf32, #tpu.memory_space<vmem>>, %arg3: memref<3x32xf32, #tpu.memory_space<vmem>>, %arg4: memref<8x32xf32, #tpu.memory_space<vmem>>, %arg5: memref<32x32xf32, #tpu.memory_space<vmem>>, %arg6: memref<8x32xf32, #tpu.memory_space<vmem>>, %arg7: memref<2x32xf32, #tpu.memory_space<vmem>>, %arg8: memref<8x32xf32, #tpu.memory_space<vmem>>, %arg9: memref<32x32xf32, #tpu.memory_space<vmem>>, %arg10: memref<8x32xf32, #tpu.memory_space<vmem>>, %arg11: memref<4x32xf32, #tpu.memory_space<vmem>>, %arg12: memref<8x32xf32, #tpu.memory_space<vmem>>, %arg13: memref<32x32xf32, #tpu.memory_space<vmem>>, %arg14: memref<8x32xf32, #tpu.memory_space<vmem>>, %arg15: memref<64x32xf32, #tpu.memory_space<vmem>>, %arg16: memref<8x32xf32, #tpu.memory_space<vmem>>, %arg17: memref<32x32xf32, #tpu.memory_space<vmem>>, %arg18: memref<8x32xf32, #tpu.memory_space<vmem>>, %arg19: memref<32x8xf32, #tpu.memory_space<vmem>>, %arg20: memref<8x8xf32, #tpu.memory_space<vmem>>, %arg21: memref<32x32xf32, #tpu.memory_space<vmem>>, %arg22: memref<8x32xf32, #tpu.memory_space<vmem>>, %arg23: memref<32x32xf32, #tpu.memory_space<vmem>>, %arg24: memref<8x32xf32, #tpu.memory_space<vmem>>, %arg25: memref<32x8xf32, #tpu.memory_space<vmem>>, %arg26: memref<8x8xf32, #tpu.memory_space<vmem>>, %arg27: memref<64x32xf32, #tpu.memory_space<vmem>>, %arg28: memref<8x32xf32, #tpu.memory_space<vmem>>, %arg29: memref<32x32xf32, #tpu.memory_space<vmem>>, %arg30: memref<8x32xf32, #tpu.memory_space<vmem>>, %arg31: memref<32x35xf32, #tpu.memory_space<vmem>>, %arg32: memref<8x35xf32, #tpu.memory_space<vmem>>, %arg33: memref<32x3xf32, #tpu.memory_space<vmem>>, %arg34: memref<8x3xf32, #tpu.memory_space<vmem>>, %arg35: memref<96x128xf32, #tpu.memory_space<vmem>>, %arg36: memref<64x128xf32, #tpu.memory_space<vmem>>, %arg37: memref<1x1xf32, #tpu.memory_space<smem>>) attributes {dimension_semantics = [], scalar_prefetch = 0 : i64, scratch_operands = 0 : i64, tpu.core_type = #tpu.core_type<tc>} {
    %cst = arith.constant 0.000000e+00 : f32
    %0 = vector.broadcast %cst : f32 to vector<8x32xf32>
    %cst_0 = arith.constant 0.000000e+00 : f32
    %1 = vector.broadcast %cst_0 : f32 to vector<8x32xf32>
    %cst_1 = arith.constant 0.000000e+00 : f32
    %2 = vector.broadcast %cst_1 : f32 to vector<8x3xf32>
    %cst_2 = arith.constant 0.000000e+00 : f32
    %3 = vector.broadcast %cst_2 : f32 to vector<8x4xf32>
    %c0 = arith.constant 0 : index
    %c0_3 = arith.constant 0 : index
    %c0_4 = arith.constant 0 : index
    %4 = vector.load %arg0[%c0, %c0_3, %c0_4] : memref<8x8x3xf32, #tpu.memory_space<vmem>>, vector<1x8x3xf32>
    %5 = vector.shape_cast %4 : vector<1x8x3xf32> to vector<8x3xf32>
    %c0_5 = arith.constant 0 : index
    %c0_6 = arith.constant 0 : index
    %c0_7 = arith.constant 0 : index
    %6 = vector.load %arg1[%c0_5, %c0_6, %c0_7] : memref<8x8x2xf32, #tpu.memory_space<vmem>>, vector<1x8x2xf32>
    %7 = vector.shape_cast %6 : vector<1x8x2xf32> to vector<8x2xf32>
    %c0_8 = arith.constant 0 : index
    %c0_9 = arith.constant 0 : index
    %c0_10 = arith.constant 0 : index
    %8 = vector.load %arg2[%c0_8, %c0_9, %c0_10] : memref<8x8x4xf32, #tpu.memory_space<vmem>>, vector<1x8x4xf32>
    %9 = vector.shape_cast %8 : vector<1x8x4xf32> to vector<8x4xf32>
    %c0_11 = arith.constant 0 : index
    %c0_12 = arith.constant 0 : index
    %10 = vector.load %arg3[%c0_11, %c0_12] : memref<3x32xf32, #tpu.memory_space<vmem>>, vector<3x32xf32>
    %cst_13 = arith.constant dense<0.000000e+00> : vector<8x32xf32>
    %11 = tpu.matmul %5, %10, %cst_13 {dimension_numbers = #tpu.dot_dimension_numbers<[1], [0], [0], [1], [0, 0, 1, 1], [], []>} : vector<8x3xf32>, vector<3x32xf32>, vector<8x32xf32> -> vector<8x32xf32>
    %c0_14 = arith.constant 0 : index
    %c0_15 = arith.constant 0 : index
    %12 = vector.load %arg4[%c0_14, %c0_15] : memref<8x32xf32, #tpu.memory_space<vmem>>, vector<8x32xf32>
    %13 = arith.addf %11, %12 : vector<8x32xf32>
    %cst_16 = arith.constant 0.000000e+00 : f32
    %14 = vector.broadcast %cst_16 : f32 to vector<8x32xf32>
    %15 = arith.maximumf %13, %14 : vector<8x32xf32>
    %c0_17 = arith.constant 0 : index
    %c0_18 = arith.constant 0 : index
    %16 = vector.load %arg5[%c0_17, %c0_18] : memref<32x32xf32, #tpu.memory_space<vmem>>, vector<32x32xf32>
    %cst_19 = arith.constant dense<0.000000e+00> : vector<8x32xf32>
    %17 = tpu.matmul %15, %16, %cst_19 {dimension_numbers = #tpu.dot_dimension_numbers<[1], [0], [0], [1], [0, 0, 1, 1], [], []>} : vector<8x32xf32>, vector<32x32xf32>, vector<8x32xf32> -> vector<8x32xf32>
    %c0_20 = arith.constant 0 : index
    %c0_21 = arith.constant 0 : index
    %18 = vector.load %arg6[%c0_20, %c0_21] : memref<8x32xf32, #tpu.memory_space<vmem>>, vector<8x32xf32>
    %19 = arith.addf %17, %18 : vector<8x32xf32>
    %c0_22 = arith.constant 0 : index
    %c0_23 = arith.constant 0 : index
    %20 = vector.load %arg7[%c0_22, %c0_23] : memref<2x32xf32, #tpu.memory_space<vmem>>, vector<2x32xf32>
    %cst_24 = arith.constant dense<0.000000e+00> : vector<8x32xf32>
    %21 = tpu.matmul %7, %20, %cst_24 {dimension_numbers = #tpu.dot_dimension_numbers<[1], [0], [0], [1], [0, 0, 1, 1], [], []>} : vector<8x2xf32>, vector<2x32xf32>, vector<8x32xf32> -> vector<8x32xf32>
    %c0_25 = arith.constant 0 : index
    %c0_26 = arith.constant 0 : index
    %22 = vector.load %arg8[%c0_25, %c0_26] : memref<8x32xf32, #tpu.memory_space<vmem>>, vector<8x32xf32>
    %23 = arith.addf %21, %22 : vector<8x32xf32>
    %cst_27 = arith.constant 0.000000e+00 : f32
    %24 = vector.broadcast %cst_27 : f32 to vector<8x32xf32>
    %25 = arith.maximumf %23, %24 : vector<8x32xf32>
    %c0_28 = arith.constant 0 : index
    %c0_29 = arith.constant 0 : index
    %26 = vector.load %arg9[%c0_28, %c0_29] : memref<32x32xf32, #tpu.memory_space<vmem>>, vector<32x32xf32>
    %cst_30 = arith.constant dense<0.000000e+00> : vector<8x32xf32>
    %27 = tpu.matmul %25, %26, %cst_30 {dimension_numbers = #tpu.dot_dimension_numbers<[1], [0], [0], [1], [0, 0, 1, 1], [], []>} : vector<8x32xf32>, vector<32x32xf32>, vector<8x32xf32> -> vector<8x32xf32>
    %c0_31 = arith.constant 0 : index
    %c0_32 = arith.constant 0 : index
    %28 = vector.load %arg10[%c0_31, %c0_32] : memref<8x32xf32, #tpu.memory_space<vmem>>, vector<8x32xf32>
    %29 = arith.addf %27, %28 : vector<8x32xf32>
    %30 = tpu.concatenate %19, %1 in 1 : vector<8x32xf32>, vector<8x32xf32> -> vector<8x64xf32>
    %c0_33 = arith.constant 0 : index
    %c0_34 = arith.constant 0 : index
    %31 = vector.load %arg15[%c0_33, %c0_34] : memref<64x32xf32, #tpu.memory_space<vmem>>, vector<64x32xf32>
    %cst_35 = arith.constant dense<0.000000e+00> : vector<8x32xf32>
    %32 = tpu.matmul %30, %31, %cst_35 {dimension_numbers = #tpu.dot_dimension_numbers<[1], [0], [0], [1], [0, 0, 1, 1], [], []>} : vector<8x64xf32>, vector<64x32xf32>, vector<8x32xf32> -> vector<8x32xf32>
    %c0_36 = arith.constant 0 : index
    %c0_37 = arith.constant 0 : index
    %33 = vector.load %arg16[%c0_36, %c0_37] : memref<8x32xf32, #tpu.memory_space<vmem>>, vector<8x32xf32>
    %34 = arith.addf %32, %33 : vector<8x32xf32>
    %cst_38 = arith.constant 0.000000e+00 : f32
    %35 = vector.broadcast %cst_38 : f32 to vector<8x32xf32>
    %36 = arith.maximumf %34, %35 : vector<8x32xf32>
    %c0_39 = arith.constant 0 : index
    %c0_40 = arith.constant 0 : index
    %37 = vector.load %arg17[%c0_39, %c0_40] : memref<32x32xf32, #tpu.memory_space<vmem>>, vector<32x32xf32>
    %cst_41 = arith.constant dense<0.000000e+00> : vector<8x32xf32>
    %38 = tpu.matmul %36, %37, %cst_41 {dimension_numbers = #tpu.dot_dimension_numbers<[1], [0], [0], [1], [0, 0, 1, 1], [], []>} : vector<8x32xf32>, vector<32x32xf32>, vector<8x32xf32> -> vector<8x32xf32>
    %c0_42 = arith.constant 0 : index
    %c0_43 = arith.constant 0 : index
    %39 = vector.load %arg18[%c0_42, %c0_43] : memref<8x32xf32, #tpu.memory_space<vmem>>, vector<8x32xf32>
    %40 = arith.addf %38, %39 : vector<8x32xf32>
    %cst_44 = arith.constant 0.000000e+00 : f32
    %41 = vector.broadcast %cst_44 : f32 to vector<8x32xf32>
    %42 = arith.maximumf %40, %41 : vector<8x32xf32>
    %c0_45 = arith.constant 0 : index
    %c0_46 = arith.constant 0 : index
    %43 = vector.load %arg19[%c0_45, %c0_46] : memref<32x8xf32, #tpu.memory_space<vmem>>, vector<32x8xf32>
    %cst_47 = arith.constant dense<0.000000e+00> : vector<8x8xf32>
    %44 = tpu.matmul %42, %43, %cst_47 {dimension_numbers = #tpu.dot_dimension_numbers<[1], [0], [0], [1], [0, 0, 1, 1], [], []>} : vector<8x32xf32>, vector<32x8xf32>, vector<8x8xf32> -> vector<8x8xf32>
    %c0_48 = arith.constant 0 : index
    %c0_49 = arith.constant 0 : index
    %45 = vector.load %arg20[%c0_48, %c0_49] : memref<8x8xf32, #tpu.memory_space<vmem>>, vector<8x8xf32>
    %46 = arith.addf %44, %45 : vector<8x8xf32>
    %47 = vector.extract_strided_slice %46 {offsets = [0, 0], sizes = [8, 4], strides = [1, 1]} : vector<8x8xf32> to vector<8x4xf32>
    %48 = vector.extract_strided_slice %46 {offsets = [0, 4], sizes = [8, 4], strides = [1, 1]} : vector<8x8xf32> to vector<8x4xf32>
    %cst_50 = arith.constant 0.000000e+00 : f32
    %49 = vector.broadcast %cst_50 : f32 to vector<8x4xf32>
    %50 = arith.maximumf %48, %49 : vector<8x4xf32>
    %c0_51 = arith.constant 0 : index
    %c0_52 = arith.constant 0 : index
    %51 = vector.load %arg21[%c0_51, %c0_52] : memref<32x32xf32, #tpu.memory_space<vmem>>, vector<32x32xf32>
    %cst_53 = arith.constant dense<0.000000e+00> : vector<8x32xf32>
    %52 = tpu.matmul %1, %51, %cst_53 {dimension_numbers = #tpu.dot_dimension_numbers<[1], [0], [0], [1], [0, 0, 1, 1], [], []>} : vector<8x32xf32>, vector<32x32xf32>, vector<8x32xf32> -> vector<8x32xf32>
    %c0_54 = arith.constant 0 : index
    %c0_55 = arith.constant 0 : index
    %53 = vector.load %arg22[%c0_54, %c0_55] : memref<8x32xf32, #tpu.memory_space<vmem>>, vector<8x32xf32>
    %54 = arith.addf %52, %53 : vector<8x32xf32>
    %cst_56 = arith.constant 0.000000e+00 : f32
    %55 = vector.broadcast %cst_56 : f32 to vector<8x32xf32>
    %56 = arith.maximumf %54, %55 : vector<8x32xf32>
    %c0_57 = arith.constant 0 : index
    %c0_58 = arith.constant 0 : index
    %57 = vector.load %arg23[%c0_57, %c0_58] : memref<32x32xf32, #tpu.memory_space<vmem>>, vector<32x32xf32>
    %cst_59 = arith.constant dense<0.000000e+00> : vector<8x32xf32>
    %58 = tpu.matmul %56, %57, %cst_59 {dimension_numbers = #tpu.dot_dimension_numbers<[1], [0], [0], [1], [0, 0, 1, 1], [], []>} : vector<8x32xf32>, vector<32x32xf32>, vector<8x32xf32> -> vector<8x32xf32>
    %c0_60 = arith.constant 0 : index
    %c0_61 = arith.constant 0 : index
    %59 = vector.load %arg24[%c0_60, %c0_61] : memref<8x32xf32, #tpu.memory_space<vmem>>, vector<8x32xf32>
    %60 = arith.addf %58, %59 : vector<8x32xf32>
    %c0_62 = arith.constant 0 : index
    %c0_63 = arith.constant 0 : index
    %61 = vector.load %arg25[%c0_62, %c0_63] : memref<32x8xf32, #tpu.memory_space<vmem>>, vector<32x8xf32>
    %cst_64 = arith.constant dense<0.000000e+00> : vector<8x8xf32>
    %62 = tpu.matmul %60, %61, %cst_64 {dimension_numbers = #tpu.dot_dimension_numbers<[1], [0], [0], [1], [0, 0, 1, 1], [], []>} : vector<8x32xf32>, vector<32x8xf32>, vector<8x8xf32> -> vector<8x8xf32>
    %c0_65 = arith.constant 0 : index
    %c0_66 = arith.constant 0 : index
    %63 = vector.load %arg26[%c0_65, %c0_66] : memref<8x8xf32, #tpu.memory_space<vmem>>, vector<8x8xf32>
    %64 = arith.addf %62, %63 : vector<8x8xf32>
    %65 = vector.extract_strided_slice %64 {offsets = [0, 0], sizes = [8, 4], strides = [1, 1]} : vector<8x8xf32> to vector<8x4xf32>
    %66 = vector.extract_strided_slice %64 {offsets = [0, 4], sizes = [8, 4], strides = [1, 1]} : vector<8x8xf32> to vector<8x4xf32>
    %cst_67 = arith.constant 0.000000e+00 : f32
    %67 = vector.broadcast %cst_67 : f32 to vector<8x4xf32>
    %68 = arith.maximumf %66, %67 : vector<8x4xf32>
    %cst_68 = arith.constant 5.000000e-01 : f32
    %69 = vector.broadcast %cst_68 : f32 to vector<8x4xf32>
    %70 = arith.mulf %69, %50 : vector<8x4xf32>
    %71 = math.exp %70 : vector<8x4xf32>
    %72 = arith.mulf %9, %71 : vector<8x4xf32>
    %73 = arith.addf %47, %72 : vector<8x4xf32>
    %c0_69 = arith.constant 0 : index
    %c0_70 = arith.constant 0 : index
    %74 = vector.load %arg11[%c0_69, %c0_70] : memref<4x32xf32, #tpu.memory_space<vmem>>, vector<4x32xf32>
    %cst_71 = arith.constant dense<0.000000e+00> : vector<8x32xf32>
    %75 = tpu.matmul %73, %74, %cst_71 {dimension_numbers = #tpu.dot_dimension_numbers<[1], [0], [0], [1], [0, 0, 1, 1], [], []>} : vector<8x4xf32>, vector<4x32xf32>, vector<8x32xf32> -> vector<8x32xf32>
    %c0_72 = arith.constant 0 : index
    %c0_73 = arith.constant 0 : index
    %76 = vector.load %arg12[%c0_72, %c0_73] : memref<8x32xf32, #tpu.memory_space<vmem>>, vector<8x32xf32>
    %77 = arith.addf %75, %76 : vector<8x32xf32>
    %cst_74 = arith.constant 0.000000e+00 : f32
    %78 = vector.broadcast %cst_74 : f32 to vector<8x32xf32>
    %79 = arith.maximumf %77, %78 : vector<8x32xf32>
    %c0_75 = arith.constant 0 : index
    %c0_76 = arith.constant 0 : index
    %80 = vector.load %arg13[%c0_75, %c0_76] : memref<32x32xf32, #tpu.memory_space<vmem>>, vector<32x32xf32>
    %cst_77 = arith.constant dense<0.000000e+00> : vector<8x32xf32>
    %81 = tpu.matmul %79, %80, %cst_77 {dimension_numbers = #tpu.dot_dimension_numbers<[1], [0], [0], [1], [0, 0, 1, 1], [], []>} : vector<8x32xf32>, vector<32x32xf32>, vector<8x32xf32> -> vector<8x32xf32>
    %c0_78 = arith.constant 0 : index
    %c0_79 = arith.constant 0 : index
    %82 = vector.load %arg14[%c0_78, %c0_79] : memref<8x32xf32, #tpu.memory_space<vmem>>, vector<8x32xf32>
    %83 = arith.addf %81, %82 : vector<8x32xf32>
    %84 = tpu.concatenate %83, %1 in 1 : vector<8x32xf32>, vector<8x32xf32> -> vector<8x64xf32>
    %c0_80 = arith.constant 0 : index
    %c0_81 = arith.constant 0 : index
    %85 = vector.load %arg27[%c0_80, %c0_81] : memref<64x32xf32, #tpu.memory_space<vmem>>, vector<64x32xf32>
    %cst_82 = arith.constant dense<0.000000e+00> : vector<8x32xf32>
    %86 = tpu.matmul %84, %85, %cst_82 {dimension_numbers = #tpu.dot_dimension_numbers<[1], [0], [0], [1], [0, 0, 1, 1], [], []>} : vector<8x64xf32>, vector<64x32xf32>, vector<8x32xf32> -> vector<8x32xf32>
    %c0_83 = arith.constant 0 : index
    %c0_84 = arith.constant 0 : index
    %87 = vector.load %arg28[%c0_83, %c0_84] : memref<8x32xf32, #tpu.memory_space<vmem>>, vector<8x32xf32>
    %88 = arith.addf %86, %87 : vector<8x32xf32>
    %cst_85 = arith.constant 0.000000e+00 : f32
    %89 = vector.broadcast %cst_85 : f32 to vector<8x32xf32>
    %90 = arith.maximumf %88, %89 : vector<8x32xf32>
    %c0_86 = arith.constant 0 : index
    %c0_87 = arith.constant 0 : index
    %91 = vector.load %arg29[%c0_86, %c0_87] : memref<32x32xf32, #tpu.memory_space<vmem>>, vector<32x32xf32>
    %cst_88 = arith.constant dense<0.000000e+00> : vector<8x32xf32>
    %92 = tpu.matmul %90, %91, %cst_88 {dimension_numbers = #tpu.dot_dimension_numbers<[1], [0], [0], [1], [0, 0, 1, 1], [], []>} : vector<8x32xf32>, vector<32x32xf32>, vector<8x32xf32> -> vector<8x32xf32>
    %c0_89 = arith.constant 0 : index
    %c0_90 = arith.constant 0 : index
    %93 = vector.load %arg30[%c0_89, %c0_90] : memref<8x32xf32, #tpu.memory_space<vmem>>, vector<8x32xf32>
    %94 = arith.addf %92, %93 : vector<8x32xf32>
    %cst_91 = arith.constant 0.000000e+00 : f32
    %95 = vector.broadcast %cst_91 : f32 to vector<8x32xf32>
    %96 = arith.maximumf %94, %95 : vector<8x32xf32>
    %c0_92 = arith.constant 0 : index
    %c0_93 = arith.constant 0 : index
    %97 = vector.load %arg31[%c0_92, %c0_93] : memref<32x35xf32, #tpu.memory_space<vmem>>, vector<32x35xf32>
    %cst_94 = arith.constant dense<0.000000e+00> : vector<8x35xf32>
    %98 = tpu.matmul %96, %97, %cst_94 {dimension_numbers = #tpu.dot_dimension_numbers<[1], [0], [0], [1], [0, 0, 1, 1], [], []>} : vector<8x32xf32>, vector<32x35xf32>, vector<8x35xf32> -> vector<8x35xf32>
    %c0_95 = arith.constant 0 : index
    %c0_96 = arith.constant 0 : index
    %99 = vector.load %arg32[%c0_95, %c0_96] : memref<8x35xf32, #tpu.memory_space<vmem>>, vector<8x35xf32>
    %100 = arith.addf %98, %99 : vector<8x35xf32>
    %101 = vector.extract_strided_slice %100 {offsets = [0, 0], sizes = [8, 3], strides = [1, 1]} : vector<8x35xf32> to vector<8x3xf32>
    %cst_97 = arith.constant 0.000000e+00 : f32
    %102 = vector.broadcast %cst_97 : f32 to vector<8x3xf32>
    %103 = arith.maximumf %101, %102 : vector<8x3xf32>
    %104 = vector.extract_strided_slice %100 {offsets = [0, 3], sizes = [8, 32], strides = [1, 1]} : vector<8x35xf32> to vector<8x32xf32>
    %cst_98 = arith.constant 0.000000e+00 : f32
    %105 = vector.broadcast %cst_98 : f32 to vector<8x32xf32>
    %106 = arith.maximumf %104, %105 : vector<8x32xf32>
    %c0_99 = arith.constant 0 : index
    %c0_100 = arith.constant 0 : index
    %107 = vector.load %arg33[%c0_99, %c0_100] : memref<32x3xf32, #tpu.memory_space<vmem>>, vector<32x3xf32>
    %cst_101 = arith.constant dense<0.000000e+00> : vector<8x3xf32>
    %108 = tpu.matmul %106, %107, %cst_101 {dimension_numbers = #tpu.dot_dimension_numbers<[1], [0], [0], [1], [0, 0, 1, 1], [], []>} : vector<8x32xf32>, vector<32x3xf32>, vector<8x3xf32> -> vector<8x3xf32>
    %c0_102 = arith.constant 0 : index
    %c0_103 = arith.constant 0 : index
    %109 = vector.load %arg34[%c0_102, %c0_103] : memref<8x3xf32, #tpu.memory_space<vmem>>, vector<8x3xf32>
    %110 = arith.addf %108, %109 : vector<8x3xf32>
    %cst_104 = arith.constant -5.000000e-01 : f32
    %cst_105 = arith.constant 1.83787704 : f32
    %111 = arith.mulf %cst_104, %cst_105 : f32
    %cst_106 = arith.constant 5.000000e-01 : f32
    %112 = vector.broadcast %cst_106 : f32 to vector<8x3xf32>
    %113 = arith.mulf %112, %103 : vector<8x3xf32>
    %114 = vector.broadcast %111 : f32 to vector<8x3xf32>
    %115 = arith.subf %114, %113 : vector<8x3xf32>
    %116 = arith.subf %5, %110 : vector<8x3xf32>
    %117 = arith.mulf %116, %116 : vector<8x3xf32>
    %cst_107 = arith.constant 5.000000e-01 : f32
    %118 = vector.broadcast %cst_107 : f32 to vector<8x3xf32>
    %119 = arith.mulf %118, %117 : vector<8x3xf32>
    %cst_108 = arith.constant 0.000000e+00 : f32
    %120 = vector.broadcast %cst_108 : f32 to vector<8x3xf32>
    %121 = arith.subf %120, %103 : vector<8x3xf32>
    %122 = math.exp %121 : vector<8x3xf32>
    %123 = arith.mulf %119, %122 : vector<8x3xf32>
    %124 = arith.subf %115, %123 : vector<8x3xf32>
    %125 = arith.subf %68, %50 : vector<8x4xf32>
    %cst_109 = arith.constant 1.000000e+00 : f32
    %126 = vector.broadcast %cst_109 : f32 to vector<8x4xf32>
    %127 = arith.subf %125, %126 : vector<8x4xf32>
    %128 = math.exp %50 : vector<8x4xf32>
    %129 = arith.subf %47, %65 : vector<8x4xf32>
    %130 = arith.mulf %129, %129 : vector<8x4xf32>
    %131 = arith.addf %128, %130 : vector<8x4xf32>
    %cst_110 = arith.constant 0.000000e+00 : f32
    %132 = vector.broadcast %cst_110 : f32 to vector<8x4xf32>
    %133 = arith.subf %132, %68 : vector<8x4xf32>
    %134 = math.exp %133 : vector<8x4xf32>
    %135 = arith.mulf %131, %134 : vector<8x4xf32>
    %136 = arith.addf %127, %135 : vector<8x4xf32>
    %137 = tpu.concatenate %29, %83 in 1 : vector<8x32xf32>, vector<8x32xf32> -> vector<8x64xf32>
    %138 = tpu.concatenate %137, %0 in 1 : vector<8x64xf32>, vector<8x32xf32> -> vector<8x96xf32>
    %c0_111 = arith.constant 0 : index
    %c0_112 = arith.constant 0 : index
    %139 = vector.load %arg35[%c0_111, %c0_112] : memref<96x128xf32, #tpu.memory_space<vmem>>, vector<96x128xf32>
    %cst_113 = arith.constant dense<0.000000e+00> : vector<8x128xf32>
    %140 = tpu.matmul %138, %139, %cst_113 {dimension_numbers = #tpu.dot_dimension_numbers<[1], [0], [0], [1], [0, 0, 1, 1], [], []>} : vector<8x96xf32>, vector<96x128xf32>, vector<8x128xf32> -> vector<8x128xf32>
    %141 = vector.extract_strided_slice %140 {offsets = [0, 0], sizes = [8, 32], strides = [1, 1]} : vector<8x128xf32> to vector<8x32xf32>
    %142 = arith.negf %141 : vector<8x32xf32>
    %143 = math.exp %142 : vector<8x32xf32>
    %cst_114 = arith.constant 1.000000e+00 : f32
    %144 = vector.broadcast %cst_114 : f32 to vector<8x32xf32>
    %145 = arith.addf %144, %143 : vector<8x32xf32>
    %146 = arith.divf %144, %145 : vector<8x32xf32>
    %147 = vector.extract_strided_slice %140 {offsets = [0, 32], sizes = [8, 32], strides = [1, 1]} : vector<8x128xf32> to vector<8x32xf32>
    %148 = arith.negf %147 : vector<8x32xf32>
    %149 = math.exp %148 : vector<8x32xf32>
    %cst_115 = arith.constant 1.000000e+00 : f32
    %150 = vector.broadcast %cst_115 : f32 to vector<8x32xf32>
    %151 = arith.addf %150, %149 : vector<8x32xf32>
    %152 = arith.divf %150, %151 : vector<8x32xf32>
    %153 = vector.extract_strided_slice %140 {offsets = [0, 64], sizes = [8, 32], strides = [1, 1]} : vector<8x128xf32> to vector<8x32xf32>
    %154 = vector.extract_strided_slice %140 {offsets = [0, 96], sizes = [8, 32], strides = [1, 1]} : vector<8x128xf32> to vector<8x32xf32>
    %155 = arith.mulf %146, %154 : vector<8x32xf32>
    %156 = arith.addf %153, %155 : vector<8x32xf32>
    %157 = math.tanh %156 : vector<8x32xf32>
    %cst_116 = arith.constant 1.000000e+00 : f32
    %158 = vector.broadcast %cst_116 : f32 to vector<8x32xf32>
    %159 = arith.subf %158, %152 : vector<8x32xf32>
    %160 = arith.mulf %159, %157 : vector<8x32xf32>
    %161 = arith.mulf %152, %0 : vector<8x32xf32>
    %162 = arith.addf %160, %161 : vector<8x32xf32>
    %163 = tpu.concatenate %162, %1 in 1 : vector<8x32xf32>, vector<8x32xf32> -> vector<8x64xf32>
    %c0_117 = arith.constant 0 : index
    %c0_118 = arith.constant 0 : index
    %164 = vector.load %arg36[%c0_117, %c0_118] : memref<64x128xf32, #tpu.memory_space<vmem>>, vector<64x128xf32>
    %cst_119 = arith.constant dense<0.000000e+00> : vector<8x128xf32>
    %165 = tpu.matmul %163, %164, %cst_119 {dimension_numbers = #tpu.dot_dimension_numbers<[1], [0], [0], [1], [0, 0, 1, 1], [], []>} : vector<8x64xf32>, vector<64x128xf32>, vector<8x128xf32> -> vector<8x128xf32>
    %166 = vector.extract_strided_slice %165 {offsets = [0, 0], sizes = [8, 32], strides = [1, 1]} : vector<8x128xf32> to vector<8x32xf32>
    %167 = arith.negf %166 : vector<8x32xf32>
    %168 = math.exp %167 : vector<8x32xf32>
    %cst_120 = arith.constant 1.000000e+00 : f32
    %169 = vector.broadcast %cst_120 : f32 to vector<8x32xf32>
    %170 = arith.addf %169, %168 : vector<8x32xf32>
    %171 = arith.divf %169, %170 : vector<8x32xf32>
    %172 = vector.extract_strided_slice %165 {offsets = [0, 32], sizes = [8, 32], strides = [1, 1]} : vector<8x128xf32> to vector<8x32xf32>
    %173 = arith.negf %172 : vector<8x32xf32>
    %174 = math.exp %173 : vector<8x32xf32>
    %cst_121 = arith.constant 1.000000e+00 : f32
    %175 = vector.broadcast %cst_121 : f32 to vector<8x32xf32>
    %176 = arith.addf %175, %174 : vector<8x32xf32>
    %177 = arith.divf %175, %176 : vector<8x32xf32>
    %178 = vector.extract_strided_slice %165 {offsets = [0, 64], sizes = [8, 32], strides = [1, 1]} : vector<8x128xf32> to vector<8x32xf32>
    %179 = vector.extract_strided_slice %165 {offsets = [0, 96], sizes = [8, 32], strides = [1, 1]} : vector<8x128xf32> to vector<8x32xf32>
    %180 = arith.mulf %171, %179 : vector<8x32xf32>
    %181 = arith.addf %178, %180 : vector<8x32xf32>
    %182 = math.tanh %181 : vector<8x32xf32>
    %cst_122 = arith.constant 1.000000e+00 : f32
    %183 = vector.broadcast %cst_122 : f32 to vector<8x32xf32>
    %184 = arith.subf %183, %177 : vector<8x32xf32>
    %185 = arith.mulf %184, %182 : vector<8x32xf32>
    %186 = arith.mulf %177, %1 : vector<8x32xf32>
    %187 = arith.addf %185, %186 : vector<8x32xf32>
    %188 = arith.addf %2, %124 : vector<8x3xf32>
    %189 = arith.addf %3, %136 : vector<8x4xf32>
    %c1 = arith.constant 1 : index
    %c0_123 = arith.constant 0 : index
    %c0_124 = arith.constant 0 : index
    %190 = vector.load %arg0[%c1, %c0_123, %c0_124] : memref<8x8x3xf32, #tpu.memory_space<vmem>>, vector<1x8x3xf32>
    %191 = vector.shape_cast %190 : vector<1x8x3xf32> to vector<8x3xf32>
    %c1_125 = arith.constant 1 : index
    %c0_126 = arith.constant 0 : index
    %c0_127 = arith.constant 0 : index
    %192 = vector.load %arg1[%c1_125, %c0_126, %c0_127] : memref<8x8x2xf32, #tpu.memory_space<vmem>>, vector<1x8x2xf32>
    %193 = vector.shape_cast %192 : vector<1x8x2xf32> to vector<8x2xf32>
    %c1_128 = arith.constant 1 : index
    %c0_129 = arith.constant 0 : index
    %c0_130 = arith.constant 0 : index
    %194 = vector.load %arg2[%c1_128, %c0_129, %c0_130] : memref<8x8x4xf32, #tpu.memory_space<vmem>>, vector<1x8x4xf32>
    %195 = vector.shape_cast %194 : vector<1x8x4xf32> to vector<8x4xf32>
    %c0_131 = arith.constant 0 : index
    %c0_132 = arith.constant 0 : index
    %196 = vector.load %arg3[%c0_131, %c0_132] : memref<3x32xf32, #tpu.memory_space<vmem>>, vector<3x32xf32>
    %cst_133 = arith.constant dense<0.000000e+00> : vector<8x32xf32>
    %197 = tpu.matmul %191, %196, %cst_133 {dimension_numbers = #tpu.dot_dimension_numbers<[1], [0], [0], [1], [0, 0, 1, 1], [], []>} : vector<8x3xf32>, vector<3x32xf32>, vector<8x32xf32> -> vector<8x32xf32>
    %c0_134 = arith.constant 0 : index
    %c0_135 = arith.constant 0 : index
    %198 = vector.load %arg4[%c0_134, %c0_135] : memref<8x32xf32, #tpu.memory_space<vmem>>, vector<8x32xf32>
    %199 = arith.addf %197, %198 : vector<8x32xf32>
    %cst_136 = arith.constant 0.000000e+00 : f32
    %200 = vector.broadcast %cst_136 : f32 to vector<8x32xf32>
    %201 = arith.maximumf %199, %200 : vector<8x32xf32>
    %c0_137 = arith.constant 0 : index
    %c0_138 = arith.constant 0 : index
    %202 = vector.load %arg5[%c0_137, %c0_138] : memref<32x32xf32, #tpu.memory_space<vmem>>, vector<32x32xf32>
    %cst_139 = arith.constant dense<0.000000e+00> : vector<8x32xf32>
    %203 = tpu.matmul %201, %202, %cst_139 {dimension_numbers = #tpu.dot_dimension_numbers<[1], [0], [0], [1], [0, 0, 1, 1], [], []>} : vector<8x32xf32>, vector<32x32xf32>, vector<8x32xf32> -> vector<8x32xf32>
    %c0_140 = arith.constant 0 : index
    %c0_141 = arith.constant 0 : index
    %204 = vector.load %arg6[%c0_140, %c0_141] : memref<8x32xf32, #tpu.memory_space<vmem>>, vector<8x32xf32>
    %205 = arith.addf %203, %204 : vector<8x32xf32>
    %c0_142 = arith.constant 0 : index
    %c0_143 = arith.constant 0 : index
    %206 = vector.load %arg7[%c0_142, %c0_143] : memref<2x32xf32, #tpu.memory_space<vmem>>, vector<2x32xf32>
    %cst_144 = arith.constant dense<0.000000e+00> : vector<8x32xf32>
    %207 = tpu.matmul %193, %206, %cst_144 {dimension_numbers = #tpu.dot_dimension_numbers<[1], [0], [0], [1], [0, 0, 1, 1], [], []>} : vector<8x2xf32>, vector<2x32xf32>, vector<8x32xf32> -> vector<8x32xf32>
    %c0_145 = arith.constant 0 : index
    %c0_146 = arith.constant 0 : index
    %208 = vector.load %arg8[%c0_145, %c0_146] : memref<8x32xf32, #tpu.memory_space<vmem>>, vector<8x32xf32>
    %209 = arith.addf %207, %208 : vector<8x32xf32>
    %cst_147 = arith.constant 0.000000e+00 : f32
    %210 = vector.broadcast %cst_147 : f32 to vector<8x32xf32>
    %211 = arith.maximumf %209, %210 : vector<8x32xf32>
    %c0_148 = arith.constant 0 : index
    %c0_149 = arith.constant 0 : index
    %212 = vector.load %arg9[%c0_148, %c0_149] : memref<32x32xf32, #tpu.memory_space<vmem>>, vector<32x32xf32>
    %cst_150 = arith.constant dense<0.000000e+00> : vector<8x32xf32>
    %213 = tpu.matmul %211, %212, %cst_150 {dimension_numbers = #tpu.dot_dimension_numbers<[1], [0], [0], [1], [0, 0, 1, 1], [], []>} : vector<8x32xf32>, vector<32x32xf32>, vector<8x32xf32> -> vector<8x32xf32>
    %c0_151 = arith.constant 0 : index
    %c0_152 = arith.constant 0 : index
    %214 = vector.load %arg10[%c0_151, %c0_152] : memref<8x32xf32, #tpu.memory_space<vmem>>, vector<8x32xf32>
    %215 = arith.addf %213, %214 : vector<8x32xf32>
    %216 = tpu.concatenate %205, %187 in 1 : vector<8x32xf32>, vector<8x32xf32> -> vector<8x64xf32>
    %c0_153 = arith.constant 0 : index
    %c0_154 = arith.constant 0 : index
    %217 = vector.load %arg15[%c0_153, %c0_154] : memref<64x32xf32, #tpu.memory_space<vmem>>, vector<64x32xf32>
    %cst_155 = arith.constant dense<0.000000e+00> : vector<8x32xf32>
    %218 = tpu.matmul %216, %217, %cst_155 {dimension_numbers = #tpu.dot_dimension_numbers<[1], [0], [0], [1], [0, 0, 1, 1], [], []>} : vector<8x64xf32>, vector<64x32xf32>, vector<8x32xf32> -> vector<8x32xf32>
    %c0_156 = arith.constant 0 : index
    %c0_157 = arith.constant 0 : index
    %219 = vector.load %arg16[%c0_156, %c0_157] : memref<8x32xf32, #tpu.memory_space<vmem>>, vector<8x32xf32>
    %220 = arith.addf %218, %219 : vector<8x32xf32>
    %cst_158 = arith.constant 0.000000e+00 : f32
    %221 = vector.broadcast %cst_158 : f32 to vector<8x32xf32>
    %222 = arith.maximumf %220, %221 : vector<8x32xf32>
    %c0_159 = arith.constant 0 : index
    %c0_160 = arith.constant 0 : index
    %223 = vector.load %arg17[%c0_159, %c0_160] : memref<32x32xf32, #tpu.memory_space<vmem>>, vector<32x32xf32>
    %cst_161 = arith.constant dense<0.000000e+00> : vector<8x32xf32>
    %224 = tpu.matmul %222, %223, %cst_161 {dimension_numbers = #tpu.dot_dimension_numbers<[1], [0], [0], [1], [0, 0, 1, 1], [], []>} : vector<8x32xf32>, vector<32x32xf32>, vector<8x32xf32> -> vector<8x32xf32>
    %c0_162 = arith.constant 0 : index
    %c0_163 = arith.constant 0 : index
    %225 = vector.load %arg18[%c0_162, %c0_163] : memref<8x32xf32, #tpu.memory_space<vmem>>, vector<8x32xf32>
    %226 = arith.addf %224, %225 : vector<8x32xf32>
    %cst_164 = arith.constant 0.000000e+00 : f32
    %227 = vector.broadcast %cst_164 : f32 to vector<8x32xf32>
    %228 = arith.maximumf %226, %227 : vector<8x32xf32>
    %c0_165 = arith.constant 0 : index
    %c0_166 = arith.constant 0 : index
    %229 = vector.load %arg19[%c0_165, %c0_166] : memref<32x8xf32, #tpu.memory_space<vmem>>, vector<32x8xf32>
    %cst_167 = arith.constant dense<0.000000e+00> : vector<8x8xf32>
    %230 = tpu.matmul %228, %229, %cst_167 {dimension_numbers = #tpu.dot_dimension_numbers<[1], [0], [0], [1], [0, 0, 1, 1], [], []>} : vector<8x32xf32>, vector<32x8xf32>, vector<8x8xf32> -> vector<8x8xf32>
    %c0_168 = arith.constant 0 : index
    %c0_169 = arith.constant 0 : index
    %231 = vector.load %arg20[%c0_168, %c0_169] : memref<8x8xf32, #tpu.memory_space<vmem>>, vector<8x8xf32>
    %232 = arith.addf %230, %231 : vector<8x8xf32>
    %233 = vector.extract_strided_slice %232 {offsets = [0, 0], sizes = [8, 4], strides = [1, 1]} : vector<8x8xf32> to vector<8x4xf32>
    %234 = vector.extract_strided_slice %232 {offsets = [0, 4], sizes = [8, 4], strides = [1, 1]} : vector<8x8xf32> to vector<8x4xf32>
    %cst_170 = arith.constant 0.000000e+00 : f32
    %235 = vector.broadcast %cst_170 : f32 to vector<8x4xf32>
    %236 = arith.maximumf %234, %235 : vector<8x4xf32>
    %c0_171 = arith.constant 0 : index
    %c0_172 = arith.constant 0 : index
    %237 = vector.load %arg21[%c0_171, %c0_172] : memref<32x32xf32, #tpu.memory_space<vmem>>, vector<32x32xf32>
    %cst_173 = arith.constant dense<0.000000e+00> : vector<8x32xf32>
    %238 = tpu.matmul %187, %237, %cst_173 {dimension_numbers = #tpu.dot_dimension_numbers<[1], [0], [0], [1], [0, 0, 1, 1], [], []>} : vector<8x32xf32>, vector<32x32xf32>, vector<8x32xf32> -> vector<8x32xf32>
    %c0_174 = arith.constant 0 : index
    %c0_175 = arith.constant 0 : index
    %239 = vector.load %arg22[%c0_174, %c0_175] : memref<8x32xf32, #tpu.memory_space<vmem>>, vector<8x32xf32>
    %240 = arith.addf %238, %239 : vector<8x32xf32>
    %cst_176 = arith.constant 0.000000e+00 : f32
    %241 = vector.broadcast %cst_176 : f32 to vector<8x32xf32>
    %242 = arith.maximumf %240, %241 : vector<8x32xf32>
    %c0_177 = arith.constant 0 : index
    %c0_178 = arith.constant 0 : index
    %243 = vector.load %arg23[%c0_177, %c0_178] : memref<32x32xf32, #tpu.memory_space<vmem>>, vector<32x32xf32>
    %cst_179 = arith.constant dense<0.000000e+00> : vector<8x32xf32>
    %244 = tpu.matmul %242, %243, %cst_179 {dimension_numbers = #tpu.dot_dimension_numbers<[1], [0], [0], [1], [0, 0, 1, 1], [], []>} : vector<8x32xf32>, vector<32x32xf32>, vector<8x32xf32> -> vector<8x32xf32>
    %c0_180 = arith.constant 0 : index
    %c0_181 = arith.constant 0 : index
    %245 = vector.load %arg24[%c0_180, %c0_181] : memref<8x32xf32, #tpu.memory_space<vmem>>, vector<8x32xf32>
    %246 = arith.addf %244, %245 : vector<8x32xf32>
    %c0_182 = arith.constant 0 : index
    %c0_183 = arith.constant 0 : index
    %247 = vector.load %arg25[%c0_182, %c0_183] : memref<32x8xf32, #tpu.memory_space<vmem>>, vector<32x8xf32>
    %cst_184 = arith.constant dense<0.000000e+00> : vector<8x8xf32>
    %248 = tpu.matmul %246, %247, %cst_184 {dimension_numbers = #tpu.dot_dimension_numbers<[1], [0], [0], [1], [0, 0, 1, 1], [], []>} : vector<8x32xf32>, vector<32x8xf32>, vector<8x8xf32> -> vector<8x8xf32>
    %c0_185 = arith.constant 0 : index
    %c0_186 = arith.constant 0 : index
    %249 = vector.load %arg26[%c0_185, %c0_186] : memref<8x8xf32, #tpu.memory_space<vmem>>, vector<8x8xf32>
    %250 = arith.addf %248, %249 : vector<8x8xf32>
    %251 = vector.extract_strided_slice %250 {offsets = [0, 0], sizes = [8, 4], strides = [1, 1]} : vector<8x8xf32> to vector<8x4xf32>
    %252 = vector.extract_strided_slice %250 {offsets = [0, 4], sizes = [8, 4], strides = [1, 1]} : vector<8x8xf32> to vector<8x4xf32>
    %cst_187 = arith.constant 0.000000e+00 : f32
    %253 = vector.broadcast %cst_187 : f32 to vector<8x4xf32>
    %254 = arith.maximumf %252, %253 : vector<8x4xf32>
    %cst_188 = arith.constant 5.000000e-01 : f32
    %255 = vector.broadcast %cst_188 : f32 to vector<8x4xf32>
    %256 = arith.mulf %255, %236 : vector<8x4xf32>
    %257 = math.exp %256 : vector<8x4xf32>
    %258 = arith.mulf %195, %257 : vector<8x4xf32>
    %259 = arith.addf %233, %258 : vector<8x4xf32>
    %c0_189 = arith.constant 0 : index
    %c0_190 = arith.constant 0 : index
    %260 = vector.load %arg11[%c0_189, %c0_190] : memref<4x32xf32, #tpu.memory_space<vmem>>, vector<4x32xf32>
    %cst_191 = arith.constant dense<0.000000e+00> : vector<8x32xf32>
    %261 = tpu.matmul %259, %260, %cst_191 {dimension_numbers = #tpu.dot_dimension_numbers<[1], [0], [0], [1], [0, 0, 1, 1], [], []>} : vector<8x4xf32>, vector<4x32xf32>, vector<8x32xf32> -> vector<8x32xf32>
    %c0_192 = arith.constant 0 : index
    %c0_193 = arith.constant 0 : index
    %262 = vector.load %arg12[%c0_192, %c0_193] : memref<8x32xf32, #tpu.memory_space<vmem>>, vector<8x32xf32>
    %263 = arith.addf %261, %262 : vector<8x32xf32>
    %cst_194 = arith.constant 0.000000e+00 : f32
    %264 = vector.broadcast %cst_194 : f32 to vector<8x32xf32>
    %265 = arith.maximumf %263, %264 : vector<8x32xf32>
    %c0_195 = arith.constant 0 : index
    %c0_196 = arith.constant 0 : index
    %266 = vector.load %arg13[%c0_195, %c0_196] : memref<32x32xf32, #tpu.memory_space<vmem>>, vector<32x32xf32>
    %cst_197 = arith.constant dense<0.000000e+00> : vector<8x32xf32>
    %267 = tpu.matmul %265, %266, %cst_197 {dimension_numbers = #tpu.dot_dimension_numbers<[1], [0], [0], [1], [0, 0, 1, 1], [], []>} : vector<8x32xf32>, vector<32x32xf32>, vector<8x32xf32> -> vector<8x32xf32>
    %c0_198 = arith.constant 0 : index
    %c0_199 = arith.constant 0 : index
    %268 = vector.load %arg14[%c0_198, %c0_199] : memref<8x32xf32, #tpu.memory_space<vmem>>, vector<8x32xf32>
    %269 = arith.addf %267, %268 : vector<8x32xf32>
    %270 = tpu.concatenate %269, %187 in 1 : vector<8x32xf32>, vector<8x32xf32> -> vector<8x64xf32>
    %c0_200 = arith.constant 0 : index
    %c0_201 = arith.constant 0 : index
    %271 = vector.load %arg27[%c0_200, %c0_201] : memref<64x32xf32, #tpu.memory_space<vmem>>, vector<64x32xf32>
    %cst_202 = arith.constant dense<0.000000e+00> : vector<8x32xf32>
    %272 = tpu.matmul %270, %271, %cst_202 {dimension_numbers = #tpu.dot_dimension_numbers<[1], [0], [0], [1], [0, 0, 1, 1], [], []>} : vector<8x64xf32>, vector<64x32xf32>, vector<8x32xf32> -> vector<8x32xf32>
    %c0_203 = arith.constant 0 : index
    %c0_204 = arith.constant 0 : index
    %273 = vector.load %arg28[%c0_203, %c0_204] : memref<8x32xf32, #tpu.memory_space<vmem>>, vector<8x32xf32>
    %274 = arith.addf %272, %273 : vector<8x32xf32>
    %cst_205 = arith.constant 0.000000e+00 : f32
    %275 = vector.broadcast %cst_205 : f32 to vector<8x32xf32>
    %276 = arith.maximumf %274, %275 : vector<8x32xf32>
    %c0_206 = arith.constant 0 : index
    %c0_207 = arith.constant 0 : index
    %277 = vector.load %arg29[%c0_206, %c0_207] : memref<32x32xf32, #tpu.memory_space<vmem>>, vector<32x32xf32>
    %cst_208 = arith.constant dense<0.000000e+00> : vector<8x32xf32>
    %278 = tpu.matmul %276, %277, %cst_208 {dimension_numbers = #tpu.dot_dimension_numbers<[1], [0], [0], [1], [0, 0, 1, 1], [], []>} : vector<8x32xf32>, vector<32x32xf32>, vector<8x32xf32> -> vector<8x32xf32>
    %c0_209 = arith.constant 0 : index
    %c0_210 = arith.constant 0 : index
    %279 = vector.load %arg30[%c0_209, %c0_210] : memref<8x32xf32, #tpu.memory_space<vmem>>, vector<8x32xf32>
    %280 = arith.addf %278, %279 : vector<8x32xf32>
    %cst_211 = arith.constant 0.000000e+00 : f32
    %281 = vector.broadcast %cst_211 : f32 to vector<8x32xf32>
    %282 = arith.maximumf %280, %281 : vector<8x32xf32>
    %c0_212 = arith.constant 0 : index
    %c0_213 = arith.constant 0 : index
    %283 = vector.load %arg31[%c0_212, %c0_213] : memref<32x35xf32, #tpu.memory_space<vmem>>, vector<32x35xf32>
    %cst_214 = arith.constant dense<0.000000e+00> : vector<8x35xf32>
    %284 = tpu.matmul %282, %283, %cst_214 {dimension_numbers = #tpu.dot_dimension_numbers<[1], [0], [0], [1], [0, 0, 1, 1], [], []>} : vector<8x32xf32>, vector<32x35xf32>, vector<8x35xf32> -> vector<8x35xf32>
    %c0_215 = arith.constant 0 : index
    %c0_216 = arith.constant 0 : index
    %285 = vector.load %arg32[%c0_215, %c0_216] : memref<8x35xf32, #tpu.memory_space<vmem>>, vector<8x35xf32>
    %286 = arith.addf %284, %285 : vector<8x35xf32>
    %287 = vector.extract_strided_slice %286 {offsets = [0, 0], sizes = [8, 3], strides = [1, 1]} : vector<8x35xf32> to vector<8x3xf32>
    %cst_217 = arith.constant 0.000000e+00 : f32
    %288 = vector.broadcast %cst_217 : f32 to vector<8x3xf32>
    %289 = arith.maximumf %287, %288 : vector<8x3xf32>
    %290 = vector.extract_strided_slice %286 {offsets = [0, 3], sizes = [8, 32], strides = [1, 1]} : vector<8x35xf32> to vector<8x32xf32>
    %cst_218 = arith.constant 0.000000e+00 : f32
    %291 = vector.broadcast %cst_218 : f32 to vector<8x32xf32>
    %292 = arith.maximumf %290, %291 : vector<8x32xf32>
    %c0_219 = arith.constant 0 : index
    %c0_220 = arith.constant 0 : index
    %293 = vector.load %arg33[%c0_219, %c0_220] : memref<32x3xf32, #tpu.memory_space<vmem>>, vector<32x3xf32>
    %cst_221 = arith.constant dense<0.000000e+00> : vector<8x3xf32>
    %294 = tpu.matmul %292, %293, %cst_221 {dimension_numbers = #tpu.dot_dimension_numbers<[1], [0], [0], [1], [0, 0, 1, 1], [], []>} : vector<8x32xf32>, vector<32x3xf32>, vector<8x3xf32> -> vector<8x3xf32>
    %c0_222 = arith.constant 0 : index
    %c0_223 = arith.constant 0 : index
    %295 = vector.load %arg34[%c0_222, %c0_223] : memref<8x3xf32, #tpu.memory_space<vmem>>, vector<8x3xf32>
    %296 = arith.addf %294, %295 : vector<8x3xf32>
    %cst_224 = arith.constant -5.000000e-01 : f32
    %cst_225 = arith.constant 1.83787704 : f32
    %297 = arith.mulf %cst_224, %cst_225 : f32
    %cst_226 = arith.constant 5.000000e-01 : f32
    %298 = vector.broadcast %cst_226 : f32 to vector<8x3xf32>
    %299 = arith.mulf %298, %289 : vector<8x3xf32>
    %300 = vector.broadcast %297 : f32 to vector<8x3xf32>
    %301 = arith.subf %300, %299 : vector<8x3xf32>
    %302 = arith.subf %191, %296 : vector<8x3xf32>
    %303 = arith.mulf %302, %302 : vector<8x3xf32>
    %cst_227 = arith.constant 5.000000e-01 : f32
    %304 = vector.broadcast %cst_227 : f32 to vector<8x3xf32>
    %305 = arith.mulf %304, %303 : vector<8x3xf32>
    %cst_228 = arith.constant 0.000000e+00 : f32
    %306 = vector.broadcast %cst_228 : f32 to vector<8x3xf32>
    %307 = arith.subf %306, %289 : vector<8x3xf32>
    %308 = math.exp %307 : vector<8x3xf32>
    %309 = arith.mulf %305, %308 : vector<8x3xf32>
    %310 = arith.subf %301, %309 : vector<8x3xf32>
    %311 = arith.subf %254, %236 : vector<8x4xf32>
    %cst_229 = arith.constant 1.000000e+00 : f32
    %312 = vector.broadcast %cst_229 : f32 to vector<8x4xf32>
    %313 = arith.subf %311, %312 : vector<8x4xf32>
    %314 = math.exp %236 : vector<8x4xf32>
    %315 = arith.subf %233, %251 : vector<8x4xf32>
    %316 = arith.mulf %315, %315 : vector<8x4xf32>
    %317 = arith.addf %314, %316 : vector<8x4xf32>
    %cst_230 = arith.constant 0.000000e+00 : f32
    %318 = vector.broadcast %cst_230 : f32 to vector<8x4xf32>
    %319 = arith.subf %318, %254 : vector<8x4xf32>
    %320 = math.exp %319 : vector<8x4xf32>
    %321 = arith.mulf %317, %320 : vector<8x4xf32>
    %322 = arith.addf %313, %321 : vector<8x4xf32>
    %323 = tpu.concatenate %215, %269 in 1 : vector<8x32xf32>, vector<8x32xf32> -> vector<8x64xf32>
    %324 = tpu.concatenate %323, %162 in 1 : vector<8x64xf32>, vector<8x32xf32> -> vector<8x96xf32>
    %c0_231 = arith.constant 0 : index
    %c0_232 = arith.constant 0 : index
    %325 = vector.load %arg35[%c0_231, %c0_232] : memref<96x128xf32, #tpu.memory_space<vmem>>, vector<96x128xf32>
    %cst_233 = arith.constant dense<0.000000e+00> : vector<8x128xf32>
    %326 = tpu.matmul %324, %325, %cst_233 {dimension_numbers = #tpu.dot_dimension_numbers<[1], [0], [0], [1], [0, 0, 1, 1], [], []>} : vector<8x96xf32>, vector<96x128xf32>, vector<8x128xf32> -> vector<8x128xf32>
    %327 = vector.extract_strided_slice %326 {offsets = [0, 0], sizes = [8, 32], strides = [1, 1]} : vector<8x128xf32> to vector<8x32xf32>
    %328 = arith.negf %327 : vector<8x32xf32>
    %329 = math.exp %328 : vector<8x32xf32>
    %cst_234 = arith.constant 1.000000e+00 : f32
    %330 = vector.broadcast %cst_234 : f32 to vector<8x32xf32>
    %331 = arith.addf %330, %329 : vector<8x32xf32>
    %332 = arith.divf %330, %331 : vector<8x32xf32>
    %333 = vector.extract_strided_slice %326 {offsets = [0, 32], sizes = [8, 32], strides = [1, 1]} : vector<8x128xf32> to vector<8x32xf32>
    %334 = arith.negf %333 : vector<8x32xf32>
    %335 = math.exp %334 : vector<8x32xf32>
    %cst_235 = arith.constant 1.000000e+00 : f32
    %336 = vector.broadcast %cst_235 : f32 to vector<8x32xf32>
    %337 = arith.addf %336, %335 : vector<8x32xf32>
    %338 = arith.divf %336, %337 : vector<8x32xf32>
    %339 = vector.extract_strided_slice %326 {offsets = [0, 64], sizes = [8, 32], strides = [1, 1]} : vector<8x128xf32> to vector<8x32xf32>
    %340 = vector.extract_strided_slice %326 {offsets = [0, 96], sizes = [8, 32], strides = [1, 1]} : vector<8x128xf32> to vector<8x32xf32>
    %341 = arith.mulf %332, %340 : vector<8x32xf32>
    %342 = arith.addf %339, %341 : vector<8x32xf32>
    %343 = math.tanh %342 : vector<8x32xf32>
    %cst_236 = arith.constant 1.000000e+00 : f32
    %344 = vector.broadcast %cst_236 : f32 to vector<8x32xf32>
    %345 = arith.subf %344, %338 : vector<8x32xf32>
    %346 = arith.mulf %345, %343 : vector<8x32xf32>
    %347 = arith.mulf %338, %162 : vector<8x32xf32>
    %348 = arith.addf %346, %347 : vector<8x32xf32>
    %349 = tpu.concatenate %348, %187 in 1 : vector<8x32xf32>, vector<8x32xf32> -> vector<8x64xf32>
    %c0_237 = arith.constant 0 : index
    %c0_238 = arith.constant 0 : index
    %350 = vector.load %arg36[%c0_237, %c0_238] : memref<64x128xf32, #tpu.memory_space<vmem>>, vector<64x128xf32>
    %cst_239 = arith.constant dense<0.000000e+00> : vector<8x128xf32>
    %351 = tpu.matmul %349, %350, %cst_239 {dimension_numbers = #tpu.dot_dimension_numbers<[1], [0], [0], [1], [0, 0, 1, 1], [], []>} : vector<8x64xf32>, vector<64x128xf32>, vector<8x128xf32> -> vector<8x128xf32>
    %352 = vector.extract_strided_slice %351 {offsets = [0, 0], sizes = [8, 32], strides = [1, 1]} : vector<8x128xf32> to vector<8x32xf32>
    %353 = arith.negf %352 : vector<8x32xf32>
    %354 = math.exp %353 : vector<8x32xf32>
    %cst_240 = arith.constant 1.000000e+00 : f32
    %355 = vector.broadcast %cst_240 : f32 to vector<8x32xf32>
    %356 = arith.addf %355, %354 : vector<8x32xf32>
    %357 = arith.divf %355, %356 : vector<8x32xf32>
    %358 = vector.extract_strided_slice %351 {offsets = [0, 32], sizes = [8, 32], strides = [1, 1]} : vector<8x128xf32> to vector<8x32xf32>
    %359 = arith.negf %358 : vector<8x32xf32>
    %360 = math.exp %359 : vector<8x32xf32>
    %cst_241 = arith.constant 1.000000e+00 : f32
    %361 = vector.broadcast %cst_241 : f32 to vector<8x32xf32>
    %362 = arith.addf %361, %360 : vector<8x32xf32>
    %363 = arith.divf %361, %362 : vector<8x32xf32>
    %364 = vector.extract_strided_slice %351 {offsets = [0, 64], sizes = [8, 32], strides = [1, 1]} : vector<8x128xf32> to vector<8x32xf32>
    %365 = vector.extract_strided_slice %351 {offsets = [0, 96], sizes = [8, 32], strides = [1, 1]} : vector<8x128xf32> to vector<8x32xf32>
    %366 = arith.mulf %357, %365 : vector<8x32xf32>
    %367 = arith.addf %364, %366 : vector<8x32xf32>
    %368 = math.tanh %367 : vector<8x32xf32>
    %cst_242 = arith.constant 1.000000e+00 : f32
    %369 = vector.broadcast %cst_242 : f32 to vector<8x32xf32>
    %370 = arith.subf %369, %363 : vector<8x32xf32>
    %371 = arith.mulf %370, %368 : vector<8x32xf32>
    %372 = arith.mulf %363, %187 : vector<8x32xf32>
    %373 = arith.addf %371, %372 : vector<8x32xf32>
    %374 = arith.addf %188, %310 : vector<8x3xf32>
    %375 = arith.addf %189, %322 : vector<8x4xf32>
    %c2 = arith.constant 2 : index
    %c0_243 = arith.constant 0 : index
    %c0_244 = arith.constant 0 : index
    %376 = vector.load %arg0[%c2, %c0_243, %c0_244] : memref<8x8x3xf32, #tpu.memory_space<vmem>>, vector<1x8x3xf32>
    %377 = vector.shape_cast %376 : vector<1x8x3xf32> to vector<8x3xf32>
    %c2_245 = arith.constant 2 : index
    %c0_246 = arith.constant 0 : index
    %c0_247 = arith.constant 0 : index
    %378 = vector.load %arg1[%c2_245, %c0_246, %c0_247] : memref<8x8x2xf32, #tpu.memory_space<vmem>>, vector<1x8x2xf32>
    %379 = vector.shape_cast %378 : vector<1x8x2xf32> to vector<8x2xf32>
    %c2_248 = arith.constant 2 : index
    %c0_249 = arith.constant 0 : index
    %c0_250 = arith.constant 0 : index
    %380 = vector.load %arg2[%c2_248, %c0_249, %c0_250] : memref<8x8x4xf32, #tpu.memory_space<vmem>>, vector<1x8x4xf32>
    %381 = vector.shape_cast %380 : vector<1x8x4xf32> to vector<8x4xf32>
    %c0_251 = arith.constant 0 : index
    %c0_252 = arith.constant 0 : index
    %382 = vector.load %arg3[%c0_251, %c0_252] : memref<3x32xf32, #tpu.memory_space<vmem>>, vector<3x32xf32>
    %cst_253 = arith.constant dense<0.000000e+00> : vector<8x32xf32>
    %383 = tpu.matmul %377, %382, %cst_253 {dimension_numbers = #tpu.dot_dimension_numbers<[1], [0], [0], [1], [0, 0, 1, 1], [], []>} : vector<8x3xf32>, vector<3x32xf32>, vector<8x32xf32> -> vector<8x32xf32>
    %c0_254 = arith.constant 0 : index
    %c0_255 = arith.constant 0 : index
    %384 = vector.load %arg4[%c0_254, %c0_255] : memref<8x32xf32, #tpu.memory_space<vmem>>, vector<8x32xf32>
    %385 = arith.addf %383, %384 : vector<8x32xf32>
    %cst_256 = arith.constant 0.000000e+00 : f32
    %386 = vector.broadcast %cst_256 : f32 to vector<8x32xf32>
    %387 = arith.maximumf %385, %386 : vector<8x32xf32>
    %c0_257 = arith.constant 0 : index
    %c0_258 = arith.constant 0 : index
    %388 = vector.load %arg5[%c0_257, %c0_258] : memref<32x32xf32, #tpu.memory_space<vmem>>, vector<32x32xf32>
    %cst_259 = arith.constant dense<0.000000e+00> : vector<8x32xf32>
    %389 = tpu.matmul %387, %388, %cst_259 {dimension_numbers = #tpu.dot_dimension_numbers<[1], [0], [0], [1], [0, 0, 1, 1], [], []>} : vector<8x32xf32>, vector<32x32xf32>, vector<8x32xf32> -> vector<8x32xf32>
    %c0_260 = arith.constant 0 : index
    %c0_261 = arith.constant 0 : index
    %390 = vector.load %arg6[%c0_260, %c0_261] : memref<8x32xf32, #tpu.memory_space<vmem>>, vector<8x32xf32>
    %391 = arith.addf %389, %390 : vector<8x32xf32>
    %c0_262 = arith.constant 0 : index
    %c0_263 = arith.constant 0 : index
    %392 = vector.load %arg7[%c0_262, %c0_263] : memref<2x32xf32, #tpu.memory_space<vmem>>, vector<2x32xf32>
    %cst_264 = arith.constant dense<0.000000e+00> : vector<8x32xf32>
    %393 = tpu.matmul %379, %392, %cst_264 {dimension_numbers = #tpu.dot_dimension_numbers<[1], [0], [0], [1], [0, 0, 1, 1], [], []>} : vector<8x2xf32>, vector<2x32xf32>, vector<8x32xf32> -> vector<8x32xf32>
    %c0_265 = arith.constant 0 : index
    %c0_266 = arith.constant 0 : index
    %394 = vector.load %arg8[%c0_265, %c0_266] : memref<8x32xf32, #tpu.memory_space<vmem>>, vector<8x32xf32>
    %395 = arith.addf %393, %394 : vector<8x32xf32>
    %cst_267 = arith.constant 0.000000e+00 : f32
    %396 = vector.broadcast %cst_267 : f32 to vector<8x32xf32>
    %397 = arith.maximumf %395, %396 : vector<8x32xf32>
    %c0_268 = arith.constant 0 : index
    %c0_269 = arith.constant 0 : index
    %398 = vector.load %arg9[%c0_268, %c0_269] : memref<32x32xf32, #tpu.memory_space<vmem>>, vector<32x32xf32>
    %cst_270 = arith.constant dense<0.000000e+00> : vector<8x32xf32>
    %399 = tpu.matmul %397, %398, %cst_270 {dimension_numbers = #tpu.dot_dimension_numbers<[1], [0], [0], [1], [0, 0, 1, 1], [], []>} : vector<8x32xf32>, vector<32x32xf32>, vector<8x32xf32> -> vector<8x32xf32>
    %c0_271 = arith.constant 0 : index
    %c0_272 = arith.constant 0 : index
    %400 = vector.load %arg10[%c0_271, %c0_272] : memref<8x32xf32, #tpu.memory_space<vmem>>, vector<8x32xf32>
    %401 = arith.addf %399, %400 : vector<8x32xf32>
    %402 = tpu.concatenate %391, %373 in 1 : vector<8x32xf32>, vector<8x32xf32> -> vector<8x64xf32>
    %c0_273 = arith.constant 0 : index
    %c0_274 = arith.constant 0 : index
    %403 = vector.load %arg15[%c0_273, %c0_274] : memref<64x32xf32, #tpu.memory_space<vmem>>, vector<64x32xf32>
    %cst_275 = arith.constant dense<0.000000e+00> : vector<8x32xf32>
    %404 = tpu.matmul %402, %403, %cst_275 {dimension_numbers = #tpu.dot_dimension_numbers<[1], [0], [0], [1], [0, 0, 1, 1], [], []>} : vector<8x64xf32>, vector<64x32xf32>, vector<8x32xf32> -> vector<8x32xf32>
    %c0_276 = arith.constant 0 : index
    %c0_277 = arith.constant 0 : index
    %405 = vector.load %arg16[%c0_276, %c0_277] : memref<8x32xf32, #tpu.memory_space<vmem>>, vector<8x32xf32>
    %406 = arith.addf %404, %405 : vector<8x32xf32>
    %cst_278 = arith.constant 0.000000e+00 : f32
    %407 = vector.broadcast %cst_278 : f32 to vector<8x32xf32>
    %408 = arith.maximumf %406, %407 : vector<8x32xf32>
    %c0_279 = arith.constant 0 : index
    %c0_280 = arith.constant 0 : index
    %409 = vector.load %arg17[%c0_279, %c0_280] : memref<32x32xf32, #tpu.memory_space<vmem>>, vector<32x32xf32>
    %cst_281 = arith.constant dense<0.000000e+00> : vector<8x32xf32>
    %410 = tpu.matmul %408, %409, %cst_281 {dimension_numbers = #tpu.dot_dimension_numbers<[1], [0], [0], [1], [0, 0, 1, 1], [], []>} : vector<8x32xf32>, vector<32x32xf32>, vector<8x32xf32> -> vector<8x32xf32>
    %c0_282 = arith.constant 0 : index
    %c0_283 = arith.constant 0 : index
    %411 = vector.load %arg18[%c0_282, %c0_283] : memref<8x32xf32, #tpu.memory_space<vmem>>, vector<8x32xf32>
    %412 = arith.addf %410, %411 : vector<8x32xf32>
    %cst_284 = arith.constant 0.000000e+00 : f32
    %413 = vector.broadcast %cst_284 : f32 to vector<8x32xf32>
    %414 = arith.maximumf %412, %413 : vector<8x32xf32>
    %c0_285 = arith.constant 0 : index
    %c0_286 = arith.constant 0 : index
    %415 = vector.load %arg19[%c0_285, %c0_286] : memref<32x8xf32, #tpu.memory_space<vmem>>, vector<32x8xf32>
    %cst_287 = arith.constant dense<0.000000e+00> : vector<8x8xf32>
    %416 = tpu.matmul %414, %415, %cst_287 {dimension_numbers = #tpu.dot_dimension_numbers<[1], [0], [0], [1], [0, 0, 1, 1], [], []>} : vector<8x32xf32>, vector<32x8xf32>, vector<8x8xf32> -> vector<8x8xf32>
    %c0_288 = arith.constant 0 : index
    %c0_289 = arith.constant 0 : index
    %417 = vector.load %arg20[%c0_288, %c0_289] : memref<8x8xf32, #tpu.memory_space<vmem>>, vector<8x8xf32>
    %418 = arith.addf %416, %417 : vector<8x8xf32>
    %419 = vector.extract_strided_slice %418 {offsets = [0, 0], sizes = [8, 4], strides = [1, 1]} : vector<8x8xf32> to vector<8x4xf32>
    %420 = vector.extract_strided_slice %418 {offsets = [0, 4], sizes = [8, 4], strides = [1, 1]} : vector<8x8xf32> to vector<8x4xf32>
    %cst_290 = arith.constant 0.000000e+00 : f32
    %421 = vector.broadcast %cst_290 : f32 to vector<8x4xf32>
    %422 = arith.maximumf %420, %421 : vector<8x4xf32>
    %c0_291 = arith.constant 0 : index
    %c0_292 = arith.constant 0 : index
    %423 = vector.load %arg21[%c0_291, %c0_292] : memref<32x32xf32, #tpu.memory_space<vmem>>, vector<32x32xf32>
    %cst_293 = arith.constant dense<0.000000e+00> : vector<8x32xf32>
    %424 = tpu.matmul %373, %423, %cst_293 {dimension_numbers = #tpu.dot_dimension_numbers<[1], [0], [0], [1], [0, 0, 1, 1], [], []>} : vector<8x32xf32>, vector<32x32xf32>, vector<8x32xf32> -> vector<8x32xf32>
    %c0_294 = arith.constant 0 : index
    %c0_295 = arith.constant 0 : index
    %425 = vector.load %arg22[%c0_294, %c0_295] : memref<8x32xf32, #tpu.memory_space<vmem>>, vector<8x32xf32>
    %426 = arith.addf %424, %425 : vector<8x32xf32>
    %cst_296 = arith.constant 0.000000e+00 : f32
    %427 = vector.broadcast %cst_296 : f32 to vector<8x32xf32>
    %428 = arith.maximumf %426, %427 : vector<8x32xf32>
    %c0_297 = arith.constant 0 : index
    %c0_298 = arith.constant 0 : index
    %429 = vector.load %arg23[%c0_297, %c0_298] : memref<32x32xf32, #tpu.memory_space<vmem>>, vector<32x32xf32>
    %cst_299 = arith.constant dense<0.000000e+00> : vector<8x32xf32>
    %430 = tpu.matmul %428, %429, %cst_299 {dimension_numbers = #tpu.dot_dimension_numbers<[1], [0], [0], [1], [0, 0, 1, 1], [], []>} : vector<8x32xf32>, vector<32x32xf32>, vector<8x32xf32> -> vector<8x32xf32>
    %c0_300 = arith.constant 0 : index
    %c0_301 = arith.constant 0 : index
    %431 = vector.load %arg24[%c0_300, %c0_301] : memref<8x32xf32, #tpu.memory_space<vmem>>, vector<8x32xf32>
    %432 = arith.addf %430, %431 : vector<8x32xf32>
    %c0_302 = arith.constant 0 : index
    %c0_303 = arith.constant 0 : index
    %433 = vector.load %arg25[%c0_302, %c0_303] : memref<32x8xf32, #tpu.memory_space<vmem>>, vector<32x8xf32>
    %cst_304 = arith.constant dense<0.000000e+00> : vector<8x8xf32>
    %434 = tpu.matmul %432, %433, %cst_304 {dimension_numbers = #tpu.dot_dimension_numbers<[1], [0], [0], [1], [0, 0, 1, 1], [], []>} : vector<8x32xf32>, vector<32x8xf32>, vector<8x8xf32> -> vector<8x8xf32>
    %c0_305 = arith.constant 0 : index
    %c0_306 = arith.constant 0 : index
    %435 = vector.load %arg26[%c0_305, %c0_306] : memref<8x8xf32, #tpu.memory_space<vmem>>, vector<8x8xf32>
    %436 = arith.addf %434, %435 : vector<8x8xf32>
    %437 = vector.extract_strided_slice %436 {offsets = [0, 0], sizes = [8, 4], strides = [1, 1]} : vector<8x8xf32> to vector<8x4xf32>
    %438 = vector.extract_strided_slice %436 {offsets = [0, 4], sizes = [8, 4], strides = [1, 1]} : vector<8x8xf32> to vector<8x4xf32>
    %cst_307 = arith.constant 0.000000e+00 : f32
    %439 = vector.broadcast %cst_307 : f32 to vector<8x4xf32>
    %440 = arith.maximumf %438, %439 : vector<8x4xf32>
    %cst_308 = arith.constant 5.000000e-01 : f32
    %441 = vector.broadcast %cst_308 : f32 to vector<8x4xf32>
    %442 = arith.mulf %441, %422 : vector<8x4xf32>
    %443 = math.exp %442 : vector<8x4xf32>
    %444 = arith.mulf %381, %443 : vector<8x4xf32>
    %445 = arith.addf %419, %444 : vector<8x4xf32>
    %c0_309 = arith.constant 0 : index
    %c0_310 = arith.constant 0 : index
    %446 = vector.load %arg11[%c0_309, %c0_310] : memref<4x32xf32, #tpu.memory_space<vmem>>, vector<4x32xf32>
    %cst_311 = arith.constant dense<0.000000e+00> : vector<8x32xf32>
    %447 = tpu.matmul %445, %446, %cst_311 {dimension_numbers = #tpu.dot_dimension_numbers<[1], [0], [0], [1], [0, 0, 1, 1], [], []>} : vector<8x4xf32>, vector<4x32xf32>, vector<8x32xf32> -> vector<8x32xf32>
    %c0_312 = arith.constant 0 : index
    %c0_313 = arith.constant 0 : index
    %448 = vector.load %arg12[%c0_312, %c0_313] : memref<8x32xf32, #tpu.memory_space<vmem>>, vector<8x32xf32>
    %449 = arith.addf %447, %448 : vector<8x32xf32>
    %cst_314 = arith.constant 0.000000e+00 : f32
    %450 = vector.broadcast %cst_314 : f32 to vector<8x32xf32>
    %451 = arith.maximumf %449, %450 : vector<8x32xf32>
    %c0_315 = arith.constant 0 : index
    %c0_316 = arith.constant 0 : index
    %452 = vector.load %arg13[%c0_315, %c0_316] : memref<32x32xf32, #tpu.memory_space<vmem>>, vector<32x32xf32>
    %cst_317 = arith.constant dense<0.000000e+00> : vector<8x32xf32>
    %453 = tpu.matmul %451, %452, %cst_317 {dimension_numbers = #tpu.dot_dimension_numbers<[1], [0], [0], [1], [0, 0, 1, 1], [], []>} : vector<8x32xf32>, vector<32x32xf32>, vector<8x32xf32> -> vector<8x32xf32>
    %c0_318 = arith.constant 0 : index
    %c0_319 = arith.constant 0 : index
    %454 = vector.load %arg14[%c0_318, %c0_319] : memref<8x32xf32, #tpu.memory_space<vmem>>, vector<8x32xf32>
    %455 = arith.addf %453, %454 : vector<8x32xf32>
    %456 = tpu.concatenate %455, %373 in 1 : vector<8x32xf32>, vector<8x32xf32> -> vector<8x64xf32>
    %c0_320 = arith.constant 0 : index
    %c0_321 = arith.constant 0 : index
    %457 = vector.load %arg27[%c0_320, %c0_321] : memref<64x32xf32, #tpu.memory_space<vmem>>, vector<64x32xf32>
    %cst_322 = arith.constant dense<0.000000e+00> : vector<8x32xf32>
    %458 = tpu.matmul %456, %457, %cst_322 {dimension_numbers = #tpu.dot_dimension_numbers<[1], [0], [0], [1], [0, 0, 1, 1], [], []>} : vector<8x64xf32>, vector<64x32xf32>, vector<8x32xf32> -> vector<8x32xf32>
    %c0_323 = arith.constant 0 : index
    %c0_324 = arith.constant 0 : index
    %459 = vector.load %arg28[%c0_323, %c0_324] : memref<8x32xf32, #tpu.memory_space<vmem>>, vector<8x32xf32>
    %460 = arith.addf %458, %459 : vector<8x32xf32>
    %cst_325 = arith.constant 0.000000e+00 : f32
    %461 = vector.broadcast %cst_325 : f32 to vector<8x32xf32>
    %462 = arith.maximumf %460, %461 : vector<8x32xf32>
    %c0_326 = arith.constant 0 : index
    %c0_327 = arith.constant 0 : index
    %463 = vector.load %arg29[%c0_326, %c0_327] : memref<32x32xf32, #tpu.memory_space<vmem>>, vector<32x32xf32>
    %cst_328 = arith.constant dense<0.000000e+00> : vector<8x32xf32>
    %464 = tpu.matmul %462, %463, %cst_328 {dimension_numbers = #tpu.dot_dimension_numbers<[1], [0], [0], [1], [0, 0, 1, 1], [], []>} : vector<8x32xf32>, vector<32x32xf32>, vector<8x32xf32> -> vector<8x32xf32>
    %c0_329 = arith.constant 0 : index
    %c0_330 = arith.constant 0 : index
    %465 = vector.load %arg30[%c0_329, %c0_330] : memref<8x32xf32, #tpu.memory_space<vmem>>, vector<8x32xf32>
    %466 = arith.addf %464, %465 : vector<8x32xf32>
    %cst_331 = arith.constant 0.000000e+00 : f32
    %467 = vector.broadcast %cst_331 : f32 to vector<8x32xf32>
    %468 = arith.maximumf %466, %467 : vector<8x32xf32>
    %c0_332 = arith.constant 0 : index
    %c0_333 = arith.constant 0 : index
    %469 = vector.load %arg31[%c0_332, %c0_333] : memref<32x35xf32, #tpu.memory_space<vmem>>, vector<32x35xf32>
    %cst_334 = arith.constant dense<0.000000e+00> : vector<8x35xf32>
    %470 = tpu.matmul %468, %469, %cst_334 {dimension_numbers = #tpu.dot_dimension_numbers<[1], [0], [0], [1], [0, 0, 1, 1], [], []>} : vector<8x32xf32>, vector<32x35xf32>, vector<8x35xf32> -> vector<8x35xf32>
    %c0_335 = arith.constant 0 : index
    %c0_336 = arith.constant 0 : index
    %471 = vector.load %arg32[%c0_335, %c0_336] : memref<8x35xf32, #tpu.memory_space<vmem>>, vector<8x35xf32>
    %472 = arith.addf %470, %471 : vector<8x35xf32>
    %473 = vector.extract_strided_slice %472 {offsets = [0, 0], sizes = [8, 3], strides = [1, 1]} : vector<8x35xf32> to vector<8x3xf32>
    %cst_337 = arith.constant 0.000000e+00 : f32
    %474 = vector.broadcast %cst_337 : f32 to vector<8x3xf32>
    %475 = arith.maximumf %473, %474 : vector<8x3xf32>
    %476 = vector.extract_strided_slice %472 {offsets = [0, 3], sizes = [8, 32], strides = [1, 1]} : vector<8x35xf32> to vector<8x32xf32>
    %cst_338 = arith.constant 0.000000e+00 : f32
    %477 = vector.broadcast %cst_338 : f32 to vector<8x32xf32>
    %478 = arith.maximumf %476, %477 : vector<8x32xf32>
    %c0_339 = arith.constant 0 : index
    %c0_340 = arith.constant 0 : index
    %479 = vector.load %arg33[%c0_339, %c0_340] : memref<32x3xf32, #tpu.memory_space<vmem>>, vector<32x3xf32>
    %cst_341 = arith.constant dense<0.000000e+00> : vector<8x3xf32>
    %480 = tpu.matmul %478, %479, %cst_341 {dimension_numbers = #tpu.dot_dimension_numbers<[1], [0], [0], [1], [0, 0, 1, 1], [], []>} : vector<8x32xf32>, vector<32x3xf32>, vector<8x3xf32> -> vector<8x3xf32>
    %c0_342 = arith.constant 0 : index
    %c0_343 = arith.constant 0 : index
    %481 = vector.load %arg34[%c0_342, %c0_343] : memref<8x3xf32, #tpu.memory_space<vmem>>, vector<8x3xf32>
    %482 = arith.addf %480, %481 : vector<8x3xf32>
    %cst_344 = arith.constant -5.000000e-01 : f32
    %cst_345 = arith.constant 1.83787704 : f32
    %483 = arith.mulf %cst_344, %cst_345 : f32
    %cst_346 = arith.constant 5.000000e-01 : f32
    %484 = vector.broadcast %cst_346 : f32 to vector<8x3xf32>
    %485 = arith.mulf %484, %475 : vector<8x3xf32>
    %486 = vector.broadcast %483 : f32 to vector<8x3xf32>
    %487 = arith.subf %486, %485 : vector<8x3xf32>
    %488 = arith.subf %377, %482 : vector<8x3xf32>
    %489 = arith.mulf %488, %488 : vector<8x3xf32>
    %cst_347 = arith.constant 5.000000e-01 : f32
    %490 = vector.broadcast %cst_347 : f32 to vector<8x3xf32>
    %491 = arith.mulf %490, %489 : vector<8x3xf32>
    %cst_348 = arith.constant 0.000000e+00 : f32
    %492 = vector.broadcast %cst_348 : f32 to vector<8x3xf32>
    %493 = arith.subf %492, %475 : vector<8x3xf32>
    %494 = math.exp %493 : vector<8x3xf32>
    %495 = arith.mulf %491, %494 : vector<8x3xf32>
    %496 = arith.subf %487, %495 : vector<8x3xf32>
    %497 = arith.subf %440, %422 : vector<8x4xf32>
    %cst_349 = arith.constant 1.000000e+00 : f32
    %498 = vector.broadcast %cst_349 : f32 to vector<8x4xf32>
    %499 = arith.subf %497, %498 : vector<8x4xf32>
    %500 = math.exp %422 : vector<8x4xf32>
    %501 = arith.subf %419, %437 : vector<8x4xf32>
    %502 = arith.mulf %501, %501 : vector<8x4xf32>
    %503 = arith.addf %500, %502 : vector<8x4xf32>
    %cst_350 = arith.constant 0.000000e+00 : f32
    %504 = vector.broadcast %cst_350 : f32 to vector<8x4xf32>
    %505 = arith.subf %504, %440 : vector<8x4xf32>
    %506 = math.exp %505 : vector<8x4xf32>
    %507 = arith.mulf %503, %506 : vector<8x4xf32>
    %508 = arith.addf %499, %507 : vector<8x4xf32>
    %509 = tpu.concatenate %401, %455 in 1 : vector<8x32xf32>, vector<8x32xf32> -> vector<8x64xf32>
    %510 = tpu.concatenate %509, %348 in 1 : vector<8x64xf32>, vector<8x32xf32> -> vector<8x96xf32>
    %c0_351 = arith.constant 0 : index
    %c0_352 = arith.constant 0 : index
    %511 = vector.load %arg35[%c0_351, %c0_352] : memref<96x128xf32, #tpu.memory_space<vmem>>, vector<96x128xf32>
    %cst_353 = arith.constant dense<0.000000e+00> : vector<8x128xf32>
    %512 = tpu.matmul %510, %511, %cst_353 {dimension_numbers = #tpu.dot_dimension_numbers<[1], [0], [0], [1], [0, 0, 1, 1], [], []>} : vector<8x96xf32>, vector<96x128xf32>, vector<8x128xf32> -> vector<8x128xf32>
    %513 = vector.extract_strided_slice %512 {offsets = [0, 0], sizes = [8, 32], strides = [1, 1]} : vector<8x128xf32> to vector<8x32xf32>
    %514 = arith.negf %513 : vector<8x32xf32>
    %515 = math.exp %514 : vector<8x32xf32>
    %cst_354 = arith.constant 1.000000e+00 : f32
    %516 = vector.broadcast %cst_354 : f32 to vector<8x32xf32>
    %517 = arith.addf %516, %515 : vector<8x32xf32>
    %518 = arith.divf %516, %517 : vector<8x32xf32>
    %519 = vector.extract_strided_slice %512 {offsets = [0, 32], sizes = [8, 32], strides = [1, 1]} : vector<8x128xf32> to vector<8x32xf32>
    %520 = arith.negf %519 : vector<8x32xf32>
    %521 = math.exp %520 : vector<8x32xf32>
    %cst_355 = arith.constant 1.000000e+00 : f32
    %522 = vector.broadcast %cst_355 : f32 to vector<8x32xf32>
    %523 = arith.addf %522, %521 : vector<8x32xf32>
    %524 = arith.divf %522, %523 : vector<8x32xf32>
    %525 = vector.extract_strided_slice %512 {offsets = [0, 64], sizes = [8, 32], strides = [1, 1]} : vector<8x128xf32> to vector<8x32xf32>
    %526 = vector.extract_strided_slice %512 {offsets = [0, 96], sizes = [8, 32], strides = [1, 1]} : vector<8x128xf32> to vector<8x32xf32>
    %527 = arith.mulf %518, %526 : vector<8x32xf32>
    %528 = arith.addf %525, %527 : vector<8x32xf32>
    %529 = math.tanh %528 : vector<8x32xf32>
    %cst_356 = arith.constant 1.000000e+00 : f32
    %530 = vector.broadcast %cst_356 : f32 to vector<8x32xf32>
    %531 = arith.subf %530, %524 : vector<8x32xf32>
    %532 = arith.mulf %531, %529 : vector<8x32xf32>
    %533 = arith.mulf %524, %348 : vector<8x32xf32>
    %534 = arith.addf %532, %533 : vector<8x32xf32>
    %535 = tpu.concatenate %534, %373 in 1 : vector<8x32xf32>, vector<8x32xf32> -> vector<8x64xf32>
    %c0_357 = arith.constant 0 : index
    %c0_358 = arith.constant 0 : index
    %536 = vector.load %arg36[%c0_357, %c0_358] : memref<64x128xf32, #tpu.memory_space<vmem>>, vector<64x128xf32>
    %cst_359 = arith.constant dense<0.000000e+00> : vector<8x128xf32>
    %537 = tpu.matmul %535, %536, %cst_359 {dimension_numbers = #tpu.dot_dimension_numbers<[1], [0], [0], [1], [0, 0, 1, 1], [], []>} : vector<8x64xf32>, vector<64x128xf32>, vector<8x128xf32> -> vector<8x128xf32>
    %538 = vector.extract_strided_slice %537 {offsets = [0, 0], sizes = [8, 32], strides = [1, 1]} : vector<8x128xf32> to vector<8x32xf32>
    %539 = arith.negf %538 : vector<8x32xf32>
    %540 = math.exp %539 : vector<8x32xf32>
    %cst_360 = arith.constant 1.000000e+00 : f32
    %541 = vector.broadcast %cst_360 : f32 to vector<8x32xf32>
    %542 = arith.addf %541, %540 : vector<8x32xf32>
    %543 = arith.divf %541, %542 : vector<8x32xf32>
    %544 = vector.extract_strided_slice %537 {offsets = [0, 32], sizes = [8, 32], strides = [1, 1]} : vector<8x128xf32> to vector<8x32xf32>
    %545 = arith.negf %544 : vector<8x32xf32>
    %546 = math.exp %545 : vector<8x32xf32>
    %cst_361 = arith.constant 1.000000e+00 : f32
    %547 = vector.broadcast %cst_361 : f32 to vector<8x32xf32>
    %548 = arith.addf %547, %546 : vector<8x32xf32>
    %549 = arith.divf %547, %548 : vector<8x32xf32>
    %550 = vector.extract_strided_slice %537 {offsets = [0, 64], sizes = [8, 32], strides = [1, 1]} : vector<8x128xf32> to vector<8x32xf32>
    %551 = vector.extract_strided_slice %537 {offsets = [0, 96], sizes = [8, 32], strides = [1, 1]} : vector<8x128xf32> to vector<8x32xf32>
    %552 = arith.mulf %543, %551 : vector<8x32xf32>
    %553 = arith.addf %550, %552 : vector<8x32xf32>
    %554 = math.tanh %553 : vector<8x32xf32>
    %cst_362 = arith.constant 1.000000e+00 : f32
    %555 = vector.broadcast %cst_362 : f32 to vector<8x32xf32>
    %556 = arith.subf %555, %549 : vector<8x32xf32>
    %557 = arith.mulf %556, %554 : vector<8x32xf32>
    %558 = arith.mulf %549, %373 : vector<8x32xf32>
    %559 = arith.addf %557, %558 : vector<8x32xf32>
    %560 = arith.addf %374, %496 : vector<8x3xf32>
    %561 = arith.addf %375, %508 : vector<8x4xf32>
    %c3 = arith.constant 3 : index
    %c0_363 = arith.constant 0 : index
    %c0_364 = arith.constant 0 : index
    %562 = vector.load %arg0[%c3, %c0_363, %c0_364] : memref<8x8x3xf32, #tpu.memory_space<vmem>>, vector<1x8x3xf32>
    %563 = vector.shape_cast %562 : vector<1x8x3xf32> to vector<8x3xf32>
    %c3_365 = arith.constant 3 : index
    %c0_366 = arith.constant 0 : index
    %c0_367 = arith.constant 0 : index
    %564 = vector.load %arg1[%c3_365, %c0_366, %c0_367] : memref<8x8x2xf32, #tpu.memory_space<vmem>>, vector<1x8x2xf32>
    %565 = vector.shape_cast %564 : vector<1x8x2xf32> to vector<8x2xf32>
    %c3_368 = arith.constant 3 : index
    %c0_369 = arith.constant 0 : index
    %c0_370 = arith.constant 0 : index
    %566 = vector.load %arg2[%c3_368, %c0_369, %c0_370] : memref<8x8x4xf32, #tpu.memory_space<vmem>>, vector<1x8x4xf32>
    %567 = vector.shape_cast %566 : vector<1x8x4xf32> to vector<8x4xf32>
    %c0_371 = arith.constant 0 : index
    %c0_372 = arith.constant 0 : index
    %568 = vector.load %arg3[%c0_371, %c0_372] : memref<3x32xf32, #tpu.memory_space<vmem>>, vector<3x32xf32>
    %cst_373 = arith.constant dense<0.000000e+00> : vector<8x32xf32>
    %569 = tpu.matmul %563, %568, %cst_373 {dimension_numbers = #tpu.dot_dimension_numbers<[1], [0], [0], [1], [0, 0, 1, 1], [], []>} : vector<8x3xf32>, vector<3x32xf32>, vector<8x32xf32> -> vector<8x32xf32>
    %c0_374 = arith.constant 0 : index
    %c0_375 = arith.constant 0 : index
    %570 = vector.load %arg4[%c0_374, %c0_375] : memref<8x32xf32, #tpu.memory_space<vmem>>, vector<8x32xf32>
    %571 = arith.addf %569, %570 : vector<8x32xf32>
    %cst_376 = arith.constant 0.000000e+00 : f32
    %572 = vector.broadcast %cst_376 : f32 to vector<8x32xf32>
    %573 = arith.maximumf %571, %572 : vector<8x32xf32>
    %c0_377 = arith.constant 0 : index
    %c0_378 = arith.constant 0 : index
    %574 = vector.load %arg5[%c0_377, %c0_378] : memref<32x32xf32, #tpu.memory_space<vmem>>, vector<32x32xf32>
    %cst_379 = arith.constant dense<0.000000e+00> : vector<8x32xf32>
    %575 = tpu.matmul %573, %574, %cst_379 {dimension_numbers = #tpu.dot_dimension_numbers<[1], [0], [0], [1], [0, 0, 1, 1], [], []>} : vector<8x32xf32>, vector<32x32xf32>, vector<8x32xf32> -> vector<8x32xf32>
    %c0_380 = arith.constant 0 : index
    %c0_381 = arith.constant 0 : index
    %576 = vector.load %arg6[%c0_380, %c0_381] : memref<8x32xf32, #tpu.memory_space<vmem>>, vector<8x32xf32>
    %577 = arith.addf %575, %576 : vector<8x32xf32>
    %c0_382 = arith.constant 0 : index
    %c0_383 = arith.constant 0 : index
    %578 = vector.load %arg7[%c0_382, %c0_383] : memref<2x32xf32, #tpu.memory_space<vmem>>, vector<2x32xf32>
    %cst_384 = arith.constant dense<0.000000e+00> : vector<8x32xf32>
    %579 = tpu.matmul %565, %578, %cst_384 {dimension_numbers = #tpu.dot_dimension_numbers<[1], [0], [0], [1], [0, 0, 1, 1], [], []>} : vector<8x2xf32>, vector<2x32xf32>, vector<8x32xf32> -> vector<8x32xf32>
    %c0_385 = arith.constant 0 : index
    %c0_386 = arith.constant 0 : index
    %580 = vector.load %arg8[%c0_385, %c0_386] : memref<8x32xf32, #tpu.memory_space<vmem>>, vector<8x32xf32>
    %581 = arith.addf %579, %580 : vector<8x32xf32>
    %cst_387 = arith.constant 0.000000e+00 : f32
    %582 = vector.broadcast %cst_387 : f32 to vector<8x32xf32>
    %583 = arith.maximumf %581, %582 : vector<8x32xf32>
    %c0_388 = arith.constant 0 : index
    %c0_389 = arith.constant 0 : index
    %584 = vector.load %arg9[%c0_388, %c0_389] : memref<32x32xf32, #tpu.memory_space<vmem>>, vector<32x32xf32>
    %cst_390 = arith.constant dense<0.000000e+00> : vector<8x32xf32>
    %585 = tpu.matmul %583, %584, %cst_390 {dimension_numbers = #tpu.dot_dimension_numbers<[1], [0], [0], [1], [0, 0, 1, 1], [], []>} : vector<8x32xf32>, vector<32x32xf32>, vector<8x32xf32> -> vector<8x32xf32>
    %c0_391 = arith.constant 0 : index
    %c0_392 = arith.constant 0 : index
    %586 = vector.load %arg10[%c0_391, %c0_392] : memref<8x32xf32, #tpu.memory_space<vmem>>, vector<8x32xf32>
    %587 = arith.addf %585, %586 : vector<8x32xf32>
    %588 = tpu.concatenate %577, %559 in 1 : vector<8x32xf32>, vector<8x32xf32> -> vector<8x64xf32>
    %c0_393 = arith.constant 0 : index
    %c0_394 = arith.constant 0 : index
    %589 = vector.load %arg15[%c0_393, %c0_394] : memref<64x32xf32, #tpu.memory_space<vmem>>, vector<64x32xf32>
    %cst_395 = arith.constant dense<0.000000e+00> : vector<8x32xf32>
    %590 = tpu.matmul %588, %589, %cst_395 {dimension_numbers = #tpu.dot_dimension_numbers<[1], [0], [0], [1], [0, 0, 1, 1], [], []>} : vector<8x64xf32>, vector<64x32xf32>, vector<8x32xf32> -> vector<8x32xf32>
    %c0_396 = arith.constant 0 : index
    %c0_397 = arith.constant 0 : index
    %591 = vector.load %arg16[%c0_396, %c0_397] : memref<8x32xf32, #tpu.memory_space<vmem>>, vector<8x32xf32>
    %592 = arith.addf %590, %591 : vector<8x32xf32>
    %cst_398 = arith.constant 0.000000e+00 : f32
    %593 = vector.broadcast %cst_398 : f32 to vector<8x32xf32>
    %594 = arith.maximumf %592, %593 : vector<8x32xf32>
    %c0_399 = arith.constant 0 : index
    %c0_400 = arith.constant 0 : index
    %595 = vector.load %arg17[%c0_399, %c0_400] : memref<32x32xf32, #tpu.memory_space<vmem>>, vector<32x32xf32>
    %cst_401 = arith.constant dense<0.000000e+00> : vector<8x32xf32>
    %596 = tpu.matmul %594, %595, %cst_401 {dimension_numbers = #tpu.dot_dimension_numbers<[1], [0], [0], [1], [0, 0, 1, 1], [], []>} : vector<8x32xf32>, vector<32x32xf32>, vector<8x32xf32> -> vector<8x32xf32>
    %c0_402 = arith.constant 0 : index
    %c0_403 = arith.constant 0 : index
    %597 = vector.load %arg18[%c0_402, %c0_403] : memref<8x32xf32, #tpu.memory_space<vmem>>, vector<8x32xf32>
    %598 = arith.addf %596, %597 : vector<8x32xf32>
    %cst_404 = arith.constant 0.000000e+00 : f32
    %599 = vector.broadcast %cst_404 : f32 to vector<8x32xf32>
    %600 = arith.maximumf %598, %599 : vector<8x32xf32>
    %c0_405 = arith.constant 0 : index
    %c0_406 = arith.constant 0 : index
    %601 = vector.load %arg19[%c0_405, %c0_406] : memref<32x8xf32, #tpu.memory_space<vmem>>, vector<32x8xf32>
    %cst_407 = arith.constant dense<0.000000e+00> : vector<8x8xf32>
    %602 = tpu.matmul %600, %601, %cst_407 {dimension_numbers = #tpu.dot_dimension_numbers<[1], [0], [0], [1], [0, 0, 1, 1], [], []>} : vector<8x32xf32>, vector<32x8xf32>, vector<8x8xf32> -> vector<8x8xf32>
    %c0_408 = arith.constant 0 : index
    %c0_409 = arith.constant 0 : index
    %603 = vector.load %arg20[%c0_408, %c0_409] : memref<8x8xf32, #tpu.memory_space<vmem>>, vector<8x8xf32>
    %604 = arith.addf %602, %603 : vector<8x8xf32>
    %605 = vector.extract_strided_slice %604 {offsets = [0, 0], sizes = [8, 4], strides = [1, 1]} : vector<8x8xf32> to vector<8x4xf32>
    %606 = vector.extract_strided_slice %604 {offsets = [0, 4], sizes = [8, 4], strides = [1, 1]} : vector<8x8xf32> to vector<8x4xf32>
    %cst_410 = arith.constant 0.000000e+00 : f32
    %607 = vector.broadcast %cst_410 : f32 to vector<8x4xf32>
    %608 = arith.maximumf %606, %607 : vector<8x4xf32>
    %c0_411 = arith.constant 0 : index
    %c0_412 = arith.constant 0 : index
    %609 = vector.load %arg21[%c0_411, %c0_412] : memref<32x32xf32, #tpu.memory_space<vmem>>, vector<32x32xf32>
    %cst_413 = arith.constant dense<0.000000e+00> : vector<8x32xf32>
    %610 = tpu.matmul %559, %609, %cst_413 {dimension_numbers = #tpu.dot_dimension_numbers<[1], [0], [0], [1], [0, 0, 1, 1], [], []>} : vector<8x32xf32>, vector<32x32xf32>, vector<8x32xf32> -> vector<8x32xf32>
    %c0_414 = arith.constant 0 : index
    %c0_415 = arith.constant 0 : index
    %611 = vector.load %arg22[%c0_414, %c0_415] : memref<8x32xf32, #tpu.memory_space<vmem>>, vector<8x32xf32>
    %612 = arith.addf %610, %611 : vector<8x32xf32>
    %cst_416 = arith.constant 0.000000e+00 : f32
    %613 = vector.broadcast %cst_416 : f32 to vector<8x32xf32>
    %614 = arith.maximumf %612, %613 : vector<8x32xf32>
    %c0_417 = arith.constant 0 : index
    %c0_418 = arith.constant 0 : index
    %615 = vector.load %arg23[%c0_417, %c0_418] : memref<32x32xf32, #tpu.memory_space<vmem>>, vector<32x32xf32>
    %cst_419 = arith.constant dense<0.000000e+00> : vector<8x32xf32>
    %616 = tpu.matmul %614, %615, %cst_419 {dimension_numbers = #tpu.dot_dimension_numbers<[1], [0], [0], [1], [0, 0, 1, 1], [], []>} : vector<8x32xf32>, vector<32x32xf32>, vector<8x32xf32> -> vector<8x32xf32>
    %c0_420 = arith.constant 0 : index
    %c0_421 = arith.constant 0 : index
    %617 = vector.load %arg24[%c0_420, %c0_421] : memref<8x32xf32, #tpu.memory_space<vmem>>, vector<8x32xf32>
    %618 = arith.addf %616, %617 : vector<8x32xf32>
    %c0_422 = arith.constant 0 : index
    %c0_423 = arith.constant 0 : index
    %619 = vector.load %arg25[%c0_422, %c0_423] : memref<32x8xf32, #tpu.memory_space<vmem>>, vector<32x8xf32>
    %cst_424 = arith.constant dense<0.000000e+00> : vector<8x8xf32>
    %620 = tpu.matmul %618, %619, %cst_424 {dimension_numbers = #tpu.dot_dimension_numbers<[1], [0], [0], [1], [0, 0, 1, 1], [], []>} : vector<8x32xf32>, vector<32x8xf32>, vector<8x8xf32> -> vector<8x8xf32>
    %c0_425 = arith.constant 0 : index
    %c0_426 = arith.constant 0 : index
    %621 = vector.load %arg26[%c0_425, %c0_426] : memref<8x8xf32, #tpu.memory_space<vmem>>, vector<8x8xf32>
    %622 = arith.addf %620, %621 : vector<8x8xf32>
    %623 = vector.extract_strided_slice %622 {offsets = [0, 0], sizes = [8, 4], strides = [1, 1]} : vector<8x8xf32> to vector<8x4xf32>
    %624 = vector.extract_strided_slice %622 {offsets = [0, 4], sizes = [8, 4], strides = [1, 1]} : vector<8x8xf32> to vector<8x4xf32>
    %cst_427 = arith.constant 0.000000e+00 : f32
    %625 = vector.broadcast %cst_427 : f32 to vector<8x4xf32>
    %626 = arith.maximumf %624, %625 : vector<8x4xf32>
    %cst_428 = arith.constant 5.000000e-01 : f32
    %627 = vector.broadcast %cst_428 : f32 to vector<8x4xf32>
    %628 = arith.mulf %627, %608 : vector<8x4xf32>
    %629 = math.exp %628 : vector<8x4xf32>
    %630 = arith.mulf %567, %629 : vector<8x4xf32>
    %631 = arith.addf %605, %630 : vector<8x4xf32>
    %c0_429 = arith.constant 0 : index
    %c0_430 = arith.constant 0 : index
    %632 = vector.load %arg11[%c0_429, %c0_430] : memref<4x32xf32, #tpu.memory_space<vmem>>, vector<4x32xf32>
    %cst_431 = arith.constant dense<0.000000e+00> : vector<8x32xf32>
    %633 = tpu.matmul %631, %632, %cst_431 {dimension_numbers = #tpu.dot_dimension_numbers<[1], [0], [0], [1], [0, 0, 1, 1], [], []>} : vector<8x4xf32>, vector<4x32xf32>, vector<8x32xf32> -> vector<8x32xf32>
    %c0_432 = arith.constant 0 : index
    %c0_433 = arith.constant 0 : index
    %634 = vector.load %arg12[%c0_432, %c0_433] : memref<8x32xf32, #tpu.memory_space<vmem>>, vector<8x32xf32>
    %635 = arith.addf %633, %634 : vector<8x32xf32>
    %cst_434 = arith.constant 0.000000e+00 : f32
    %636 = vector.broadcast %cst_434 : f32 to vector<8x32xf32>
    %637 = arith.maximumf %635, %636 : vector<8x32xf32>
    %c0_435 = arith.constant 0 : index
    %c0_436 = arith.constant 0 : index
    %638 = vector.load %arg13[%c0_435, %c0_436] : memref<32x32xf32, #tpu.memory_space<vmem>>, vector<32x32xf32>
    %cst_437 = arith.constant dense<0.000000e+00> : vector<8x32xf32>
    %639 = tpu.matmul %637, %638, %cst_437 {dimension_numbers = #tpu.dot_dimension_numbers<[1], [0], [0], [1], [0, 0, 1, 1], [], []>} : vector<8x32xf32>, vector<32x32xf32>, vector<8x32xf32> -> vector<8x32xf32>
    %c0_438 = arith.constant 0 : index
    %c0_439 = arith.constant 0 : index
    %640 = vector.load %arg14[%c0_438, %c0_439] : memref<8x32xf32, #tpu.memory_space<vmem>>, vector<8x32xf32>
    %641 = arith.addf %639, %640 : vector<8x32xf32>
    %642 = tpu.concatenate %641, %559 in 1 : vector<8x32xf32>, vector<8x32xf32> -> vector<8x64xf32>
    %c0_440 = arith.constant 0 : index
    %c0_441 = arith.constant 0 : index
    %643 = vector.load %arg27[%c0_440, %c0_441] : memref<64x32xf32, #tpu.memory_space<vmem>>, vector<64x32xf32>
    %cst_442 = arith.constant dense<0.000000e+00> : vector<8x32xf32>
    %644 = tpu.matmul %642, %643, %cst_442 {dimension_numbers = #tpu.dot_dimension_numbers<[1], [0], [0], [1], [0, 0, 1, 1], [], []>} : vector<8x64xf32>, vector<64x32xf32>, vector<8x32xf32> -> vector<8x32xf32>
    %c0_443 = arith.constant 0 : index
    %c0_444 = arith.constant 0 : index
    %645 = vector.load %arg28[%c0_443, %c0_444] : memref<8x32xf32, #tpu.memory_space<vmem>>, vector<8x32xf32>
    %646 = arith.addf %644, %645 : vector<8x32xf32>
    %cst_445 = arith.constant 0.000000e+00 : f32
    %647 = vector.broadcast %cst_445 : f32 to vector<8x32xf32>
    %648 = arith.maximumf %646, %647 : vector<8x32xf32>
    %c0_446 = arith.constant 0 : index
    %c0_447 = arith.constant 0 : index
    %649 = vector.load %arg29[%c0_446, %c0_447] : memref<32x32xf32, #tpu.memory_space<vmem>>, vector<32x32xf32>
    %cst_448 = arith.constant dense<0.000000e+00> : vector<8x32xf32>
    %650 = tpu.matmul %648, %649, %cst_448 {dimension_numbers = #tpu.dot_dimension_numbers<[1], [0], [0], [1], [0, 0, 1, 1], [], []>} : vector<8x32xf32>, vector<32x32xf32>, vector<8x32xf32> -> vector<8x32xf32>
    %c0_449 = arith.constant 0 : index
    %c0_450 = arith.constant 0 : index
    %651 = vector.load %arg30[%c0_449, %c0_450] : memref<8x32xf32, #tpu.memory_space<vmem>>, vector<8x32xf32>
    %652 = arith.addf %650, %651 : vector<8x32xf32>
    %cst_451 = arith.constant 0.000000e+00 : f32
    %653 = vector.broadcast %cst_451 : f32 to vector<8x32xf32>
    %654 = arith.maximumf %652, %653 : vector<8x32xf32>
    %c0_452 = arith.constant 0 : index
    %c0_453 = arith.constant 0 : index
    %655 = vector.load %arg31[%c0_452, %c0_453] : memref<32x35xf32, #tpu.memory_space<vmem>>, vector<32x35xf32>
    %cst_454 = arith.constant dense<0.000000e+00> : vector<8x35xf32>
    %656 = tpu.matmul %654, %655, %cst_454 {dimension_numbers = #tpu.dot_dimension_numbers<[1], [0], [0], [1], [0, 0, 1, 1], [], []>} : vector<8x32xf32>, vector<32x35xf32>, vector<8x35xf32> -> vector<8x35xf32>
    %c0_455 = arith.constant 0 : index
    %c0_456 = arith.constant 0 : index
    %657 = vector.load %arg32[%c0_455, %c0_456] : memref<8x35xf32, #tpu.memory_space<vmem>>, vector<8x35xf32>
    %658 = arith.addf %656, %657 : vector<8x35xf32>
    %659 = vector.extract_strided_slice %658 {offsets = [0, 0], sizes = [8, 3], strides = [1, 1]} : vector<8x35xf32> to vector<8x3xf32>
    %cst_457 = arith.constant 0.000000e+00 : f32
    %660 = vector.broadcast %cst_457 : f32 to vector<8x3xf32>
    %661 = arith.maximumf %659, %660 : vector<8x3xf32>
    %662 = vector.extract_strided_slice %658 {offsets = [0, 3], sizes = [8, 32], strides = [1, 1]} : vector<8x35xf32> to vector<8x32xf32>
    %cst_458 = arith.constant 0.000000e+00 : f32
    %663 = vector.broadcast %cst_458 : f32 to vector<8x32xf32>
    %664 = arith.maximumf %662, %663 : vector<8x32xf32>
    %c0_459 = arith.constant 0 : index
    %c0_460 = arith.constant 0 : index
    %665 = vector.load %arg33[%c0_459, %c0_460] : memref<32x3xf32, #tpu.memory_space<vmem>>, vector<32x3xf32>
    %cst_461 = arith.constant dense<0.000000e+00> : vector<8x3xf32>
    %666 = tpu.matmul %664, %665, %cst_461 {dimension_numbers = #tpu.dot_dimension_numbers<[1], [0], [0], [1], [0, 0, 1, 1], [], []>} : vector<8x32xf32>, vector<32x3xf32>, vector<8x3xf32> -> vector<8x3xf32>
    %c0_462 = arith.constant 0 : index
    %c0_463 = arith.constant 0 : index
    %667 = vector.load %arg34[%c0_462, %c0_463] : memref<8x3xf32, #tpu.memory_space<vmem>>, vector<8x3xf32>
    %668 = arith.addf %666, %667 : vector<8x3xf32>
    %cst_464 = arith.constant -5.000000e-01 : f32
    %cst_465 = arith.constant 1.83787704 : f32
    %669 = arith.mulf %cst_464, %cst_465 : f32
    %cst_466 = arith.constant 5.000000e-01 : f32
    %670 = vector.broadcast %cst_466 : f32 to vector<8x3xf32>
    %671 = arith.mulf %670, %661 : vector<8x3xf32>
    %672 = vector.broadcast %669 : f32 to vector<8x3xf32>
    %673 = arith.subf %672, %671 : vector<8x3xf32>
    %674 = arith.subf %563, %668 : vector<8x3xf32>
    %675 = arith.mulf %674, %674 : vector<8x3xf32>
    %cst_467 = arith.constant 5.000000e-01 : f32
    %676 = vector.broadcast %cst_467 : f32 to vector<8x3xf32>
    %677 = arith.mulf %676, %675 : vector<8x3xf32>
    %cst_468 = arith.constant 0.000000e+00 : f32
    %678 = vector.broadcast %cst_468 : f32 to vector<8x3xf32>
    %679 = arith.subf %678, %661 : vector<8x3xf32>
    %680 = math.exp %679 : vector<8x3xf32>
    %681 = arith.mulf %677, %680 : vector<8x3xf32>
    %682 = arith.subf %673, %681 : vector<8x3xf32>
    %683 = arith.subf %626, %608 : vector<8x4xf32>
    %cst_469 = arith.constant 1.000000e+00 : f32
    %684 = vector.broadcast %cst_469 : f32 to vector<8x4xf32>
    %685 = arith.subf %683, %684 : vector<8x4xf32>
    %686 = math.exp %608 : vector<8x4xf32>
    %687 = arith.subf %605, %623 : vector<8x4xf32>
    %688 = arith.mulf %687, %687 : vector<8x4xf32>
    %689 = arith.addf %686, %688 : vector<8x4xf32>
    %cst_470 = arith.constant 0.000000e+00 : f32
    %690 = vector.broadcast %cst_470 : f32 to vector<8x4xf32>
    %691 = arith.subf %690, %626 : vector<8x4xf32>
    %692 = math.exp %691 : vector<8x4xf32>
    %693 = arith.mulf %689, %692 : vector<8x4xf32>
    %694 = arith.addf %685, %693 : vector<8x4xf32>
    %695 = tpu.concatenate %587, %641 in 1 : vector<8x32xf32>, vector<8x32xf32> -> vector<8x64xf32>
    %696 = tpu.concatenate %695, %534 in 1 : vector<8x64xf32>, vector<8x32xf32> -> vector<8x96xf32>
    %c0_471 = arith.constant 0 : index
    %c0_472 = arith.constant 0 : index
    %697 = vector.load %arg35[%c0_471, %c0_472] : memref<96x128xf32, #tpu.memory_space<vmem>>, vector<96x128xf32>
    %cst_473 = arith.constant dense<0.000000e+00> : vector<8x128xf32>
    %698 = tpu.matmul %696, %697, %cst_473 {dimension_numbers = #tpu.dot_dimension_numbers<[1], [0], [0], [1], [0, 0, 1, 1], [], []>} : vector<8x96xf32>, vector<96x128xf32>, vector<8x128xf32> -> vector<8x128xf32>
    %699 = vector.extract_strided_slice %698 {offsets = [0, 0], sizes = [8, 32], strides = [1, 1]} : vector<8x128xf32> to vector<8x32xf32>
    %700 = arith.negf %699 : vector<8x32xf32>
    %701 = math.exp %700 : vector<8x32xf32>
    %cst_474 = arith.constant 1.000000e+00 : f32
    %702 = vector.broadcast %cst_474 : f32 to vector<8x32xf32>
    %703 = arith.addf %702, %701 : vector<8x32xf32>
    %704 = arith.divf %702, %703 : vector<8x32xf32>
    %705 = vector.extract_strided_slice %698 {offsets = [0, 32], sizes = [8, 32], strides = [1, 1]} : vector<8x128xf32> to vector<8x32xf32>
    %706 = arith.negf %705 : vector<8x32xf32>
    %707 = math.exp %706 : vector<8x32xf32>
    %cst_475 = arith.constant 1.000000e+00 : f32
    %708 = vector.broadcast %cst_475 : f32 to vector<8x32xf32>
    %709 = arith.addf %708, %707 : vector<8x32xf32>
    %710 = arith.divf %708, %709 : vector<8x32xf32>
    %711 = vector.extract_strided_slice %698 {offsets = [0, 64], sizes = [8, 32], strides = [1, 1]} : vector<8x128xf32> to vector<8x32xf32>
    %712 = vector.extract_strided_slice %698 {offsets = [0, 96], sizes = [8, 32], strides = [1, 1]} : vector<8x128xf32> to vector<8x32xf32>
    %713 = arith.mulf %704, %712 : vector<8x32xf32>
    %714 = arith.addf %711, %713 : vector<8x32xf32>
    %715 = math.tanh %714 : vector<8x32xf32>
    %cst_476 = arith.constant 1.000000e+00 : f32
    %716 = vector.broadcast %cst_476 : f32 to vector<8x32xf32>
    %717 = arith.subf %716, %710 : vector<8x32xf32>
    %718 = arith.mulf %717, %715 : vector<8x32xf32>
    %719 = arith.mulf %710, %534 : vector<8x32xf32>
    %720 = arith.addf %718, %719 : vector<8x32xf32>
    %721 = tpu.concatenate %720, %559 in 1 : vector<8x32xf32>, vector<8x32xf32> -> vector<8x64xf32>
    %c0_477 = arith.constant 0 : index
    %c0_478 = arith.constant 0 : index
    %722 = vector.load %arg36[%c0_477, %c0_478] : memref<64x128xf32, #tpu.memory_space<vmem>>, vector<64x128xf32>
    %cst_479 = arith.constant dense<0.000000e+00> : vector<8x128xf32>
    %723 = tpu.matmul %721, %722, %cst_479 {dimension_numbers = #tpu.dot_dimension_numbers<[1], [0], [0], [1], [0, 0, 1, 1], [], []>} : vector<8x64xf32>, vector<64x128xf32>, vector<8x128xf32> -> vector<8x128xf32>
    %724 = vector.extract_strided_slice %723 {offsets = [0, 0], sizes = [8, 32], strides = [1, 1]} : vector<8x128xf32> to vector<8x32xf32>
    %725 = arith.negf %724 : vector<8x32xf32>
    %726 = math.exp %725 : vector<8x32xf32>
    %cst_480 = arith.constant 1.000000e+00 : f32
    %727 = vector.broadcast %cst_480 : f32 to vector<8x32xf32>
    %728 = arith.addf %727, %726 : vector<8x32xf32>
    %729 = arith.divf %727, %728 : vector<8x32xf32>
    %730 = vector.extract_strided_slice %723 {offsets = [0, 32], sizes = [8, 32], strides = [1, 1]} : vector<8x128xf32> to vector<8x32xf32>
    %731 = arith.negf %730 : vector<8x32xf32>
    %732 = math.exp %731 : vector<8x32xf32>
    %cst_481 = arith.constant 1.000000e+00 : f32
    %733 = vector.broadcast %cst_481 : f32 to vector<8x32xf32>
    %734 = arith.addf %733, %732 : vector<8x32xf32>
    %735 = arith.divf %733, %734 : vector<8x32xf32>
    %736 = vector.extract_strided_slice %723 {offsets = [0, 64], sizes = [8, 32], strides = [1, 1]} : vector<8x128xf32> to vector<8x32xf32>
    %737 = vector.extract_strided_slice %723 {offsets = [0, 96], sizes = [8, 32], strides = [1, 1]} : vector<8x128xf32> to vector<8x32xf32>
    %738 = arith.mulf %729, %737 : vector<8x32xf32>
    %739 = arith.addf %736, %738 : vector<8x32xf32>
    %740 = math.tanh %739 : vector<8x32xf32>
    %cst_482 = arith.constant 1.000000e+00 : f32
    %741 = vector.broadcast %cst_482 : f32 to vector<8x32xf32>
    %742 = arith.subf %741, %735 : vector<8x32xf32>
    %743 = arith.mulf %742, %740 : vector<8x32xf32>
    %744 = arith.mulf %735, %559 : vector<8x32xf32>
    %745 = arith.addf %743, %744 : vector<8x32xf32>
    %746 = arith.addf %560, %682 : vector<8x3xf32>
    %747 = arith.addf %561, %694 : vector<8x4xf32>
    %c4 = arith.constant 4 : index
    %c0_483 = arith.constant 0 : index
    %c0_484 = arith.constant 0 : index
    %748 = vector.load %arg0[%c4, %c0_483, %c0_484] : memref<8x8x3xf32, #tpu.memory_space<vmem>>, vector<1x8x3xf32>
    %749 = vector.shape_cast %748 : vector<1x8x3xf32> to vector<8x3xf32>
    %c4_485 = arith.constant 4 : index
    %c0_486 = arith.constant 0 : index
    %c0_487 = arith.constant 0 : index
    %750 = vector.load %arg1[%c4_485, %c0_486, %c0_487] : memref<8x8x2xf32, #tpu.memory_space<vmem>>, vector<1x8x2xf32>
    %751 = vector.shape_cast %750 : vector<1x8x2xf32> to vector<8x2xf32>
    %c4_488 = arith.constant 4 : index
    %c0_489 = arith.constant 0 : index
    %c0_490 = arith.constant 0 : index
    %752 = vector.load %arg2[%c4_488, %c0_489, %c0_490] : memref<8x8x4xf32, #tpu.memory_space<vmem>>, vector<1x8x4xf32>
    %753 = vector.shape_cast %752 : vector<1x8x4xf32> to vector<8x4xf32>
    %c0_491 = arith.constant 0 : index
    %c0_492 = arith.constant 0 : index
    %754 = vector.load %arg3[%c0_491, %c0_492] : memref<3x32xf32, #tpu.memory_space<vmem>>, vector<3x32xf32>
    %cst_493 = arith.constant dense<0.000000e+00> : vector<8x32xf32>
    %755 = tpu.matmul %749, %754, %cst_493 {dimension_numbers = #tpu.dot_dimension_numbers<[1], [0], [0], [1], [0, 0, 1, 1], [], []>} : vector<8x3xf32>, vector<3x32xf32>, vector<8x32xf32> -> vector<8x32xf32>
    %c0_494 = arith.constant 0 : index
    %c0_495 = arith.constant 0 : index
    %756 = vector.load %arg4[%c0_494, %c0_495] : memref<8x32xf32, #tpu.memory_space<vmem>>, vector<8x32xf32>
    %757 = arith.addf %755, %756 : vector<8x32xf32>
    %cst_496 = arith.constant 0.000000e+00 : f32
    %758 = vector.broadcast %cst_496 : f32 to vector<8x32xf32>
    %759 = arith.maximumf %757, %758 : vector<8x32xf32>
    %c0_497 = arith.constant 0 : index
    %c0_498 = arith.constant 0 : index
    %760 = vector.load %arg5[%c0_497, %c0_498] : memref<32x32xf32, #tpu.memory_space<vmem>>, vector<32x32xf32>
    %cst_499 = arith.constant dense<0.000000e+00> : vector<8x32xf32>
    %761 = tpu.matmul %759, %760, %cst_499 {dimension_numbers = #tpu.dot_dimension_numbers<[1], [0], [0], [1], [0, 0, 1, 1], [], []>} : vector<8x32xf32>, vector<32x32xf32>, vector<8x32xf32> -> vector<8x32xf32>
    %c0_500 = arith.constant 0 : index
    %c0_501 = arith.constant 0 : index
    %762 = vector.load %arg6[%c0_500, %c0_501] : memref<8x32xf32, #tpu.memory_space<vmem>>, vector<8x32xf32>
    %763 = arith.addf %761, %762 : vector<8x32xf32>
    %c0_502 = arith.constant 0 : index
    %c0_503 = arith.constant 0 : index
    %764 = vector.load %arg7[%c0_502, %c0_503] : memref<2x32xf32, #tpu.memory_space<vmem>>, vector<2x32xf32>
    %cst_504 = arith.constant dense<0.000000e+00> : vector<8x32xf32>
    %765 = tpu.matmul %751, %764, %cst_504 {dimension_numbers = #tpu.dot_dimension_numbers<[1], [0], [0], [1], [0, 0, 1, 1], [], []>} : vector<8x2xf32>, vector<2x32xf32>, vector<8x32xf32> -> vector<8x32xf32>
    %c0_505 = arith.constant 0 : index
    %c0_506 = arith.constant 0 : index
    %766 = vector.load %arg8[%c0_505, %c0_506] : memref<8x32xf32, #tpu.memory_space<vmem>>, vector<8x32xf32>
    %767 = arith.addf %765, %766 : vector<8x32xf32>
    %cst_507 = arith.constant 0.000000e+00 : f32
    %768 = vector.broadcast %cst_507 : f32 to vector<8x32xf32>
    %769 = arith.maximumf %767, %768 : vector<8x32xf32>
    %c0_508 = arith.constant 0 : index
    %c0_509 = arith.constant 0 : index
    %770 = vector.load %arg9[%c0_508, %c0_509] : memref<32x32xf32, #tpu.memory_space<vmem>>, vector<32x32xf32>
    %cst_510 = arith.constant dense<0.000000e+00> : vector<8x32xf32>
    %771 = tpu.matmul %769, %770, %cst_510 {dimension_numbers = #tpu.dot_dimension_numbers<[1], [0], [0], [1], [0, 0, 1, 1], [], []>} : vector<8x32xf32>, vector<32x32xf32>, vector<8x32xf32> -> vector<8x32xf32>
    %c0_511 = arith.constant 0 : index
    %c0_512 = arith.constant 0 : index
    %772 = vector.load %arg10[%c0_511, %c0_512] : memref<8x32xf32, #tpu.memory_space<vmem>>, vector<8x32xf32>
    %773 = arith.addf %771, %772 : vector<8x32xf32>
    %774 = tpu.concatenate %763, %745 in 1 : vector<8x32xf32>, vector<8x32xf32> -> vector<8x64xf32>
    %c0_513 = arith.constant 0 : index
    %c0_514 = arith.constant 0 : index
    %775 = vector.load %arg15[%c0_513, %c0_514] : memref<64x32xf32, #tpu.memory_space<vmem>>, vector<64x32xf32>
    %cst_515 = arith.constant dense<0.000000e+00> : vector<8x32xf32>
    %776 = tpu.matmul %774, %775, %cst_515 {dimension_numbers = #tpu.dot_dimension_numbers<[1], [0], [0], [1], [0, 0, 1, 1], [], []>} : vector<8x64xf32>, vector<64x32xf32>, vector<8x32xf32> -> vector<8x32xf32>
    %c0_516 = arith.constant 0 : index
    %c0_517 = arith.constant 0 : index
    %777 = vector.load %arg16[%c0_516, %c0_517] : memref<8x32xf32, #tpu.memory_space<vmem>>, vector<8x32xf32>
    %778 = arith.addf %776, %777 : vector<8x32xf32>
    %cst_518 = arith.constant 0.000000e+00 : f32
    %779 = vector.broadcast %cst_518 : f32 to vector<8x32xf32>
    %780 = arith.maximumf %778, %779 : vector<8x32xf32>
    %c0_519 = arith.constant 0 : index
    %c0_520 = arith.constant 0 : index
    %781 = vector.load %arg17[%c0_519, %c0_520] : memref<32x32xf32, #tpu.memory_space<vmem>>, vector<32x32xf32>
    %cst_521 = arith.constant dense<0.000000e+00> : vector<8x32xf32>
    %782 = tpu.matmul %780, %781, %cst_521 {dimension_numbers = #tpu.dot_dimension_numbers<[1], [0], [0], [1], [0, 0, 1, 1], [], []>} : vector<8x32xf32>, vector<32x32xf32>, vector<8x32xf32> -> vector<8x32xf32>
    %c0_522 = arith.constant 0 : index
    %c0_523 = arith.constant 0 : index
    %783 = vector.load %arg18[%c0_522, %c0_523] : memref<8x32xf32, #tpu.memory_space<vmem>>, vector<8x32xf32>
    %784 = arith.addf %782, %783 : vector<8x32xf32>
    %cst_524 = arith.constant 0.000000e+00 : f32
    %785 = vector.broadcast %cst_524 : f32 to vector<8x32xf32>
    %786 = arith.maximumf %784, %785 : vector<8x32xf32>
    %c0_525 = arith.constant 0 : index
    %c0_526 = arith.constant 0 : index
    %787 = vector.load %arg19[%c0_525, %c0_526] : memref<32x8xf32, #tpu.memory_space<vmem>>, vector<32x8xf32>
    %cst_527 = arith.constant dense<0.000000e+00> : vector<8x8xf32>
    %788 = tpu.matmul %786, %787, %cst_527 {dimension_numbers = #tpu.dot_dimension_numbers<[1], [0], [0], [1], [0, 0, 1, 1], [], []>} : vector<8x32xf32>, vector<32x8xf32>, vector<8x8xf32> -> vector<8x8xf32>
    %c0_528 = arith.constant 0 : index
    %c0_529 = arith.constant 0 : index
    %789 = vector.load %arg20[%c0_528, %c0_529] : memref<8x8xf32, #tpu.memory_space<vmem>>, vector<8x8xf32>
    %790 = arith.addf %788, %789 : vector<8x8xf32>
    %791 = vector.extract_strided_slice %790 {offsets = [0, 0], sizes = [8, 4], strides = [1, 1]} : vector<8x8xf32> to vector<8x4xf32>
    %792 = vector.extract_strided_slice %790 {offsets = [0, 4], sizes = [8, 4], strides = [1, 1]} : vector<8x8xf32> to vector<8x4xf32>
    %cst_530 = arith.constant 0.000000e+00 : f32
    %793 = vector.broadcast %cst_530 : f32 to vector<8x4xf32>
    %794 = arith.maximumf %792, %793 : vector<8x4xf32>
    %c0_531 = arith.constant 0 : index
    %c0_532 = arith.constant 0 : index
    %795 = vector.load %arg21[%c0_531, %c0_532] : memref<32x32xf32, #tpu.memory_space<vmem>>, vector<32x32xf32>
    %cst_533 = arith.constant dense<0.000000e+00> : vector<8x32xf32>
    %796 = tpu.matmul %745, %795, %cst_533 {dimension_numbers = #tpu.dot_dimension_numbers<[1], [0], [0], [1], [0, 0, 1, 1], [], []>} : vector<8x32xf32>, vector<32x32xf32>, vector<8x32xf32> -> vector<8x32xf32>
    %c0_534 = arith.constant 0 : index
    %c0_535 = arith.constant 0 : index
    %797 = vector.load %arg22[%c0_534, %c0_535] : memref<8x32xf32, #tpu.memory_space<vmem>>, vector<8x32xf32>
    %798 = arith.addf %796, %797 : vector<8x32xf32>
    %cst_536 = arith.constant 0.000000e+00 : f32
    %799 = vector.broadcast %cst_536 : f32 to vector<8x32xf32>
    %800 = arith.maximumf %798, %799 : vector<8x32xf32>
    %c0_537 = arith.constant 0 : index
    %c0_538 = arith.constant 0 : index
    %801 = vector.load %arg23[%c0_537, %c0_538] : memref<32x32xf32, #tpu.memory_space<vmem>>, vector<32x32xf32>
    %cst_539 = arith.constant dense<0.000000e+00> : vector<8x32xf32>
    %802 = tpu.matmul %800, %801, %cst_539 {dimension_numbers = #tpu.dot_dimension_numbers<[1], [0], [0], [1], [0, 0, 1, 1], [], []>} : vector<8x32xf32>, vector<32x32xf32>, vector<8x32xf32> -> vector<8x32xf32>
    %c0_540 = arith.constant 0 : index
    %c0_541 = arith.constant 0 : index
    %803 = vector.load %arg24[%c0_540, %c0_541] : memref<8x32xf32, #tpu.memory_space<vmem>>, vector<8x32xf32>
    %804 = arith.addf %802, %803 : vector<8x32xf32>
    %c0_542 = arith.constant 0 : index
    %c0_543 = arith.constant 0 : index
    %805 = vector.load %arg25[%c0_542, %c0_543] : memref<32x8xf32, #tpu.memory_space<vmem>>, vector<32x8xf32>
    %cst_544 = arith.constant dense<0.000000e+00> : vector<8x8xf32>
    %806 = tpu.matmul %804, %805, %cst_544 {dimension_numbers = #tpu.dot_dimension_numbers<[1], [0], [0], [1], [0, 0, 1, 1], [], []>} : vector<8x32xf32>, vector<32x8xf32>, vector<8x8xf32> -> vector<8x8xf32>
    %c0_545 = arith.constant 0 : index
    %c0_546 = arith.constant 0 : index
    %807 = vector.load %arg26[%c0_545, %c0_546] : memref<8x8xf32, #tpu.memory_space<vmem>>, vector<8x8xf32>
    %808 = arith.addf %806, %807 : vector<8x8xf32>
    %809 = vector.extract_strided_slice %808 {offsets = [0, 0], sizes = [8, 4], strides = [1, 1]} : vector<8x8xf32> to vector<8x4xf32>
    %810 = vector.extract_strided_slice %808 {offsets = [0, 4], sizes = [8, 4], strides = [1, 1]} : vector<8x8xf32> to vector<8x4xf32>
    %cst_547 = arith.constant 0.000000e+00 : f32
    %811 = vector.broadcast %cst_547 : f32 to vector<8x4xf32>
    %812 = arith.maximumf %810, %811 : vector<8x4xf32>
    %cst_548 = arith.constant 5.000000e-01 : f32
    %813 = vector.broadcast %cst_548 : f32 to vector<8x4xf32>
    %814 = arith.mulf %813, %794 : vector<8x4xf32>
    %815 = math.exp %814 : vector<8x4xf32>
    %816 = arith.mulf %753, %815 : vector<8x4xf32>
    %817 = arith.addf %791, %816 : vector<8x4xf32>
    %c0_549 = arith.constant 0 : index
    %c0_550 = arith.constant 0 : index
    %818 = vector.load %arg11[%c0_549, %c0_550] : memref<4x32xf32, #tpu.memory_space<vmem>>, vector<4x32xf32>
    %cst_551 = arith.constant dense<0.000000e+00> : vector<8x32xf32>
    %819 = tpu.matmul %817, %818, %cst_551 {dimension_numbers = #tpu.dot_dimension_numbers<[1], [0], [0], [1], [0, 0, 1, 1], [], []>} : vector<8x4xf32>, vector<4x32xf32>, vector<8x32xf32> -> vector<8x32xf32>
    %c0_552 = arith.constant 0 : index
    %c0_553 = arith.constant 0 : index
    %820 = vector.load %arg12[%c0_552, %c0_553] : memref<8x32xf32, #tpu.memory_space<vmem>>, vector<8x32xf32>
    %821 = arith.addf %819, %820 : vector<8x32xf32>
    %cst_554 = arith.constant 0.000000e+00 : f32
    %822 = vector.broadcast %cst_554 : f32 to vector<8x32xf32>
    %823 = arith.maximumf %821, %822 : vector<8x32xf32>
    %c0_555 = arith.constant 0 : index
    %c0_556 = arith.constant 0 : index
    %824 = vector.load %arg13[%c0_555, %c0_556] : memref<32x32xf32, #tpu.memory_space<vmem>>, vector<32x32xf32>
    %cst_557 = arith.constant dense<0.000000e+00> : vector<8x32xf32>
    %825 = tpu.matmul %823, %824, %cst_557 {dimension_numbers = #tpu.dot_dimension_numbers<[1], [0], [0], [1], [0, 0, 1, 1], [], []>} : vector<8x32xf32>, vector<32x32xf32>, vector<8x32xf32> -> vector<8x32xf32>
    %c0_558 = arith.constant 0 : index
    %c0_559 = arith.constant 0 : index
    %826 = vector.load %arg14[%c0_558, %c0_559] : memref<8x32xf32, #tpu.memory_space<vmem>>, vector<8x32xf32>
    %827 = arith.addf %825, %826 : vector<8x32xf32>
    %828 = tpu.concatenate %827, %745 in 1 : vector<8x32xf32>, vector<8x32xf32> -> vector<8x64xf32>
    %c0_560 = arith.constant 0 : index
    %c0_561 = arith.constant 0 : index
    %829 = vector.load %arg27[%c0_560, %c0_561] : memref<64x32xf32, #tpu.memory_space<vmem>>, vector<64x32xf32>
    %cst_562 = arith.constant dense<0.000000e+00> : vector<8x32xf32>
    %830 = tpu.matmul %828, %829, %cst_562 {dimension_numbers = #tpu.dot_dimension_numbers<[1], [0], [0], [1], [0, 0, 1, 1], [], []>} : vector<8x64xf32>, vector<64x32xf32>, vector<8x32xf32> -> vector<8x32xf32>
    %c0_563 = arith.constant 0 : index
    %c0_564 = arith.constant 0 : index
    %831 = vector.load %arg28[%c0_563, %c0_564] : memref<8x32xf32, #tpu.memory_space<vmem>>, vector<8x32xf32>
    %832 = arith.addf %830, %831 : vector<8x32xf32>
    %cst_565 = arith.constant 0.000000e+00 : f32
    %833 = vector.broadcast %cst_565 : f32 to vector<8x32xf32>
    %834 = arith.maximumf %832, %833 : vector<8x32xf32>
    %c0_566 = arith.constant 0 : index
    %c0_567 = arith.constant 0 : index
    %835 = vector.load %arg29[%c0_566, %c0_567] : memref<32x32xf32, #tpu.memory_space<vmem>>, vector<32x32xf32>
    %cst_568 = arith.constant dense<0.000000e+00> : vector<8x32xf32>
    %836 = tpu.matmul %834, %835, %cst_568 {dimension_numbers = #tpu.dot_dimension_numbers<[1], [0], [0], [1], [0, 0, 1, 1], [], []>} : vector<8x32xf32>, vector<32x32xf32>, vector<8x32xf32> -> vector<8x32xf32>
    %c0_569 = arith.constant 0 : index
    %c0_570 = arith.constant 0 : index
    %837 = vector.load %arg30[%c0_569, %c0_570] : memref<8x32xf32, #tpu.memory_space<vmem>>, vector<8x32xf32>
    %838 = arith.addf %836, %837 : vector<8x32xf32>
    %cst_571 = arith.constant 0.000000e+00 : f32
    %839 = vector.broadcast %cst_571 : f32 to vector<8x32xf32>
    %840 = arith.maximumf %838, %839 : vector<8x32xf32>
    %c0_572 = arith.constant 0 : index
    %c0_573 = arith.constant 0 : index
    %841 = vector.load %arg31[%c0_572, %c0_573] : memref<32x35xf32, #tpu.memory_space<vmem>>, vector<32x35xf32>
    %cst_574 = arith.constant dense<0.000000e+00> : vector<8x35xf32>
    %842 = tpu.matmul %840, %841, %cst_574 {dimension_numbers = #tpu.dot_dimension_numbers<[1], [0], [0], [1], [0, 0, 1, 1], [], []>} : vector<8x32xf32>, vector<32x35xf32>, vector<8x35xf32> -> vector<8x35xf32>
    %c0_575 = arith.constant 0 : index
    %c0_576 = arith.constant 0 : index
    %843 = vector.load %arg32[%c0_575, %c0_576] : memref<8x35xf32, #tpu.memory_space<vmem>>, vector<8x35xf32>
    %844 = arith.addf %842, %843 : vector<8x35xf32>
    %845 = vector.extract_strided_slice %844 {offsets = [0, 0], sizes = [8, 3], strides = [1, 1]} : vector<8x35xf32> to vector<8x3xf32>
    %cst_577 = arith.constant 0.000000e+00 : f32
    %846 = vector.broadcast %cst_577 : f32 to vector<8x3xf32>
    %847 = arith.maximumf %845, %846 : vector<8x3xf32>
    %848 = vector.extract_strided_slice %844 {offsets = [0, 3], sizes = [8, 32], strides = [1, 1]} : vector<8x35xf32> to vector<8x32xf32>
    %cst_578 = arith.constant 0.000000e+00 : f32
    %849 = vector.broadcast %cst_578 : f32 to vector<8x32xf32>
    %850 = arith.maximumf %848, %849 : vector<8x32xf32>
    %c0_579 = arith.constant 0 : index
    %c0_580 = arith.constant 0 : index
    %851 = vector.load %arg33[%c0_579, %c0_580] : memref<32x3xf32, #tpu.memory_space<vmem>>, vector<32x3xf32>
    %cst_581 = arith.constant dense<0.000000e+00> : vector<8x3xf32>
    %852 = tpu.matmul %850, %851, %cst_581 {dimension_numbers = #tpu.dot_dimension_numbers<[1], [0], [0], [1], [0, 0, 1, 1], [], []>} : vector<8x32xf32>, vector<32x3xf32>, vector<8x3xf32> -> vector<8x3xf32>
    %c0_582 = arith.constant 0 : index
    %c0_583 = arith.constant 0 : index
    %853 = vector.load %arg34[%c0_582, %c0_583] : memref<8x3xf32, #tpu.memory_space<vmem>>, vector<8x3xf32>
    %854 = arith.addf %852, %853 : vector<8x3xf32>
    %cst_584 = arith.constant -5.000000e-01 : f32
    %cst_585 = arith.constant 1.83787704 : f32
    %855 = arith.mulf %cst_584, %cst_585 : f32
    %cst_586 = arith.constant 5.000000e-01 : f32
    %856 = vector.broadcast %cst_586 : f32 to vector<8x3xf32>
    %857 = arith.mulf %856, %847 : vector<8x3xf32>
    %858 = vector.broadcast %855 : f32 to vector<8x3xf32>
    %859 = arith.subf %858, %857 : vector<8x3xf32>
    %860 = arith.subf %749, %854 : vector<8x3xf32>
    %861 = arith.mulf %860, %860 : vector<8x3xf32>
    %cst_587 = arith.constant 5.000000e-01 : f32
    %862 = vector.broadcast %cst_587 : f32 to vector<8x3xf32>
    %863 = arith.mulf %862, %861 : vector<8x3xf32>
    %cst_588 = arith.constant 0.000000e+00 : f32
    %864 = vector.broadcast %cst_588 : f32 to vector<8x3xf32>
    %865 = arith.subf %864, %847 : vector<8x3xf32>
    %866 = math.exp %865 : vector<8x3xf32>
    %867 = arith.mulf %863, %866 : vector<8x3xf32>
    %868 = arith.subf %859, %867 : vector<8x3xf32>
    %869 = arith.subf %812, %794 : vector<8x4xf32>
    %cst_589 = arith.constant 1.000000e+00 : f32
    %870 = vector.broadcast %cst_589 : f32 to vector<8x4xf32>
    %871 = arith.subf %869, %870 : vector<8x4xf32>
    %872 = math.exp %794 : vector<8x4xf32>
    %873 = arith.subf %791, %809 : vector<8x4xf32>
    %874 = arith.mulf %873, %873 : vector<8x4xf32>
    %875 = arith.addf %872, %874 : vector<8x4xf32>
    %cst_590 = arith.constant 0.000000e+00 : f32
    %876 = vector.broadcast %cst_590 : f32 to vector<8x4xf32>
    %877 = arith.subf %876, %812 : vector<8x4xf32>
    %878 = math.exp %877 : vector<8x4xf32>
    %879 = arith.mulf %875, %878 : vector<8x4xf32>
    %880 = arith.addf %871, %879 : vector<8x4xf32>
    %881 = tpu.concatenate %773, %827 in 1 : vector<8x32xf32>, vector<8x32xf32> -> vector<8x64xf32>
    %882 = tpu.concatenate %881, %720 in 1 : vector<8x64xf32>, vector<8x32xf32> -> vector<8x96xf32>
    %c0_591 = arith.constant 0 : index
    %c0_592 = arith.constant 0 : index
    %883 = vector.load %arg35[%c0_591, %c0_592] : memref<96x128xf32, #tpu.memory_space<vmem>>, vector<96x128xf32>
    %cst_593 = arith.constant dense<0.000000e+00> : vector<8x128xf32>
    %884 = tpu.matmul %882, %883, %cst_593 {dimension_numbers = #tpu.dot_dimension_numbers<[1], [0], [0], [1], [0, 0, 1, 1], [], []>} : vector<8x96xf32>, vector<96x128xf32>, vector<8x128xf32> -> vector<8x128xf32>
    %885 = vector.extract_strided_slice %884 {offsets = [0, 0], sizes = [8, 32], strides = [1, 1]} : vector<8x128xf32> to vector<8x32xf32>
    %886 = arith.negf %885 : vector<8x32xf32>
    %887 = math.exp %886 : vector<8x32xf32>
    %cst_594 = arith.constant 1.000000e+00 : f32
    %888 = vector.broadcast %cst_594 : f32 to vector<8x32xf32>
    %889 = arith.addf %888, %887 : vector<8x32xf32>
    %890 = arith.divf %888, %889 : vector<8x32xf32>
    %891 = vector.extract_strided_slice %884 {offsets = [0, 32], sizes = [8, 32], strides = [1, 1]} : vector<8x128xf32> to vector<8x32xf32>
    %892 = arith.negf %891 : vector<8x32xf32>
    %893 = math.exp %892 : vector<8x32xf32>
    %cst_595 = arith.constant 1.000000e+00 : f32
    %894 = vector.broadcast %cst_595 : f32 to vector<8x32xf32>
    %895 = arith.addf %894, %893 : vector<8x32xf32>
    %896 = arith.divf %894, %895 : vector<8x32xf32>
    %897 = vector.extract_strided_slice %884 {offsets = [0, 64], sizes = [8, 32], strides = [1, 1]} : vector<8x128xf32> to vector<8x32xf32>
    %898 = vector.extract_strided_slice %884 {offsets = [0, 96], sizes = [8, 32], strides = [1, 1]} : vector<8x128xf32> to vector<8x32xf32>
    %899 = arith.mulf %890, %898 : vector<8x32xf32>
    %900 = arith.addf %897, %899 : vector<8x32xf32>
    %901 = math.tanh %900 : vector<8x32xf32>
    %cst_596 = arith.constant 1.000000e+00 : f32
    %902 = vector.broadcast %cst_596 : f32 to vector<8x32xf32>
    %903 = arith.subf %902, %896 : vector<8x32xf32>
    %904 = arith.mulf %903, %901 : vector<8x32xf32>
    %905 = arith.mulf %896, %720 : vector<8x32xf32>
    %906 = arith.addf %904, %905 : vector<8x32xf32>
    %907 = tpu.concatenate %906, %745 in 1 : vector<8x32xf32>, vector<8x32xf32> -> vector<8x64xf32>
    %c0_597 = arith.constant 0 : index
    %c0_598 = arith.constant 0 : index
    %908 = vector.load %arg36[%c0_597, %c0_598] : memref<64x128xf32, #tpu.memory_space<vmem>>, vector<64x128xf32>
    %cst_599 = arith.constant dense<0.000000e+00> : vector<8x128xf32>
    %909 = tpu.matmul %907, %908, %cst_599 {dimension_numbers = #tpu.dot_dimension_numbers<[1], [0], [0], [1], [0, 0, 1, 1], [], []>} : vector<8x64xf32>, vector<64x128xf32>, vector<8x128xf32> -> vector<8x128xf32>
    %910 = vector.extract_strided_slice %909 {offsets = [0, 0], sizes = [8, 32], strides = [1, 1]} : vector<8x128xf32> to vector<8x32xf32>
    %911 = arith.negf %910 : vector<8x32xf32>
    %912 = math.exp %911 : vector<8x32xf32>
    %cst_600 = arith.constant 1.000000e+00 : f32
    %913 = vector.broadcast %cst_600 : f32 to vector<8x32xf32>
    %914 = arith.addf %913, %912 : vector<8x32xf32>
    %915 = arith.divf %913, %914 : vector<8x32xf32>
    %916 = vector.extract_strided_slice %909 {offsets = [0, 32], sizes = [8, 32], strides = [1, 1]} : vector<8x128xf32> to vector<8x32xf32>
    %917 = arith.negf %916 : vector<8x32xf32>
    %918 = math.exp %917 : vector<8x32xf32>
    %cst_601 = arith.constant 1.000000e+00 : f32
    %919 = vector.broadcast %cst_601 : f32 to vector<8x32xf32>
    %920 = arith.addf %919, %918 : vector<8x32xf32>
    %921 = arith.divf %919, %920 : vector<8x32xf32>
    %922 = vector.extract_strided_slice %909 {offsets = [0, 64], sizes = [8, 32], strides = [1, 1]} : vector<8x128xf32> to vector<8x32xf32>
    %923 = vector.extract_strided_slice %909 {offsets = [0, 96], sizes = [8, 32], strides = [1, 1]} : vector<8x128xf32> to vector<8x32xf32>
    %924 = arith.mulf %915, %923 : vector<8x32xf32>
    %925 = arith.addf %922, %924 : vector<8x32xf32>
    %926 = math.tanh %925 : vector<8x32xf32>
    %cst_602 = arith.constant 1.000000e+00 : f32
    %927 = vector.broadcast %cst_602 : f32 to vector<8x32xf32>
    %928 = arith.subf %927, %921 : vector<8x32xf32>
    %929 = arith.mulf %928, %926 : vector<8x32xf32>
    %930 = arith.mulf %921, %745 : vector<8x32xf32>
    %931 = arith.addf %929, %930 : vector<8x32xf32>
    %932 = arith.addf %746, %868 : vector<8x3xf32>
    %933 = arith.addf %747, %880 : vector<8x4xf32>
    %c5 = arith.constant 5 : index
    %c0_603 = arith.constant 0 : index
    %c0_604 = arith.constant 0 : index
    %934 = vector.load %arg0[%c5, %c0_603, %c0_604] : memref<8x8x3xf32, #tpu.memory_space<vmem>>, vector<1x8x3xf32>
    %935 = vector.shape_cast %934 : vector<1x8x3xf32> to vector<8x3xf32>
    %c5_605 = arith.constant 5 : index
    %c0_606 = arith.constant 0 : index
    %c0_607 = arith.constant 0 : index
    %936 = vector.load %arg1[%c5_605, %c0_606, %c0_607] : memref<8x8x2xf32, #tpu.memory_space<vmem>>, vector<1x8x2xf32>
    %937 = vector.shape_cast %936 : vector<1x8x2xf32> to vector<8x2xf32>
    %c5_608 = arith.constant 5 : index
    %c0_609 = arith.constant 0 : index
    %c0_610 = arith.constant 0 : index
    %938 = vector.load %arg2[%c5_608, %c0_609, %c0_610] : memref<8x8x4xf32, #tpu.memory_space<vmem>>, vector<1x8x4xf32>
    %939 = vector.shape_cast %938 : vector<1x8x4xf32> to vector<8x4xf32>
    %c0_611 = arith.constant 0 : index
    %c0_612 = arith.constant 0 : index
    %940 = vector.load %arg3[%c0_611, %c0_612] : memref<3x32xf32, #tpu.memory_space<vmem>>, vector<3x32xf32>
    %cst_613 = arith.constant dense<0.000000e+00> : vector<8x32xf32>
    %941 = tpu.matmul %935, %940, %cst_613 {dimension_numbers = #tpu.dot_dimension_numbers<[1], [0], [0], [1], [0, 0, 1, 1], [], []>} : vector<8x3xf32>, vector<3x32xf32>, vector<8x32xf32> -> vector<8x32xf32>
    %c0_614 = arith.constant 0 : index
    %c0_615 = arith.constant 0 : index
    %942 = vector.load %arg4[%c0_614, %c0_615] : memref<8x32xf32, #tpu.memory_space<vmem>>, vector<8x32xf32>
    %943 = arith.addf %941, %942 : vector<8x32xf32>
    %cst_616 = arith.constant 0.000000e+00 : f32
    %944 = vector.broadcast %cst_616 : f32 to vector<8x32xf32>
    %945 = arith.maximumf %943, %944 : vector<8x32xf32>
    %c0_617 = arith.constant 0 : index
    %c0_618 = arith.constant 0 : index
    %946 = vector.load %arg5[%c0_617, %c0_618] : memref<32x32xf32, #tpu.memory_space<vmem>>, vector<32x32xf32>
    %cst_619 = arith.constant dense<0.000000e+00> : vector<8x32xf32>
    %947 = tpu.matmul %945, %946, %cst_619 {dimension_numbers = #tpu.dot_dimension_numbers<[1], [0], [0], [1], [0, 0, 1, 1], [], []>} : vector<8x32xf32>, vector<32x32xf32>, vector<8x32xf32> -> vector<8x32xf32>
    %c0_620 = arith.constant 0 : index
    %c0_621 = arith.constant 0 : index
    %948 = vector.load %arg6[%c0_620, %c0_621] : memref<8x32xf32, #tpu.memory_space<vmem>>, vector<8x32xf32>
    %949 = arith.addf %947, %948 : vector<8x32xf32>
    %c0_622 = arith.constant 0 : index
    %c0_623 = arith.constant 0 : index
    %950 = vector.load %arg7[%c0_622, %c0_623] : memref<2x32xf32, #tpu.memory_space<vmem>>, vector<2x32xf32>
    %cst_624 = arith.constant dense<0.000000e+00> : vector<8x32xf32>
    %951 = tpu.matmul %937, %950, %cst_624 {dimension_numbers = #tpu.dot_dimension_numbers<[1], [0], [0], [1], [0, 0, 1, 1], [], []>} : vector<8x2xf32>, vector<2x32xf32>, vector<8x32xf32> -> vector<8x32xf32>
    %c0_625 = arith.constant 0 : index
    %c0_626 = arith.constant 0 : index
    %952 = vector.load %arg8[%c0_625, %c0_626] : memref<8x32xf32, #tpu.memory_space<vmem>>, vector<8x32xf32>
    %953 = arith.addf %951, %952 : vector<8x32xf32>
    %cst_627 = arith.constant 0.000000e+00 : f32
    %954 = vector.broadcast %cst_627 : f32 to vector<8x32xf32>
    %955 = arith.maximumf %953, %954 : vector<8x32xf32>
    %c0_628 = arith.constant 0 : index
    %c0_629 = arith.constant 0 : index
    %956 = vector.load %arg9[%c0_628, %c0_629] : memref<32x32xf32, #tpu.memory_space<vmem>>, vector<32x32xf32>
    %cst_630 = arith.constant dense<0.000000e+00> : vector<8x32xf32>
    %957 = tpu.matmul %955, %956, %cst_630 {dimension_numbers = #tpu.dot_dimension_numbers<[1], [0], [0], [1], [0, 0, 1, 1], [], []>} : vector<8x32xf32>, vector<32x32xf32>, vector<8x32xf32> -> vector<8x32xf32>
    %c0_631 = arith.constant 0 : index
    %c0_632 = arith.constant 0 : index
    %958 = vector.load %arg10[%c0_631, %c0_632] : memref<8x32xf32, #tpu.memory_space<vmem>>, vector<8x32xf32>
    %959 = arith.addf %957, %958 : vector<8x32xf32>
    %960 = tpu.concatenate %949, %931 in 1 : vector<8x32xf32>, vector<8x32xf32> -> vector<8x64xf32>
    %c0_633 = arith.constant 0 : index
    %c0_634 = arith.constant 0 : index
    %961 = vector.load %arg15[%c0_633, %c0_634] : memref<64x32xf32, #tpu.memory_space<vmem>>, vector<64x32xf32>
    %cst_635 = arith.constant dense<0.000000e+00> : vector<8x32xf32>
    %962 = tpu.matmul %960, %961, %cst_635 {dimension_numbers = #tpu.dot_dimension_numbers<[1], [0], [0], [1], [0, 0, 1, 1], [], []>} : vector<8x64xf32>, vector<64x32xf32>, vector<8x32xf32> -> vector<8x32xf32>
    %c0_636 = arith.constant 0 : index
    %c0_637 = arith.constant 0 : index
    %963 = vector.load %arg16[%c0_636, %c0_637] : memref<8x32xf32, #tpu.memory_space<vmem>>, vector<8x32xf32>
    %964 = arith.addf %962, %963 : vector<8x32xf32>
    %cst_638 = arith.constant 0.000000e+00 : f32
    %965 = vector.broadcast %cst_638 : f32 to vector<8x32xf32>
    %966 = arith.maximumf %964, %965 : vector<8x32xf32>
    %c0_639 = arith.constant 0 : index
    %c0_640 = arith.constant 0 : index
    %967 = vector.load %arg17[%c0_639, %c0_640] : memref<32x32xf32, #tpu.memory_space<vmem>>, vector<32x32xf32>
    %cst_641 = arith.constant dense<0.000000e+00> : vector<8x32xf32>
    %968 = tpu.matmul %966, %967, %cst_641 {dimension_numbers = #tpu.dot_dimension_numbers<[1], [0], [0], [1], [0, 0, 1, 1], [], []>} : vector<8x32xf32>, vector<32x32xf32>, vector<8x32xf32> -> vector<8x32xf32>
    %c0_642 = arith.constant 0 : index
    %c0_643 = arith.constant 0 : index
    %969 = vector.load %arg18[%c0_642, %c0_643] : memref<8x32xf32, #tpu.memory_space<vmem>>, vector<8x32xf32>
    %970 = arith.addf %968, %969 : vector<8x32xf32>
    %cst_644 = arith.constant 0.000000e+00 : f32
    %971 = vector.broadcast %cst_644 : f32 to vector<8x32xf32>
    %972 = arith.maximumf %970, %971 : vector<8x32xf32>
    %c0_645 = arith.constant 0 : index
    %c0_646 = arith.constant 0 : index
    %973 = vector.load %arg19[%c0_645, %c0_646] : memref<32x8xf32, #tpu.memory_space<vmem>>, vector<32x8xf32>
    %cst_647 = arith.constant dense<0.000000e+00> : vector<8x8xf32>
    %974 = tpu.matmul %972, %973, %cst_647 {dimension_numbers = #tpu.dot_dimension_numbers<[1], [0], [0], [1], [0, 0, 1, 1], [], []>} : vector<8x32xf32>, vector<32x8xf32>, vector<8x8xf32> -> vector<8x8xf32>
    %c0_648 = arith.constant 0 : index
    %c0_649 = arith.constant 0 : index
    %975 = vector.load %arg20[%c0_648, %c0_649] : memref<8x8xf32, #tpu.memory_space<vmem>>, vector<8x8xf32>
    %976 = arith.addf %974, %975 : vector<8x8xf32>
    %977 = vector.extract_strided_slice %976 {offsets = [0, 0], sizes = [8, 4], strides = [1, 1]} : vector<8x8xf32> to vector<8x4xf32>
    %978 = vector.extract_strided_slice %976 {offsets = [0, 4], sizes = [8, 4], strides = [1, 1]} : vector<8x8xf32> to vector<8x4xf32>
    %cst_650 = arith.constant 0.000000e+00 : f32
    %979 = vector.broadcast %cst_650 : f32 to vector<8x4xf32>
    %980 = arith.maximumf %978, %979 : vector<8x4xf32>
    %c0_651 = arith.constant 0 : index
    %c0_652 = arith.constant 0 : index
    %981 = vector.load %arg21[%c0_651, %c0_652] : memref<32x32xf32, #tpu.memory_space<vmem>>, vector<32x32xf32>
    %cst_653 = arith.constant dense<0.000000e+00> : vector<8x32xf32>
    %982 = tpu.matmul %931, %981, %cst_653 {dimension_numbers = #tpu.dot_dimension_numbers<[1], [0], [0], [1], [0, 0, 1, 1], [], []>} : vector<8x32xf32>, vector<32x32xf32>, vector<8x32xf32> -> vector<8x32xf32>
    %c0_654 = arith.constant 0 : index
    %c0_655 = arith.constant 0 : index
    %983 = vector.load %arg22[%c0_654, %c0_655] : memref<8x32xf32, #tpu.memory_space<vmem>>, vector<8x32xf32>
    %984 = arith.addf %982, %983 : vector<8x32xf32>
    %cst_656 = arith.constant 0.000000e+00 : f32
    %985 = vector.broadcast %cst_656 : f32 to vector<8x32xf32>
    %986 = arith.maximumf %984, %985 : vector<8x32xf32>
    %c0_657 = arith.constant 0 : index
    %c0_658 = arith.constant 0 : index
    %987 = vector.load %arg23[%c0_657, %c0_658] : memref<32x32xf32, #tpu.memory_space<vmem>>, vector<32x32xf32>
    %cst_659 = arith.constant dense<0.000000e+00> : vector<8x32xf32>
    %988 = tpu.matmul %986, %987, %cst_659 {dimension_numbers = #tpu.dot_dimension_numbers<[1], [0], [0], [1], [0, 0, 1, 1], [], []>} : vector<8x32xf32>, vector<32x32xf32>, vector<8x32xf32> -> vector<8x32xf32>
    %c0_660 = arith.constant 0 : index
    %c0_661 = arith.constant 0 : index
    %989 = vector.load %arg24[%c0_660, %c0_661] : memref<8x32xf32, #tpu.memory_space<vmem>>, vector<8x32xf32>
    %990 = arith.addf %988, %989 : vector<8x32xf32>
    %c0_662 = arith.constant 0 : index
    %c0_663 = arith.constant 0 : index
    %991 = vector.load %arg25[%c0_662, %c0_663] : memref<32x8xf32, #tpu.memory_space<vmem>>, vector<32x8xf32>
    %cst_664 = arith.constant dense<0.000000e+00> : vector<8x8xf32>
    %992 = tpu.matmul %990, %991, %cst_664 {dimension_numbers = #tpu.dot_dimension_numbers<[1], [0], [0], [1], [0, 0, 1, 1], [], []>} : vector<8x32xf32>, vector<32x8xf32>, vector<8x8xf32> -> vector<8x8xf32>
    %c0_665 = arith.constant 0 : index
    %c0_666 = arith.constant 0 : index
    %993 = vector.load %arg26[%c0_665, %c0_666] : memref<8x8xf32, #tpu.memory_space<vmem>>, vector<8x8xf32>
    %994 = arith.addf %992, %993 : vector<8x8xf32>
    %995 = vector.extract_strided_slice %994 {offsets = [0, 0], sizes = [8, 4], strides = [1, 1]} : vector<8x8xf32> to vector<8x4xf32>
    %996 = vector.extract_strided_slice %994 {offsets = [0, 4], sizes = [8, 4], strides = [1, 1]} : vector<8x8xf32> to vector<8x4xf32>
    %cst_667 = arith.constant 0.000000e+00 : f32
    %997 = vector.broadcast %cst_667 : f32 to vector<8x4xf32>
    %998 = arith.maximumf %996, %997 : vector<8x4xf32>
    %cst_668 = arith.constant 5.000000e-01 : f32
    %999 = vector.broadcast %cst_668 : f32 to vector<8x4xf32>
    %1000 = arith.mulf %999, %980 : vector<8x4xf32>
    %1001 = math.exp %1000 : vector<8x4xf32>
    %1002 = arith.mulf %939, %1001 : vector<8x4xf32>
    %1003 = arith.addf %977, %1002 : vector<8x4xf32>
    %c0_669 = arith.constant 0 : index
    %c0_670 = arith.constant 0 : index
    %1004 = vector.load %arg11[%c0_669, %c0_670] : memref<4x32xf32, #tpu.memory_space<vmem>>, vector<4x32xf32>
    %cst_671 = arith.constant dense<0.000000e+00> : vector<8x32xf32>
    %1005 = tpu.matmul %1003, %1004, %cst_671 {dimension_numbers = #tpu.dot_dimension_numbers<[1], [0], [0], [1], [0, 0, 1, 1], [], []>} : vector<8x4xf32>, vector<4x32xf32>, vector<8x32xf32> -> vector<8x32xf32>
    %c0_672 = arith.constant 0 : index
    %c0_673 = arith.constant 0 : index
    %1006 = vector.load %arg12[%c0_672, %c0_673] : memref<8x32xf32, #tpu.memory_space<vmem>>, vector<8x32xf32>
    %1007 = arith.addf %1005, %1006 : vector<8x32xf32>
    %cst_674 = arith.constant 0.000000e+00 : f32
    %1008 = vector.broadcast %cst_674 : f32 to vector<8x32xf32>
    %1009 = arith.maximumf %1007, %1008 : vector<8x32xf32>
    %c0_675 = arith.constant 0 : index
    %c0_676 = arith.constant 0 : index
    %1010 = vector.load %arg13[%c0_675, %c0_676] : memref<32x32xf32, #tpu.memory_space<vmem>>, vector<32x32xf32>
    %cst_677 = arith.constant dense<0.000000e+00> : vector<8x32xf32>
    %1011 = tpu.matmul %1009, %1010, %cst_677 {dimension_numbers = #tpu.dot_dimension_numbers<[1], [0], [0], [1], [0, 0, 1, 1], [], []>} : vector<8x32xf32>, vector<32x32xf32>, vector<8x32xf32> -> vector<8x32xf32>
    %c0_678 = arith.constant 0 : index
    %c0_679 = arith.constant 0 : index
    %1012 = vector.load %arg14[%c0_678, %c0_679] : memref<8x32xf32, #tpu.memory_space<vmem>>, vector<8x32xf32>
    %1013 = arith.addf %1011, %1012 : vector<8x32xf32>
    %1014 = tpu.concatenate %1013, %931 in 1 : vector<8x32xf32>, vector<8x32xf32> -> vector<8x64xf32>
    %c0_680 = arith.constant 0 : index
    %c0_681 = arith.constant 0 : index
    %1015 = vector.load %arg27[%c0_680, %c0_681] : memref<64x32xf32, #tpu.memory_space<vmem>>, vector<64x32xf32>
    %cst_682 = arith.constant dense<0.000000e+00> : vector<8x32xf32>
    %1016 = tpu.matmul %1014, %1015, %cst_682 {dimension_numbers = #tpu.dot_dimension_numbers<[1], [0], [0], [1], [0, 0, 1, 1], [], []>} : vector<8x64xf32>, vector<64x32xf32>, vector<8x32xf32> -> vector<8x32xf32>
    %c0_683 = arith.constant 0 : index
    %c0_684 = arith.constant 0 : index
    %1017 = vector.load %arg28[%c0_683, %c0_684] : memref<8x32xf32, #tpu.memory_space<vmem>>, vector<8x32xf32>
    %1018 = arith.addf %1016, %1017 : vector<8x32xf32>
    %cst_685 = arith.constant 0.000000e+00 : f32
    %1019 = vector.broadcast %cst_685 : f32 to vector<8x32xf32>
    %1020 = arith.maximumf %1018, %1019 : vector<8x32xf32>
    %c0_686 = arith.constant 0 : index
    %c0_687 = arith.constant 0 : index
    %1021 = vector.load %arg29[%c0_686, %c0_687] : memref<32x32xf32, #tpu.memory_space<vmem>>, vector<32x32xf32>
    %cst_688 = arith.constant dense<0.000000e+00> : vector<8x32xf32>
    %1022 = tpu.matmul %1020, %1021, %cst_688 {dimension_numbers = #tpu.dot_dimension_numbers<[1], [0], [0], [1], [0, 0, 1, 1], [], []>} : vector<8x32xf32>, vector<32x32xf32>, vector<8x32xf32> -> vector<8x32xf32>
    %c0_689 = arith.constant 0 : index
    %c0_690 = arith.constant 0 : index
    %1023 = vector.load %arg30[%c0_689, %c0_690] : memref<8x32xf32, #tpu.memory_space<vmem>>, vector<8x32xf32>
    %1024 = arith.addf %1022, %1023 : vector<8x32xf32>
    %cst_691 = arith.constant 0.000000e+00 : f32
    %1025 = vector.broadcast %cst_691 : f32 to vector<8x32xf32>
    %1026 = arith.maximumf %1024, %1025 : vector<8x32xf32>
    %c0_692 = arith.constant 0 : index
    %c0_693 = arith.constant 0 : index
    %1027 = vector.load %arg31[%c0_692, %c0_693] : memref<32x35xf32, #tpu.memory_space<vmem>>, vector<32x35xf32>
    %cst_694 = arith.constant dense<0.000000e+00> : vector<8x35xf32>
    %1028 = tpu.matmul %1026, %1027, %cst_694 {dimension_numbers = #tpu.dot_dimension_numbers<[1], [0], [0], [1], [0, 0, 1, 1], [], []>} : vector<8x32xf32>, vector<32x35xf32>, vector<8x35xf32> -> vector<8x35xf32>
    %c0_695 = arith.constant 0 : index
    %c0_696 = arith.constant 0 : index
    %1029 = vector.load %arg32[%c0_695, %c0_696] : memref<8x35xf32, #tpu.memory_space<vmem>>, vector<8x35xf32>
    %1030 = arith.addf %1028, %1029 : vector<8x35xf32>
    %1031 = vector.extract_strided_slice %1030 {offsets = [0, 0], sizes = [8, 3], strides = [1, 1]} : vector<8x35xf32> to vector<8x3xf32>
    %cst_697 = arith.constant 0.000000e+00 : f32
    %1032 = vector.broadcast %cst_697 : f32 to vector<8x3xf32>
    %1033 = arith.maximumf %1031, %1032 : vector<8x3xf32>
    %1034 = vector.extract_strided_slice %1030 {offsets = [0, 3], sizes = [8, 32], strides = [1, 1]} : vector<8x35xf32> to vector<8x32xf32>
    %cst_698 = arith.constant 0.000000e+00 : f32
    %1035 = vector.broadcast %cst_698 : f32 to vector<8x32xf32>
    %1036 = arith.maximumf %1034, %1035 : vector<8x32xf32>
    %c0_699 = arith.constant 0 : index
    %c0_700 = arith.constant 0 : index
    %1037 = vector.load %arg33[%c0_699, %c0_700] : memref<32x3xf32, #tpu.memory_space<vmem>>, vector<32x3xf32>
    %cst_701 = arith.constant dense<0.000000e+00> : vector<8x3xf32>
    %1038 = tpu.matmul %1036, %1037, %cst_701 {dimension_numbers = #tpu.dot_dimension_numbers<[1], [0], [0], [1], [0, 0, 1, 1], [], []>} : vector<8x32xf32>, vector<32x3xf32>, vector<8x3xf32> -> vector<8x3xf32>
    %c0_702 = arith.constant 0 : index
    %c0_703 = arith.constant 0 : index
    %1039 = vector.load %arg34[%c0_702, %c0_703] : memref<8x3xf32, #tpu.memory_space<vmem>>, vector<8x3xf32>
    %1040 = arith.addf %1038, %1039 : vector<8x3xf32>
    %cst_704 = arith.constant -5.000000e-01 : f32
    %cst_705 = arith.constant 1.83787704 : f32
    %1041 = arith.mulf %cst_704, %cst_705 : f32
    %cst_706 = arith.constant 5.000000e-01 : f32
    %1042 = vector.broadcast %cst_706 : f32 to vector<8x3xf32>
    %1043 = arith.mulf %1042, %1033 : vector<8x3xf32>
    %1044 = vector.broadcast %1041 : f32 to vector<8x3xf32>
    %1045 = arith.subf %1044, %1043 : vector<8x3xf32>
    %1046 = arith.subf %935, %1040 : vector<8x3xf32>
    %1047 = arith.mulf %1046, %1046 : vector<8x3xf32>
    %cst_707 = arith.constant 5.000000e-01 : f32
    %1048 = vector.broadcast %cst_707 : f32 to vector<8x3xf32>
    %1049 = arith.mulf %1048, %1047 : vector<8x3xf32>
    %cst_708 = arith.constant 0.000000e+00 : f32
    %1050 = vector.broadcast %cst_708 : f32 to vector<8x3xf32>
    %1051 = arith.subf %1050, %1033 : vector<8x3xf32>
    %1052 = math.exp %1051 : vector<8x3xf32>
    %1053 = arith.mulf %1049, %1052 : vector<8x3xf32>
    %1054 = arith.subf %1045, %1053 : vector<8x3xf32>
    %1055 = arith.subf %998, %980 : vector<8x4xf32>
    %cst_709 = arith.constant 1.000000e+00 : f32
    %1056 = vector.broadcast %cst_709 : f32 to vector<8x4xf32>
    %1057 = arith.subf %1055, %1056 : vector<8x4xf32>
    %1058 = math.exp %980 : vector<8x4xf32>
    %1059 = arith.subf %977, %995 : vector<8x4xf32>
    %1060 = arith.mulf %1059, %1059 : vector<8x4xf32>
    %1061 = arith.addf %1058, %1060 : vector<8x4xf32>
    %cst_710 = arith.constant 0.000000e+00 : f32
    %1062 = vector.broadcast %cst_710 : f32 to vector<8x4xf32>
    %1063 = arith.subf %1062, %998 : vector<8x4xf32>
    %1064 = math.exp %1063 : vector<8x4xf32>
    %1065 = arith.mulf %1061, %1064 : vector<8x4xf32>
    %1066 = arith.addf %1057, %1065 : vector<8x4xf32>
    %1067 = tpu.concatenate %959, %1013 in 1 : vector<8x32xf32>, vector<8x32xf32> -> vector<8x64xf32>
    %1068 = tpu.concatenate %1067, %906 in 1 : vector<8x64xf32>, vector<8x32xf32> -> vector<8x96xf32>
    %c0_711 = arith.constant 0 : index
    %c0_712 = arith.constant 0 : index
    %1069 = vector.load %arg35[%c0_711, %c0_712] : memref<96x128xf32, #tpu.memory_space<vmem>>, vector<96x128xf32>
    %cst_713 = arith.constant dense<0.000000e+00> : vector<8x128xf32>
    %1070 = tpu.matmul %1068, %1069, %cst_713 {dimension_numbers = #tpu.dot_dimension_numbers<[1], [0], [0], [1], [0, 0, 1, 1], [], []>} : vector<8x96xf32>, vector<96x128xf32>, vector<8x128xf32> -> vector<8x128xf32>
    %1071 = vector.extract_strided_slice %1070 {offsets = [0, 0], sizes = [8, 32], strides = [1, 1]} : vector<8x128xf32> to vector<8x32xf32>
    %1072 = arith.negf %1071 : vector<8x32xf32>
    %1073 = math.exp %1072 : vector<8x32xf32>
    %cst_714 = arith.constant 1.000000e+00 : f32
    %1074 = vector.broadcast %cst_714 : f32 to vector<8x32xf32>
    %1075 = arith.addf %1074, %1073 : vector<8x32xf32>
    %1076 = arith.divf %1074, %1075 : vector<8x32xf32>
    %1077 = vector.extract_strided_slice %1070 {offsets = [0, 32], sizes = [8, 32], strides = [1, 1]} : vector<8x128xf32> to vector<8x32xf32>
    %1078 = arith.negf %1077 : vector<8x32xf32>
    %1079 = math.exp %1078 : vector<8x32xf32>
    %cst_715 = arith.constant 1.000000e+00 : f32
    %1080 = vector.broadcast %cst_715 : f32 to vector<8x32xf32>
    %1081 = arith.addf %1080, %1079 : vector<8x32xf32>
    %1082 = arith.divf %1080, %1081 : vector<8x32xf32>
    %1083 = vector.extract_strided_slice %1070 {offsets = [0, 64], sizes = [8, 32], strides = [1, 1]} : vector<8x128xf32> to vector<8x32xf32>
    %1084 = vector.extract_strided_slice %1070 {offsets = [0, 96], sizes = [8, 32], strides = [1, 1]} : vector<8x128xf32> to vector<8x32xf32>
    %1085 = arith.mulf %1076, %1084 : vector<8x32xf32>
    %1086 = arith.addf %1083, %1085 : vector<8x32xf32>
    %1087 = math.tanh %1086 : vector<8x32xf32>
    %cst_716 = arith.constant 1.000000e+00 : f32
    %1088 = vector.broadcast %cst_716 : f32 to vector<8x32xf32>
    %1089 = arith.subf %1088, %1082 : vector<8x32xf32>
    %1090 = arith.mulf %1089, %1087 : vector<8x32xf32>
    %1091 = arith.mulf %1082, %906 : vector<8x32xf32>
    %1092 = arith.addf %1090, %1091 : vector<8x32xf32>
    %1093 = tpu.concatenate %1092, %931 in 1 : vector<8x32xf32>, vector<8x32xf32> -> vector<8x64xf32>
    %c0_717 = arith.constant 0 : index
    %c0_718 = arith.constant 0 : index
    %1094 = vector.load %arg36[%c0_717, %c0_718] : memref<64x128xf32, #tpu.memory_space<vmem>>, vector<64x128xf32>
    %cst_719 = arith.constant dense<0.000000e+00> : vector<8x128xf32>
    %1095 = tpu.matmul %1093, %1094, %cst_719 {dimension_numbers = #tpu.dot_dimension_numbers<[1], [0], [0], [1], [0, 0, 1, 1], [], []>} : vector<8x64xf32>, vector<64x128xf32>, vector<8x128xf32> -> vector<8x128xf32>
    %1096 = vector.extract_strided_slice %1095 {offsets = [0, 0], sizes = [8, 32], strides = [1, 1]} : vector<8x128xf32> to vector<8x32xf32>
    %1097 = arith.negf %1096 : vector<8x32xf32>
    %1098 = math.exp %1097 : vector<8x32xf32>
    %cst_720 = arith.constant 1.000000e+00 : f32
    %1099 = vector.broadcast %cst_720 : f32 to vector<8x32xf32>
    %1100 = arith.addf %1099, %1098 : vector<8x32xf32>
    %1101 = arith.divf %1099, %1100 : vector<8x32xf32>
    %1102 = vector.extract_strided_slice %1095 {offsets = [0, 32], sizes = [8, 32], strides = [1, 1]} : vector<8x128xf32> to vector<8x32xf32>
    %1103 = arith.negf %1102 : vector<8x32xf32>
    %1104 = math.exp %1103 : vector<8x32xf32>
    %cst_721 = arith.constant 1.000000e+00 : f32
    %1105 = vector.broadcast %cst_721 : f32 to vector<8x32xf32>
    %1106 = arith.addf %1105, %1104 : vector<8x32xf32>
    %1107 = arith.divf %1105, %1106 : vector<8x32xf32>
    %1108 = vector.extract_strided_slice %1095 {offsets = [0, 64], sizes = [8, 32], strides = [1, 1]} : vector<8x128xf32> to vector<8x32xf32>
    %1109 = vector.extract_strided_slice %1095 {offsets = [0, 96], sizes = [8, 32], strides = [1, 1]} : vector<8x128xf32> to vector<8x32xf32>
    %1110 = arith.mulf %1101, %1109 : vector<8x32xf32>
    %1111 = arith.addf %1108, %1110 : vector<8x32xf32>
    %1112 = math.tanh %1111 : vector<8x32xf32>
    %cst_722 = arith.constant 1.000000e+00 : f32
    %1113 = vector.broadcast %cst_722 : f32 to vector<8x32xf32>
    %1114 = arith.subf %1113, %1107 : vector<8x32xf32>
    %1115 = arith.mulf %1114, %1112 : vector<8x32xf32>
    %1116 = arith.mulf %1107, %931 : vector<8x32xf32>
    %1117 = arith.addf %1115, %1116 : vector<8x32xf32>
    %1118 = arith.addf %932, %1054 : vector<8x3xf32>
    %1119 = arith.addf %933, %1066 : vector<8x4xf32>
    %c6 = arith.constant 6 : index
    %c0_723 = arith.constant 0 : index
    %c0_724 = arith.constant 0 : index
    %1120 = vector.load %arg0[%c6, %c0_723, %c0_724] : memref<8x8x3xf32, #tpu.memory_space<vmem>>, vector<1x8x3xf32>
    %1121 = vector.shape_cast %1120 : vector<1x8x3xf32> to vector<8x3xf32>
    %c6_725 = arith.constant 6 : index
    %c0_726 = arith.constant 0 : index
    %c0_727 = arith.constant 0 : index
    %1122 = vector.load %arg1[%c6_725, %c0_726, %c0_727] : memref<8x8x2xf32, #tpu.memory_space<vmem>>, vector<1x8x2xf32>
    %1123 = vector.shape_cast %1122 : vector<1x8x2xf32> to vector<8x2xf32>
    %c6_728 = arith.constant 6 : index
    %c0_729 = arith.constant 0 : index
    %c0_730 = arith.constant 0 : index
    %1124 = vector.load %arg2[%c6_728, %c0_729, %c0_730] : memref<8x8x4xf32, #tpu.memory_space<vmem>>, vector<1x8x4xf32>
    %1125 = vector.shape_cast %1124 : vector<1x8x4xf32> to vector<8x4xf32>
    %c0_731 = arith.constant 0 : index
    %c0_732 = arith.constant 0 : index
    %1126 = vector.load %arg3[%c0_731, %c0_732] : memref<3x32xf32, #tpu.memory_space<vmem>>, vector<3x32xf32>
    %cst_733 = arith.constant dense<0.000000e+00> : vector<8x32xf32>
    %1127 = tpu.matmul %1121, %1126, %cst_733 {dimension_numbers = #tpu.dot_dimension_numbers<[1], [0], [0], [1], [0, 0, 1, 1], [], []>} : vector<8x3xf32>, vector<3x32xf32>, vector<8x32xf32> -> vector<8x32xf32>
    %c0_734 = arith.constant 0 : index
    %c0_735 = arith.constant 0 : index
    %1128 = vector.load %arg4[%c0_734, %c0_735] : memref<8x32xf32, #tpu.memory_space<vmem>>, vector<8x32xf32>
    %1129 = arith.addf %1127, %1128 : vector<8x32xf32>
    %cst_736 = arith.constant 0.000000e+00 : f32
    %1130 = vector.broadcast %cst_736 : f32 to vector<8x32xf32>
    %1131 = arith.maximumf %1129, %1130 : vector<8x32xf32>
    %c0_737 = arith.constant 0 : index
    %c0_738 = arith.constant 0 : index
    %1132 = vector.load %arg5[%c0_737, %c0_738] : memref<32x32xf32, #tpu.memory_space<vmem>>, vector<32x32xf32>
    %cst_739 = arith.constant dense<0.000000e+00> : vector<8x32xf32>
    %1133 = tpu.matmul %1131, %1132, %cst_739 {dimension_numbers = #tpu.dot_dimension_numbers<[1], [0], [0], [1], [0, 0, 1, 1], [], []>} : vector<8x32xf32>, vector<32x32xf32>, vector<8x32xf32> -> vector<8x32xf32>
    %c0_740 = arith.constant 0 : index
    %c0_741 = arith.constant 0 : index
    %1134 = vector.load %arg6[%c0_740, %c0_741] : memref<8x32xf32, #tpu.memory_space<vmem>>, vector<8x32xf32>
    %1135 = arith.addf %1133, %1134 : vector<8x32xf32>
    %c0_742 = arith.constant 0 : index
    %c0_743 = arith.constant 0 : index
    %1136 = vector.load %arg7[%c0_742, %c0_743] : memref<2x32xf32, #tpu.memory_space<vmem>>, vector<2x32xf32>
    %cst_744 = arith.constant dense<0.000000e+00> : vector<8x32xf32>
    %1137 = tpu.matmul %1123, %1136, %cst_744 {dimension_numbers = #tpu.dot_dimension_numbers<[1], [0], [0], [1], [0, 0, 1, 1], [], []>} : vector<8x2xf32>, vector<2x32xf32>, vector<8x32xf32> -> vector<8x32xf32>
    %c0_745 = arith.constant 0 : index
    %c0_746 = arith.constant 0 : index
    %1138 = vector.load %arg8[%c0_745, %c0_746] : memref<8x32xf32, #tpu.memory_space<vmem>>, vector<8x32xf32>
    %1139 = arith.addf %1137, %1138 : vector<8x32xf32>
    %cst_747 = arith.constant 0.000000e+00 : f32
    %1140 = vector.broadcast %cst_747 : f32 to vector<8x32xf32>
    %1141 = arith.maximumf %1139, %1140 : vector<8x32xf32>
    %c0_748 = arith.constant 0 : index
    %c0_749 = arith.constant 0 : index
    %1142 = vector.load %arg9[%c0_748, %c0_749] : memref<32x32xf32, #tpu.memory_space<vmem>>, vector<32x32xf32>
    %cst_750 = arith.constant dense<0.000000e+00> : vector<8x32xf32>
    %1143 = tpu.matmul %1141, %1142, %cst_750 {dimension_numbers = #tpu.dot_dimension_numbers<[1], [0], [0], [1], [0, 0, 1, 1], [], []>} : vector<8x32xf32>, vector<32x32xf32>, vector<8x32xf32> -> vector<8x32xf32>
    %c0_751 = arith.constant 0 : index
    %c0_752 = arith.constant 0 : index
    %1144 = vector.load %arg10[%c0_751, %c0_752] : memref<8x32xf32, #tpu.memory_space<vmem>>, vector<8x32xf32>
    %1145 = arith.addf %1143, %1144 : vector<8x32xf32>
    %1146 = tpu.concatenate %1135, %1117 in 1 : vector<8x32xf32>, vector<8x32xf32> -> vector<8x64xf32>
    %c0_753 = arith.constant 0 : index
    %c0_754 = arith.constant 0 : index
    %1147 = vector.load %arg15[%c0_753, %c0_754] : memref<64x32xf32, #tpu.memory_space<vmem>>, vector<64x32xf32>
    %cst_755 = arith.constant dense<0.000000e+00> : vector<8x32xf32>
    %1148 = tpu.matmul %1146, %1147, %cst_755 {dimension_numbers = #tpu.dot_dimension_numbers<[1], [0], [0], [1], [0, 0, 1, 1], [], []>} : vector<8x64xf32>, vector<64x32xf32>, vector<8x32xf32> -> vector<8x32xf32>
    %c0_756 = arith.constant 0 : index
    %c0_757 = arith.constant 0 : index
    %1149 = vector.load %arg16[%c0_756, %c0_757] : memref<8x32xf32, #tpu.memory_space<vmem>>, vector<8x32xf32>
    %1150 = arith.addf %1148, %1149 : vector<8x32xf32>
    %cst_758 = arith.constant 0.000000e+00 : f32
    %1151 = vector.broadcast %cst_758 : f32 to vector<8x32xf32>
    %1152 = arith.maximumf %1150, %1151 : vector<8x32xf32>
    %c0_759 = arith.constant 0 : index
    %c0_760 = arith.constant 0 : index
    %1153 = vector.load %arg17[%c0_759, %c0_760] : memref<32x32xf32, #tpu.memory_space<vmem>>, vector<32x32xf32>
    %cst_761 = arith.constant dense<0.000000e+00> : vector<8x32xf32>
    %1154 = tpu.matmul %1152, %1153, %cst_761 {dimension_numbers = #tpu.dot_dimension_numbers<[1], [0], [0], [1], [0, 0, 1, 1], [], []>} : vector<8x32xf32>, vector<32x32xf32>, vector<8x32xf32> -> vector<8x32xf32>
    %c0_762 = arith.constant 0 : index
    %c0_763 = arith.constant 0 : index
    %1155 = vector.load %arg18[%c0_762, %c0_763] : memref<8x32xf32, #tpu.memory_space<vmem>>, vector<8x32xf32>
    %1156 = arith.addf %1154, %1155 : vector<8x32xf32>
    %cst_764 = arith.constant 0.000000e+00 : f32
    %1157 = vector.broadcast %cst_764 : f32 to vector<8x32xf32>
    %1158 = arith.maximumf %1156, %1157 : vector<8x32xf32>
    %c0_765 = arith.constant 0 : index
    %c0_766 = arith.constant 0 : index
    %1159 = vector.load %arg19[%c0_765, %c0_766] : memref<32x8xf32, #tpu.memory_space<vmem>>, vector<32x8xf32>
    %cst_767 = arith.constant dense<0.000000e+00> : vector<8x8xf32>
    %1160 = tpu.matmul %1158, %1159, %cst_767 {dimension_numbers = #tpu.dot_dimension_numbers<[1], [0], [0], [1], [0, 0, 1, 1], [], []>} : vector<8x32xf32>, vector<32x8xf32>, vector<8x8xf32> -> vector<8x8xf32>
    %c0_768 = arith.constant 0 : index
    %c0_769 = arith.constant 0 : index
    %1161 = vector.load %arg20[%c0_768, %c0_769] : memref<8x8xf32, #tpu.memory_space<vmem>>, vector<8x8xf32>
    %1162 = arith.addf %1160, %1161 : vector<8x8xf32>
    %1163 = vector.extract_strided_slice %1162 {offsets = [0, 0], sizes = [8, 4], strides = [1, 1]} : vector<8x8xf32> to vector<8x4xf32>
    %1164 = vector.extract_strided_slice %1162 {offsets = [0, 4], sizes = [8, 4], strides = [1, 1]} : vector<8x8xf32> to vector<8x4xf32>
    %cst_770 = arith.constant 0.000000e+00 : f32
    %1165 = vector.broadcast %cst_770 : f32 to vector<8x4xf32>
    %1166 = arith.maximumf %1164, %1165 : vector<8x4xf32>
    %c0_771 = arith.constant 0 : index
    %c0_772 = arith.constant 0 : index
    %1167 = vector.load %arg21[%c0_771, %c0_772] : memref<32x32xf32, #tpu.memory_space<vmem>>, vector<32x32xf32>
    %cst_773 = arith.constant dense<0.000000e+00> : vector<8x32xf32>
    %1168 = tpu.matmul %1117, %1167, %cst_773 {dimension_numbers = #tpu.dot_dimension_numbers<[1], [0], [0], [1], [0, 0, 1, 1], [], []>} : vector<8x32xf32>, vector<32x32xf32>, vector<8x32xf32> -> vector<8x32xf32>
    %c0_774 = arith.constant 0 : index
    %c0_775 = arith.constant 0 : index
    %1169 = vector.load %arg22[%c0_774, %c0_775] : memref<8x32xf32, #tpu.memory_space<vmem>>, vector<8x32xf32>
    %1170 = arith.addf %1168, %1169 : vector<8x32xf32>
    %cst_776 = arith.constant 0.000000e+00 : f32
    %1171 = vector.broadcast %cst_776 : f32 to vector<8x32xf32>
    %1172 = arith.maximumf %1170, %1171 : vector<8x32xf32>
    %c0_777 = arith.constant 0 : index
    %c0_778 = arith.constant 0 : index
    %1173 = vector.load %arg23[%c0_777, %c0_778] : memref<32x32xf32, #tpu.memory_space<vmem>>, vector<32x32xf32>
    %cst_779 = arith.constant dense<0.000000e+00> : vector<8x32xf32>
    %1174 = tpu.matmul %1172, %1173, %cst_779 {dimension_numbers = #tpu.dot_dimension_numbers<[1], [0], [0], [1], [0, 0, 1, 1], [], []>} : vector<8x32xf32>, vector<32x32xf32>, vector<8x32xf32> -> vector<8x32xf32>
    %c0_780 = arith.constant 0 : index
    %c0_781 = arith.constant 0 : index
    %1175 = vector.load %arg24[%c0_780, %c0_781] : memref<8x32xf32, #tpu.memory_space<vmem>>, vector<8x32xf32>
    %1176 = arith.addf %1174, %1175 : vector<8x32xf32>
    %c0_782 = arith.constant 0 : index
    %c0_783 = arith.constant 0 : index
    %1177 = vector.load %arg25[%c0_782, %c0_783] : memref<32x8xf32, #tpu.memory_space<vmem>>, vector<32x8xf32>
    %cst_784 = arith.constant dense<0.000000e+00> : vector<8x8xf32>
    %1178 = tpu.matmul %1176, %1177, %cst_784 {dimension_numbers = #tpu.dot_dimension_numbers<[1], [0], [0], [1], [0, 0, 1, 1], [], []>} : vector<8x32xf32>, vector<32x8xf32>, vector<8x8xf32> -> vector<8x8xf32>
    %c0_785 = arith.constant 0 : index
    %c0_786 = arith.constant 0 : index
    %1179 = vector.load %arg26[%c0_785, %c0_786] : memref<8x8xf32, #tpu.memory_space<vmem>>, vector<8x8xf32>
    %1180 = arith.addf %1178, %1179 : vector<8x8xf32>
    %1181 = vector.extract_strided_slice %1180 {offsets = [0, 0], sizes = [8, 4], strides = [1, 1]} : vector<8x8xf32> to vector<8x4xf32>
    %1182 = vector.extract_strided_slice %1180 {offsets = [0, 4], sizes = [8, 4], strides = [1, 1]} : vector<8x8xf32> to vector<8x4xf32>
    %cst_787 = arith.constant 0.000000e+00 : f32
    %1183 = vector.broadcast %cst_787 : f32 to vector<8x4xf32>
    %1184 = arith.maximumf %1182, %1183 : vector<8x4xf32>
    %cst_788 = arith.constant 5.000000e-01 : f32
    %1185 = vector.broadcast %cst_788 : f32 to vector<8x4xf32>
    %1186 = arith.mulf %1185, %1166 : vector<8x4xf32>
    %1187 = math.exp %1186 : vector<8x4xf32>
    %1188 = arith.mulf %1125, %1187 : vector<8x4xf32>
    %1189 = arith.addf %1163, %1188 : vector<8x4xf32>
    %c0_789 = arith.constant 0 : index
    %c0_790 = arith.constant 0 : index
    %1190 = vector.load %arg11[%c0_789, %c0_790] : memref<4x32xf32, #tpu.memory_space<vmem>>, vector<4x32xf32>
    %cst_791 = arith.constant dense<0.000000e+00> : vector<8x32xf32>
    %1191 = tpu.matmul %1189, %1190, %cst_791 {dimension_numbers = #tpu.dot_dimension_numbers<[1], [0], [0], [1], [0, 0, 1, 1], [], []>} : vector<8x4xf32>, vector<4x32xf32>, vector<8x32xf32> -> vector<8x32xf32>
    %c0_792 = arith.constant 0 : index
    %c0_793 = arith.constant 0 : index
    %1192 = vector.load %arg12[%c0_792, %c0_793] : memref<8x32xf32, #tpu.memory_space<vmem>>, vector<8x32xf32>
    %1193 = arith.addf %1191, %1192 : vector<8x32xf32>
    %cst_794 = arith.constant 0.000000e+00 : f32
    %1194 = vector.broadcast %cst_794 : f32 to vector<8x32xf32>
    %1195 = arith.maximumf %1193, %1194 : vector<8x32xf32>
    %c0_795 = arith.constant 0 : index
    %c0_796 = arith.constant 0 : index
    %1196 = vector.load %arg13[%c0_795, %c0_796] : memref<32x32xf32, #tpu.memory_space<vmem>>, vector<32x32xf32>
    %cst_797 = arith.constant dense<0.000000e+00> : vector<8x32xf32>
    %1197 = tpu.matmul %1195, %1196, %cst_797 {dimension_numbers = #tpu.dot_dimension_numbers<[1], [0], [0], [1], [0, 0, 1, 1], [], []>} : vector<8x32xf32>, vector<32x32xf32>, vector<8x32xf32> -> vector<8x32xf32>
    %c0_798 = arith.constant 0 : index
    %c0_799 = arith.constant 0 : index
    %1198 = vector.load %arg14[%c0_798, %c0_799] : memref<8x32xf32, #tpu.memory_space<vmem>>, vector<8x32xf32>
    %1199 = arith.addf %1197, %1198 : vector<8x32xf32>
    %1200 = tpu.concatenate %1199, %1117 in 1 : vector<8x32xf32>, vector<8x32xf32> -> vector<8x64xf32>
    %c0_800 = arith.constant 0 : index
    %c0_801 = arith.constant 0 : index
    %1201 = vector.load %arg27[%c0_800, %c0_801] : memref<64x32xf32, #tpu.memory_space<vmem>>, vector<64x32xf32>
    %cst_802 = arith.constant dense<0.000000e+00> : vector<8x32xf32>
    %1202 = tpu.matmul %1200, %1201, %cst_802 {dimension_numbers = #tpu.dot_dimension_numbers<[1], [0], [0], [1], [0, 0, 1, 1], [], []>} : vector<8x64xf32>, vector<64x32xf32>, vector<8x32xf32> -> vector<8x32xf32>
    %c0_803 = arith.constant 0 : index
    %c0_804 = arith.constant 0 : index
    %1203 = vector.load %arg28[%c0_803, %c0_804] : memref<8x32xf32, #tpu.memory_space<vmem>>, vector<8x32xf32>
    %1204 = arith.addf %1202, %1203 : vector<8x32xf32>
    %cst_805 = arith.constant 0.000000e+00 : f32
    %1205 = vector.broadcast %cst_805 : f32 to vector<8x32xf32>
    %1206 = arith.maximumf %1204, %1205 : vector<8x32xf32>
    %c0_806 = arith.constant 0 : index
    %c0_807 = arith.constant 0 : index
    %1207 = vector.load %arg29[%c0_806, %c0_807] : memref<32x32xf32, #tpu.memory_space<vmem>>, vector<32x32xf32>
    %cst_808 = arith.constant dense<0.000000e+00> : vector<8x32xf32>
    %1208 = tpu.matmul %1206, %1207, %cst_808 {dimension_numbers = #tpu.dot_dimension_numbers<[1], [0], [0], [1], [0, 0, 1, 1], [], []>} : vector<8x32xf32>, vector<32x32xf32>, vector<8x32xf32> -> vector<8x32xf32>
    %c0_809 = arith.constant 0 : index
    %c0_810 = arith.constant 0 : index
    %1209 = vector.load %arg30[%c0_809, %c0_810] : memref<8x32xf32, #tpu.memory_space<vmem>>, vector<8x32xf32>
    %1210 = arith.addf %1208, %1209 : vector<8x32xf32>
    %cst_811 = arith.constant 0.000000e+00 : f32
    %1211 = vector.broadcast %cst_811 : f32 to vector<8x32xf32>
    %1212 = arith.maximumf %1210, %1211 : vector<8x32xf32>
    %c0_812 = arith.constant 0 : index
    %c0_813 = arith.constant 0 : index
    %1213 = vector.load %arg31[%c0_812, %c0_813] : memref<32x35xf32, #tpu.memory_space<vmem>>, vector<32x35xf32>
    %cst_814 = arith.constant dense<0.000000e+00> : vector<8x35xf32>
    %1214 = tpu.matmul %1212, %1213, %cst_814 {dimension_numbers = #tpu.dot_dimension_numbers<[1], [0], [0], [1], [0, 0, 1, 1], [], []>} : vector<8x32xf32>, vector<32x35xf32>, vector<8x35xf32> -> vector<8x35xf32>
    %c0_815 = arith.constant 0 : index
    %c0_816 = arith.constant 0 : index
    %1215 = vector.load %arg32[%c0_815, %c0_816] : memref<8x35xf32, #tpu.memory_space<vmem>>, vector<8x35xf32>
    %1216 = arith.addf %1214, %1215 : vector<8x35xf32>
    %1217 = vector.extract_strided_slice %1216 {offsets = [0, 0], sizes = [8, 3], strides = [1, 1]} : vector<8x35xf32> to vector<8x3xf32>
    %cst_817 = arith.constant 0.000000e+00 : f32
    %1218 = vector.broadcast %cst_817 : f32 to vector<8x3xf32>
    %1219 = arith.maximumf %1217, %1218 : vector<8x3xf32>
    %1220 = vector.extract_strided_slice %1216 {offsets = [0, 3], sizes = [8, 32], strides = [1, 1]} : vector<8x35xf32> to vector<8x32xf32>
    %cst_818 = arith.constant 0.000000e+00 : f32
    %1221 = vector.broadcast %cst_818 : f32 to vector<8x32xf32>
    %1222 = arith.maximumf %1220, %1221 : vector<8x32xf32>
    %c0_819 = arith.constant 0 : index
    %c0_820 = arith.constant 0 : index
    %1223 = vector.load %arg33[%c0_819, %c0_820] : memref<32x3xf32, #tpu.memory_space<vmem>>, vector<32x3xf32>
    %cst_821 = arith.constant dense<0.000000e+00> : vector<8x3xf32>
    %1224 = tpu.matmul %1222, %1223, %cst_821 {dimension_numbers = #tpu.dot_dimension_numbers<[1], [0], [0], [1], [0, 0, 1, 1], [], []>} : vector<8x32xf32>, vector<32x3xf32>, vector<8x3xf32> -> vector<8x3xf32>
    %c0_822 = arith.constant 0 : index
    %c0_823 = arith.constant 0 : index
    %1225 = vector.load %arg34[%c0_822, %c0_823] : memref<8x3xf32, #tpu.memory_space<vmem>>, vector<8x3xf32>
    %1226 = arith.addf %1224, %1225 : vector<8x3xf32>
    %cst_824 = arith.constant -5.000000e-01 : f32
    %cst_825 = arith.constant 1.83787704 : f32
    %1227 = arith.mulf %cst_824, %cst_825 : f32
    %cst_826 = arith.constant 5.000000e-01 : f32
    %1228 = vector.broadcast %cst_826 : f32 to vector<8x3xf32>
    %1229 = arith.mulf %1228, %1219 : vector<8x3xf32>
    %1230 = vector.broadcast %1227 : f32 to vector<8x3xf32>
    %1231 = arith.subf %1230, %1229 : vector<8x3xf32>
    %1232 = arith.subf %1121, %1226 : vector<8x3xf32>
    %1233 = arith.mulf %1232, %1232 : vector<8x3xf32>
    %cst_827 = arith.constant 5.000000e-01 : f32
    %1234 = vector.broadcast %cst_827 : f32 to vector<8x3xf32>
    %1235 = arith.mulf %1234, %1233 : vector<8x3xf32>
    %cst_828 = arith.constant 0.000000e+00 : f32
    %1236 = vector.broadcast %cst_828 : f32 to vector<8x3xf32>
    %1237 = arith.subf %1236, %1219 : vector<8x3xf32>
    %1238 = math.exp %1237 : vector<8x3xf32>
    %1239 = arith.mulf %1235, %1238 : vector<8x3xf32>
    %1240 = arith.subf %1231, %1239 : vector<8x3xf32>
    %1241 = arith.subf %1184, %1166 : vector<8x4xf32>
    %cst_829 = arith.constant 1.000000e+00 : f32
    %1242 = vector.broadcast %cst_829 : f32 to vector<8x4xf32>
    %1243 = arith.subf %1241, %1242 : vector<8x4xf32>
    %1244 = math.exp %1166 : vector<8x4xf32>
    %1245 = arith.subf %1163, %1181 : vector<8x4xf32>
    %1246 = arith.mulf %1245, %1245 : vector<8x4xf32>
    %1247 = arith.addf %1244, %1246 : vector<8x4xf32>
    %cst_830 = arith.constant 0.000000e+00 : f32
    %1248 = vector.broadcast %cst_830 : f32 to vector<8x4xf32>
    %1249 = arith.subf %1248, %1184 : vector<8x4xf32>
    %1250 = math.exp %1249 : vector<8x4xf32>
    %1251 = arith.mulf %1247, %1250 : vector<8x4xf32>
    %1252 = arith.addf %1243, %1251 : vector<8x4xf32>
    %1253 = tpu.concatenate %1145, %1199 in 1 : vector<8x32xf32>, vector<8x32xf32> -> vector<8x64xf32>
    %1254 = tpu.concatenate %1253, %1092 in 1 : vector<8x64xf32>, vector<8x32xf32> -> vector<8x96xf32>
    %c0_831 = arith.constant 0 : index
    %c0_832 = arith.constant 0 : index
    %1255 = vector.load %arg35[%c0_831, %c0_832] : memref<96x128xf32, #tpu.memory_space<vmem>>, vector<96x128xf32>
    %cst_833 = arith.constant dense<0.000000e+00> : vector<8x128xf32>
    %1256 = tpu.matmul %1254, %1255, %cst_833 {dimension_numbers = #tpu.dot_dimension_numbers<[1], [0], [0], [1], [0, 0, 1, 1], [], []>} : vector<8x96xf32>, vector<96x128xf32>, vector<8x128xf32> -> vector<8x128xf32>
    %1257 = vector.extract_strided_slice %1256 {offsets = [0, 0], sizes = [8, 32], strides = [1, 1]} : vector<8x128xf32> to vector<8x32xf32>
    %1258 = arith.negf %1257 : vector<8x32xf32>
    %1259 = math.exp %1258 : vector<8x32xf32>
    %cst_834 = arith.constant 1.000000e+00 : f32
    %1260 = vector.broadcast %cst_834 : f32 to vector<8x32xf32>
    %1261 = arith.addf %1260, %1259 : vector<8x32xf32>
    %1262 = arith.divf %1260, %1261 : vector<8x32xf32>
    %1263 = vector.extract_strided_slice %1256 {offsets = [0, 32], sizes = [8, 32], strides = [1, 1]} : vector<8x128xf32> to vector<8x32xf32>
    %1264 = arith.negf %1263 : vector<8x32xf32>
    %1265 = math.exp %1264 : vector<8x32xf32>
    %cst_835 = arith.constant 1.000000e+00 : f32
    %1266 = vector.broadcast %cst_835 : f32 to vector<8x32xf32>
    %1267 = arith.addf %1266, %1265 : vector<8x32xf32>
    %1268 = arith.divf %1266, %1267 : vector<8x32xf32>
    %1269 = vector.extract_strided_slice %1256 {offsets = [0, 64], sizes = [8, 32], strides = [1, 1]} : vector<8x128xf32> to vector<8x32xf32>
    %1270 = vector.extract_strided_slice %1256 {offsets = [0, 96], sizes = [8, 32], strides = [1, 1]} : vector<8x128xf32> to vector<8x32xf32>
    %1271 = arith.mulf %1262, %1270 : vector<8x32xf32>
    %1272 = arith.addf %1269, %1271 : vector<8x32xf32>
    %1273 = math.tanh %1272 : vector<8x32xf32>
    %cst_836 = arith.constant 1.000000e+00 : f32
    %1274 = vector.broadcast %cst_836 : f32 to vector<8x32xf32>
    %1275 = arith.subf %1274, %1268 : vector<8x32xf32>
    %1276 = arith.mulf %1275, %1273 : vector<8x32xf32>
    %1277 = arith.mulf %1268, %1092 : vector<8x32xf32>
    %1278 = arith.addf %1276, %1277 : vector<8x32xf32>
    %1279 = tpu.concatenate %1278, %1117 in 1 : vector<8x32xf32>, vector<8x32xf32> -> vector<8x64xf32>
    %c0_837 = arith.constant 0 : index
    %c0_838 = arith.constant 0 : index
    %1280 = vector.load %arg36[%c0_837, %c0_838] : memref<64x128xf32, #tpu.memory_space<vmem>>, vector<64x128xf32>
    %cst_839 = arith.constant dense<0.000000e+00> : vector<8x128xf32>
    %1281 = tpu.matmul %1279, %1280, %cst_839 {dimension_numbers = #tpu.dot_dimension_numbers<[1], [0], [0], [1], [0, 0, 1, 1], [], []>} : vector<8x64xf32>, vector<64x128xf32>, vector<8x128xf32> -> vector<8x128xf32>
    %1282 = vector.extract_strided_slice %1281 {offsets = [0, 0], sizes = [8, 32], strides = [1, 1]} : vector<8x128xf32> to vector<8x32xf32>
    %1283 = arith.negf %1282 : vector<8x32xf32>
    %1284 = math.exp %1283 : vector<8x32xf32>
    %cst_840 = arith.constant 1.000000e+00 : f32
    %1285 = vector.broadcast %cst_840 : f32 to vector<8x32xf32>
    %1286 = arith.addf %1285, %1284 : vector<8x32xf32>
    %1287 = arith.divf %1285, %1286 : vector<8x32xf32>
    %1288 = vector.extract_strided_slice %1281 {offsets = [0, 32], sizes = [8, 32], strides = [1, 1]} : vector<8x128xf32> to vector<8x32xf32>
    %1289 = arith.negf %1288 : vector<8x32xf32>
    %1290 = math.exp %1289 : vector<8x32xf32>
    %cst_841 = arith.constant 1.000000e+00 : f32
    %1291 = vector.broadcast %cst_841 : f32 to vector<8x32xf32>
    %1292 = arith.addf %1291, %1290 : vector<8x32xf32>
    %1293 = arith.divf %1291, %1292 : vector<8x32xf32>
    %1294 = vector.extract_strided_slice %1281 {offsets = [0, 64], sizes = [8, 32], strides = [1, 1]} : vector<8x128xf32> to vector<8x32xf32>
    %1295 = vector.extract_strided_slice %1281 {offsets = [0, 96], sizes = [8, 32], strides = [1, 1]} : vector<8x128xf32> to vector<8x32xf32>
    %1296 = arith.mulf %1287, %1295 : vector<8x32xf32>
    %1297 = arith.addf %1294, %1296 : vector<8x32xf32>
    %1298 = math.tanh %1297 : vector<8x32xf32>
    %cst_842 = arith.constant 1.000000e+00 : f32
    %1299 = vector.broadcast %cst_842 : f32 to vector<8x32xf32>
    %1300 = arith.subf %1299, %1293 : vector<8x32xf32>
    %1301 = arith.mulf %1300, %1298 : vector<8x32xf32>
    %1302 = arith.mulf %1293, %1117 : vector<8x32xf32>
    %1303 = arith.addf %1301, %1302 : vector<8x32xf32>
    %1304 = arith.addf %1118, %1240 : vector<8x3xf32>
    %1305 = arith.addf %1119, %1252 : vector<8x4xf32>
    %c7 = arith.constant 7 : index
    %c0_843 = arith.constant 0 : index
    %c0_844 = arith.constant 0 : index
    %1306 = vector.load %arg0[%c7, %c0_843, %c0_844] : memref<8x8x3xf32, #tpu.memory_space<vmem>>, vector<1x8x3xf32>
    %1307 = vector.shape_cast %1306 : vector<1x8x3xf32> to vector<8x3xf32>
    %c7_845 = arith.constant 7 : index
    %c0_846 = arith.constant 0 : index
    %c0_847 = arith.constant 0 : index
    %1308 = vector.load %arg2[%c7_845, %c0_846, %c0_847] : memref<8x8x4xf32, #tpu.memory_space<vmem>>, vector<1x8x4xf32>
    %1309 = vector.shape_cast %1308 : vector<1x8x4xf32> to vector<8x4xf32>
    %c0_848 = arith.constant 0 : index
    %c0_849 = arith.constant 0 : index
    %1310 = vector.load %arg3[%c0_848, %c0_849] : memref<3x32xf32, #tpu.memory_space<vmem>>, vector<3x32xf32>
    %cst_850 = arith.constant dense<0.000000e+00> : vector<8x32xf32>
    %1311 = tpu.matmul %1307, %1310, %cst_850 {dimension_numbers = #tpu.dot_dimension_numbers<[1], [0], [0], [1], [0, 0, 1, 1], [], []>} : vector<8x3xf32>, vector<3x32xf32>, vector<8x32xf32> -> vector<8x32xf32>
    %c0_851 = arith.constant 0 : index
    %c0_852 = arith.constant 0 : index
    %1312 = vector.load %arg4[%c0_851, %c0_852] : memref<8x32xf32, #tpu.memory_space<vmem>>, vector<8x32xf32>
    %1313 = arith.addf %1311, %1312 : vector<8x32xf32>
    %cst_853 = arith.constant 0.000000e+00 : f32
    %1314 = vector.broadcast %cst_853 : f32 to vector<8x32xf32>
    %1315 = arith.maximumf %1313, %1314 : vector<8x32xf32>
    %c0_854 = arith.constant 0 : index
    %c0_855 = arith.constant 0 : index
    %1316 = vector.load %arg5[%c0_854, %c0_855] : memref<32x32xf32, #tpu.memory_space<vmem>>, vector<32x32xf32>
    %cst_856 = arith.constant dense<0.000000e+00> : vector<8x32xf32>
    %1317 = tpu.matmul %1315, %1316, %cst_856 {dimension_numbers = #tpu.dot_dimension_numbers<[1], [0], [0], [1], [0, 0, 1, 1], [], []>} : vector<8x32xf32>, vector<32x32xf32>, vector<8x32xf32> -> vector<8x32xf32>
    %c0_857 = arith.constant 0 : index
    %c0_858 = arith.constant 0 : index
    %1318 = vector.load %arg6[%c0_857, %c0_858] : memref<8x32xf32, #tpu.memory_space<vmem>>, vector<8x32xf32>
    %1319 = arith.addf %1317, %1318 : vector<8x32xf32>
    %1320 = tpu.concatenate %1319, %1303 in 1 : vector<8x32xf32>, vector<8x32xf32> -> vector<8x64xf32>
    %c0_859 = arith.constant 0 : index
    %c0_860 = arith.constant 0 : index
    %1321 = vector.load %arg15[%c0_859, %c0_860] : memref<64x32xf32, #tpu.memory_space<vmem>>, vector<64x32xf32>
    %cst_861 = arith.constant dense<0.000000e+00> : vector<8x32xf32>
    %1322 = tpu.matmul %1320, %1321, %cst_861 {dimension_numbers = #tpu.dot_dimension_numbers<[1], [0], [0], [1], [0, 0, 1, 1], [], []>} : vector<8x64xf32>, vector<64x32xf32>, vector<8x32xf32> -> vector<8x32xf32>
    %c0_862 = arith.constant 0 : index
    %c0_863 = arith.constant 0 : index
    %1323 = vector.load %arg16[%c0_862, %c0_863] : memref<8x32xf32, #tpu.memory_space<vmem>>, vector<8x32xf32>
    %1324 = arith.addf %1322, %1323 : vector<8x32xf32>
    %cst_864 = arith.constant 0.000000e+00 : f32
    %1325 = vector.broadcast %cst_864 : f32 to vector<8x32xf32>
    %1326 = arith.maximumf %1324, %1325 : vector<8x32xf32>
    %c0_865 = arith.constant 0 : index
    %c0_866 = arith.constant 0 : index
    %1327 = vector.load %arg17[%c0_865, %c0_866] : memref<32x32xf32, #tpu.memory_space<vmem>>, vector<32x32xf32>
    %cst_867 = arith.constant dense<0.000000e+00> : vector<8x32xf32>
    %1328 = tpu.matmul %1326, %1327, %cst_867 {dimension_numbers = #tpu.dot_dimension_numbers<[1], [0], [0], [1], [0, 0, 1, 1], [], []>} : vector<8x32xf32>, vector<32x32xf32>, vector<8x32xf32> -> vector<8x32xf32>
    %c0_868 = arith.constant 0 : index
    %c0_869 = arith.constant 0 : index
    %1329 = vector.load %arg18[%c0_868, %c0_869] : memref<8x32xf32, #tpu.memory_space<vmem>>, vector<8x32xf32>
    %1330 = arith.addf %1328, %1329 : vector<8x32xf32>
    %cst_870 = arith.constant 0.000000e+00 : f32
    %1331 = vector.broadcast %cst_870 : f32 to vector<8x32xf32>
    %1332 = arith.maximumf %1330, %1331 : vector<8x32xf32>
    %c0_871 = arith.constant 0 : index
    %c0_872 = arith.constant 0 : index
    %1333 = vector.load %arg19[%c0_871, %c0_872] : memref<32x8xf32, #tpu.memory_space<vmem>>, vector<32x8xf32>
    %cst_873 = arith.constant dense<0.000000e+00> : vector<8x8xf32>
    %1334 = tpu.matmul %1332, %1333, %cst_873 {dimension_numbers = #tpu.dot_dimension_numbers<[1], [0], [0], [1], [0, 0, 1, 1], [], []>} : vector<8x32xf32>, vector<32x8xf32>, vector<8x8xf32> -> vector<8x8xf32>
    %c0_874 = arith.constant 0 : index
    %c0_875 = arith.constant 0 : index
    %1335 = vector.load %arg20[%c0_874, %c0_875] : memref<8x8xf32, #tpu.memory_space<vmem>>, vector<8x8xf32>
    %1336 = arith.addf %1334, %1335 : vector<8x8xf32>
    %1337 = vector.extract_strided_slice %1336 {offsets = [0, 0], sizes = [8, 4], strides = [1, 1]} : vector<8x8xf32> to vector<8x4xf32>
    %1338 = vector.extract_strided_slice %1336 {offsets = [0, 4], sizes = [8, 4], strides = [1, 1]} : vector<8x8xf32> to vector<8x4xf32>
    %cst_876 = arith.constant 0.000000e+00 : f32
    %1339 = vector.broadcast %cst_876 : f32 to vector<8x4xf32>
    %1340 = arith.maximumf %1338, %1339 : vector<8x4xf32>
    %c0_877 = arith.constant 0 : index
    %c0_878 = arith.constant 0 : index
    %1341 = vector.load %arg21[%c0_877, %c0_878] : memref<32x32xf32, #tpu.memory_space<vmem>>, vector<32x32xf32>
    %cst_879 = arith.constant dense<0.000000e+00> : vector<8x32xf32>
    %1342 = tpu.matmul %1303, %1341, %cst_879 {dimension_numbers = #tpu.dot_dimension_numbers<[1], [0], [0], [1], [0, 0, 1, 1], [], []>} : vector<8x32xf32>, vector<32x32xf32>, vector<8x32xf32> -> vector<8x32xf32>
    %c0_880 = arith.constant 0 : index
    %c0_881 = arith.constant 0 : index
    %1343 = vector.load %arg22[%c0_880, %c0_881] : memref<8x32xf32, #tpu.memory_space<vmem>>, vector<8x32xf32>
    %1344 = arith.addf %1342, %1343 : vector<8x32xf32>
    %cst_882 = arith.constant 0.000000e+00 : f32
    %1345 = vector.broadcast %cst_882 : f32 to vector<8x32xf32>
    %1346 = arith.maximumf %1344, %1345 : vector<8x32xf32>
    %c0_883 = arith.constant 0 : index
    %c0_884 = arith.constant 0 : index
    %1347 = vector.load %arg23[%c0_883, %c0_884] : memref<32x32xf32, #tpu.memory_space<vmem>>, vector<32x32xf32>
    %cst_885 = arith.constant dense<0.000000e+00> : vector<8x32xf32>
    %1348 = tpu.matmul %1346, %1347, %cst_885 {dimension_numbers = #tpu.dot_dimension_numbers<[1], [0], [0], [1], [0, 0, 1, 1], [], []>} : vector<8x32xf32>, vector<32x32xf32>, vector<8x32xf32> -> vector<8x32xf32>
    %c0_886 = arith.constant 0 : index
    %c0_887 = arith.constant 0 : index
    %1349 = vector.load %arg24[%c0_886, %c0_887] : memref<8x32xf32, #tpu.memory_space<vmem>>, vector<8x32xf32>
    %1350 = arith.addf %1348, %1349 : vector<8x32xf32>
    %c0_888 = arith.constant 0 : index
    %c0_889 = arith.constant 0 : index
    %1351 = vector.load %arg25[%c0_888, %c0_889] : memref<32x8xf32, #tpu.memory_space<vmem>>, vector<32x8xf32>
    %cst_890 = arith.constant dense<0.000000e+00> : vector<8x8xf32>
    %1352 = tpu.matmul %1350, %1351, %cst_890 {dimension_numbers = #tpu.dot_dimension_numbers<[1], [0], [0], [1], [0, 0, 1, 1], [], []>} : vector<8x32xf32>, vector<32x8xf32>, vector<8x8xf32> -> vector<8x8xf32>
    %c0_891 = arith.constant 0 : index
    %c0_892 = arith.constant 0 : index
    %1353 = vector.load %arg26[%c0_891, %c0_892] : memref<8x8xf32, #tpu.memory_space<vmem>>, vector<8x8xf32>
    %1354 = arith.addf %1352, %1353 : vector<8x8xf32>
    %1355 = vector.extract_strided_slice %1354 {offsets = [0, 0], sizes = [8, 4], strides = [1, 1]} : vector<8x8xf32> to vector<8x4xf32>
    %1356 = vector.extract_strided_slice %1354 {offsets = [0, 4], sizes = [8, 4], strides = [1, 1]} : vector<8x8xf32> to vector<8x4xf32>
    %cst_893 = arith.constant 0.000000e+00 : f32
    %1357 = vector.broadcast %cst_893 : f32 to vector<8x4xf32>
    %1358 = arith.maximumf %1356, %1357 : vector<8x4xf32>
    %cst_894 = arith.constant 5.000000e-01 : f32
    %1359 = vector.broadcast %cst_894 : f32 to vector<8x4xf32>
    %1360 = arith.mulf %1359, %1340 : vector<8x4xf32>
    %1361 = math.exp %1360 : vector<8x4xf32>
    %1362 = arith.mulf %1309, %1361 : vector<8x4xf32>
    %1363 = arith.addf %1337, %1362 : vector<8x4xf32>
    %c0_895 = arith.constant 0 : index
    %c0_896 = arith.constant 0 : index
    %1364 = vector.load %arg11[%c0_895, %c0_896] : memref<4x32xf32, #tpu.memory_space<vmem>>, vector<4x32xf32>
    %cst_897 = arith.constant dense<0.000000e+00> : vector<8x32xf32>
    %1365 = tpu.matmul %1363, %1364, %cst_897 {dimension_numbers = #tpu.dot_dimension_numbers<[1], [0], [0], [1], [0, 0, 1, 1], [], []>} : vector<8x4xf32>, vector<4x32xf32>, vector<8x32xf32> -> vector<8x32xf32>
    %c0_898 = arith.constant 0 : index
    %c0_899 = arith.constant 0 : index
    %1366 = vector.load %arg12[%c0_898, %c0_899] : memref<8x32xf32, #tpu.memory_space<vmem>>, vector<8x32xf32>
    %1367 = arith.addf %1365, %1366 : vector<8x32xf32>
    %cst_900 = arith.constant 0.000000e+00 : f32
    %1368 = vector.broadcast %cst_900 : f32 to vector<8x32xf32>
    %1369 = arith.maximumf %1367, %1368 : vector<8x32xf32>
    %c0_901 = arith.constant 0 : index
    %c0_902 = arith.constant 0 : index
    %1370 = vector.load %arg13[%c0_901, %c0_902] : memref<32x32xf32, #tpu.memory_space<vmem>>, vector<32x32xf32>
    %cst_903 = arith.constant dense<0.000000e+00> : vector<8x32xf32>
    %1371 = tpu.matmul %1369, %1370, %cst_903 {dimension_numbers = #tpu.dot_dimension_numbers<[1], [0], [0], [1], [0, 0, 1, 1], [], []>} : vector<8x32xf32>, vector<32x32xf32>, vector<8x32xf32> -> vector<8x32xf32>
    %c0_904 = arith.constant 0 : index
    %c0_905 = arith.constant 0 : index
    %1372 = vector.load %arg14[%c0_904, %c0_905] : memref<8x32xf32, #tpu.memory_space<vmem>>, vector<8x32xf32>
    %1373 = arith.addf %1371, %1372 : vector<8x32xf32>
    %1374 = tpu.concatenate %1373, %1303 in 1 : vector<8x32xf32>, vector<8x32xf32> -> vector<8x64xf32>
    %c0_906 = arith.constant 0 : index
    %c0_907 = arith.constant 0 : index
    %1375 = vector.load %arg27[%c0_906, %c0_907] : memref<64x32xf32, #tpu.memory_space<vmem>>, vector<64x32xf32>
    %cst_908 = arith.constant dense<0.000000e+00> : vector<8x32xf32>
    %1376 = tpu.matmul %1374, %1375, %cst_908 {dimension_numbers = #tpu.dot_dimension_numbers<[1], [0], [0], [1], [0, 0, 1, 1], [], []>} : vector<8x64xf32>, vector<64x32xf32>, vector<8x32xf32> -> vector<8x32xf32>
    %c0_909 = arith.constant 0 : index
    %c0_910 = arith.constant 0 : index
    %1377 = vector.load %arg28[%c0_909, %c0_910] : memref<8x32xf32, #tpu.memory_space<vmem>>, vector<8x32xf32>
    %1378 = arith.addf %1376, %1377 : vector<8x32xf32>
    %cst_911 = arith.constant 0.000000e+00 : f32
    %1379 = vector.broadcast %cst_911 : f32 to vector<8x32xf32>
    %1380 = arith.maximumf %1378, %1379 : vector<8x32xf32>
    %c0_912 = arith.constant 0 : index
    %c0_913 = arith.constant 0 : index
    %1381 = vector.load %arg29[%c0_912, %c0_913] : memref<32x32xf32, #tpu.memory_space<vmem>>, vector<32x32xf32>
    %cst_914 = arith.constant dense<0.000000e+00> : vector<8x32xf32>
    %1382 = tpu.matmul %1380, %1381, %cst_914 {dimension_numbers = #tpu.dot_dimension_numbers<[1], [0], [0], [1], [0, 0, 1, 1], [], []>} : vector<8x32xf32>, vector<32x32xf32>, vector<8x32xf32> -> vector<8x32xf32>
    %c0_915 = arith.constant 0 : index
    %c0_916 = arith.constant 0 : index
    %1383 = vector.load %arg30[%c0_915, %c0_916] : memref<8x32xf32, #tpu.memory_space<vmem>>, vector<8x32xf32>
    %1384 = arith.addf %1382, %1383 : vector<8x32xf32>
    %cst_917 = arith.constant 0.000000e+00 : f32
    %1385 = vector.broadcast %cst_917 : f32 to vector<8x32xf32>
    %1386 = arith.maximumf %1384, %1385 : vector<8x32xf32>
    %c0_918 = arith.constant 0 : index
    %c0_919 = arith.constant 0 : index
    %1387 = vector.load %arg31[%c0_918, %c0_919] : memref<32x35xf32, #tpu.memory_space<vmem>>, vector<32x35xf32>
    %cst_920 = arith.constant dense<0.000000e+00> : vector<8x35xf32>
    %1388 = tpu.matmul %1386, %1387, %cst_920 {dimension_numbers = #tpu.dot_dimension_numbers<[1], [0], [0], [1], [0, 0, 1, 1], [], []>} : vector<8x32xf32>, vector<32x35xf32>, vector<8x35xf32> -> vector<8x35xf32>
    %c0_921 = arith.constant 0 : index
    %c0_922 = arith.constant 0 : index
    %1389 = vector.load %arg32[%c0_921, %c0_922] : memref<8x35xf32, #tpu.memory_space<vmem>>, vector<8x35xf32>
    %1390 = arith.addf %1388, %1389 : vector<8x35xf32>
    %1391 = vector.extract_strided_slice %1390 {offsets = [0, 0], sizes = [8, 3], strides = [1, 1]} : vector<8x35xf32> to vector<8x3xf32>
    %cst_923 = arith.constant 0.000000e+00 : f32
    %1392 = vector.broadcast %cst_923 : f32 to vector<8x3xf32>
    %1393 = arith.maximumf %1391, %1392 : vector<8x3xf32>
    %1394 = vector.extract_strided_slice %1390 {offsets = [0, 3], sizes = [8, 32], strides = [1, 1]} : vector<8x35xf32> to vector<8x32xf32>
    %cst_924 = arith.constant 0.000000e+00 : f32
    %1395 = vector.broadcast %cst_924 : f32 to vector<8x32xf32>
    %1396 = arith.maximumf %1394, %1395 : vector<8x32xf32>
    %c0_925 = arith.constant 0 : index
    %c0_926 = arith.constant 0 : index
    %1397 = vector.load %arg33[%c0_925, %c0_926] : memref<32x3xf32, #tpu.memory_space<vmem>>, vector<32x3xf32>
    %cst_927 = arith.constant dense<0.000000e+00> : vector<8x3xf32>
    %1398 = tpu.matmul %1396, %1397, %cst_927 {dimension_numbers = #tpu.dot_dimension_numbers<[1], [0], [0], [1], [0, 0, 1, 1], [], []>} : vector<8x32xf32>, vector<32x3xf32>, vector<8x3xf32> -> vector<8x3xf32>
    %c0_928 = arith.constant 0 : index
    %c0_929 = arith.constant 0 : index
    %1399 = vector.load %arg34[%c0_928, %c0_929] : memref<8x3xf32, #tpu.memory_space<vmem>>, vector<8x3xf32>
    %1400 = arith.addf %1398, %1399 : vector<8x3xf32>
    %cst_930 = arith.constant -5.000000e-01 : f32
    %cst_931 = arith.constant 1.83787704 : f32
    %1401 = arith.mulf %cst_930, %cst_931 : f32
    %cst_932 = arith.constant 5.000000e-01 : f32
    %1402 = vector.broadcast %cst_932 : f32 to vector<8x3xf32>
    %1403 = arith.mulf %1402, %1393 : vector<8x3xf32>
    %1404 = vector.broadcast %1401 : f32 to vector<8x3xf32>
    %1405 = arith.subf %1404, %1403 : vector<8x3xf32>
    %1406 = arith.subf %1307, %1400 : vector<8x3xf32>
    %1407 = arith.mulf %1406, %1406 : vector<8x3xf32>
    %cst_933 = arith.constant 5.000000e-01 : f32
    %1408 = vector.broadcast %cst_933 : f32 to vector<8x3xf32>
    %1409 = arith.mulf %1408, %1407 : vector<8x3xf32>
    %cst_934 = arith.constant 0.000000e+00 : f32
    %1410 = vector.broadcast %cst_934 : f32 to vector<8x3xf32>
    %1411 = arith.subf %1410, %1393 : vector<8x3xf32>
    %1412 = math.exp %1411 : vector<8x3xf32>
    %1413 = arith.mulf %1409, %1412 : vector<8x3xf32>
    %1414 = arith.subf %1405, %1413 : vector<8x3xf32>
    %1415 = arith.subf %1358, %1340 : vector<8x4xf32>
    %cst_935 = arith.constant 1.000000e+00 : f32
    %1416 = vector.broadcast %cst_935 : f32 to vector<8x4xf32>
    %1417 = arith.subf %1415, %1416 : vector<8x4xf32>
    %1418 = math.exp %1340 : vector<8x4xf32>
    %1419 = arith.subf %1337, %1355 : vector<8x4xf32>
    %1420 = arith.mulf %1419, %1419 : vector<8x4xf32>
    %1421 = arith.addf %1418, %1420 : vector<8x4xf32>
    %cst_936 = arith.constant 0.000000e+00 : f32
    %1422 = vector.broadcast %cst_936 : f32 to vector<8x4xf32>
    %1423 = arith.subf %1422, %1358 : vector<8x4xf32>
    %1424 = math.exp %1423 : vector<8x4xf32>
    %1425 = arith.mulf %1421, %1424 : vector<8x4xf32>
    %1426 = arith.addf %1417, %1425 : vector<8x4xf32>
    %1427 = arith.addf %1304, %1414 : vector<8x3xf32>
    %1428 = arith.addf %1305, %1426 : vector<8x4xf32>
    %1429 = tpu.iota {dimensions = array<i32: 0>} : vector<8x3xi32>
    %1430 = tpu.iota {dimensions = array<i32: 0>} : vector<8x4xi32>
    %c4_i32 = arith.constant 4 : i32
    %1431 = vector.broadcast %c4_i32 : i32 to vector<8x3xi32>
    %1432 = arith.cmpi slt, %1429, %1431 : vector<8x3xi32>
    %cst_937 = arith.constant 0.000000e+00 : f32
    %1433 = vector.broadcast %cst_937 : f32 to vector<8x3xf32>
    %1434 = arith.select %1432, %1427, %1433 : vector<8x3xi1>, vector<8x3xf32>
    %1435 = vector.shape_cast %1434 : vector<8x3xf32> to vector<1x8x3xf32>
    %cst_938 = arith.constant dense<0.000000e+00> : vector<1xf32>
    %1436 = vector.multi_reduction <add>, %1435, %cst_938 [1, 2] : vector<1x8x3xf32> to vector<1xf32>
    %1437 = vector.shape_cast %1436 : vector<1xf32> to vector<1x1x1xf32>
    %1438 = vector.extract %1437[0, 0, 0] : f32 from vector<1x1x1xf32>
    %c4_i32_939 = arith.constant 4 : i32
    %1439 = vector.broadcast %c4_i32_939 : i32 to vector<8x4xi32>
    %1440 = arith.cmpi slt, %1430, %1439 : vector<8x4xi32>
    %cst_940 = arith.constant 0.000000e+00 : f32
    %1441 = vector.broadcast %cst_940 : f32 to vector<8x4xf32>
    %1442 = arith.select %1440, %1428, %1441 : vector<8x4xi1>, vector<8x4xf32>
    %1443 = vector.shape_cast %1442 : vector<8x4xf32> to vector<1x8x4xf32>
    %cst_941 = arith.constant dense<0.000000e+00> : vector<1xf32>
    %1444 = vector.multi_reduction <add>, %1443, %cst_941 [1, 2] : vector<1x8x4xf32> to vector<1xf32>
    %1445 = vector.shape_cast %1444 : vector<1xf32> to vector<1x1x1xf32>
    %1446 = vector.extract %1445[0, 0, 0] : f32 from vector<1x1x1xf32>
    %cst_942 = arith.constant 0.000000e+00 : f32
    %1447 = arith.subf %cst_942, %1438 : f32
    %cst_943 = arith.constant 5.000000e-01 : f32
    %1448 = arith.mulf %cst_943, %1446 : f32
    %1449 = arith.addf %1447, %1448 : f32
    %c0_944 = arith.constant 0 : index
    %c0_945 = arith.constant 0 : index
    %1450 = memref.load %arg37[%c0_944, %c0_945] : memref<1x1xf32, #tpu.memory_space<smem>>
    memref.store %1449, %arg37[%c0_944, %c0_945] : memref<1x1xf32, #tpu.memory_space<smem>>
    return
  }
}

</mosaic_0001>

<bundles_post_ra>
// kernel: tpu_custom_call.1
= control target key start
LH: loop header
LB: loop body
LE: loop exit
PB: predicated region body
PF: predicated region fallthrough
CT: control target
= control target key end

     0   :  { %s14985_s6 = smov 1   ;;  %s14986_s10 = smov 2   ;;  %s18619_s0 = inlined_call_operand.smem [shape: u32[38], index: -1, kind: input, shape index: {}] }
   0x1   :  { %s15048_s5 = sld [smem:[%s18619_s0]]   ;;  %s14987_s14 = smov 3  }
   0x2   :  { %s15053_s9 = sld [smem:[%s18619_s0 + %s14985_s6]]   ;;  %s14988_s18 = smov 4  }
   0x3   :  { %s15058_s13 = sld [smem:[%s18619_s0 + %s14986_s10]]   ;;  %s14989_s22 = smov 5  }
   0x4   :  { %s15063_s17 = sld [smem:[%s18619_s0 + %s14987_s14]]   ;;  %s14990_s26 = smov 6  }
   0x5   :  { %s15068_s21 = sld [smem:[%s18619_s0 + %s14988_s18]]   ;;  %s14991_s30 = smov 7  }
   0x6   :  { %s15073_s25 = sld [smem:[%s18619_s0 + %s14989_s22]]   ;;  %s14992_s4 = smov 8  }
   0x7   :  { %s15078_s29 = sld [smem:[%s18619_s0 + %s14990_s26]]   ;;  %s14993_s10 = smov 9  }
   0x8   :  { %s15083_s3 = sld [smem:[%s18619_s0 + %s14991_s30]]   ;;  %s14994_s15 = smov 10  }
   0x9   :  { %18856 = sst [smem:[#allocation24_spill]] %s15058_s13  ;;  %s14995_s20 = smov 11  }
   0xa   :  { %s15088_s8 = sld [smem:[%s18619_s0 + %s14992_s4]]   ;;  %s14996_s26 = smov 12  }
   0xb   :  { %s15093_s14 = sld [smem:[%s18619_s0 + %s14993_s10]]   ;;  %s14997_s1 = smov 13  }
   0xc   :  { %s15098_s19 = sld [smem:[%s18619_s0 + %s14994_s15]]   ;;  %s14998_s7 = smov 14  }
   0xd   :  { %18857 = sst [smem:[#allocation25_spill]] %s15078_s29  ;;  %s14999_s15 = smov 15  }
   0xe   :  { %s15103_s24 = sld [smem:[%s18619_s0 + %s14995_s20]]   ;;  %s15000_s22 = smov 16  }
   0xf   :  { %s15108_s30 = sld [smem:[%s18619_s0 + %s14996_s26]]   ;;  %s15001_s28 = smov 17  }
  0x10   :  { %18858 = sst [smem:[#allocation26_spill]] %s15088_s8 }
  0x11   :  { %18859 = sst [smem:[#allocation27_spill]] %s15093_s14 }
  0x12   :  { %s15113_s6 = sld [smem:[%s18619_s0 + %s14997_s1]]  }
  0x13   :  { %s15118_s12 = sld [smem:[%s18619_s0 + %s14998_s7]]   ;;  %s15002_s7 = smov 18  }
  0x14   :  { %s15123_s20 = sld [smem:[%s18619_s0 + %s14999_s15]]   ;;  %s15003_s15 = smov 19  }
  0x15   :  { %18860 = sst [smem:[#allocation28_spill]] %s15108_s30 }
  0x16   :  { %s15128_s27 = sld [smem:[%s18619_s0 + %s15000_s22]]   ;;  %s15004_s22 = smov 20  }
  0x17   :  { %s15133_s4 = sld [smem:[%s18619_s0 + %s15001_s28]]   ;;  %s15005_s28 = smov 21  }
  0x18   :  { %18861 = sst [smem:[#allocation29_spill]] %s15113_s6 }
  0x19   :  { %s15138_s30 = sld [smem:[%s18619_s0 + %s15002_s7]]   ;;  %s15006_s7 = smov 22  }
  0x1a   :  { %s15143_s13 = sld [smem:[%s18619_s0 + %s15003_s15]]   ;;  %s15007_s15 = smov 23  }
  0x1b   :  { %s15148_s6 = sld [smem:[%s18619_s0 + %s15004_s22]]   ;;  %s15008_s22 = smov 24  }
  0x1c   :  { %18862 = sst [smem:[#allocation30_spill]] %s15128_s27 }
  0x1d   :  { %18863 = sst [smem:[#allocation31_spill]] %s15133_s4 }
  0x1e   :  { %s15153_s27 = sld [smem:[%s18619_s0 + %s15005_s28]]   ;;  %s15009_s28 = smov 25  }
  0x1f   :  { %s15158_s29 = sld [smem:[%s18619_s0 + %s15006_s7]]   ;;  %s15010_s7 = smov 26  }
  0x20   :  { %18864 = sst [smem:[#allocation32_spill]] %s15143_s13 }
  0x21   :  { %18865 = sst [smem:[#allocation33_spill]] %s15148_s6 }
  0x22   :  { %s15163_s13 = sld [smem:[%s18619_s0 + %s15007_s15]]   ;;  %s15011_s15 = smov 27  }
  0x23   :  { %s15168_s6 = sld [smem:[%s18619_s0 + %s15008_s22]]   ;;  %s15012_s22 = smov 28  }
  0x24   :  { %18866 = sst [smem:[#allocation34_spill]] %s15153_s27 }
  0x25   :  { %s15173_s27 = sld [smem:[%s18619_s0 + %s15009_s28]]   ;;  %s15013_s28 = smov 29  }
  0x26   :  { %s15178_s4 = sld [smem:[%s18619_s0 + %s15010_s7]]   ;;  %s15014_s7 = smov 30  }
  0x27   :  { %s15198_s8 = sld [smem:[%s18619_s0 + %s15014_s7]]   ;;  %s15018_s7 = smov 34  }
  0x28   :  { %18867 = sst [smem:[#allocation35_spill]] %s15163_s13 }
  0x29   :  { %18868 = sst [smem:[#allocation36_spill]] %s15168_s6 }
  0x2a   :  { %s15183_s13 = sld [smem:[%s18619_s0 + %s15011_s15]]   ;;  %s15015_s15 = smov 31  }
  0x2b   :  { %18869 = sst [smem:[#allocation37_spill]] %s15173_s27 }
  0x2c   :  { %s15188_s6 = sld [smem:[%s18619_s0 + %s15012_s22]]   ;;  %s15016_s22 = smov 32  }
  0x2d   :  { %s15193_s27 = sld [smem:[%s18619_s0 + %s15013_s28]]   ;;  %s15017_s28 = smov 33  }
  0x2e   :  { %s15218_s14 = sld [smem:[%s18619_s0 + %s15018_s7]]  }
  0x30   :  { %18870 = sst [smem:[#allocation38_spill]] %s15183_s13 }
  0x31   :  { %s15203_s13 = sld [smem:[%s18619_s0 + %s15015_s15]]   ;;  %s15019_s15 = smov 35  }
  0x32   :  { %18871 = sst [smem:[#allocation39_spill]] %s15188_s6 }
  0x33   :  { %18872 = sst [smem:[#allocation40_spill]] %s15193_s27 }
  0x34   :  { %s15208_s6 = sld [smem:[%s18619_s0 + %s15016_s22]]   ;;  %s15020_s22 = smov 36  }
  0x35   :  { %s15213_s27 = sld [smem:[%s18619_s0 + %s15017_s28]]   ;;  %s15021_s28 = smov 37  }
  0x37   :  { %18873 = sst [smem:[#allocation41_spill]] %s15203_s13 }
  0x38   :  { %s15223_s13 = sld [smem:[%s18619_s0 + %s15019_s15]]  }
  0x3a   :  { %18874 = sst [smem:[#allocation42_spill]] %s15208_s6 }
  0x3b   :  { %18875 = sst [smem:[#allocation43_spill]] %s15213_s27 }
  0x3c   :  { %s15228_s6 = sld [smem:[%s18619_s0 + %s15020_s22]]  }
  0x3d   :  { %s15233_s27 = sld [smem:[%s18619_s0 + %s15021_s28]]  }
  0x3e   :  { %18876 = sst [smem:[#allocation44_spill]] %s15223_s13 }
  0x42   :  { %18877 = sst [smem:[#allocation45_spill]] %s15228_s6 }
  0x43   :  { %18878 = sst [smem:[#allocation46_spill]] %s15233_s27 }
  0x44   :  { %80 = vsyncpa [#allocation3], 0 }
  0x45   :  { %81 = vsyncpa [#allocation6], 0 }
  0x46   :  { %82 = vsyncpa [#allocation9], 0 }
  0x47   :  { %83 = vsyncpa [#allocation12], 0 }
  0x48   :  { %84 = vsyncpa [#allocation15], 0 }
  0x49   :  { %85 = vsyncpa [#allocation4], 0  ;;  %s15022_s7 = smov [#allocation5]   ;;  %s15023_s11 = smov [#allocation8]  }
  0x4a   :  { %s114_s10 = sshll.u32 %s15022_s7, 4  ;;  %s138_s15 = sshll.u32 %s15023_s11, 4  ;;  %s115_s10 = int_to_ptr.vmem [resolvable:$true] %s114_s10  ;;  %s139_s15 = int_to_ptr.vmem [resolvable:$true] %s138_s15 }
  0x4b   :  { %s14793_s16 = scalar_lea.vmem %s115_s10, 32  ;;  %p14798_p1 = scmp.lt.s32.totalorder %s115_s10, %s115_s10 }
  0x4c   :  { %p14794_p0 = scmp.ne.s32.totalorder %s115_s10, %s14793_s16  ;;  %p14799_p2 = scmp.lt.s32.totalorder %s14793_s16, %s14793_s16 }
  0x4e   :  { %p14800_p3 = por %p14799_p2, %p14798_p1 }
  0x50   :  { %p14801_p4 = pnand %p14800_p3, %p14794_p0 }
  0x52   :  { %14804 = shalt.err (!%p14801_p4)
}
  0x53   :  { %117 = dma.hbm_to_vmem [thread:$0]  %s15083_s3, 32, %s115_s10, [#allocation6]  }
  0x54   :  { %s14813_s0 = scalar_lea.vmem %s139_s15, 64  ;;  %p14818_p6 = scmp.lt.s32.totalorder %s139_s15, %s139_s15 }
  0x55   :  { %p14814_p5 = scmp.ne.s32.totalorder %s139_s15, %s14813_s0  ;;  %p14819_p7 = scmp.lt.s32.totalorder %s14813_s0, %s14813_s0 }
  0x57   :  { %p14820_p8 = por %p14819_p7, %p14818_p6 }
  0x59   :  { %p14821_p9 = pnand %p14820_p8, %p14814_p5 }
  0x5b   :  { %14824 = shalt.err (!%p14821_p9)
}
  0x5c   :  { %141 = dma.hbm_to_vmem [thread:$0]  %s15103_s24, 64, %s139_s15, [#allocation9]  }
  0x5d   :  { %s15024_s18 = smov [#allocation11]   ;;  %s15025_s23 = smov [#allocation14]  }
  0x5e   :  { %s168_s22 = sshll.u32 %s15024_s18, 4  ;;  %s200_s26 = sshll.u32 %s15025_s23, 4  ;;  %s169_s22 = int_to_ptr.vmem [resolvable:$true] %s168_s22  ;;  %s201_s26 = int_to_ptr.vmem [resolvable:$true] %s200_s26 }
  0x5f   :  { %s14833_s28 = scalar_lea.vmem %s169_s22, 128  ;;  %p14838_p11 = scmp.lt.s32.totalorder %s169_s22, %s169_s22 }
  0x60   :  { %p14834_p10 = scmp.ne.s32.totalorder %s169_s22, %s14833_s28  ;;  %p14839_p12 = scmp.lt.s32.totalorder %s14833_s28, %s14833_s28 }
  0x62   :  { %p14840_p13 = por %p14839_p12, %p14838_p11 }
  0x64   :  { %p14841_p0 = pnand %p14840_p13, %p14834_p10 }
  0x66   :  { %14844 = shalt.err (!%p14841_p0)
}
  0x67   :  { %171 = dma.hbm_to_vmem [thread:$0]  %s15138_s30, 128, %s169_s22, [#allocation12]  }
  0x68   :  { %s14853_s3 = scalar_lea.vmem %s201_s26, 128  ;;  %p14858_p2 = scmp.lt.s32.totalorder %s201_s26, %s201_s26 }
  0x69   :  { %p14854_p1 = scmp.ne.s32.totalorder %s201_s26, %s14853_s3  ;;  %p14859_p3 = scmp.lt.s32.totalorder %s14853_s3, %s14853_s3 }
  0x6b   :  { %p14860_p4 = por %p14859_p3, %p14858_p2 }
  0x6d   :  { %p14861_p5 = pnand %p14860_p4, %p14854_p1 }
  0x6f   :  { %14864 = shalt.err (!%p14861_p5)
}
  0x70   :  { %203 = dma.hbm_to_vmem [thread:$0]  %s15178_s4, 128, %s201_s26, [#allocation15]  }
  0x71   :  { %s15026_s24 = smov [#allocation2]   ;;  %s15027_s2 = smov [#allocation7]  }
  0x72   :  { %s98_s1 = sshll.u32 %s15026_s24, 4  ;;  %s128_s7 = sshll.u32 %s15027_s2, 4  ;;  %s99_s1 = int_to_ptr.vmem [resolvable:$true] %s98_s1  ;;  %s129_s7 = int_to_ptr.vmem [resolvable:$true] %s128_s7 }
  0x73   :  { %s14873_s10 = scalar_lea.vmem %s99_s1, 64  ;;  %p14878_p7 = scmp.lt.s32.totalorder %s99_s1, %s99_s1 }
  0x74   :  { %p14874_p6 = scmp.ne.s32.totalorder %s99_s1, %s14873_s10  ;;  %p14879_p8 = scmp.lt.s32.totalorder %s14873_s10, %s14873_s10 }
  0x76   :  { %p14880_p9 = por %p14879_p8, %p14878_p7 }
  0x78   :  { %p14881_p10 = pnand %p14880_p9, %p14874_p6 }
  0x7a   :  { %14884 = shalt.err (!%p14881_p10)
}
  0x7b   :  { %101 = dma.hbm_to_vmem [thread:$0]  %s15063_s17, 64, %s99_s1, [#allocation3]  }
  0x7c   :  { %s14893_s30 = scalar_lea.vmem %s129_s7, 128  ;;  %p14898_p12 = scmp.lt.s32.totalorder %s129_s7, %s129_s7 }
  0x7d   :  { %p14894_p11 = scmp.ne.s32.totalorder %s129_s7, %s14893_s30  ;;  %p14899_p13 = scmp.lt.s32.totalorder %s14893_s30, %s14893_s30 }
  0x7f   :  { %p14900_p0 = por %p14899_p13, %p14898_p12 }
  0x81   :  { %p14901_p1 = pnand %p14900_p0, %p14894_p11 }
  0x83   :  { %14904 = shalt.err (!%p14901_p1)
}
  0x84   :  { %131 = dma.hbm_to_vmem [thread:$0]  %s15098_s19, 128, %s129_s7, [#allocation6]  }
  0x85   :  { %s15028_s4 = smov [#allocation10]   ;;  %s15029_s15 = smov [#allocation13]  }
  0x86   :  { %s152_s11 = sshll.u32 %s15028_s4, 4  ;;  %s184_s16 = sshll.u32 %s15029_s15, 4  ;;  %s153_s11 = int_to_ptr.vmem [resolvable:$true] %s152_s11  ;;  %s185_s16 = int_to_ptr.vmem [resolvable:$true] %s184_s16 }
  0x87   :  { %s14913_s0 = scalar_lea.vmem %s153_s11, 128  ;;  %p14918_p3 = scmp.lt.s32.totalorder %s153_s11, %s153_s11 }
  0x88   :  { %p14914_p2 = scmp.ne.s32.totalorder %s153_s11, %s14913_s0  ;;  %p14919_p4 = scmp.lt.s32.totalorder %s14913_s0, %s14913_s0 }
  0x8a   :  { %p14920_p5 = por %p14919_p4, %p14918_p3 }
  0x8c   :  { %p14921_p6 = pnand %p14920_p5, %p14914_p2 }
  0x8e   :  { %14924 = shalt.err (!%p14921_p6)
}
  0x8f   :  { %155 = dma.hbm_to_vmem [thread:$0]  %s15118_s12, 128, %s153_s11, [#allocation9]  }
  0x90   :  { %s14933_s17 = scalar_lea.vmem %s185_s16, 128  ;;  %p14938_p8 = scmp.lt.s32.totalorder %s185_s16, %s185_s16 }
  0x91   :  { %p14934_p7 = scmp.ne.s32.totalorder %s185_s16, %s14933_s17  ;;  %p14939_p9 = scmp.lt.s32.totalorder %s14933_s17, %s14933_s17 }
  0x93   :  { %p14940_p10 = por %p14939_p9, %p14938_p8 }
  0x95   :  { %p14941_p11 = pnand %p14940_p10, %p14934_p7 }
  0x97   :  { %14944 = shalt.err (!%p14941_p11)
}
  0x98   :  { %187 = dma.hbm_to_vmem [thread:$0]  %s15158_s29, 128, %s185_s16, [#allocation12]  }
  0x99   :  { %s15030_s19 = smov [#allocation16]  }
  0x9a   :  { %s216_s18 = sshll.u32 %s15030_s19, 4  ;;  %s217_s18 = int_to_ptr.vmem [resolvable:$true] %s216_s18 }
  0x9b   :  { %s14953_s22 = scalar_lea.vmem %s217_s18, 128  ;;  %p14958_p13 = scmp.lt.s32.totalorder %s217_s18, %s217_s18 }
  0x9c   :  { %p14954_p12 = scmp.ne.s32.totalorder %s217_s18, %s14953_s22  ;;  %p14959_p0 = scmp.lt.s32.totalorder %s14953_s22, %s14953_s22 }
  0x9e   :  { %p14960_p1 = por %p14959_p0, %p14958_p13 }
  0xa0   :  { %p14961_p2 = pnand %p14960_p1, %p14954_p12 }
  0xa2   :  { %14964 = shalt.err (!%p14961_p2)
}
  0xa3   :  { %219 = dma.hbm_to_vmem [thread:$0]  %s15198_s8, 128, %s217_s18, [#allocation15]  }
  0xa4   :  { %14973 = dma.done.wait [#allocation3], 64  }
  0xa5   :  { %14974 = vsyncadd [#allocation3], 4294967232 }
  0xa6   :  { %14975 = dma.done.wait [#allocation6], 160  }
  0xa7   :  { %14976 = vsyncadd [#allocation6], 4294967136 }
  0xa8   :  { %14977 = dma.done.wait [#allocation9], 192  }
  0xa9   :  { %14978 = vsyncadd [#allocation9], 4294967104 }
  0xaa   :  { %14979 = dma.done.wait [#allocation12], 256  }
  0xab   :  { %14980 = vsyncadd [#allocation12], 4294967040 }
  0xac   :  { %14981 = dma.done.wait [#allocation15], 256  }
  0xad   :  { %14982 = vsyncadd [#allocation15], 4294967040  ;;  %v18679_v0 = vmov 0.0   ;;  %vm15032_vm0 = vmmov 0   ;;  %vm268_vm1 = vcmask 1042432   ;;  %vm264_vm2 = vcmask 23552  }
  0xae   :  { %12585 = vmatprep.subr.mxu0 %v18679_v0  ;;  %12587 = vmatprep.mubr.msk.f32.mxu0 %vm15032_vm0, %v18679_v0  ;;  %v15250_v1 = vld [vmem:[#allocation2] sm:$0x7]  ;;  %v15254_v3 = vld [vmem:[%s15073_s25 + $0x18] sm:$0xff]  ;;  %v15265_v4 = vld [vmem:[%s15073_s25 + $0x10] sm:$0xff]  ;;  %vm428_vm3 = vcmask 1041408   ;;  %vm424_vm4 = vcmask 15360  }
  0xaf   :  { %12590 = vmatprep.subr.mxu1 %v18679_v0  ;;  %12598 = vmatprep.mubr.msk.f32.mxu1 %vm15032_vm0, %v18679_v0  ;;  %v259_v2 = vld [vmem:[%s15048_s5] sm:$0xff]  ;;  %v15270_v5 = vld [vmem:[%s15073_s25 + $0x8] sm:$0xff]  ;;  %vm348_vm5 = vcmask 261120   ;;  %v15293_v14 = vld [vmem:[%s15123_s20 + $0x38] sm:$0xff]  ;;  %s18879_s29 = sld [smem:[#allocation27_spill]]  ;;  %vm591_vm6 = vcmask 523264  }
  0xb0   :  { %12586 = vmatpush3.msk.msra.mxu0 %vm268_vm1, %v15250_v1  ;;  %12591 = vmatpush3.msra.mxu1 %v15254_v3  ;;  %v15275_v6 = vld [vmem:[%s15073_s25] sm:$0xff]  ;;  %v15297_v15 = vld [vmem:[%s15123_s20 + $0x30] sm:$0xff]  ;;  %v15304_v16 = vld [vmem:[%s15123_s20 + $0x28] sm:$0xff]  ;;  %s18880_s8 = sld [smem:[#allocation26_spill]]  ;;  %vm1075_vm7 = vcmask 1043456   ;;  %s18675_s4 = smov 124  }
  0xb1   :  { %12588 = vmatmul.mubr.msk.f32.vlgmr.msra.gmra.mxu0 %vm264_vm2, %v259_v2  ;;  %12592 = vmatprep.subr.mxu1 %v18679_v0  ;;  %v15279_v7 = vld [vmem:[#allocation5] sm:$0x3]  ;;  %v15314_v18 = vld [vmem:[%s15123_s20 + $0x18] sm:$0xff]  ;;  %v15319_v19 = vld [vmem:[%s15123_s20 + $0x10] sm:$0xff]  ;;  %s18881_s12 = sld [smem:[#allocation31_spill]]  ;;  %vm1071_vm8 = vcmask 31744  }
  0xb2   :  { %12601 = vmatprep.subr.mxu0 %v18679_v0  ;;  %12603 = vmatprep.mubr.msk.f32.mxu0 %vm15032_vm0, %v18679_v0  ;;  %v260_v8 = vld [vmem:[%s15053_s9] sm:$0xff]  ;;  %v15326_v20 = vld [vmem:[%s15123_s20 + $0x8] sm:$0xff]  ;;  %s18882_s23 = sld [smem:[#allocation25_spill]]  ;;  %s18677_s17 = smov 32   ;;  %vm1594_vm9 = vcmask 785408  }
  0xb3   :  { %12593 = vmatpush3.msra.mxu1 %v15265_v4  ;;  %12602 = vmatpush3.msk.msra.mxu0 %vm428_vm3, %v15279_v7  ;;  %v15289_v9 = vld [vmem:[%s15068_s21] sm:$0xff]  ;;  %s18883_s26 = sld [smem:[#allocation34_spill]]  ;;  %s18949_s27 = smov 96  }
  0xb4   :  { %12594 = vmatprep.subr.mxu1 %v18679_v0  ;;  %12606 = vmatprep.subr.mxu0 %v18679_v0  ;;  %v15309_v17 = vld [vmem:[%s15123_s20 + $0x20] sm:$0xff]  ;;  %s18884_s28 = sld [smem:[#allocation30_spill]] }
  0xb5   :  { %12595 = vmatpush3.msra.mxu1 %v15270_v5  ;;  %12604 = vmatmul.mubr.msk.f32.vlgmr.msra.gmra.mxu0 %vm424_vm4, %v260_v8  ;;  %v15331_v21 = vld [vmem:[%s15123_s20] sm:$0xff]  ;;  %v15335_v22 = vld [vmem:[%s18879_s29 + $0x18] sm:$0xff]  ;;  %v15338_v23 = vld [vmem:[%s18879_s29 + $0x10] sm:$0xff]  ;;  %s18885_s3 = sld [smem:[#allocation32_spill]] }
  0xb6   :  { %12596 = vmatprep.subr.mxu1 %v18679_v0  ;;  %12614 = vmatprep.mubr.msk.f32.mxu0 %vm15032_vm0, %v18679_v0  ;;  %v15343_v24 = vld [vmem:[%s18880_s8] sm:$0xff]  ;;  %v15347_v25 = vld [vmem:[%s18879_s29 + $0x8] sm:$0xff]  ;;  %s18886_s24 = sld [smem:[#allocation35_spill]] }
  0xb7   :  { %12597 = vmatpush3.msra.mxu1 %v15275_v6  ;;  %12607 = vmatpush3.msra.mxu0 %v15335_v22  ;;  %v15353_v28 = vld [vmem:[%s18879_s29] sm:$0xff]  ;;  %v15358_v31 = vld [vmem:[%s18881_s12 + $0x18] sm:$0xff]  ;;  %v15376_v37 = vld [vmem:[%s18881_s12 + $0x10] sm:$0xff]  ;;  %s18887_s1 = sld [smem:[#allocation37_spill]] }
  0xb8   :  { %12617 = vmatprep.subr.mxu1 %v18679_v0  ;;  %12608 = vmatprep.subr.mxu0 %v18679_v0  ;;  %v15368_v32 = vld [vmem:[%s18882_s23] sm:$0xff]  ;;  %v15381_v38 = vld [vmem:[%s18881_s12 + $0x8] sm:$0xff]  ;;  %s18888_s2 = sld [smem:[#allocation33_spill]] }
  0xb9   :  { %12609 = vmatpush3.msra.mxu0 %v15338_v23  ;;  %v15386_v39 = vld [vmem:[%s18881_s12] sm:$0xff]  ;;  %v15390_v40 = vld [vmem:[%s18883_s26 + $0x18] sm:$0xff]  ;;  %v15394_v41 = vld [vmem:[%s18883_s26 + $0x10] sm:$0xff]  ;;  %s18889_s7 = sld [smem:[#allocation36_spill]] }
  0xba   :  { %12610 = vmatprep.subr.mxu0 %v18679_v0  ;;  %v15399_v42 = vld [vmem:[%s18883_s26 + $0x8] sm:$0xff]  ;;  %v15404_v43 = vld [vmem:[%s18883_s26] sm:$0xff]  ;;  %s18892_s10 = sld [smem:[#allocation29_spill]] }
  0xbb   :  { %12611 = vmatpush3.msra.mxu0 %v15347_v25  ;;  %v15416_v46 = vld [vmem:[%s18884_s28] sm:$0xff]  ;;  %v15420_v51 = vld [vmem:[%s18885_s3 + $0x18] sm:$0xff]  ;;  %v15424_v52 = vld [vmem:[%s18885_s3 + $0x10] sm:$0xff]  ;;  %s18893_s30 = sld [smem:[#allocation24_spill]] }
  0xbc   :  { %12612 = vmatprep.subr.mxu0 %v18679_v0  ;;  %v15433_v53 = vld [vmem:[%s18885_s3 + $0x8] sm:$0xff]  ;;  %v15438_v54 = vld [vmem:[%s18885_s3] sm:$0xff]  ;;  %v15448_v63 = vld [vmem:[%s18886_s24 + $0x18] sm:$0xff]  ;;  %s18894_s11 = sld [smem:[#allocation38_spill]] }
  0xbd   :  { %12613 = vmatpush3.msra.mxu0 %v15353_v28  ;;  %v15442_v57 = vld [vmem:[#allocation11] sm:$0xff]  ;;  %v15445_v61 = vld [vmem:[#allocation13] sm:$0xff]  ;;  %v15453_v8 = vld [vmem:[%s18886_s24 + $0x10] sm:$0xff]  ;;  %s18896_s15 = sld [smem:[#allocation28_spill]] }
  0xbe   :  { %12636 = vmatprep.subr.mxu0 %v18679_v0  ;;  %s18901_s16 = sld [smem:[#allocation40_spill]] }
  0xbf   :  { %s18907_s0 = sld [smem:[#allocation39_spill]] }
  0xc0   :  { %s18908_s19 = sld [smem:[#allocation41_spill]] }
  0xc1   :  { %s18930_s18 = sld [smem:[#allocation43_spill]] }
  0xc2   :  { %s18934_s22 = sld [smem:[#allocation42_spill]] }
 0x171   :  { %v338_v10 = vpop.f32.mrf.mxu0 }
 0x172   :  { %v339_v11 = vadd.f32 %v338_v10, %v15289_v9  ;;  %v15460_v10 = vld [vmem:[%s18886_s24 + $0x8] sm:$0xff] }
 0x173   :  { %v12589_v12 = vpop.f32.mrf.mxu0 }
 0x174   :  { %v342_v13 = vmax.f32 %v339_v11, 0.0  ;;  %v15465_v12 = vld [vmem:[%s18886_s24] sm:$0xff] }
 0x175   :  { %v498_v26 = vpop.f32.mrf.mxu0 }
 0x176   :  { %12599 = vmatmul.mubr.msk.f32.vlgmr.msra.gmra.mxu1 %vm348_vm5, %v342_v13  ;;  %v499_v27 = vadd.f32 %v498_v26, %v15343_v24  ;;  %v15475_v13 = vld [vmem:[%s18887_s1 + $0x18] sm:$0xff]  ;;  %v15480_v26 = vld [vmem:[%s18887_s1 + $0x10] sm:$0xff] }
 0x177   :  { %12618 = vmatpush3.msra.mxu1 %v15293_v14  ;;  %12633 = vmatprep.mubr.msk.f32.mxu1 %vm15032_vm0, %v18679_v0  ;;  %v12605_v29 = vpop.f32.mrf.mxu0 }
 0x178   :  { %12619 = vmatprep.subr.mxu1 %v18679_v0  ;;  %v502_v30 = vmax.f32 %v499_v27, 0.0  ;;  %v15485_v27 = vld [vmem:[%s18887_s1 + $0x8] sm:$0xff]  ;;  %v15490_v29 = vld [vmem:[%s18887_s1] sm:$0xff] }
 0x179   :  { %12620 = vmatpush3.msra.mxu1 %v15297_v15 }
 0x17a   :  { %12621 = vmatprep.subr.mxu1 %v18679_v0  ;;  %12615 = vmatmul.mubr.msk.f32.vlgmr.msra.gmra.mxu0 %vm348_vm5, %v502_v30  ;;  %v15495_v30 = vld [vmem:[%s18888_s2] sm:$0xff] }
 0x17b   :  { %12622 = vmatpush3.msra.mxu1 %v15304_v16  ;;  %12637 = vmatpush3.msra.mxu0 %v15358_v31 }
 0x17c   :  { %12623 = vmatprep.subr.mxu1 %v18679_v0  ;;  %12644 = vmatprep.mubr.msk.f32.mxu0 %vm15032_vm0, %v18679_v0 }
 0x17d   :  { %12624 = vmatpush3.msra.mxu1 %v15309_v17  ;;  %12638 = vmatprep.subr.mxu0 %v18679_v0 }
 0x17e   :  { %12625 = vmatprep.subr.mxu1 %v18679_v0  ;;  %12639 = vmatpush3.msra.mxu0 %v15376_v37 }
 0x17f   :  { %12626 = vmatpush3.msra.mxu1 %v15314_v18  ;;  %12640 = vmatprep.subr.mxu0 %v18679_v0 }
 0x180   :  { %12627 = vmatprep.subr.mxu1 %v18679_v0  ;;  %12641 = vmatpush3.msra.mxu0 %v15381_v38 }
 0x181   :  { %12628 = vmatpush3.msra.mxu1 %v15319_v19  ;;  %12642 = vmatprep.subr.mxu0 %v18679_v0 }
 0x182   :  { %12629 = vmatprep.subr.mxu1 %v18679_v0  ;;  %12643 = vmatpush3.msra.mxu0 %v15386_v39 }
 0x183   :  { %12630 = vmatpush3.msra.mxu1 %v15326_v20  ;;  %12647 = vmatprep.subr.mxu0 %v18679_v0 }
 0x184   :  { %12631 = vmatprep.subr.mxu1 %v18679_v0 }
 0x185   :  { %12632 = vmatpush3.msra.mxu1 %v15331_v21 }
 0x186   :  { %12658 = vmatprep.subr.mxu1 %v18679_v0 }
 0x236   :  { %v418_v33 = vpop.f32.mrf.mxu1 }
 0x237   :  { %v419_v34 = vadd.f32 %v418_v33, %v15368_v32 }
 0x238   :  { %v12600_v35 = vpop.f32.mrf.mxu1 }
 0x239   :  { %v581_v36 = vsel %vm348_vm5, %v419_v34, 0.0 }
 0x23a   :  { %12634 = vmatmul.mubr.msk.f32.vlgmr.msra.gmra.mxu1 %vm591_vm6, %v581_v36  ;;  %v15406_v44 = vpop.f32.mrf.mxu0 }
 0x23b   :  { %12666 = vmatprep.mubr.msk.f32.mxu1 %vm15032_vm0, %v18679_v0  ;;  %12659 = vmatpush3.msra.mxu1 %v15390_v40 }
 0x23c   :  { %12660 = vmatprep.subr.mxu1 %v18679_v0  ;;  %v12616_v45 = vpop.f32.mrf.mxu0 }
 0x23d   :  { %12661 = vmatpush3.msra.mxu1 %v15394_v41 }
 0x23e   :  { %12662 = vmatprep.subr.mxu1 %v18679_v0 }
 0x23f   :  { %12663 = vmatpush3.msra.mxu1 %v15399_v42 }
 0x240   :  { %12664 = vmatprep.subr.mxu1 %v18679_v0 }
 0x241   :  { %12665 = vmatpush3.msra.mxu1 %v15404_v43 }
 0x242   :  { %12667 = vmatmul.mubr.f32.vlgmr.msra.gmra.mxu1 %v18679_v0  ;;  %12680 = vmatprep.subr.mxu1 %v18679_v0 }
 0x243   :  { %12688 = vmatprep.mubr.msk.f32.mxu1 %vm15032_vm0, %v18679_v0  ;;  %12681 = vmatpush3.msra.mxu1 %v15475_v13 }
 0x244   :  { %12682 = vmatprep.subr.mxu1 %v18679_v0 }
 0x245   :  { %12683 = vmatpush3.msra.mxu1 %v15480_v26 }
 0x246   :  { %12684 = vmatprep.subr.mxu1 %v18679_v0 }
 0x247   :  { %12685 = vmatpush3.msra.mxu1 %v15485_v27 }
 0x248   :  { %12686 = vmatprep.subr.mxu1 %v18679_v0 }
 0x249   :  { %12687 = vmatpush3.msra.mxu1 %v15490_v29 }
 0x24a   :  { %12696 = vmatprep.subr.mxu1 %v18679_v0 }
 0x2fa   :  { %v661_v47 = vpop.f32.mrf.mxu1 }
 0x2fb   :  { %v662_v48 = vadd.f32 %v661_v47, %v15416_v46  ;;  %v15505_v47 = vld [vmem:[%s18889_s7] sm:$0xff] }
 0x2fc   :  { %v12635_v49 = vpop.f32.mrf.mxu1 }
 0x2fd   :  { %v665_v50 = vmax.f32 %v662_v48, 0.0 }
 0x2ff   :  { %12645 = vmatmul.mubr.msk.f32.vlgmr.msra.gmra.mxu0 %vm348_vm5, %v665_v50 }
 0x300   :  { %12648 = vmatpush3.msra.mxu0 %v15420_v51  ;;  %12655 = vmatprep.mubr.msk.f32.mxu0 %vm15032_vm0, %v18679_v0 }
 0x301   :  { %12649 = vmatprep.subr.mxu0 %v18679_v0 }
 0x302   :  { %12650 = vmatpush3.msra.mxu0 %v15424_v52  ;;  %v898_v55 = vpop.f32.mrf.mxu1 }
 0x303   :  { %12651 = vmatprep.subr.mxu0 %v18679_v0  ;;  %v899_v2 = vadd.f32 %v898_v55, %v15445_v61 }
 0x304   :  { %12652 = vmatpush3.msra.mxu0 %v15433_v53  ;;  %v12668_v56 = vpop.f32.mrf.mxu1 }
 0x305   :  { %12653 = vmatprep.subr.mxu0 %v18679_v0  ;;  %v902_v11 = vmax.f32 %v899_v2, 0.0  ;;  %v15509_v56 = vld [vmem:[#allocation8] sm:$0xf] }
 0x306   :  { %12654 = vmatpush3.msra.mxu0 %v15438_v54 }
 0x307   :  { %12669 = vmatprep.subr.mxu0 %v18679_v0 }
 0x3bf   :  { %v740_v58 = vpop.f32.mrf.mxu0 }
 0x3c0   :  { %v741_v59 = vadd.f32 %v740_v58, %v15442_v57 }
 0x3c1   :  { %v12646_v60 = vpop.f32.mrf.mxu0 }
 0x3c2   :  { %v744_v62 = vmax.f32 %v741_v59, 0.0  ;;  %v15518_v59 = vld [vmem:[%s18892_s10 + $0x18] sm:$0xff]  ;;  %v261_v60 = vld [vmem:[%s18893_s30] sm:$0xff] }
 0x3c4   :  { %12656 = vmatmul.mubr.msk.f32.vlgmr.msra.gmra.mxu0 %vm348_vm5, %v744_v62 }
 0x3c5   :  { %12670 = vmatpush3.msra.mxu0 %v15448_v63  ;;  %12677 = vmatprep.mubr.msk.f32.mxu0 %vm15032_vm0, %v18679_v0 }
 0x3c6   :  { %12671 = vmatprep.subr.mxu0 %v18679_v0 }
 0x3c7   :  { %12672 = vmatpush3.msra.mxu0 %v15453_v8 }
 0x3c8   :  { %12673 = vmatprep.subr.mxu0 %v18679_v0 }
 0x3c9   :  { %12674 = vmatpush3.msra.mxu0 %v15460_v10 }
 0x3ca   :  { %12675 = vmatprep.subr.mxu0 %v18679_v0 }
 0x3cb   :  { %12676 = vmatpush3.msra.mxu0 %v15465_v12 }
 0x3cc   :  { %12678 = vmatmul.mubr.msk.f32.vlgmr.msra.gmra.mxu0 %vm348_vm5, %v902_v11  ;;  %12691 = vmatprep.subr.mxu0 %v18679_v0 }
 0x3cd   :  { %12693 = vmatprep.mubr.msk.f32.mxu0 %vm15032_vm0, %v18679_v0  ;;  %12692 = vmatpush3.msk.msra.mxu0 %vm1075_vm7, %v15509_v56 }
 0x3ce   :  { %12707 = vmatprep.subr.mxu0 %v18679_v0 }
 0x484   :  { %v819_v33 = vpop.f32.mrf.mxu0 }
 0x485   :  { %v15498_v34 = vadd.f32 %v819_v33, %v15495_v30 }
 0x486   :  { %v12657_v35 = vpop.f32.mrf.mxu0 }
 0x487   :  { %18890 = vst [vmem:[#allocation47_spill] sm:$0xff] %v15498_v34  ;;  %v15501_v36 = vmax.f32 %v15498_v34, 0.0 }
 0x489   :  { %18891 = vst [vmem:[#allocation48_spill] sm:$0xff] %v15501_v36  ;;  %v1060_v45 = vmul.f32 0.5, %v15501_v36 }
 0x48b   :  { %v1061_v48 = vmul.f32 1.442695, %v1060_v45  ;;  %v15530_v45 = vld [vmem:[%s18892_s10 + $0x10] sm:$0xff] }
 0x48c   :  { %v977_v49 = vpop.f32.mrf.mxu0 }
 0x48d   :  { %14342 = vpow2.f32 %v1061_v48  ;;  %v978_v50 = vadd.f32 %v977_v49, %v15505_v47  ;;  %v15535_v48 = vld [vmem:[%s18892_s10 + $0x8] sm:$0xff]  ;;  %v15539_v49 = vld [vmem:[%s18892_s10] sm:$0xff] }
 0x48e   :  { %v12679_v55 = vpop.f32.mrf.mxu0 }
 0x48f   :  { %12689 = vmatmul.mubr.msk.f32.vlgmr.msra.gmra.mxu1 %vm348_vm5, %v978_v50  ;;  %v15544_v50 = vld [vmem:[%s18894_s11 + $0x38] sm:$0xff]  ;;  %v15547_v55 = vld [vmem:[%s18894_s11 + $0x30] sm:$0xff] }
 0x490   :  { %12704 = vmatprep.mubr.msk.f32.mxu1 %vm15032_vm0, %v18679_v0  ;;  %12697 = vmatpush3.msra.mxu1 %v15518_v59 }
 0x491   :  { %12698 = vmatprep.subr.mxu1 %v18679_v0 }
 0x492   :  { %12699 = vmatpush3.msra.mxu1 %v15530_v45 }
 0x493   :  { %12700 = vmatprep.subr.mxu1 %v18679_v0 }
 0x494   :  { %12701 = vmatpush3.msra.mxu1 %v15535_v48 }
 0x495   :  { %12702 = vmatprep.subr.mxu1 %v18679_v0 }
 0x496   :  { %12703 = vmatpush3.msra.mxu1 %v15539_v49 }
 0x497   :  { %12726 = vmatprep.subr.mxu1 %v18679_v0 }
 0x49a   :  { %v14343_v58 = vpop.eup %14342 }
 0x49b   :  { %1064 = vrot.lane.b32.xlu0 %v14343_v58, %s18675_s4  ;;  %v15553_v58 = vld [vmem:[%s18894_s11 + $0x28] sm:$0xff]  ;;  %s18683_s4 = smov 64  }
 0x49c   :  { %18897 = vst [vmem:[#allocation50_spill] sm:$0xff] %v15553_v58 }
 0x50d   :  { %v1065_v62 = vpop.permute.xlu0 %1064 }
 0x50e   :  { %v1067_v2 = vmul.f32 %v1065_v62, %v261_v60  ;;  %v15558_v60 = vld [vmem:[%s18894_s11 + $0x20] sm:$0xff]  ;;  %v15563_v62 = vld [vmem:[%s18894_s11 + $0x18] sm:$0xff] }
 0x50f   :  { %18898 = vst [vmem:[#allocation51_spill] sm:$0xff] %v15558_v60  ;;  %18899 = vst [vmem:[#allocation52_spill] sm:$0xff] %v15563_v62 }
 0x510   :  { %v1068_v11 = vadd.f32 %v1067_v2, %v15498_v34  ;;  %v15568_v2 = vld [vmem:[%s18894_s11 + $0x10] sm:$0xff] }
 0x511   :  { %18900 = vst [vmem:[#allocation53_spill] sm:$0xff] %v15568_v2 }
 0x512   :  { %12694 = vmatmul.mubr.msk.f32.vlgmr.msra.gmra.mxu0 %vm1071_vm8, %v1068_v11  ;;  %v15575_v11 = vld [vmem:[%s18896_s15] sm:$0xff] }
 0x513   :  { %12723 = vmatprep.mubr.msk.f32.mxu0 %vm15032_vm0, %v18679_v0  ;;  %12708 = vmatpush3.msra.mxu0 %v15544_v50  ;;  %18902 = vst [vmem:[#allocation54_spill] sm:$0xff] %v15575_v11 }
 0x514   :  { %12709 = vmatprep.subr.mxu0 %v18679_v0 }
 0x515   :  { %12710 = vmatpush3.msra.mxu0 %v15547_v55 }
 0x516   :  { %12711 = vmatprep.subr.mxu0 %v18679_v0 }
 0x517   :  { %12712 = vmatpush3.msra.mxu0 %v15553_v58 }
 0x518   :  { %12713 = vmatprep.subr.mxu0 %v18679_v0 }
 0x519   :  { %12714 = vmatpush3.msra.mxu0 %v15558_v60  ;;  %v15624_v60 = vld [vmem:[%s18908_s19 + $0x18] sm:$0xff] }
 0x51a   :  { %12715 = vmatprep.subr.mxu0 %v18679_v0  ;;  %18913 = vst [vmem:[#allocation63_spill] sm:$0xff] %v15624_v60 }
 0x51b   :  { %12716 = vmatpush3.msra.mxu0 %v15563_v62  ;;  %v15582_v62 = vld [vmem:[%s18894_s11 + $0x8] sm:$0xff] }
 0x51c   :  { %12717 = vmatprep.subr.mxu0 %v18679_v0  ;;  %18903 = vst [vmem:[#allocation55_spill] sm:$0xff] %v15582_v62 }
 0x51d   :  { %12718 = vmatpush3.msra.mxu0 %v15568_v2  ;;  %v15587_v2 = vld [vmem:[%s18894_s11] sm:$0xff] }
 0x51e   :  { %12719 = vmatprep.subr.mxu0 %v18679_v0  ;;  %18904 = vst [vmem:[#allocation56_spill] sm:$0xff] %v15587_v2 }
 0x51f   :  { %12720 = vmatpush3.msra.mxu0 %v15582_v62 }
 0x520   :  { %12721 = vmatprep.subr.mxu0 %v18679_v0 }
 0x521   :  { %12722 = vmatpush3.msra.mxu0 %v15587_v2 }
 0x522   :  { %12748 = vmatprep.subr.mxu0 %v18679_v0 }
 0x54f   :  { %v15527_v33 = vpop.f32.mrf.mxu1 }
 0x550   :  { %18895 = vst [vmem:[#allocation49_spill] sm:$0xff] %v15527_v33 }
 0x551   :  { %v12690_v35 = vpop.f32.mrf.mxu1 }
 0x5d2   :  { %v1145_v35 = vpop.f32.mrf.mxu0 }
 0x5d3   :  { %v1146_v36 = vadd.f32 %v1145_v35, %v15575_v11 }
 0x5d4   :  { %v12695_v34 = vpop.f32.mrf.mxu0 }
 0x5d5   :  { %v1149_v33 = vmax.f32 %v1146_v36, 0.0  ;;  %v15592_v34 = vld [vmem:[%s18901_s16 + $0x18] sm:$0xff] }
 0x5d6   :  { %18905 = vst [vmem:[#allocation57_spill] sm:$0xff] %v15592_v34  ;;  %v15596_v36 = vld [vmem:[#allocation10] sm:$0xff] }
 0x5d7   :  { %12705 = vmatmul.mubr.msk.f32.vlgmr.msra.gmra.mxu1 %vm348_vm5, %v1149_v33  ;;  %18906 = vst [vmem:[#allocation58_spill] sm:$0xff] %v15596_v36 }
 0x5d8   :  { %12734 = vmatprep.mubr.msk.f32.mxu1 %vm15032_vm0, %v18679_v0  ;;  %12727 = vmatpush3.msra.mxu1 %v15592_v34  ;;  %v15605_v34 = vld [vmem:[%s18901_s16 + $0x10] sm:$0xff] }
 0x5d9   :  { %12728 = vmatprep.subr.mxu1 %v18679_v0  ;;  %18909 = vst [vmem:[#allocation59_spill] sm:$0xff] %v15605_v34 }
 0x5da   :  { %12729 = vmatpush3.msra.mxu1 %v15605_v34 }
 0x5db   :  { %12730 = vmatprep.subr.mxu1 %v18679_v0 }
 0x697   :  { %v1224_v33 = vpop.f32.mrf.mxu1 }
 0x698   :  { %v1225_v35 = vadd.f32 %v1224_v33, %v15596_v36  ;;  %v15610_v33 = vld [vmem:[%s18901_s16 + $0x8] sm:$0xff] }
 0x699   :  { %v12706_v11 = vpop.f32.mrf.mxu1  ;;  %18910 = vst [vmem:[#allocation60_spill] sm:$0xff] %v15610_v33  ;;  %12731 = vmatpush3.msra.mxu1 %v15610_v33  ;;  %v15628_v33 = vld [vmem:[%s18908_s19 + $0x10] sm:$0xff] }
 0x69a   :  { %v1228_v62 = vsel %vm348_vm5, %v1225_v35, 0.0  ;;  %1577 = vrot.lane.b32.xlu0 %v1225_v35, %s18677_s17  ;;  %v15614_v11 = vld [vmem:[%s18901_s16] sm:$0xff]  ;;  %12732 = vmatprep.subr.mxu1 %v18679_v0  ;;  %18914 = vst [vmem:[#allocation64_spill] sm:$0xff] %v15628_v33 }
 0x69b   :  { %12724 = vmatmul.mubr.msk.f32.vlgmr.msra.gmra.mxu0 %vm591_vm6, %v1228_v62  ;;  %18911 = vst [vmem:[#allocation61_spill] sm:$0xff] %v15614_v11  ;;  %12733 = vmatpush3.msra.mxu1 %v15614_v11  ;;  %v15620_v62 = vld [vmem:[%s18907_s0] sm:$0xff]  ;;  %v15654_v11 = vld [vmem:[%s15223_s13 + $0x50] sm:$0xff] }
 0x69c   :  { %12756 = vmatprep.mubr.msk.f32.mxu0 %vm15032_vm0, %v18679_v0  ;;  %12737 = vmatprep.subr.mxu1 %v18679_v0  ;;  %18912 = vst [vmem:[#allocation62_spill] sm:$0xff] %v15620_v62  ;;  %18919 = vst [vmem:[#allocation69_spill] sm:$0xff] %v15654_v11 }
 0x75b   :  { %v1307_v35 = vpop.f32.mrf.mxu0 }
 0x75c   :  { %v1308_v36 = vadd.f32 %v1307_v35, %v15620_v62 }
 0x75d   :  { %v12725_v34 = vpop.f32.mrf.mxu0 }
 0x75e   :  { %v1311_v2 = vmax.f32 %v1308_v36, 0.0  ;;  %v15637_v34 = vld [vmem:[%s18908_s19 + $0x8] sm:$0xff]  ;;  %v15646_v36 = vld [vmem:[#allocation16] sm:$0xff] }
 0x75f   :  { %18915 = vst [vmem:[#allocation65_spill] sm:$0xff] %v15637_v34  ;;  %18917 = vst [vmem:[#allocation67_spill] sm:$0xff] %v15646_v36 }
 0x760   :  { %12735 = vmatmul.mubr.msk.f32.vlgmr.msra.gmra.mxu1 %vm348_vm5, %v1311_v2  ;;  %v15642_v2 = vld [vmem:[%s18908_s19] sm:$0xff] }
 0x761   :  { %12738 = vmatpush3.msra.mxu1 %v15624_v60  ;;  %12745 = vmatprep.mubr.msk.f32.mxu1 %vm15032_vm0, %v18679_v0  ;;  %18916 = vst [vmem:[#allocation66_spill] sm:$0xff] %v15642_v2 }
 0x762   :  { %12739 = vmatprep.subr.mxu1 %v18679_v0 }
 0x763   :  { %12740 = vmatpush3.msra.mxu1 %v15628_v33 }
 0x764   :  { %12741 = vmatprep.subr.mxu1 %v18679_v0 }
 0x765   :  { %12742 = vmatpush3.msra.mxu1 %v15637_v34  ;;  %v15650_v34 = vld [vmem:[%s15223_s13 + $0x58] sm:$0xff] }
 0x766   :  { %12743 = vmatprep.subr.mxu1 %v18679_v0  ;;  %18918 = vst [vmem:[#allocation68_spill] sm:$0xff] %v15650_v34 }
 0x767   :  { %12744 = vmatpush3.msra.mxu1 %v15642_v2  ;;  %v15661_v2 = vld [vmem:[%s15223_s13 + $0x48] sm:$0xff] }
 0x768   :  { %12759 = vmatprep.subr.mxu1 %v18679_v0  ;;  %18920 = vst [vmem:[#allocation70_spill] sm:$0xff] %v15661_v2 }
 0x820   :  { %v1386_v35 = vpop.f32.mrf.mxu1 }
 0x821   :  { %v1387_v33 = vadd.f32 %v1386_v35, %v15646_v36  ;;  %v15681_v35 = vld [vmem:[%s15223_s13 + $0x28] sm:$0xff] }
 0x822   :  { %v12736_v60 = vpop.f32.mrf.mxu1  ;;  %18924 = vst [vmem:[#allocation74_spill] sm:$0xff] %v15681_v35 }
 0x823   :  { %v1390_v62 = vmax.f32 %v1387_v33, 0.0  ;;  %v15666_v60 = vld [vmem:[%s15223_s13 + $0x40] sm:$0xff]  ;;  %v15671_v33 = vld [vmem:[%s15223_s13 + $0x38] sm:$0xff] }
 0x824   :  { %18921 = vst [vmem:[#allocation71_spill] sm:$0xff] %v15666_v60  ;;  %18922 = vst [vmem:[#allocation72_spill] sm:$0xff] %v15671_v33 }
 0x825   :  { %12746 = vmatmul.mubr.msk.f32.vlgmr.msra.gmra.mxu1 %vm348_vm5, %v1390_v62  ;;  %v15676_v62 = vld [vmem:[%s15223_s13 + $0x30] sm:$0xff] }
 0x826   :  { %12760 = vmatpush3.msra.mxu1 %v15650_v34  ;;  %12783 = vmatprep.mubr.msk.f32.mxu1 %vm15032_vm0, %v18679_v0  ;;  %18923 = vst [vmem:[#allocation73_spill] sm:$0xff] %v15676_v62 }
 0x827   :  { %12761 = vmatprep.subr.mxu1 %v18679_v0 }
 0x828   :  { %12762 = vmatpush3.msra.mxu1 %v15654_v11  ;;  %v15693_v11 = vld [vmem:[#allocation7] sm:$0xff] }
 0x829   :  { %12763 = vmatprep.subr.mxu1 %v18679_v0  ;;  %18927 = vst [vmem:[#allocation77_spill] sm:$0xff] %v15693_v11  ;;  %v578_v34 = vadd.f32 %v15406_v44, %v15693_v11  ;;  %v15736_v11 = vld [vmem:[%s18930_s18 + $0x8] sm:$0xff] }
 0x82a   :  { %12764 = vmatpush3.msra.mxu1 %v15661_v2  ;;  %v15686_v2 = vld [vmem:[%s15223_s13 + $0x20] sm:$0xff]  ;;  %18935 = vst [vmem:[#allocation83_spill] sm:$0xff] %v15736_v11 }
 0x82b   :  { %12765 = vmatprep.subr.mxu1 %v18679_v0  ;;  %18925 = vst [vmem:[#allocation75_spill] sm:$0xff] %v15686_v2 }
 0x82c   :  { %12766 = vmatpush3.msra.mxu1 %v15666_v60  ;;  %v15691_v60 = vld [vmem:[%s15223_s13 + $0x18] sm:$0xff] }
 0x82d   :  { %12767 = vmatprep.subr.mxu1 %v18679_v0  ;;  %18926 = vst [vmem:[#allocation76_spill] sm:$0xff] %v15691_v60 }
 0x82e   :  { %12768 = vmatpush3.msra.mxu1 %v15671_v33  ;;  %v15698_v33 = vld [vmem:[%s15223_s13 + $0x10] sm:$0xff] }
 0x82f   :  { %12769 = vmatprep.subr.mxu1 %v18679_v0  ;;  %18928 = vst [vmem:[#allocation78_spill] sm:$0xff] %v15698_v33 }
 0x830   :  { %12770 = vmatpush3.msra.mxu1 %v15676_v62  ;;  %v1578_v62 = vpop.permute.xlu0 %1577 }
 0x831   :  { %12771 = vmatprep.subr.mxu1 %v18679_v0  ;;  %v1580_v36 = vsel %vm348_vm5, %v578_v34, %v1578_v62 }
 0x832   :  { %12772 = vmatpush3.msra.mxu1 %v15681_v35  ;;  %v15705_v35 = vld [vmem:[%s15223_s13 + $0x8] sm:$0xff]  ;;  %v1581_v44 = vsel %vm591_vm6, %v1580_v36, 0.0  ;;  %v15728_v36 = vld [vmem:[%s18930_s18 + $0x10] sm:$0xff] }
 0x833   :  { %12773 = vmatprep.subr.mxu1 %v18679_v0  ;;  %18929 = vst [vmem:[#allocation79_spill] sm:$0xff] %v15705_v35  ;;  %18933 = vst [vmem:[#allocation82_spill] sm:$0xff] %v15728_v36 }
 0x834   :  { %12774 = vmatpush3.msra.mxu1 %v15686_v2  ;;  %v15711_v2 = vld [vmem:[%s15223_s13] sm:$0xff] }
 0x835   :  { %12775 = vmatprep.subr.mxu1 %v18679_v0  ;;  %18931 = vst [vmem:[#allocation80_spill] sm:$0xff] %v15711_v2 }
 0x836   :  { %12776 = vmatpush3.msra.mxu1 %v15691_v60  ;;  %v15741_v60 = vld [vmem:[%s18930_s18] sm:$0xff] }
 0x837   :  { %12777 = vmatprep.subr.mxu1 %v18679_v0  ;;  %18936 = vst [vmem:[#allocation84_spill] sm:$0xff] %v15741_v60 }
 0x838   :  { %12778 = vmatpush3.msra.mxu1 %v15698_v33 }
 0x839   :  { %12779 = vmatprep.subr.mxu1 %v18679_v0 }
 0x83a   :  { %12780 = vmatpush3.msra.mxu1 %v15705_v35  ;;  %v15725_v35 = vld [vmem:[%s18930_s18 + $0x18] sm:$0xff] }
 0x83b   :  { %12781 = vmatprep.subr.mxu1 %v18679_v0  ;;  %18932 = vst [vmem:[#allocation81_spill] sm:$0xff] %v15725_v35  ;;  %12749 = vmatpush3.msra.mxu0 %v15725_v35 }
 0x83c   :  { %12782 = vmatpush3.msra.mxu1 %v15711_v2  ;;  %12750 = vmatprep.subr.mxu0 %v18679_v0 }
 0x83d   :  { %12784 = vmatmul.mubr.msk.f32.vlgmr.msra.gmra.mxu1 %vm1594_vm9, %v1581_v44  ;;  %12821 = vmatprep.subr.mxu1 %v18679_v0 }
 0x83e   :  { %12822 = vmatpush3.msk.msra.mxu1 %vm428_vm3, %v15279_v7  ;;  %12823 = vmatprep.mubr.msk.f32.mxu1 %vm15032_vm0, %v18679_v0 }
 0x83f   :  { %12826 = vmatprep.subr.mxu1 %v18679_v0  ;;  %12751 = vmatpush3.msra.mxu0 %v15728_v36  ;;  %v15746_v36 = vld [vmem:[%s18934_s22] sm:$0xff]  ;;  %s18990_s22 = smov 125  }
 0x840   :  { %12752 = vmatprep.subr.mxu0 %v18679_v0  ;;  %18937 = vst [vmem:[#allocation85_spill] sm:$0xff] %v15746_v36 }
 0x841   :  { %12753 = vmatpush3.msra.mxu0 %v15736_v11 }
 0x842   :  { %12754 = vmatprep.subr.mxu0 %v18679_v0 }
 0x843   :  { %12755 = vmatpush3.msra.mxu0 %v15741_v60 }
 0x844   :  { %12786 = vmatprep.subr.mxu0 %v18679_v0 }
 0x8e5   :  { %v1465_v34 = vpop.f32.mrf.mxu1 }
 0x8e7   :  { %v12747_v62 = vpop.f32.mrf.mxu1 }
 0x8fd   :  { %v1664_v7 = vpop.f32.mrf.mxu1 }
 0x8fe   :  { %1675 = vrot.lane.b32.xlu1 %v1664_v7, %s18677_s17  ;;  %v11622_v2 = vmul.f32 -1.442695, %v1664_v7  ;;  %s18696_s17 = smov 125  }
 0x8ff   :  { %v12785_v44 = vpop.f32.mrf.mxu1 }
 0x900   :  { %14344 = vpow2.f32 %v11622_v2  ;;  %v1466_v2 = vadd.f32 %v1465_v34, %v15746_v36 }
 0x90d   :  { %v14345_v62 = vpop.eup %14344 }
 0x90e   :  { %v1671_v33 = vadd.f32 1.0, %v14345_v62  ;;  %v15750_v62 = vmax.f32 %v1466_v2, 0.0  ;;  %v15759_v2 = vld [vmem:[%s15228_s6 + $0x38] sm:$0xff] }
 0x90f   :  { %18940 = vst [vmem:[#allocation87_spill] sm:$0xff] %v15759_v2 }
 0x910   :  { %14346 = vrcp.f32 %v1671_v33  ;;  %18938 = vst [vmem:[#allocation86_spill] sm:$0xff] %v15750_v62 }
 0x91d   :  { %v14347_v44 = vpop.eup %14346 }
 0x970   :  { %v1676_v35 = vpop.permute.xlu1 %1675 }
 0x971   :  { %v1678_v33 = vmul.f32 %v14347_v44, %v1676_v35  ;;  %v18939_v35 = vmov 0.0  }
 0x973   :  { %1680 = vrot.lane.b32.xlu1 %v1678_v33, %s18683_s4  ;;  %s18698_s4 = smov 96   ;;  %v15762_v33 = vld [vmem:[%s15228_s6 + $0x30] sm:$0xff] }
 0x974   :  { %18941 = vst [vmem:[#allocation88_spill] sm:$0xff] %v15762_v33 }
 0x977   :  { %1476 = vrot.lane.b32.xlu1 %v15750_v62, %s18696_s17  ;;  %v15794_v62 = vld [vmem:[%s15228_s6] sm:$0xff]  ;;  %s18947_s17 = smov 32  }
 0x9e5   :  { %v1681_v0 = vpop.permute.xlu1 %1680 }
 0x9e6   :  { %v1683_v60 = vadd.f32 %v1681_v0, %v1664_v7  ;;  %v15767_v0 = vld [vmem:[%s15228_s6 + $0x28] sm:$0xff]  ;;  %v15782_v7 = vld [vmem:[%s15228_s6 + $0x10] sm:$0xff] }
 0x9e7   :  { %18942 = vst [vmem:[#allocation89_spill] sm:$0xff] %v15767_v0  ;;  %18945 = vst [vmem:[#allocation92_spill] sm:$0xff] %v15782_v7 }
 0x9e8   :  { %14348 = vtanh.f32 %v1683_v60  ;;  %v15777_v60 = vld [vmem:[%s15228_s6 + $0x18] sm:$0xff] }
 0x9e9   :  { %v1477_v11 = vpop.permute.xlu1 %1476  ;;  %18944 = vst [vmem:[#allocation91_spill] sm:$0xff] %v15777_v60 }
 0x9ea   :  { %12757 = vmatmul.mubr.msk.f32.vlgmr.msra.gmra.mxu0 %vm348_vm5, %v1477_v11  ;;  %v15772_v11 = vld [vmem:[%s15228_s6 + $0x20] sm:$0xff] }
 0x9eb   :  { %12802 = vmatprep.mubr.msk.f32.mxu0 %vm15032_vm0, %v18939_v35  ;;  %12787 = vmatpush3.msra.mxu0 %v15759_v2  ;;  %18943 = vst [vmem:[#allocation90_spill] sm:$0xff] %v15772_v11 }
 0x9ec   :  { %12788 = vmatprep.subr.mxu0 %v18939_v35 }
 0x9ed   :  { %12789 = vmatpush3.msra.mxu0 %v15762_v33 }
 0x9ee   :  { %12790 = vmatprep.subr.mxu0 %v18939_v35 }
 0x9ef   :  { %12791 = vmatpush3.msra.mxu0 %v15767_v0  ;;  %v1691_v0 = vmul.f32 0.0, %v14347_v44 }
 0x9f0   :  { %12792 = vmatprep.subr.mxu0 %v18939_v35 }
 0x9f1   :  { %12793 = vmatpush3.msra.mxu0 %v15772_v11 }
 0x9f2   :  { %12794 = vmatprep.subr.mxu0 %v18939_v35 }
 0x9f3   :  { %12795 = vmatpush3.msra.mxu0 %v15777_v60  ;;  %v1685_v60 = vsub.f32 1.0, %v14347_v44  ;;  %v15811_v44 = vld [vmem:[%s15048_s5 + $0x8] sm:$0xff] }
 0x9f4   :  { %12796 = vmatprep.subr.mxu0 %v18939_v35 }
 0x9f5   :  { %v14349_v34 = vpop.eup %14348  ;;  %12797 = vmatpush3.msra.mxu0 %v15782_v7 }
 0x9f6   :  { %1687 = vrot.lane.b32.xlu0 %v14349_v34, %s18698_s4  ;;  %v15787_v34 = vld [vmem:[%s15228_s6 + $0x8] sm:$0xff]  ;;  %12798 = vmatprep.subr.mxu0 %v18939_v35  ;;  %s18952_s6 = smov 124  }
 0x9f7   :  { %18946 = vst [vmem:[#allocation93_spill] sm:$0xff] %v15787_v34  ;;  %12799 = vmatpush3.msra.mxu0 %v15787_v34 }
 0x9f8   :  { %12800 = vmatprep.subr.mxu0 %v18939_v35 }
 0x9f9   :  { %12801 = vmatpush3.msra.mxu0 %v15794_v62 }
 0x9fa   :  { %12805 = vmatprep.subr.mxu0 %v18939_v35 }
 0xa68   :  { %v1688_v11 = vpop.permute.xlu0 %1687 }
 0xa69   :  { %v1690_v33 = vmul.f32 %v1688_v11, %v1685_v60 }
 0xa6b   :  { %v15798_v2 = vadd.f32 %v1691_v0, %v1690_v33 }
 0xa6d   :  { %1694 = vrot.lane.b32.xlu0 %v15798_v2, %s18698_s4  ;;  %s18948_s4 = smov 64  }
 0xaaa   :  { %v15802_v7 = vpop.f32.mrf.mxu0 }
 0xaac   :  { %v12758_v34 = vpop.f32.mrf.mxu0 }
 0xadf   :  { %v1695_v36 = vpop.permute.xlu0 %1694 }
 0xae0   :  { %v1697_v58 = vsel %vm348_vm5, %v1695_v36, 0.0 }
 0xae1   :  { %12803 = vmatmul.mubr.msk.f32.vlgmr.msra.gmra.mxu0 %vm591_vm6, %v1697_v58 }
 0xae2   :  { %12806 = vmatpush3.msk.msra.mxu0 %vm268_vm1, %v15250_v1  ;;  %12807 = vmatprep.mubr.msk.f32.mxu0 %vm15032_vm0, %v18939_v35 }
 0xae3   :  { %12810 = vmatprep.subr.mxu0 %v18939_v35 }
 0xae5   :  { %12808 = vmatmul.mubr.msk.f32.vlgmr.msra.gmra.mxu0 %vm264_vm2, %v15811_v44 }
 0xae6   :  { %12811 = vmatpush3.msra.mxu0 %v15254_v3  ;;  %12818 = vmatprep.mubr.msk.f32.mxu0 %vm15032_vm0, %v18939_v35 }
 0xae7   :  { %12812 = vmatprep.subr.mxu0 %v18939_v35 }
 0xae8   :  { %12813 = vmatpush3.msra.mxu0 %v15265_v4 }
 0xae9   :  { %12814 = vmatprep.subr.mxu0 %v18939_v35 }
 0xaea   :  { %12815 = vmatpush3.msra.mxu0 %v15270_v5 }
 0xaeb   :  { %12816 = vmatprep.subr.mxu0 %v18939_v35 }
 0xaec   :  { %12817 = vmatpush3.msra.mxu0 %v15275_v6 }
 0xaed   :  { %12837 = vmatprep.subr.mxu0 %v18939_v35 }
 0xba1   :  { %v1775_v1 = vpop.f32.mrf.mxu0 }
 0xba2   :  { %1786 = vrot.lane.b32.xlu1 %v1775_v1, %s18947_s17  ;;  %v11624_v4 = vmul.f32 -1.442695, %v1775_v1 }
 0xba3   :  { %v12804_v3 = vpop.f32.mrf.mxu0 }
 0xba4   :  { %14350 = vpow2.f32 %v11624_v4 }
 0xba5   :  { %v1881_v58 = vpop.f32.mrf.mxu0 }
 0xba6   :  { %v1882_v36 = vadd.f32 %v1881_v58, %v15289_v9 }
 0xba7   :  { %v12809_v33 = vpop.f32.mrf.mxu0 }
 0xba8   :  { %v1885_v0 = vmax.f32 %v1882_v36, 0.0  ;;  %v18955_v36 = vld [vmem:[#allocation52_spill] sm:$0xff]  ;;  %v18957_v33 = vld [vmem:[#allocation55_spill] sm:$0xff] }
 0xbaa   :  { %12819 = vmatmul.mubr.msk.f32.vlgmr.msra.gmra.mxu0 %vm348_vm5, %v1885_v0 }
 0xbab   :  { %12838 = vmatpush3.msra.mxu0 %v15293_v14  ;;  %12853 = vmatprep.mubr.msk.f32.mxu0 %vm15032_vm0, %v18939_v35 }
 0xbac   :  { %12839 = vmatprep.subr.mxu0 %v18939_v35 }
 0xbad   :  { %12840 = vmatpush3.msra.mxu0 %v15297_v15 }
 0xbae   :  { %12841 = vmatprep.subr.mxu0 %v18939_v35 }
 0xbaf   :  { %12842 = vmatpush3.msra.mxu0 %v15304_v16  ;;  %v11626_v16 = vld [vmem:[%s15053_s9 + $0x8] sm:$0xff] }
 0xbb0   :  { %12843 = vmatprep.subr.mxu0 %v18939_v35  ;;  %12824 = vmatmul.mubr.msk.f32.vlgmr.msra.gmra.mxu1 %vm424_vm4, %v11626_v16  ;;  %v18961_v16 = vld [vmem:[#allocation57_spill] sm:$0xff] }
 0xbb1   :  { %12844 = vmatpush3.msra.mxu0 %v15309_v17  ;;  %v14351_v5 = vpop.eup %14350  ;;  %12827 = vmatpush3.msra.mxu1 %v15335_v22 }
 0xbb2   :  { %12845 = vmatprep.subr.mxu0 %v18939_v35  ;;  %v1782_v6 = vadd.f32 1.0, %v14351_v5  ;;  %12834 = vmatprep.mubr.msk.f32.mxu1 %vm15032_vm0, %v18939_v35 }
 0xbb3   :  { %12846 = vmatpush3.msra.mxu0 %v15314_v18  ;;  %12828 = vmatprep.subr.mxu1 %v18939_v35 }
 0xbb4   :  { %12847 = vmatprep.subr.mxu0 %v18939_v35  ;;  %14352 = vrcp.f32 %v1782_v6  ;;  %12829 = vmatpush3.msra.mxu1 %v15338_v23  ;;  %v18960_v6 = vld [vmem:[#allocation54_spill] sm:$0xff] }
 0xbb5   :  { %12848 = vmatpush3.msra.mxu0 %v15319_v19  ;;  %12830 = vmatprep.subr.mxu1 %v18939_v35 }
 0xbb6   :  { %12849 = vmatprep.subr.mxu0 %v18939_v35  ;;  %12831 = vmatpush3.msra.mxu1 %v15347_v25 }
 0xbb7   :  { %12850 = vmatpush3.msra.mxu0 %v15326_v20  ;;  %12832 = vmatprep.subr.mxu1 %v18939_v35 }
 0xbb8   :  { %12851 = vmatprep.subr.mxu0 %v18939_v35  ;;  %12833 = vmatpush3.msra.mxu1 %v15353_v28 }
 0xbb9   :  { %12852 = vmatpush3.msra.mxu0 %v15331_v21  ;;  %12856 = vmatprep.subr.mxu1 %v18939_v35 }
 0xbba   :  { %12878 = vmatprep.subr.mxu0 %v18939_v35 }
 0xbc1   :  { %v14353_v9 = vpop.eup %14352 }
 0xbc2   :  { %v1796_v25 = vsub.f32 1.0, %v14353_v9  ;;  %v1802_v34 = vmul.f32 0.0, %v14353_v9 }
 0xc14   :  { %v1787_v14 = vpop.permute.xlu1 %1786 }
 0xc15   :  { %v1789_v15 = vmul.f32 %v14353_v9, %v1787_v14 }
 0xc17   :  { %1791 = vrot.lane.b32.xlu0 %v1789_v15, %s18948_s4 }
 0xc6a   :  { %v1955_v19 = vpop.f32.mrf.mxu0 }
 0xc6b   :  { %v1956_v3 = vadd.f32 %v1955_v19, %v15368_v32  ;;  %v18964_v19 = vld [vmem:[#allocation61_spill] sm:$0xff] }
 0xc6c   :  { %v12820_v20 = vpop.f32.mrf.mxu0 }
 0xc70   :  { %v2028_v22 = vpop.f32.mrf.mxu1 }
 0xc71   :  { %v2029_v23 = vadd.f32 %v2028_v22, %v15343_v24 }
 0xc72   :  { %v12825_v11 = vpop.f32.mrf.mxu1 }
 0xc73   :  { %v2032_v60 = vmax.f32 %v2029_v23, 0.0 }
 0xc75   :  { %12835 = vmatmul.mubr.msk.f32.vlgmr.msra.gmra.mxu1 %vm348_vm5, %v2032_v60  ;;  %v18966_v60 = vld [vmem:[#allocation81_spill] sm:$0xff] }
 0xc76   :  { %12857 = vmatpush3.msra.mxu1 %v15358_v31  ;;  %12864 = vmatprep.mubr.msk.f32.mxu1 %vm15032_vm0, %v18939_v35 }
 0xc77   :  { %12858 = vmatprep.subr.mxu1 %v18939_v35 }
 0xc78   :  { %12859 = vmatpush3.msra.mxu1 %v15376_v37 }
 0xc79   :  { %12860 = vmatprep.subr.mxu1 %v18939_v35 }
 0xc7a   :  { %12861 = vmatpush3.msra.mxu1 %v15381_v38 }
 0xc7b   :  { %12862 = vmatprep.subr.mxu1 %v18939_v35 }
 0xc7c   :  { %12863 = vmatpush3.msra.mxu1 %v15386_v39 }
 0xc7d   :  { %12867 = vmatprep.subr.mxu1 %v18939_v35 }
 0xc89   :  { %v1792_v17 = vpop.permute.xlu0 %1791 }
 0xc8a   :  { %v1794_v18 = vadd.f32 %v1792_v17, %v1775_v1  ;;  %v18962_v17 = vld [vmem:[#allocation59_spill] sm:$0xff] }
 0xc8c   :  { %14354 = vtanh.f32 %v1794_v18  ;;  %v18963_v18 = vld [vmem:[#allocation60_spill] sm:$0xff] }
 0xc99   :  { %v14355_v21 = vpop.eup %14354 }
 0xc9a   :  { %1798 = vrot.lane.b32.xlu1 %v14355_v21, %s18949_s27  ;;  %v18965_v21 = vld [vmem:[#allocation58_spill] sm:$0xff] }
 0xd0c   :  { %v1799_v28 = vpop.permute.xlu1 %1798 }
 0xd0d   :  { %v1801_v1 = vmul.f32 %v1799_v28, %v1796_v25  ;;  %v18967_v25 = vld [vmem:[#allocation82_spill] sm:$0xff]  ;;  %v18968_v28 = vld [vmem:[#allocation83_spill] sm:$0xff] }
 0xd0f   :  { %v15871_v24 = vadd.f32 %v1802_v34, %v1801_v1  ;;  %v18969_v34 = vld [vmem:[#allocation84_spill] sm:$0xff] }
 0xd11   :  { %v2106_v31 = vsel %vm348_vm5, %v1956_v3, %v15871_v24  ;;  %2330 = vrot.lane.b32.xlu0 %v15871_v24, %s18949_s27  ;;  %v18970_v3 = vld [vmem:[#allocation62_spill] sm:$0xff] }
 0xd12   :  { %12854 = vmatmul.mubr.msk.f32.vlgmr.msra.gmra.mxu0 %vm591_vm6, %v2106_v31 }
 0xd13   :  { %12879 = vmatpush3.msra.mxu0 %v15390_v40  ;;  %12886 = vmatprep.mubr.msk.f32.mxu0 %vm15032_vm0, %v18939_v35 }
 0xd14   :  { %12880 = vmatprep.subr.mxu0 %v18939_v35 }
 0xd15   :  { %12881 = vmatpush3.msra.mxu0 %v15394_v41 }
 0xd16   :  { %12882 = vmatprep.subr.mxu0 %v18939_v35 }
 0xd17   :  { %12883 = vmatpush3.msra.mxu0 %v15399_v42 }
 0xd18   :  { %12884 = vmatprep.subr.mxu0 %v18939_v35 }
 0xd19   :  { %12885 = vmatpush3.msra.mxu0 %v15404_v43 }
 0xd1a   :  { %12900 = vmatprep.subr.mxu0 %v18939_v35 }
 0xd35   :  { %v15902_v37 = vpop.f32.mrf.mxu1 }
 0xd37   :  { %v12836_v38 = vpop.f32.mrf.mxu1 }
 0xd83   :  { %v2331_v32 = vpop.permute.xlu0 %2330 }
 0xd84   :  { %12887 = vmatmul.mubr.msk.f32.vlgmr.msra.gmra.mxu0 %vm348_vm5, %v2331_v32 }
 0xd85   :  { %12901 = vmatpush3.msra.mxu0 %v15475_v13  ;;  %12908 = vmatprep.mubr.msk.f32.mxu0 %vm15032_vm0, %v18939_v35 }
 0xd86   :  { %12902 = vmatprep.subr.mxu0 %v18939_v35 }
 0xd87   :  { %12903 = vmatpush3.msra.mxu0 %v15480_v26 }
 0xd88   :  { %12904 = vmatprep.subr.mxu0 %v18939_v35 }
 0xd89   :  { %12905 = vmatpush3.msra.mxu0 %v15485_v27 }
 0xd8a   :  { %12906 = vmatprep.subr.mxu0 %v18939_v35 }
 0xd8b   :  { %12907 = vmatpush3.msra.mxu0 %v15490_v29 }
 0xd8c   :  { %12916 = vmatprep.subr.mxu0 %v18939_v35 }
 0xdd2   :  { %v2176_v39 = vpop.f32.mrf.mxu0 }
 0xdd3   :  { %v2177_v40 = vadd.f32 %v2176_v39, %v15416_v46  ;;  %v18971_v39 = vld [vmem:[#allocation63_spill] sm:$0xff] }
 0xdd4   :  { %v12855_v41 = vpop.f32.mrf.mxu0 }
 0xdd5   :  { %v2180_v42 = vmax.f32 %v2177_v40, 0.0  ;;  %v18972_v40 = vld [vmem:[#allocation64_spill] sm:$0xff]  ;;  %v18973_v41 = vld [vmem:[#allocation65_spill] sm:$0xff] }
 0xdd7   :  { %12865 = vmatmul.mubr.msk.f32.vlgmr.msra.gmra.mxu1 %vm348_vm5, %v2180_v42  ;;  %v18974_v42 = vld [vmem:[#allocation66_spill] sm:$0xff] }
 0xdd8   :  { %12868 = vmatpush3.msra.mxu1 %v15420_v51  ;;  %12875 = vmatprep.mubr.msk.f32.mxu1 %vm15032_vm0, %v18939_v35 }
 0xdd9   :  { %12869 = vmatprep.subr.mxu1 %v18939_v35 }
 0xdda   :  { %12870 = vmatpush3.msra.mxu1 %v15424_v52 }
 0xddb   :  { %12871 = vmatprep.subr.mxu1 %v18939_v35 }
 0xddc   :  { %12872 = vmatpush3.msra.mxu1 %v15433_v53 }
 0xddd   :  { %12873 = vmatprep.subr.mxu1 %v18939_v35 }
 0xdde   :  { %12874 = vmatpush3.msra.mxu1 %v15438_v54 }
 0xddf   :  { %12889 = vmatprep.subr.mxu1 %v18939_v35 }
 0xe44   :  { %v2400_v43 = vpop.f32.mrf.mxu0 }
 0xe45   :  { %v2401_v52 = vadd.f32 %v2400_v43, %v15445_v61 }
 0xe46   :  { %v12888_v46 = vpop.f32.mrf.mxu0 }
 0xe47   :  { %v2404_v53 = vmax.f32 %v2401_v52, 0.0  ;;  %v18975_v46 = vld [vmem:[#allocation67_spill] sm:$0xff]  ;;  %v18977_v52 = vld [vmem:[#allocation69_spill] sm:$0xff] }
 0xe97   :  { %v2250_v51 = vpop.f32.mrf.mxu1 }
 0xe98   :  { %v2251_v13 = vadd.f32 %v2250_v51, %v15442_v57 }
 0xe99   :  { %v12866_v26 = vpop.f32.mrf.mxu1 }
 0xe9a   :  { %v2254_v27 = vmax.f32 %v2251_v13, 0.0 }
 0xe9c   :  { %12876 = vmatmul.mubr.msk.f32.vlgmr.msra.gmra.mxu1 %vm348_vm5, %v2254_v27  ;;  %v18976_v27 = vld [vmem:[#allocation68_spill] sm:$0xff] }
 0xe9d   :  { %12890 = vmatpush3.msra.mxu1 %v15448_v63  ;;  %12897 = vmatprep.mubr.msk.f32.mxu1 %vm15032_vm0, %v18939_v35 }
 0xe9e   :  { %12891 = vmatprep.subr.mxu1 %v18939_v35 }
 0xe9f   :  { %12892 = vmatpush3.msra.mxu1 %v15453_v8 }
 0xea0   :  { %12893 = vmatprep.subr.mxu1 %v18939_v35 }
 0xea1   :  { %12894 = vmatpush3.msra.mxu1 %v15460_v10 }
 0xea2   :  { %12895 = vmatprep.subr.mxu1 %v18939_v35 }
 0xea3   :  { %12896 = vmatpush3.msra.mxu1 %v15465_v12 }
 0xea4   :  { %12898 = vmatmul.mubr.msk.f32.vlgmr.msra.gmra.mxu1 %vm348_vm5, %v2404_v53  ;;  %12911 = vmatprep.subr.mxu1 %v18939_v35  ;;  %v18978_v53 = vld [vmem:[#allocation70_spill] sm:$0xff] }
 0xea5   :  { %12912 = vmatpush3.msk.msra.mxu1 %vm1075_vm7, %v15509_v56  ;;  %12913 = vmatprep.mubr.msk.f32.mxu1 %vm15032_vm0, %v18939_v35 }
 0xea6   :  { %12927 = vmatprep.subr.mxu1 %v18939_v35 }
 0xf5c   :  { %v2324_v54 = vpop.f32.mrf.mxu1 }
 0xf5d   :  { %v15936_v57 = vadd.f32 %v2324_v54, %v15495_v30  ;;  %v18979_v54 = vld [vmem:[#allocation71_spill] sm:$0xff] }
 0xf5e   :  { %v12877_v61 = vpop.f32.mrf.mxu1 }
 0xf5f   :  { %18950 = vst [vmem:[#allocation94_spill] sm:$0xff] %v15936_v57  ;;  %v15939_v63 = vmax.f32 %v15936_v57, 0.0  ;;  %v18980_v61 = vld [vmem:[#allocation72_spill] sm:$0xff] }
 0xf61   :  { %18951 = vst [vmem:[#allocation95_spill] sm:$0xff] %v15939_v63  ;;  %v2552_v8 = vmul.f32 0.5, %v15939_v63 }
 0xf63   :  { %v2553_v10 = vmul.f32 1.442695, %v2552_v8  ;;  %v18981_v8 = vld [vmem:[#allocation73_spill] sm:$0xff] }
 0xf64   :  { %v2474_v12 = vpop.f32.mrf.mxu1 }
 0xf65   :  { %14356 = vpow2.f32 %v2553_v10  ;;  %v2475_v29 = vadd.f32 %v2474_v12, %v15505_v47  ;;  %v11627_v47 = vld [vmem:[%s18893_s30 + $0x8] sm:$0xff]  ;;  %v18982_v10 = vld [vmem:[#allocation74_spill] sm:$0xff]  ;;  %v18983_v12 = vld [vmem:[#allocation75_spill] sm:$0xff] }
 0xf66   :  { %v12899_v56 = vpop.f32.mrf.mxu1 }
 0xf67   :  { %12909 = vmatmul.mubr.msk.f32.vlgmr.msra.gmra.mxu0 %vm348_vm5, %v2475_v29  ;;  %v18984_v56 = vld [vmem:[#allocation76_spill] sm:$0xff] }
 0xf68   :  { %12917 = vmatpush3.msra.mxu0 %v15518_v59  ;;  %12924 = vmatprep.mubr.msk.f32.mxu0 %vm15032_vm0, %v18939_v35 }
 0xf69   :  { %12918 = vmatprep.subr.mxu0 %v18939_v35 }
 0xf6a   :  { %12919 = vmatpush3.msra.mxu0 %v15530_v45 }
 0xf6b   :  { %12920 = vmatprep.subr.mxu0 %v18939_v35 }
 0xf6c   :  { %12921 = vmatpush3.msra.mxu0 %v15535_v48  ;;  %v18953_v48 = vld [vmem:[#allocation50_spill] sm:$0xff] }
 0xf6d   :  { %12922 = vmatprep.subr.mxu0 %v18939_v35 }
 0xf6e   :  { %12923 = vmatpush3.msra.mxu0 %v15539_v49  ;;  %v18954_v49 = vld [vmem:[#allocation51_spill] sm:$0xff] }
 0xf6f   :  { %12946 = vmatprep.subr.mxu0 %v18939_v35 }
 0xf72   :  { %v14357_v30 = vpop.eup %14356 }
 0xf73   :  { %2556 = vrot.lane.b32.xlu1 %v14357_v30, %s18952_s6  ;;  %v18985_v30 = vld [vmem:[#allocation77_spill] sm:$0xff] }
 0xf77   :  { %3037 = vrot.lane.b32.xlu1 %v15798_v2, %s18947_s17 }
 0xfe5   :  { %v2557_v59 = vpop.permute.xlu1 %2556 }
 0xfe6   :  { %v2559_v58 = vmul.f32 %v11627_v47, %v2557_v59  ;;  %v2103_v47 = vadd.f32 %v15902_v37, %v18985_v30  ;;  %v18986_v59 = vld [vmem:[#allocation78_spill] sm:$0xff]  ;;  %v16052_v37 = vld [vmem:[#allocation5] sm:$0x3] }
 0xfe8   :  { %v2560_v45 = vadd.f32 %v2559_v58, %v15936_v57 }
 0xfea   :  { %12914 = vmatmul.mubr.msk.f32.vlgmr.msra.gmra.mxu1 %vm1071_vm8, %v2560_v45  ;;  %v18987_v45 = vld [vmem:[#allocation79_spill] sm:$0xff] }
 0xfeb   :  { %12928 = vmatpush3.msra.mxu1 %v15544_v50  ;;  %12943 = vmatprep.mubr.msk.f32.mxu1 %vm15032_vm0, %v18939_v35  ;;  %v18956_v50 = vld [vmem:[#allocation53_spill] sm:$0xff] }
 0xfec   :  { %12929 = vmatprep.subr.mxu1 %v18939_v35 }
 0xfed   :  { %12930 = vmatpush3.msra.mxu1 %v15547_v55  ;;  %v18958_v55 = vld [vmem:[#allocation56_spill] sm:$0xff] }
 0xfee   :  { %12931 = vmatprep.subr.mxu1 %v18939_v35 }
 0xfef   :  { %12932 = vmatpush3.msra.mxu1 %v18953_v48  ;;  %v3038_v48 = vpop.permute.xlu1 %3037 }
 0xff0   :  { %12933 = vmatprep.subr.mxu1 %v18939_v35 }
 0xff1   :  { %12934 = vmatpush3.msra.mxu1 %v18954_v49 }
 0xff2   :  { %12935 = vmatprep.subr.mxu1 %v18939_v35 }
 0xff3   :  { %12936 = vmatpush3.msra.mxu1 %v18955_v36  ;;  %v18988_v36 = vld [vmem:[#allocation80_spill] sm:$0xff] }
 0xff4   :  { %12937 = vmatprep.subr.mxu1 %v18939_v35 }
 0xff5   :  { %12938 = vmatpush3.msra.mxu1 %v18956_v50 }
 0xff6   :  { %12939 = vmatprep.subr.mxu1 %v18939_v35 }
 0xff7   :  { %12940 = vmatpush3.msra.mxu1 %v18957_v33 }
 0xff8   :  { %12941 = vmatprep.subr.mxu1 %v18939_v35 }
 0xff9   :  { %12942 = vmatpush3.msra.mxu1 %v18958_v55 }
 0xffa   :  { %12968 = vmatprep.subr.mxu1 %v18939_v35 }
0x1027   :  { %v15978_v0 = vpop.f32.mrf.mxu0 }
0x1028   :  { %18959 = vst [vmem:[#allocation50_spill] sm:$0xff] %v15978_v0 }
0x1029   :  { %v12910_v4 = vpop.f32.mrf.mxu0 }
0x10aa   :  { %v2630_v5 = vpop.f32.mrf.mxu1 }
0x10ab   :  { %v2631_v9 = vadd.f32 %v2630_v5, %v18960_v6 }
0x10ac   :  { %v12915_v14 = vpop.f32.mrf.mxu1 }
0x10ad   :  { %v2634_v15 = vmax.f32 %v2631_v9, 0.0 }
0x10af   :  { %12925 = vmatmul.mubr.msk.f32.vlgmr.msra.gmra.mxu0 %vm348_vm5, %v2634_v15 }
0x10b0   :  { %12947 = vmatpush3.msra.mxu0 %v18961_v16  ;;  %12954 = vmatprep.mubr.msk.f32.mxu0 %vm15032_vm0, %v18939_v35  ;;  %v18989_v16 = vld [vmem:[#allocation85_spill] sm:$0xff] }
0x10b1   :  { %12948 = vmatprep.subr.mxu0 %v18939_v35 }
0x10b2   :  { %12949 = vmatpush3.msra.mxu0 %v18962_v17 }
0x10b3   :  { %12950 = vmatprep.subr.mxu0 %v18939_v35 }
0x10b4   :  { %12951 = vmatpush3.msra.mxu0 %v18963_v18 }
0x10b5   :  { %12952 = vmatprep.subr.mxu0 %v18939_v35 }
0x10b6   :  { %12953 = vmatpush3.msra.mxu0 %v18964_v19 }
0x10b7   :  { %12957 = vmatprep.subr.mxu0 %v18939_v35 }
0x116f   :  { %v2704_v20 = vpop.f32.mrf.mxu0 }
0x1170   :  { %v2705_v22 = vadd.f32 %v2704_v20, %v18965_v21 }
0x1171   :  { %v12926_v23 = vpop.f32.mrf.mxu0 }
0x1172   :  { %v2708_v11 = vsel %vm348_vm5, %v2705_v22, %v15871_v24  ;;  %3033 = vrot.lane.b32.xlu0 %v2705_v22, %s18947_s17  ;;  %v18991_v23 = vld [vmem:[#allocation87_spill] sm:$0xff] }
0x1173   :  { %12944 = vmatmul.mubr.msk.f32.vlgmr.msra.gmra.mxu1 %vm591_vm6, %v2708_v11  ;;  %v18992_v11 = vld [vmem:[#allocation88_spill] sm:$0xff] }
0x1174   :  { %12969 = vmatpush3.msra.mxu1 %v18966_v60  ;;  %12976 = vmatprep.mubr.msk.f32.mxu1 %vm15032_vm0, %v18939_v35  ;;  %v18993_v60 = vld [vmem:[#allocation89_spill] sm:$0xff] }
0x1175   :  { %12970 = vmatprep.subr.mxu1 %v18939_v35 }
0x1176   :  { %12971 = vmatpush3.msra.mxu1 %v18967_v25  ;;  %v18994_v25 = vld [vmem:[#allocation90_spill] sm:$0xff] }
0x1177   :  { %12972 = vmatprep.subr.mxu1 %v18939_v35 }
0x1178   :  { %12973 = vmatpush3.msra.mxu1 %v18968_v28  ;;  %v18995_v28 = vld [vmem:[#allocation91_spill] sm:$0xff] }
0x1179   :  { %12974 = vmatprep.subr.mxu1 %v18939_v35 }
0x117a   :  { %12975 = vmatpush3.msra.mxu1 %v18969_v34 }
0x117b   :  { %13006 = vmatprep.subr.mxu1 %v18939_v35 }
0x11e4   :  { %v3034_v29 = vpop.permute.xlu0 %3033 }
0x11e5   :  { %v3036_v58 = vsel %vm348_vm5, %v2103_v47, %v3034_v29 }
0x11e6   :  { %v3040_v49 = vsel %vm591_vm6, %v3036_v58, %v3038_v48 }
0x1233   :  { %v2778_v1 = vpop.f32.mrf.mxu1 }
0x1234   :  { %v2779_v31 = vadd.f32 %v2778_v1, %v18970_v3  ;;  %v18996_v1 = vld [vmem:[#allocation92_spill] sm:$0xff]  ;;  %v18997_v3 = vld [vmem:[#allocation93_spill] sm:$0xff] }
0x1235   :  { %v12945_v32 = vpop.f32.mrf.mxu1 }
0x1236   :  { %v2782_v38 = vmax.f32 %v2779_v31, 0.0 }
0x1238   :  { %12955 = vmatmul.mubr.msk.f32.vlgmr.msra.gmra.mxu0 %vm348_vm5, %v2782_v38 }
0x1239   :  { %12958 = vmatpush3.msra.mxu0 %v18971_v39  ;;  %12965 = vmatprep.mubr.msk.f32.mxu0 %vm15032_vm0, %v18939_v35 }
0x123a   :  { %12959 = vmatprep.subr.mxu0 %v18939_v35 }
0x123b   :  { %12960 = vmatpush3.msra.mxu0 %v18972_v40 }
0x123c   :  { %12961 = vmatprep.subr.mxu0 %v18939_v35 }
0x123d   :  { %12962 = vmatpush3.msra.mxu0 %v18973_v41  ;;  %v18998_v41 = vld [vmem:[#allocation86_spill] sm:$0xff] }
0x123e   :  { %12963 = vmatprep.subr.mxu0 %v18939_v35 }
0x123f   :  { %12964 = vmatpush3.msra.mxu0 %v18974_v42  ;;  %v1555_v42 = vsub.f32 0.0, %v18998_v41 }
0x1240   :  { %12979 = vmatprep.subr.mxu0 %v18939_v35 }
0x12f8   :  { %v2852_v43 = vpop.f32.mrf.mxu0 }
0x12f9   :  { %v2853_v51 = vadd.f32 %v2852_v43, %v18975_v46  ;;  %v16090_v46 = vld [vmem:[%s15218_s14] sm:$0xff] }
0x12fa   :  { %v12956_v13 = vpop.f32.mrf.mxu0 }
0x12fb   :  { %v2856_v26 = vmax.f32 %v2853_v51, 0.0  ;;  %v1556_v51 = vmul.f32 1.442695, %v1555_v42  ;;  %v16189_v42 = vld [vmem:[%s18879_s29 + $0x18] sm:$0xff] }
0x12fd   :  { %12966 = vmatmul.mubr.msk.f32.vlgmr.msra.gmra.mxu0 %vm348_vm5, %v2856_v26  ;;  %v14491_v26 = vld [vmem:[%s15048_s5] sm:$0xff] }
0x12fe   :  { %12980 = vmatpush3.msra.mxu0 %v18976_v27  ;;  %13003 = vmatprep.mubr.msk.f32.mxu0 %vm15032_vm0, %v18939_v35 }
0x12ff   :  { %12981 = vmatprep.subr.mxu0 %v18939_v35 }
0x1300   :  { %12982 = vmatpush3.msra.mxu0 %v18977_v52 }
0x1301   :  { %12983 = vmatprep.subr.mxu0 %v18939_v35 }
0x1302   :  { %12984 = vmatpush3.msra.mxu0 %v18978_v53 }
0x1303   :  { %12985 = vmatprep.subr.mxu0 %v18939_v35 }
0x1304   :  { %12986 = vmatpush3.msra.mxu0 %v18979_v54 }
0x1305   :  { %12987 = vmatprep.subr.mxu0 %v18939_v35 }
0x1306   :  { %12988 = vmatpush3.msra.mxu0 %v18980_v61 }
0x1307   :  { %12989 = vmatprep.subr.mxu0 %v18939_v35 }
0x1308   :  { %12990 = vmatpush3.msra.mxu0 %v18981_v8 }
0x1309   :  { %12991 = vmatprep.subr.mxu0 %v18939_v35 }
0x130a   :  { %12992 = vmatpush3.msra.mxu0 %v18982_v10  ;;  %v1550_v10 = vmul.f32 0.5, %v18998_v41  ;;  %v11653_v41 = vld [vmem:[%s15053_s9 + $0x10] sm:$0xff] }
0x130b   :  { %12993 = vmatprep.subr.mxu0 %v18939_v35 }
0x130c   :  { %12994 = vmatpush3.msra.mxu0 %v18983_v12 }
0x130d   :  { %12995 = vmatprep.subr.mxu0 %v18939_v35 }
0x130e   :  { %12996 = vmatpush3.msra.mxu0 %v18984_v56 }
0x130f   :  { %12997 = vmatprep.subr.mxu0 %v18939_v35 }
0x1310   :  { %12998 = vmatpush3.msra.mxu0 %v18986_v59  ;;  %v1551_v59 = vsub.f32 -0.9189385, %v1550_v10 }
0x1311   :  { %12999 = vmatprep.subr.mxu0 %v18939_v35 }
0x1312   :  { %13000 = vmatpush3.msra.mxu0 %v18987_v45 }
0x1313   :  { %13001 = vmatprep.subr.mxu0 %v18939_v35 }
0x1314   :  { %13002 = vmatpush3.msra.mxu0 %v18988_v36 }
0x1315   :  { %13004 = vmatmul.mubr.msk.f32.vlgmr.msra.gmra.mxu0 %vm1594_vm9, %v3040_v49  ;;  %13041 = vmatprep.subr.mxu0 %v18939_v35 }
0x1316   :  { %13042 = vmatpush3.msk.msra.mxu0 %vm428_vm3, %v16052_v37  ;;  %13043 = vmatprep.mubr.msk.f32.mxu0 %vm15032_vm0, %v18939_v35 }
0x1317   :  { %13046 = vmatprep.subr.mxu0 %v18939_v35 }
0x1319   :  { %13044 = vmatmul.mubr.msk.f32.vlgmr.msra.gmra.mxu0 %vm424_vm4, %v11653_v41 }
0x131a   :  { %13047 = vmatpush3.msra.mxu0 %v16189_v42  ;;  %13054 = vmatprep.mubr.msk.f32.mxu0 %vm15032_vm0, %v18939_v35 }
0x131b   :  { %13048 = vmatprep.subr.mxu0 %v18939_v35 }
0x13bd   :  { %v2926_v50 = vpop.f32.mrf.mxu0 }
0x13be   :  { %v2927_v17 = vadd.f32 %v2926_v50, %v18989_v16 }
0x13bf   :  { %v12967_v33 = vpop.f32.mrf.mxu0 }
0x13c0   :  { %v2930_v19 = vmax.f32 %v2927_v17, 0.0  ;;  %v16103_v33 = vld [vmem:[#allocation2] sm:$0x7] }
0x13c1   :  { %v16139_v17 = vld [vmem:[%s15068_s21] sm:$0xff] }
0x13c2   :  { %v3011_v43 = vsub.f32 0.0, %v2930_v19  ;;  %v3006_v12 = vmul.f32 0.5, %v2930_v19 }
0x13c4   :  { %v3012_v13 = vmul.f32 1.442695, %v3011_v43  ;;  %v3007_v58 = vsub.f32 -0.9189385, %v3006_v12  ;;  %v16196_v43 = vld [vmem:[%s18879_s29 + $0x10] sm:$0xff]  ;;  %v16217_v12 = vld [vmem:[%s18881_s12 + $0x18] sm:$0xff] }
0x13c5   :  { %13049 = vmatpush3.msra.mxu0 %v16196_v43 }
0x13c6   :  { %13050 = vmatprep.subr.mxu0 %v18939_v35 }
0x13d5   :  { %v3110_v55 = vpop.f32.mrf.mxu0 }
0x13d6   :  { %3121 = vrot.lane.b32.xlu0 %v3110_v55, %s18947_s17  ;;  %v11649_v5 = vmul.f32 -1.442695, %v3110_v55 }
0x13d7   :  { %v13005_v4 = vpop.f32.mrf.mxu0 }
0x13d8   :  { %14358 = vpow2.f32 %v11649_v5  ;;  %v16116_v4 = vld [vmem:[%s15073_s25 + $0x18] sm:$0xff]  ;;  %v16123_v5 = vld [vmem:[%s15073_s25 + $0x10] sm:$0xff] }
0x13e5   :  { %v14359_v6 = vpop.eup %14358 }
0x13e6   :  { %v3117_v9 = vadd.f32 1.0, %v14359_v6  ;;  %v16128_v6 = vld [vmem:[%s15073_s25 + $0x8] sm:$0xff] }
0x13e8   :  { %14360 = vrcp.f32 %v3117_v9  ;;  %v16133_v9 = vld [vmem:[%s15073_s25] sm:$0xff] }
0x13f5   :  { %v14361_v14 = vpop.eup %14360 }
0x13f6   :  { %v3131_v31 = vsub.f32 1.0, %v14361_v14  ;;  %v3137_v38 = vmul.f32 %v14361_v14, %v15798_v2 }
0x1448   :  { %v3122_v15 = vpop.permute.xlu0 %3121 }
0x1449   :  { %v3124_v18 = vmul.f32 %v14361_v14, %v3122_v15 }
0x144b   :  { %3126 = vrot.lane.b32.xlu1 %v3124_v18, %s18948_s4 }
0x144f   :  { %2932 = vrot.lane.b32.xlu1 %v2930_v19, %s18990_s22 }
0x14bd   :  { %v3127_v20 = vpop.permute.xlu1 %3126 }
0x14be   :  { %v3129_v21 = vadd.f32 %v3127_v20, %v3110_v55  ;;  %v16110_v55 = vld [vmem:[%s15048_s5 + $0x10] sm:$0xff] }
0x14c0   :  { %14362 = vtanh.f32 %v3129_v21  ;;  %v16144_v21 = vld [vmem:[%s15123_s20 + $0x38] sm:$0xff] }
0x14c1   :  { %v2933_v22 = vpop.permute.xlu1 %2932  ;;  %14364 = vpow2.f32 %v1556_v51  ;;  %v16201_v51 = vld [vmem:[%s18879_s29 + $0x8] sm:$0xff] }
0x14c2   :  { %12977 = vmatmul.mubr.msk.f32.vlgmr.msra.gmra.mxu1 %vm348_vm5, %v2933_v22  ;;  %14366 = vpow2.f32 %v3012_v13  ;;  %v16151_v22 = vld [vmem:[%s15123_s20 + $0x30] sm:$0xff]  ;;  %13051 = vmatpush3.msra.mxu0 %v16201_v51 }
0x14c3   :  { %13007 = vmatpush3.msra.mxu1 %v18991_v23  ;;  %13022 = vmatprep.mubr.msk.f32.mxu1 %vm15032_vm0, %v18939_v35  ;;  %v16156_v23 = vld [vmem:[%s15123_s20 + $0x28] sm:$0xff] }
0x14c4   :  { %13008 = vmatprep.subr.mxu1 %v18939_v35  ;;  %13052 = vmatprep.subr.mxu0 %v18939_v35 }
0x14c5   :  { %13009 = vmatpush3.msra.mxu1 %v18992_v11  ;;  %v16161_v11 = vld [vmem:[%s15123_s20 + $0x20] sm:$0xff] }
0x14c6   :  { %13010 = vmatprep.subr.mxu1 %v18939_v35 }
0x14c7   :  { %13011 = vmatpush3.msra.mxu1 %v18993_v60  ;;  %v16166_v60 = vld [vmem:[%s15123_s20 + $0x18] sm:$0xff] }
0x14c8   :  { %13012 = vmatprep.subr.mxu1 %v18939_v35 }
0x14c9   :  { %13013 = vmatpush3.msra.mxu1 %v18994_v25  ;;  %v16171_v25 = vld [vmem:[%s15123_s20 + $0x10] sm:$0xff] }
0x14ca   :  { %13014 = vmatprep.subr.mxu1 %v18939_v35 }
0x14cb   :  { %13015 = vmatpush3.msra.mxu1 %v18995_v28  ;;  %v16176_v28 = vld [vmem:[%s15123_s20 + $0x8] sm:$0xff] }
0x14cc   :  { %13016 = vmatprep.subr.mxu1 %v18939_v35 }
0x14cd   :  { %v14363_v34 = vpop.eup %14362  ;;  %13017 = vmatpush3.msra.mxu1 %v18996_v1 }
0x14ce   :  { %3133 = vrot.lane.b32.xlu0 %v14363_v34, %s18949_s27  ;;  %13018 = vmatprep.subr.mxu1 %v18939_v35  ;;  %v14365_v56 = vpop.eup %14364  ;;  %v16181_v34 = vld [vmem:[%s15123_s20] sm:$0xff] }
0x14cf   :  { %13019 = vmatpush3.msra.mxu1 %v18997_v3  ;;  %v14367_v47 = vpop.eup %14366 }
0x14d0   :  { %13020 = vmatprep.subr.mxu1 %v18939_v35 }
0x14d1   :  { %13021 = vmatpush3.msra.mxu1 %v15794_v62  ;;  %v1547_v62 = vadd.f32 %v15802_v7, %v16090_v46 }
0x14d2   :  { %13025 = vmatprep.subr.mxu1 %v18939_v35 }
0x14d3   :  { %v1552_v27 = vsub.f32 %v14491_v26, %v1547_v62  ;;  %v16206_v62 = vld [vmem:[%s18879_s29] sm:$0xff] }
0x14d4   :  { %13053 = vmatpush3.msra.mxu0 %v16206_v62 }
0x14d5   :  { %v1553_v2 = vmul.f32 %v1552_v27, %v1552_v27  ;;  %13076 = vmatprep.subr.mxu0 %v18939_v35 }
0x14d7   :  { %v1554_v61 = vmul.f32 0.5, %v1553_v2 }
0x14d9   :  { %v1558_v7 = vmul.f32 %v14365_v56, %v1554_v61 }
0x14db   :  { %v1559_v48 = vsub.f32 %v1551_v59, %v1558_v7  ;;  %v16224_v7 = vld [vmem:[%s18881_s12 + $0x10] sm:$0xff]  ;;  %v16229_v59 = vld [vmem:[%s18882_s23] sm:$0xff] }
0x1540   :  { %v3134_v32 = vpop.permute.xlu0 %3133 }
0x1541   :  { %v3136_v39 = vmul.f32 %v3134_v32, %v3131_v31 }
0x1543   :  { %v16084_v40 = vadd.f32 %v3137_v38, %v3136_v39 }
0x1545   :  { %3140 = vrot.lane.b32.xlu0 %v16084_v40, %s18949_s27 }
0x1582   :  { %v3002_v52 = vpop.f32.mrf.mxu1 }
0x1583   :  { %v3003_v53 = vadd.f32 %v3002_v52, %v16090_v46 }
0x1584   :  { %v12978_v54 = vpop.f32.mrf.mxu1 }
0x1585   :  { %v3008_v8 = vsub.f32 %v15811_v44, %v3003_v53  ;;  %v3466_v53 = vpop.f32.mrf.mxu0  ;;  %v16212_v54 = vld [vmem:[%s18880_s8] sm:$0xff] }
0x1586   :  { %v3467_v61 = vadd.f32 %v16212_v54, %v3466_v53 }
0x1587   :  { %v3009_v29 = vmul.f32 %v3008_v8, %v3008_v8  ;;  %v13045_v8 = vpop.f32.mrf.mxu0 }
0x1588   :  { %v3470_v10 = vmax.f32 %v3467_v61, 0.0 }
0x1589   :  { %v3010_v30 = vmul.f32 0.5, %v3009_v29 }
0x158a   :  { %13055 = vmatmul.mubr.msk.f32.vlgmr.msra.gmra.mxu0 %vm348_vm5, %v3470_v10  ;;  %v16324_v10 = vld [vmem:[#allocation11] sm:$0xff] }
0x158b   :  { %v3014_v45 = vmul.f32 %v14367_v47, %v3010_v30  ;;  %13077 = vmatpush3.msra.mxu0 %v16217_v12  ;;  %13084 = vmatprep.mubr.msk.f32.mxu0 %vm15032_vm0, %v18939_v35 }
0x158c   :  { %13078 = vmatprep.subr.mxu0 %v18939_v35 }
0x158d   :  { %v3015_v49 = vsub.f32 %v3007_v58, %v3014_v45  ;;  %13079 = vmatpush3.msra.mxu0 %v16224_v7  ;;  %v16234_v45 = vld [vmem:[%s18881_s12 + $0x8] sm:$0xff] }
0x158e   :  { %13080 = vmatprep.subr.mxu0 %v18939_v35 }
0x158f   :  { %v16098_v36 = vadd.f32 %v3015_v49, %v1559_v48  ;;  %13081 = vmatpush3.msra.mxu0 %v16234_v45  ;;  %v16241_v49 = vld [vmem:[%s18881_s12] sm:$0xff] }
0x1590   :  { %13082 = vmatprep.subr.mxu0 %v18939_v35 }
0x1591   :  { %13083 = vmatpush3.msra.mxu0 %v16241_v49 }
0x1592   :  { %13087 = vmatprep.subr.mxu0 %v18939_v35 }
0x15b7   :  { %v3141_v50 = vpop.permute.xlu0 %3140 }
0x15b8   :  { %v3143_v44 = vsel %vm348_vm5, %v3141_v50, %v15871_v24  ;;  %v16251_v50 = vld [vmem:[%s18883_s26 + $0x18] sm:$0xff] }
0x15b9   :  { %13023 = vmatmul.mubr.msk.f32.vlgmr.msra.gmra.mxu1 %vm591_vm6, %v3143_v44  ;;  %v16258_v44 = vld [vmem:[%s18883_s26 + $0x10] sm:$0xff] }
0x15ba   :  { %13026 = vmatpush3.msk.msra.mxu1 %vm268_vm1, %v16103_v33  ;;  %13027 = vmatprep.mubr.msk.f32.mxu1 %vm15032_vm0, %v18939_v35 }
0x15bb   :  { %13030 = vmatprep.subr.mxu1 %v18939_v35 }
0x15bd   :  { %13028 = vmatmul.mubr.msk.f32.vlgmr.msra.gmra.mxu1 %vm264_vm2, %v16110_v55 }
0x15be   :  { %13031 = vmatpush3.msra.mxu1 %v16116_v4  ;;  %13038 = vmatprep.mubr.msk.f32.mxu1 %vm15032_vm0, %v18939_v35 }
0x15bf   :  { %13032 = vmatprep.subr.mxu1 %v18939_v35 }
0x15c0   :  { %13033 = vmatpush3.msra.mxu1 %v16123_v5 }
0x15c1   :  { %13034 = vmatprep.subr.mxu1 %v18939_v35 }
0x15c2   :  { %13035 = vmatpush3.msra.mxu1 %v16128_v6 }
0x15c3   :  { %13036 = vmatprep.subr.mxu1 %v18939_v35 }
0x15c4   :  { %13037 = vmatpush3.msra.mxu1 %v16133_v9 }
0x15c5   :  { %13057 = vmatprep.subr.mxu1 %v18939_v35 }
0x1679   :  { %v3213_v14 = vpop.f32.mrf.mxu1 }
0x167a   :  { %3224 = vrot.lane.b32.xlu1 %v3213_v14, %s18947_s17  ;;  %v11651_v1 = vmul.f32 -1.442695, %v3213_v14 }
0x167b   :  { %v13024_v15 = vpop.f32.mrf.mxu1 }
0x167c   :  { %14368 = vpow2.f32 %v11651_v1  ;;  %v16268_v15 = vld [vmem:[%s18883_s26] sm:$0xff] }
0x167d   :  { %v3319_v16 = vpop.f32.mrf.mxu1  ;;  %v16291_v1 = vld [vmem:[%s18887_s1] sm:$0xff] }
0x167e   :  { %v3320_v18 = vadd.f32 %v16139_v17, %v3319_v16 }
0x167f   :  { %v13029_v19 = vpop.f32.mrf.mxu1 }
0x1680   :  { %v3323_v20 = vmax.f32 %v3320_v18, 0.0  ;;  %v16274_v18 = vld [vmem:[%s18887_s1 + $0x18] sm:$0xff]  ;;  %v16281_v19 = vld [vmem:[%s18887_s1 + $0x10] sm:$0xff] }
0x1682   :  { %13039 = vmatmul.mubr.msk.f32.vlgmr.msra.gmra.mxu1 %vm348_vm5, %v3323_v20  ;;  %v16286_v20 = vld [vmem:[%s18887_s1 + $0x8] sm:$0xff] }
0x1683   :  { %13058 = vmatpush3.msra.mxu1 %v16144_v21  ;;  %13073 = vmatprep.mubr.msk.f32.mxu1 %vm15032_vm0, %v18939_v35 }
0x1684   :  { %13059 = vmatprep.subr.mxu1 %v18939_v35 }
0x1685   :  { %13060 = vmatpush3.msra.mxu1 %v16151_v22 }
0x1686   :  { %13061 = vmatprep.subr.mxu1 %v18939_v35 }
0x1687   :  { %13062 = vmatpush3.msra.mxu1 %v16156_v23 }
0x1688   :  { %13063 = vmatprep.subr.mxu1 %v18939_v35 }
0x1689   :  { %13064 = vmatpush3.msra.mxu1 %v16161_v11  ;;  %v14369_v3 = vpop.eup %14368 }
0x168a   :  { %13065 = vmatprep.subr.mxu1 %v18939_v35  ;;  %v3220_v31 = vadd.f32 1.0, %v14369_v3  ;;  %v16295_v3 = vpop.f32.mrf.mxu0 }
0x168b   :  { %13066 = vmatpush3.msra.mxu1 %v16166_v60 }
0x168c   :  { %13067 = vmatprep.subr.mxu1 %v18939_v35  ;;  %14370 = vrcp.f32 %v3220_v31  ;;  %v13056_v31 = vpop.f32.mrf.mxu0 }
0x168d   :  { %13068 = vmatpush3.msra.mxu1 %v16171_v25  ;;  %v16344_v31 = vld [vmem:[%s18886_s24 + $0x8] sm:$0xff] }
0x168e   :  { %13069 = vmatprep.subr.mxu1 %v18939_v35 }
0x168f   :  { %13070 = vmatpush3.msra.mxu1 %v16176_v28 }
0x1690   :  { %13071 = vmatprep.subr.mxu1 %v18939_v35 }
0x1691   :  { %13072 = vmatpush3.msra.mxu1 %v16181_v34 }
0x1692   :  { %13098 = vmatprep.subr.mxu1 %v18939_v35 }
0x1699   :  { %v14371_v32 = vpop.eup %14370 }
0x169a   :  { %v3234_v29 = vsub.f32 1.0, %v14371_v32  ;;  %v3240_v30 = vmul.f32 %v14371_v32, %v15871_v24 }
0x16ec   :  { %v3225_v38 = vpop.permute.xlu1 %3224 }
0x16ed   :  { %v3227_v39 = vmul.f32 %v14371_v32, %v3225_v38  ;;  %v16298_v38 = vld [vmem:[%s18884_s28] sm:$0xff] }
0x16ef   :  { %3229 = vrot.lane.b32.xlu0 %v3227_v39, %s18948_s4 }
0x1742   :  { %v3393_v27 = vpop.f32.mrf.mxu1 }
0x1743   :  { %v3394_v58 = vadd.f32 %v16229_v59, %v3393_v27  ;;  %v16310_v27 = vld [vmem:[%s18885_s3 + $0x10] sm:$0xff] }
0x1744   :  { %v13040_v2 = vpop.f32.mrf.mxu1 }
0x1745   :  { %v16315_v2 = vld [vmem:[%s18885_s3 + $0x8] sm:$0xff] }
0x1761   :  { %v3230_v13 = vpop.permute.xlu0 %3229 }
0x1762   :  { %v3232_v26 = vadd.f32 %v3230_v13, %v3213_v14  ;;  %v16263_v14 = vld [vmem:[%s18883_s26 + $0x8] sm:$0xff] }
0x1764   :  { %14372 = vtanh.f32 %v3232_v26  ;;  %v16303_v26 = vld [vmem:[%s18885_s3 + $0x18] sm:$0xff] }
0x1771   :  { %v14373_v52 = vpop.eup %14372 }
0x1772   :  { %3236 = vrot.lane.b32.xlu1 %v14373_v52, %s18949_s27  ;;  %v16320_v52 = vld [vmem:[%s18885_s3] sm:$0xff] }
0x17e4   :  { %v3237_v56 = vpop.permute.xlu1 %3236 }
0x17e5   :  { %v3239_v47 = vmul.f32 %v3237_v56, %v3234_v29 }
0x17e7   :  { %v16237_v48 = vadd.f32 %v3240_v30, %v3239_v47  ;;  %v16329_v47 = vld [vmem:[%s18886_s24 + $0x18] sm:$0xff] }
0x17e9   :  { %v3544_v24 = vsel %vm348_vm5, %v3394_v58, %v16237_v48  ;;  %3768 = vrot.lane.b32.xlu0 %v16237_v48, %s18949_s27  ;;  %v16334_v58 = vld [vmem:[#allocation13] sm:$0xff] }
0x17ea   :  { %13074 = vmatmul.mubr.msk.f32.vlgmr.msra.gmra.mxu1 %vm591_vm6, %v3544_v24 }
0x17eb   :  { %13099 = vmatpush3.msra.mxu1 %v16251_v50  ;;  %13106 = vmatprep.mubr.msk.f32.mxu1 %vm15032_vm0, %v18939_v35 }
0x17ec   :  { %13100 = vmatprep.subr.mxu1 %v18939_v35 }
0x17ed   :  { %13101 = vmatpush3.msra.mxu1 %v16258_v44 }
0x17ee   :  { %13102 = vmatprep.subr.mxu1 %v18939_v35 }
0x17ef   :  { %13103 = vmatpush3.msra.mxu1 %v16263_v14 }
0x17f0   :  { %13104 = vmatprep.subr.mxu1 %v18939_v35 }
0x17f1   :  { %13105 = vmatpush3.msra.mxu1 %v16268_v15 }
0x17f2   :  { %13120 = vmatprep.subr.mxu1 %v18939_v35 }
0x185b   :  { %v3769_v16 = vpop.permute.xlu0 %3768 }
0x185c   :  { %13107 = vmatmul.mubr.msk.f32.vlgmr.msra.gmra.mxu1 %vm348_vm5, %v3769_v16  ;;  %v16339_v16 = vld [vmem:[%s18886_s24 + $0x10] sm:$0xff] }
0x185d   :  { %13121 = vmatpush3.msra.mxu1 %v16274_v18  ;;  %13128 = vmatprep.mubr.msk.f32.mxu1 %vm15032_vm0, %v18939_v35 }
0x185e   :  { %13122 = vmatprep.subr.mxu1 %v18939_v35 }
0x185f   :  { %13123 = vmatpush3.msra.mxu1 %v16281_v19 }
0x1860   :  { %13124 = vmatprep.subr.mxu1 %v18939_v35 }
0x1861   :  { %13125 = vmatpush3.msra.mxu1 %v16286_v20 }
0x1862   :  { %13126 = vmatprep.subr.mxu1 %v18939_v35 }
0x1863   :  { %13127 = vmatpush3.msra.mxu1 %v16291_v1 }
0x1864   :  { %13136 = vmatprep.subr.mxu1 %v18939_v35 }
0x18aa   :  { %v3614_v32 = vpop.f32.mrf.mxu1 }
0x18ab   :  { %v3615_v39 = vadd.f32 %v16298_v38, %v3614_v32 }
0x18ac   :  { %v13075_v41 = vpop.f32.mrf.mxu1 }
0x18ad   :  { %v3618_v13 = vmax.f32 %v3615_v39, 0.0  ;;  %v16349_v39 = vld [vmem:[%s18886_s24] sm:$0xff]  ;;  %v16354_v41 = vld [vmem:[#allocation8] sm:$0xf] }
0x18ae   :  { %18999 = vst [vmem:[#allocation51_spill] sm:$0xff] %v16349_v39  ;;  %19000 = vst [vmem:[#allocation52_spill] sm:$0xff] %v16354_v41 }
0x18af   :  { %13085 = vmatmul.mubr.msk.f32.vlgmr.msra.gmra.mxu0 %vm348_vm5, %v3618_v13 }
0x18b0   :  { %13088 = vmatpush3.msra.mxu0 %v16303_v26  ;;  %13095 = vmatprep.mubr.msk.f32.mxu0 %vm15032_vm0, %v18939_v35 }
0x18b1   :  { %13089 = vmatprep.subr.mxu0 %v18939_v35 }
0x18b2   :  { %13090 = vmatpush3.msra.mxu0 %v16310_v27 }
0x18b3   :  { %13091 = vmatprep.subr.mxu0 %v18939_v35 }
0x18b4   :  { %13092 = vmatpush3.msra.mxu0 %v16315_v2 }
0x18b5   :  { %13093 = vmatprep.subr.mxu0 %v18939_v35 }
0x18b6   :  { %13094 = vmatpush3.msra.mxu0 %v16320_v52 }
0x18b7   :  { %13109 = vmatprep.subr.mxu0 %v18939_v35 }
0x191c   :  { %v3838_v53 = vpop.f32.mrf.mxu1 }
0x191d   :  { %v3839_v24 = vadd.f32 %v16334_v58, %v3838_v53  ;;  %v16362_v53 = vld [vmem:[%s18888_s2] sm:$0xff] }
0x191e   :  { %v13108_v61 = vpop.f32.mrf.mxu1  ;;  %19001 = vst [vmem:[#allocation53_spill] sm:$0xff] %v16362_v53 }
0x191f   :  { %v3842_v32 = vmax.f32 %v3839_v24, 0.0 }
0x196f   :  { %v3688_v8 = vpop.f32.mrf.mxu0 }
0x1970   :  { %v3689_v29 = vadd.f32 %v16324_v10, %v3688_v8 }
0x1971   :  { %v13086_v56 = vpop.f32.mrf.mxu0 }
0x1972   :  { %v3692_v30 = vmax.f32 %v3689_v29, 0.0 }
0x1974   :  { %13096 = vmatmul.mubr.msk.f32.vlgmr.msra.gmra.mxu0 %vm348_vm5, %v3692_v30 }
0x1975   :  { %13110 = vmatpush3.msra.mxu0 %v16329_v47  ;;  %13117 = vmatprep.mubr.msk.f32.mxu0 %vm15032_vm0, %v18939_v35 }
0x1976   :  { %13111 = vmatprep.subr.mxu0 %v18939_v35 }
0x1977   :  { %13112 = vmatpush3.msra.mxu0 %v16339_v16 }
0x1978   :  { %13113 = vmatprep.subr.mxu0 %v18939_v35 }
0x1979   :  { %13114 = vmatpush3.msra.mxu0 %v16344_v31 }
0x197a   :  { %13115 = vmatprep.subr.mxu0 %v18939_v35 }
0x197b   :  { %13116 = vmatpush3.msra.mxu0 %v16349_v39 }
0x197c   :  { %13118 = vmatmul.mubr.msk.f32.vlgmr.msra.gmra.mxu0 %vm348_vm5, %v3842_v32  ;;  %13131 = vmatprep.subr.mxu0 %v18939_v35  ;;  %v16372_v32 = vld [vmem:[%s18889_s7] sm:$0xff] }
0x197d   :  { %13132 = vmatpush3.msk.msra.mxu0 %vm1075_vm7, %v16354_v41  ;;  %13133 = vmatprep.mubr.msk.f32.mxu0 %vm15032_vm0, %v18939_v35  ;;  %19004 = vst [vmem:[#allocation54_spill] sm:$0xff] %v16372_v32 }
0x197e   :  { %13147 = vmatprep.subr.mxu0 %v18939_v35 }
0x1a34   :  { %v3762_v13 = vpop.f32.mrf.mxu0 }
0x1a35   :  { %v16365_v61 = vadd.f32 %v16362_v53, %v3762_v13  ;;  %v16377_v13 = vld [vmem:[%s18892_s10 + $0x18] sm:$0xff] }
0x1a36   :  { %v13097_v8 = vpop.f32.mrf.mxu0  ;;  %19005 = vst [vmem:[#allocation57_spill] sm:$0xff] %v16377_v13 }
0x1a37   :  { %19002 = vst [vmem:[#allocation55_spill] sm:$0xff] %v16365_v61  ;;  %v16368_v29 = vmax.f32 %v16365_v61, 0.0  ;;  %v16384_v8 = vld [vmem:[%s18892_s10 + $0x10] sm:$0xff] }
0x1a38   :  { %19006 = vst [vmem:[#allocation59_spill] sm:$0xff] %v16384_v8 }
0x1a39   :  { %19003 = vst [vmem:[#allocation56_spill] sm:$0xff] %v16368_v29  ;;  %v3990_v56 = vmul.f32 0.5, %v16368_v29 }
0x1a3b   :  { %v3991_v30 = vmul.f32 1.442695, %v3990_v56 }
0x1a3c   :  { %v3912_v24 = vpop.f32.mrf.mxu0 }
0x1a3d   :  { %14374 = vpow2.f32 %v3991_v30  ;;  %v3913_v63 = vadd.f32 %v16372_v32, %v3912_v24  ;;  %v11654_v30 = vld [vmem:[%s18893_s30 + $0x10] sm:$0xff] }
0x1a3e   :  { %v13119_v57 = vpop.f32.mrf.mxu0 }
0x1a3f   :  { %13129 = vmatmul.mubr.msk.f32.vlgmr.msra.gmra.mxu1 %vm348_vm5, %v3913_v63  ;;  %v16389_v57 = vld [vmem:[%s18892_s10 + $0x8] sm:$0xff]  ;;  %v16394_v63 = vld [vmem:[%s18892_s10] sm:$0xff] }
0x1a40   :  { %13137 = vmatpush3.msra.mxu1 %v16377_v13  ;;  %13144 = vmatprep.mubr.msk.f32.mxu1 %vm15032_vm0, %v18939_v35  ;;  %19007 = vst [vmem:[#allocation60_spill] sm:$0xff] %v16389_v57  ;;  %19008 = vst [vmem:[#allocation61_spill] sm:$0xff] %v16394_v63 }
0x1a41   :  { %13138 = vmatprep.subr.mxu1 %v18939_v35 }
0x1a42   :  { %13139 = vmatpush3.msra.mxu1 %v16384_v8  ;;  %v16454_v8 = vld [vmem:[%s18901_s16 + $0x18] sm:$0xff] }
0x1a43   :  { %13140 = vmatprep.subr.mxu1 %v18939_v35  ;;  %19019 = vst [vmem:[#allocation67_spill] sm:$0xff] %v16454_v8 }
0x1a44   :  { %13141 = vmatpush3.msra.mxu1 %v16389_v57  ;;  %v16405_v57 = vld [vmem:[%s18894_s11 + $0x38] sm:$0xff] }
0x1a45   :  { %13142 = vmatprep.subr.mxu1 %v18939_v35  ;;  %19009 = vst [vmem:[#allocation58_spill] sm:$0xff] %v16405_v57 }
0x1a46   :  { %13143 = vmatpush3.msra.mxu1 %v16394_v63 }
0x1a47   :  { %13166 = vmatprep.subr.mxu1 %v18939_v35 }
0x1a4a   :  { %v14375_v56 = vpop.eup %14374 }
0x1a4b   :  { %3994 = vrot.lane.b32.xlu1 %v14375_v56, %s18952_s6  ;;  %v16412_v56 = vld [vmem:[%s18894_s11 + $0x30] sm:$0xff] }
0x1a4c   :  { %19010 = vst [vmem:[#allocation81_spill] sm:$0xff] %v16412_v56 }
0x1a4f   :  { %4475 = vrot.lane.b32.xlu1 %v16084_v40, %s18947_s17 }
0x1abd   :  { %v3995_v24 = vpop.permute.xlu1 %3994 }
0x1abe   :  { %v3997_v29 = vmul.f32 %v11654_v30, %v3995_v24  ;;  %v16427_v30 = vld [vmem:[%s18894_s11 + $0x18] sm:$0xff]  ;;  %v16432_v24 = vld [vmem:[%s18894_s11 + $0x10] sm:$0xff] }
0x1abf   :  { %19013 = vst [vmem:[#allocation84_spill] sm:$0xff] %v16427_v30  ;;  %19014 = vst [vmem:[#allocation62_spill] sm:$0xff] %v16432_v24 }
0x1ac0   :  { %v3998_v0 = vadd.f32 %v3997_v29, %v16365_v61  ;;  %v16417_v29 = vld [vmem:[%s18894_s11 + $0x28] sm:$0xff] }
0x1ac1   :  { %19011 = vst [vmem:[#allocation82_spill] sm:$0xff] %v16417_v29  ;;  %v16437_v61 = vld [vmem:[%s18894_s11 + $0x8] sm:$0xff] }
0x1ac2   :  { %13134 = vmatmul.mubr.msk.f32.vlgmr.msra.gmra.mxu0 %vm1071_vm8, %v3998_v0  ;;  %v16422_v0 = vld [vmem:[%s18894_s11 + $0x20] sm:$0xff]  ;;  %19015 = vst [vmem:[#allocation63_spill] sm:$0xff] %v16437_v61 }
0x1ac3   :  { %13148 = vmatpush3.msra.mxu0 %v16405_v57  ;;  %13163 = vmatprep.mubr.msk.f32.mxu0 %vm15032_vm0, %v18939_v35  ;;  %19012 = vst [vmem:[#allocation83_spill] sm:$0xff] %v16422_v0 }
0x1ac4   :  { %13149 = vmatprep.subr.mxu0 %v18939_v35 }
0x1ac5   :  { %13150 = vmatpush3.msra.mxu0 %v16412_v56  ;;  %v16449_v56 = vld [vmem:[%s18896_s15] sm:$0xff] }
0x1ac6   :  { %13151 = vmatprep.subr.mxu0 %v18939_v35  ;;  %19018 = vst [vmem:[#allocation66_spill] sm:$0xff] %v16449_v56 }
0x1ac7   :  { %13152 = vmatpush3.msra.mxu0 %v16417_v29 }
0x1ac8   :  { %13153 = vmatprep.subr.mxu0 %v18939_v35 }
0x1ac9   :  { %13154 = vmatpush3.msra.mxu0 %v16422_v0  ;;  %v16442_v0 = vld [vmem:[%s18894_s11] sm:$0xff] }
0x1aca   :  { %13155 = vmatprep.subr.mxu0 %v18939_v35  ;;  %19016 = vst [vmem:[#allocation64_spill] sm:$0xff] %v16442_v0 }
0x1acb   :  { %13156 = vmatpush3.msra.mxu0 %v16427_v30 }
0x1acc   :  { %13157 = vmatprep.subr.mxu0 %v18939_v35 }
0x1acd   :  { %13158 = vmatpush3.msra.mxu0 %v16432_v24 }
0x1ace   :  { %13159 = vmatprep.subr.mxu0 %v18939_v35 }
0x1acf   :  { %13160 = vmatpush3.msra.mxu0 %v16437_v61 }
0x1ad0   :  { %13161 = vmatprep.subr.mxu0 %v18939_v35 }
0x1ad1   :  { %13162 = vmatpush3.msra.mxu0 %v16442_v0 }
0x1ad2   :  { %13188 = vmatprep.subr.mxu0 %v18939_v35 }
0x1aff   :  { %v16446_v30 = vpop.f32.mrf.mxu1 }
0x1b00   :  { %19017 = vst [vmem:[#allocation65_spill] sm:$0xff] %v16446_v30 }
0x1b01   :  { %v13130_v24 = vpop.f32.mrf.mxu1 }
0x1b02   :  { %v16461_v24 = vld [vmem:[%s18901_s16 + $0x10] sm:$0xff] }
0x1b03   :  { %19020 = vst [vmem:[#allocation68_spill] sm:$0xff] %v16461_v24 }
0x1b82   :  { %v4068_v29 = vpop.f32.mrf.mxu0 }
0x1b83   :  { %v4069_v57 = vadd.f32 %v16449_v56, %v4068_v29  ;;  %v16475_v29 = vld [vmem:[#allocation10] sm:$0xff] }
0x1b84   :  { %v13135_v61 = vpop.f32.mrf.mxu0  ;;  %19023 = vst [vmem:[#allocation71_spill] sm:$0xff] %v16475_v29 }
0x1b85   :  { %v4072_v63 = vmax.f32 %v4069_v57, 0.0  ;;  %v16466_v61 = vld [vmem:[%s18901_s16 + $0x8] sm:$0xff]  ;;  %v16471_v57 = vld [vmem:[%s18901_s16] sm:$0xff] }
0x1b86   :  { %19021 = vst [vmem:[#allocation69_spill] sm:$0xff] %v16466_v61  ;;  %19022 = vst [vmem:[#allocation70_spill] sm:$0xff] %v16471_v57 }
0x1b87   :  { %13145 = vmatmul.mubr.msk.f32.vlgmr.msra.gmra.mxu1 %vm348_vm5, %v4072_v63 }
0x1b88   :  { %13167 = vmatpush3.msra.mxu1 %v16454_v8  ;;  %13174 = vmatprep.mubr.msk.f32.mxu1 %vm15032_vm0, %v18939_v35  ;;  %v16483_v8 = vld [vmem:[%s18930_s18 + $0x18] sm:$0xff] }
0x1b89   :  { %13168 = vmatprep.subr.mxu1 %v18939_v35  ;;  %19024 = vst [vmem:[#allocation72_spill] sm:$0xff] %v16483_v8 }
0x1b8a   :  { %13169 = vmatpush3.msra.mxu1 %v16461_v24 }
0x1b8b   :  { %13170 = vmatprep.subr.mxu1 %v18939_v35 }
0x1b8c   :  { %13171 = vmatpush3.msra.mxu1 %v16466_v61 }
0x1b8d   :  { %13172 = vmatprep.subr.mxu1 %v18939_v35 }
0x1b8e   :  { %13173 = vmatpush3.msra.mxu1 %v16471_v57 }
0x1b8f   :  { %13177 = vmatprep.subr.mxu1 %v18939_v35 }
0x1c47   :  { %v4142_v63 = vpop.f32.mrf.mxu1 }
0x1c48   :  { %v4143_v30 = vadd.f32 %v16475_v29, %v4142_v63  ;;  %v16490_v63 = vld [vmem:[%s18930_s18 + $0x10] sm:$0xff] }
0x1c49   :  { %v13146_v24 = vpop.f32.mrf.mxu1  ;;  %19025 = vst [vmem:[#allocation73_spill] sm:$0xff] %v16490_v63 }
0x1c4a   :  { %v4146_v61 = vsel %vm348_vm5, %v4143_v30, %v16237_v48  ;;  %4471 = vrot.lane.b32.xlu0 %v4143_v30, %s18947_s17  ;;  %v16495_v30 = vld [vmem:[%s18930_s18 + $0x8] sm:$0xff]  ;;  %v16500_v24 = vld [vmem:[%s18930_s18] sm:$0xff] }
0x1c4b   :  { %13164 = vmatmul.mubr.msk.f32.vlgmr.msra.gmra.mxu0 %vm591_vm6, %v4146_v61  ;;  %19026 = vst [vmem:[#allocation74_spill] sm:$0xff] %v16495_v30  ;;  %19027 = vst [vmem:[#allocation75_spill] sm:$0xff] %v16500_v24 }
0x1c4c   :  { %13189 = vmatpush3.msra.mxu0 %v16483_v8  ;;  %13196 = vmatprep.mubr.msk.f32.mxu0 %vm15032_vm0, %v18939_v35  ;;  %v16505_v8 = vld [vmem:[%s18907_s0] sm:$0xff] }
0x1c4d   :  { %13190 = vmatprep.subr.mxu0 %v18939_v35  ;;  %19028 = vst [vmem:[#allocation76_spill] sm:$0xff] %v16505_v8 }
0x1c4e   :  { %13191 = vmatpush3.msra.mxu0 %v16490_v63 }
0x1c4f   :  { %13192 = vmatprep.subr.mxu0 %v18939_v35 }
0x1c50   :  { %13193 = vmatpush3.msra.mxu0 %v16495_v30  ;;  %v16510_v30 = vld [vmem:[%s18908_s19 + $0x18] sm:$0xff] }
0x1c51   :  { %13194 = vmatprep.subr.mxu0 %v18939_v35  ;;  %19029 = vst [vmem:[#allocation77_spill] sm:$0xff] %v16510_v30 }
0x1c52   :  { %13195 = vmatpush3.msra.mxu0 %v16500_v24  ;;  %v16517_v24 = vld [vmem:[%s18908_s19 + $0x10] sm:$0xff] }
0x1c53   :  { %13226 = vmatprep.subr.mxu0 %v18939_v35  ;;  %19030 = vst [vmem:[#allocation78_spill] sm:$0xff] %v16517_v24 }
0x1d0b   :  { %v4216_v61 = vpop.f32.mrf.mxu0 }
0x1d0c   :  { %v4217_v63 = vadd.f32 %v16505_v8, %v4216_v61  ;;  %v16531_v61 = vld [vmem:[#allocation16] sm:$0xff] }
0x1d0d   :  { %v13165_v29 = vpop.f32.mrf.mxu0  ;;  %19033 = vst [vmem:[#allocation85_spill] sm:$0xff] %v16531_v61 }
0x1d0e   :  { %v4220_v57 = vmax.f32 %v4217_v63, 0.0  ;;  %v16522_v29 = vld [vmem:[%s18908_s19 + $0x8] sm:$0xff] }
0x1d0f   :  { %19031 = vst [vmem:[#allocation79_spill] sm:$0xff] %v16522_v29 }
0x1d10   :  { %13175 = vmatmul.mubr.msk.f32.vlgmr.msra.gmra.mxu1 %vm348_vm5, %v4220_v57  ;;  %v16527_v57 = vld [vmem:[%s18908_s19] sm:$0xff]  ;;  %s19047_s19 = sld [smem:[#allocation42_spill]] }
0x1d11   :  { %13178 = vmatpush3.msra.mxu1 %v16510_v30  ;;  %13185 = vmatprep.mubr.msk.f32.mxu1 %vm15032_vm0, %v18939_v35  ;;  %19032 = vst [vmem:[#allocation80_spill] sm:$0xff] %v16527_v57 }
0x1d12   :  { %13179 = vmatprep.subr.mxu1 %v18939_v35 }
0x1d13   :  { %13180 = vmatpush3.msra.mxu1 %v16517_v24 }
0x1d14   :  { %13181 = vmatprep.subr.mxu1 %v18939_v35 }
0x1d15   :  { %13182 = vmatpush3.msra.mxu1 %v16522_v29  ;;  %v16536_v29 = vld [vmem:[%s15223_s13 + $0x58] sm:$0xff] }
0x1d16   :  { %13183 = vmatprep.subr.mxu1 %v18939_v35  ;;  %19034 = vst [vmem:[#allocation87_spill] sm:$0xff] %v16536_v29 }
0x1d17   :  { %13184 = vmatpush3.msra.mxu1 %v16527_v57  ;;  %v16543_v57 = vld [vmem:[%s15223_s13 + $0x50] sm:$0xff] }
0x1d18   :  { %13199 = vmatprep.subr.mxu1 %v18939_v35  ;;  %19035 = vst [vmem:[#allocation88_spill] sm:$0xff] %v16543_v57 }
0x1dd0   :  { %v4290_v63 = vpop.f32.mrf.mxu1 }
0x1dd1   :  { %v4291_v24 = vadd.f32 %v16531_v61, %v4290_v63  ;;  %v16563_v63 = vld [vmem:[%s15223_s13 + $0x30] sm:$0xff]  ;;  %v16593_v61 = vld [vmem:[%s15223_s13 + $0x8] sm:$0xff] }
0x1dd2   :  { %v13176_v30 = vpop.f32.mrf.mxu1  ;;  %19039 = vst [vmem:[#allocation92_spill] sm:$0xff] %v16563_v63  ;;  %19045 = vst [vmem:[#allocation99_spill] sm:$0xff] %v16593_v61 }
0x1dd3   :  { %v4294_v8 = vmax.f32 %v4291_v24, 0.0  ;;  %v16548_v30 = vld [vmem:[%s15223_s13 + $0x48] sm:$0xff]  ;;  %v16558_v24 = vld [vmem:[%s15223_s13 + $0x38] sm:$0xff] }
0x1dd4   :  { %19036 = vst [vmem:[#allocation89_spill] sm:$0xff] %v16548_v30  ;;  %19038 = vst [vmem:[#allocation91_spill] sm:$0xff] %v16558_v24 }
0x1dd5   :  { %13186 = vmatmul.mubr.msk.f32.vlgmr.msra.gmra.mxu1 %vm348_vm5, %v4294_v8  ;;  %v16553_v8 = vld [vmem:[%s15223_s13 + $0x40] sm:$0xff] }
0x1dd6   :  { %13200 = vmatpush3.msra.mxu1 %v16536_v29  ;;  %13223 = vmatprep.mubr.msk.f32.mxu1 %vm15032_vm0, %v18939_v35  ;;  %19037 = vst [vmem:[#allocation90_spill] sm:$0xff] %v16553_v8 }
0x1dd7   :  { %13201 = vmatprep.subr.mxu1 %v18939_v35 }
0x1dd8   :  { %13202 = vmatpush3.msra.mxu1 %v16543_v57  ;;  %v16578_v57 = vld [vmem:[%s15223_s13 + $0x18] sm:$0xff] }
0x1dd9   :  { %13203 = vmatprep.subr.mxu1 %v18939_v35  ;;  %19042 = vst [vmem:[#allocation96_spill] sm:$0xff] %v16578_v57 }
0x1dda   :  { %13204 = vmatpush3.msra.mxu1 %v16548_v30  ;;  %v16568_v30 = vld [vmem:[%s15223_s13 + $0x28] sm:$0xff] }
0x1ddb   :  { %13205 = vmatprep.subr.mxu1 %v18939_v35  ;;  %19040 = vst [vmem:[#allocation93_spill] sm:$0xff] %v16568_v30 }
0x1ddc   :  { %13206 = vmatpush3.msra.mxu1 %v16553_v8  ;;  %v16573_v8 = vld [vmem:[%s15223_s13 + $0x20] sm:$0xff] }
0x1ddd   :  { %13207 = vmatprep.subr.mxu1 %v18939_v35  ;;  %19041 = vst [vmem:[#allocation86_spill] sm:$0xff] %v16573_v8 }
0x1dde   :  { %13208 = vmatpush3.msra.mxu1 %v16558_v24  ;;  %v4472_v24 = vpop.permute.xlu0 %4471 }
0x1ddf   :  { %13209 = vmatprep.subr.mxu1 %v18939_v35 }
0x1de0   :  { %13210 = vmatpush3.msra.mxu1 %v16563_v63  ;;  %v16581_v63 = vld [vmem:[#allocation7] sm:$0xff] }
0x1de1   :  { %13211 = vmatprep.subr.mxu1 %v18939_v35  ;;  %19043 = vst [vmem:[#allocation97_spill] sm:$0xff] %v16581_v63  ;;  %v3541_v29 = vadd.f32 %v16581_v63, %v16295_v3  ;;  %v16599_v3 = vld [vmem:[%s15223_s13] sm:$0xff] }
0x1de2   :  { %13212 = vmatpush3.msra.mxu1 %v16568_v30  ;;  %v16587_v30 = vld [vmem:[%s15223_s13 + $0x10] sm:$0xff]  ;;  %19046 = vst [vmem:[#allocation100_spill] sm:$0xff] %v16599_v3  ;;  %s19048_s13 = sld [smem:[#allocation45_spill]] }
0x1de3   :  { %13213 = vmatprep.subr.mxu1 %v18939_v35  ;;  %19044 = vst [vmem:[#allocation98_spill] sm:$0xff] %v16587_v30 }
0x1de4   :  { %13214 = vmatpush3.msra.mxu1 %v16573_v8  ;;  %v4474_v8 = vsel %vm348_vm5, %v3541_v29, %v4472_v24 }
0x1de5   :  { %13215 = vmatprep.subr.mxu1 %v18939_v35 }
0x1de6   :  { %13216 = vmatpush3.msra.mxu1 %v16578_v57  ;;  %v4476_v57 = vpop.permute.xlu1 %4475 }
0x1de7   :  { %13217 = vmatprep.subr.mxu1 %v18939_v35  ;;  %v4478_v56 = vsel %vm591_vm6, %v4474_v8, %v4476_v57 }
0x1de8   :  { %13218 = vmatpush3.msra.mxu1 %v16587_v30 }
0x1de9   :  { %13219 = vmatprep.subr.mxu1 %v18939_v35 }
0x1dea   :  { %13220 = vmatpush3.msra.mxu1 %v16593_v61 }
0x1deb   :  { %13221 = vmatprep.subr.mxu1 %v18939_v35 }
0x1dec   :  { %13222 = vmatpush3.msra.mxu1 %v16599_v3 }
0x1ded   :  { %13224 = vmatmul.mubr.msk.f32.vlgmr.msra.gmra.mxu1 %vm1594_vm9, %v4478_v56  ;;  %13261 = vmatprep.subr.mxu1 %v18939_v35 }
0x1dee   :  { %13262 = vmatpush3.msk.msra.mxu1 %vm428_vm3, %v16052_v37  ;;  %13263 = vmatprep.mubr.msk.f32.mxu1 %vm15032_vm0, %v18939_v35  ;;  %v16611_v37 = vld [vmem:[%s19047_s19] sm:$0xff] }
0x1def   :  { %13266 = vmatprep.subr.mxu1 %v18939_v35  ;;  %19049 = vst [vmem:[#allocation101_spill] sm:$0xff] %v16611_v37 }
0x1e95   :  { %v4364_v29 = vpop.f32.mrf.mxu1 }
0x1e96   :  { %v4365_v0 = vadd.f32 %v16611_v37, %v4364_v29  ;;  %v16640_v29 = vld [vmem:[%s19048_s13 + $0x18] sm:$0xff] }
0x1e97   :  { %v13187_v24 = vpop.f32.mrf.mxu1  ;;  %19054 = vst [vmem:[#allocation106_spill] sm:$0xff] %v16640_v29 }
0x1e98   :  { %v4368_v24 = vmax.f32 %v4365_v0, 0.0  ;;  %v16630_v0 = vld [vmem:[%s19048_s13 + $0x28] sm:$0xff] }
0x1e99   :  { %19052 = vst [vmem:[#allocation104_spill] sm:$0xff] %v16630_v0 }
0x1e9a   :  { %v4444_v53 = vmul.f32 0.5, %v4368_v24 }
0x1ead   :  { %v4548_v57 = vpop.f32.mrf.mxu1 }
0x1eae   :  { %4559 = vrot.lane.b32.xlu0 %v4548_v57, %s18947_s17  ;;  %v11676_v3 = vmul.f32 -1.442695, %v4548_v57 }
0x1eaf   :  { %v13225_v8 = vpop.f32.mrf.mxu1 }
0x1eb0   :  { %14376 = vpow2.f32 %v11676_v3 }
0x1ebd   :  { %v14377_v56 = vpop.eup %14376 }
0x1ebe   :  { %v4555_v61 = vadd.f32 1.0, %v14377_v56  ;;  %v16618_v56 = vld [vmem:[%s19048_s13 + $0x38] sm:$0xff] }
0x1ebf   :  { %19050 = vst [vmem:[#allocation102_spill] sm:$0xff] %v16618_v56 }
0x1ec0   :  { %14378 = vrcp.f32 %v4555_v61 }
0x1ecd   :  { %v14379_v30 = vpop.eup %14378 }
0x1f20   :  { %v4560_v63 = vpop.permute.xlu0 %4559 }
0x1f21   :  { %v4562_v13 = vmul.f32 %v14379_v30, %v4560_v63  ;;  %v16635_v63 = vld [vmem:[%s19048_s13 + $0x20] sm:$0xff] }
0x1f22   :  { %19053 = vst [vmem:[#allocation105_spill] sm:$0xff] %v16635_v63 }
0x1f23   :  { %4564 = vrot.lane.b32.xlu1 %v4562_v13, %s18948_s4  ;;  %v16625_v13 = vld [vmem:[%s19048_s13 + $0x30] sm:$0xff] }
0x1f24   :  { %19051 = vst [vmem:[#allocation103_spill] sm:$0xff] %v16625_v13 }
0x1f27   :  { %4370 = vrot.lane.b32.xlu1 %v4368_v24, %s18990_s22 }
0x1f95   :  { %v4565_v3 = vpop.permute.xlu1 %4564 }
0x1f96   :  { %v4567_v8 = vadd.f32 %v4565_v3, %v4548_v57  ;;  %v16645_v3 = vld [vmem:[%s19048_s13 + $0x10] sm:$0xff] }
0x1f97   :  { %19055 = vst [vmem:[#allocation107_spill] sm:$0xff] %v16645_v3 }
0x1f98   :  { %14380 = vtanh.f32 %v4567_v8  ;;  %v16651_v8 = vld [vmem:[%s19048_s13 + $0x8] sm:$0xff] }
0x1f99   :  { %v4371_v61 = vpop.permute.xlu1 %4370  ;;  %19056 = vst [vmem:[#allocation108_spill] sm:$0xff] %v16651_v8 }
0x1f9a   :  { %13197 = vmatmul.mubr.msk.f32.vlgmr.msra.gmra.mxu0 %vm348_vm5, %v4371_v61  ;;  %v16656_v61 = vld [vmem:[%s19048_s13] sm:$0xff] }
0x1f9b   :  { %13227 = vmatpush3.msra.mxu0 %v16618_v56  ;;  %13242 = vmatprep.mubr.msk.f32.mxu0 %vm15032_vm0, %v18939_v35  ;;  %19057 = vst [vmem:[#allocation109_spill] sm:$0xff] %v16656_v61 }
0x1f9c   :  { %13228 = vmatprep.subr.mxu0 %v18939_v35 }
0x1f9d   :  { %13229 = vmatpush3.msra.mxu0 %v16625_v13  ;;  %v4449_v13 = vsub.f32 0.0, %v4368_v24 }
0x1f9e   :  { %13230 = vmatprep.subr.mxu0 %v18939_v35 }
0x1f9f   :  { %13231 = vmatpush3.msra.mxu0 %v16630_v0 }
0x1fa0   :  { %13232 = vmatprep.subr.mxu0 %v18939_v35 }
0x1fa1   :  { %13233 = vmatpush3.msra.mxu0 %v16635_v63 }
0x1fa2   :  { %13234 = vmatprep.subr.mxu0 %v18939_v35 }
0x1fa3   :  { %13235 = vmatpush3.msra.mxu0 %v16640_v29  ;;  %v4569_v29 = vsub.f32 1.0, %v14379_v30 }
0x1fa4   :  { %13236 = vmatprep.subr.mxu0 %v18939_v35 }
0x1fa5   :  { %v14381_v57 = vpop.eup %14380  ;;  %13237 = vmatpush3.msra.mxu0 %v16645_v3  ;;  %v4575_v3 = vmul.f32 %v14379_v30, %v16084_v40  ;;  %v4445_v30 = vsub.f32 -0.9189385, %v4444_v53 }
0x1fa6   :  { %4571 = vrot.lane.b32.xlu0 %v14381_v57, %s18949_s27  ;;  %13238 = vmatprep.subr.mxu0 %v18939_v35 }
0x1fa7   :  { %13239 = vmatpush3.msra.mxu0 %v16651_v8  ;;  %v4450_v8 = vmul.f32 1.442695, %v4449_v13 }
0x1fa8   :  { %13240 = vmatprep.subr.mxu0 %v18939_v35 }
0x1fa9   :  { %13241 = vmatpush3.msra.mxu0 %v16656_v61  ;;  %14382 = vpow2.f32 %v4450_v8 }
0x1faa   :  { %13245 = vmatprep.subr.mxu0 %v18939_v35 }
0x1fb6   :  { %v14383_v40 = vpop.eup %14382 }
0x2018   :  { %v4572_v63 = vpop.permute.xlu0 %4571 }
0x2019   :  { %v4574_v0 = vmul.f32 %v4572_v63, %v4569_v29 }
0x201b   :  { %v16661_v57 = vadd.f32 %v4575_v3, %v4574_v0 }
0x201d   :  { %4578 = vrot.lane.b32.xlu0 %v16661_v57, %s18949_s27 }
0x205a   :  { %v4440_v56 = vpop.f32.mrf.mxu0 }
0x205b   :  { %v4441_v37 = vadd.f32 %v4440_v56, %v16090_v46  ;;  %v16678_v46 = vld [vmem:[%s15048_s5 + $0x18] sm:$0xff] }
0x205c   :  { %v13198_v61 = vpop.f32.mrf.mxu0 }
0x205d   :  { %v4446_v32 = vsub.f32 %v16110_v55, %v4441_v37 }
0x205f   :  { %v4447_v41 = vmul.f32 %v4446_v32, %v4446_v32 }
0x2061   :  { %v4448_v39 = vmul.f32 0.5, %v4447_v41 }
0x2063   :  { %v4452_v0 = vmul.f32 %v14383_v40, %v4448_v39  ;;  %v19063_v40 = vld [vmem:[#allocation54_spill] sm:$0xff] }
0x2065   :  { %v4453_v63 = vsub.f32 %v4445_v30, %v4452_v0 }
0x2067   :  { %v16668_v29 = vadd.f32 %v4453_v63, %v16098_v36  ;;  %v19064_v63 = vld [vmem:[#allocation57_spill] sm:$0xff] }
0x208f   :  { %v4579_v3 = vpop.permute.xlu0 %4578 }
0x2090   :  { %v4581_v13 = vsel %vm348_vm5, %v4579_v3, %v16237_v48  ;;  %v19065_v3 = vld [vmem:[#allocation59_spill] sm:$0xff] }
0x2091   :  { %13243 = vmatmul.mubr.msk.f32.vlgmr.msra.gmra.mxu0 %vm591_vm6, %v4581_v13  ;;  %v19066_v13 = vld [vmem:[#allocation60_spill] sm:$0xff] }
0x2092   :  { %13246 = vmatpush3.msk.msra.mxu0 %vm268_vm1, %v16103_v33  ;;  %13247 = vmatprep.mubr.msk.f32.mxu0 %vm15032_vm0, %v18939_v35 }
0x2093   :  { %13250 = vmatprep.subr.mxu0 %v18939_v35 }
0x2095   :  { %13248 = vmatmul.mubr.msk.f32.vlgmr.msra.gmra.mxu0 %vm264_vm2, %v16678_v46 }
0x2096   :  { %13251 = vmatpush3.msra.mxu0 %v16116_v4  ;;  %13258 = vmatprep.mubr.msk.f32.mxu0 %vm15032_vm0, %v18939_v35 }
0x2097   :  { %13252 = vmatprep.subr.mxu0 %v18939_v35 }
0x2098   :  { %13253 = vmatpush3.msra.mxu0 %v16123_v5 }
0x2099   :  { %13254 = vmatprep.subr.mxu0 %v18939_v35 }
0x209a   :  { %13255 = vmatpush3.msra.mxu0 %v16128_v6 }
0x209b   :  { %13256 = vmatprep.subr.mxu0 %v18939_v35 }
0x209c   :  { %13257 = vmatpush3.msra.mxu0 %v16133_v9 }
0x209d   :  { %13277 = vmatprep.subr.mxu0 %v18939_v35 }
0x2151   :  { %v4651_v36 = vpop.f32.mrf.mxu0 }
0x2152   :  { %4662 = vrot.lane.b32.xlu1 %v4651_v36, %s18947_s17  ;;  %v11678_v5 = vmul.f32 -1.442695, %v4651_v36 }
0x2153   :  { %v13244_v33 = vpop.f32.mrf.mxu0 }
0x2154   :  { %14384 = vpow2.f32 %v11678_v5  ;;  %v19068_v5 = vld [vmem:[#allocation58_spill] sm:$0xff] }
0x2155   :  { %v4757_v55 = vpop.f32.mrf.mxu0 }
0x2156   :  { %v4758_v4 = vadd.f32 %v16139_v17, %v4757_v55  ;;  %v11681_v55 = vld [vmem:[%s18893_s30 + $0x18] sm:$0xff] }
0x2157   :  { %v13249_v39 = vpop.f32.mrf.mxu0 }
0x2158   :  { %v4761_v41 = vmax.f32 %v4758_v4, 0.0 }
0x215a   :  { %13259 = vmatmul.mubr.msk.f32.vlgmr.msra.gmra.mxu0 %vm348_vm5, %v4761_v41 }
0x215b   :  { %13278 = vmatpush3.msra.mxu0 %v16144_v21  ;;  %13293 = vmatprep.mubr.msk.f32.mxu0 %vm15032_vm0, %v18939_v35 }
0x215c   :  { %13279 = vmatprep.subr.mxu0 %v18939_v35 }
0x215d   :  { %13280 = vmatpush3.msra.mxu0 %v16151_v22 }
0x215e   :  { %13281 = vmatprep.subr.mxu0 %v18939_v35 }
0x215f   :  { %13282 = vmatpush3.msra.mxu0 %v16156_v23  ;;  %v11680_v23 = vld [vmem:[%s15053_s9 + $0x18] sm:$0xff] }
0x2160   :  { %13283 = vmatprep.subr.mxu0 %v18939_v35  ;;  %13264 = vmatmul.mubr.msk.f32.vlgmr.msra.gmra.mxu1 %vm424_vm4, %v11680_v23  ;;  %v19074_v23 = vld [vmem:[#allocation63_spill] sm:$0xff] }
0x2161   :  { %13284 = vmatpush3.msra.mxu0 %v16161_v11  ;;  %v14385_v6 = vpop.eup %14384  ;;  %13267 = vmatpush3.msra.mxu1 %v16189_v42 }
0x2162   :  { %13285 = vmatprep.subr.mxu0 %v18939_v35  ;;  %v4658_v9 = vadd.f32 1.0, %v14385_v6  ;;  %13274 = vmatprep.mubr.msk.f32.mxu1 %vm15032_vm0, %v18939_v35  ;;  %v19069_v6 = vld [vmem:[#allocation81_spill] sm:$0xff] }
0x2163   :  { %13286 = vmatpush3.msra.mxu0 %v16166_v60  ;;  %13268 = vmatprep.subr.mxu1 %v18939_v35 }
0x2164   :  { %13287 = vmatprep.subr.mxu0 %v18939_v35  ;;  %14386 = vrcp.f32 %v4658_v9  ;;  %13269 = vmatpush3.msra.mxu1 %v16196_v43  ;;  %v19070_v9 = vld [vmem:[#allocation82_spill] sm:$0xff] }
0x2165   :  { %13288 = vmatpush3.msra.mxu0 %v16171_v25  ;;  %13270 = vmatprep.subr.mxu1 %v18939_v35 }
0x2166   :  { %13289 = vmatprep.subr.mxu0 %v18939_v35  ;;  %13271 = vmatpush3.msra.mxu1 %v16201_v51 }
0x2167   :  { %13290 = vmatpush3.msra.mxu0 %v16176_v28  ;;  %13272 = vmatprep.subr.mxu1 %v18939_v35 }
0x2168   :  { %13291 = vmatprep.subr.mxu0 %v18939_v35  ;;  %13273 = vmatpush3.msra.mxu1 %v16206_v62 }
0x2169   :  { %13292 = vmatpush3.msra.mxu0 %v16181_v34  ;;  %13296 = vmatprep.subr.mxu1 %v18939_v35 }
0x216a   :  { %13318 = vmatprep.subr.mxu0 %v18939_v35 }
0x2171   :  { %v14387_v17 = vpop.eup %14386 }
0x2172   :  { %v4672_v51 = vsub.f32 1.0, %v14387_v17  ;;  %v4678_v37 = vmul.f32 %v14387_v17, %v16237_v48 }
0x21c4   :  { %v4663_v21 = vpop.permute.xlu1 %4662 }
0x21c5   :  { %v4665_v22 = vmul.f32 %v14387_v17, %v4663_v21  ;;  %v19071_v17 = vld [vmem:[#allocation83_spill] sm:$0xff]  ;;  %v19072_v21 = vld [vmem:[#allocation84_spill] sm:$0xff] }
0x21c7   :  { %4667 = vrot.lane.b32.xlu0 %v4665_v22, %s18948_s4  ;;  %v19073_v22 = vld [vmem:[#allocation62_spill] sm:$0xff] }
0x221a   :  { %v4831_v25 = vpop.f32.mrf.mxu0 }
0x221c   :  { %v13260_v28 = vpop.f32.mrf.mxu0 }
0x2220   :  { %v4904_v42 = vpop.f32.mrf.mxu1 }
0x2221   :  { %v4905_v43 = vadd.f32 %v16212_v54, %v4904_v42  ;;  %v4832_v54 = vadd.f32 %v16229_v59, %v4831_v25 }
0x2222   :  { %v13265_v53 = vpop.f32.mrf.mxu1 }
0x2223   :  { %v4908_v32 = vmax.f32 %v4905_v43, 0.0 }
0x2225   :  { %13275 = vmatmul.mubr.msk.f32.vlgmr.msra.gmra.mxu1 %vm348_vm5, %v4908_v32  ;;  %v19078_v32 = vld [vmem:[#allocation67_spill] sm:$0xff] }
0x2226   :  { %13297 = vmatpush3.msra.mxu1 %v16217_v12  ;;  %13304 = vmatprep.mubr.msk.f32.mxu1 %vm15032_vm0, %v18939_v35 }
0x2227   :  { %13298 = vmatprep.subr.mxu1 %v18939_v35 }
0x2228   :  { %13299 = vmatpush3.msra.mxu1 %v16224_v7 }
0x2229   :  { %13300 = vmatprep.subr.mxu1 %v18939_v35 }
0x222a   :  { %13301 = vmatpush3.msra.mxu1 %v16234_v45 }
0x222b   :  { %13302 = vmatprep.subr.mxu1 %v18939_v35 }
0x222c   :  { %13303 = vmatpush3.msra.mxu1 %v16241_v49 }
0x222d   :  { %13307 = vmatprep.subr.mxu1 %v18939_v35 }
0x2239   :  { %v4668_v11 = vpop.permute.xlu0 %4667 }
0x223a   :  { %v4670_v60 = vadd.f32 %v4668_v11, %v4651_v36  ;;  %v19067_v36 = vld [vmem:[#allocation61_spill] sm:$0xff]  ;;  %v19075_v11 = vld [vmem:[#allocation64_spill] sm:$0xff] }
0x223c   :  { %14388 = vtanh.f32 %v4670_v60 }
0x2249   :  { %v14389_v34 = vpop.eup %14388 }
0x224a   :  { %4674 = vrot.lane.b32.xlu1 %v14389_v34, %s18949_s27  ;;  %v19077_v34 = vld [vmem:[#allocation66_spill] sm:$0xff] }
0x22bc   :  { %v4675_v62 = vpop.permute.xlu1 %4674 }
0x22bd   :  { %v4677_v24 = vmul.f32 %v4675_v62, %v4672_v51  ;;  %v19079_v51 = vld [vmem:[#allocation68_spill] sm:$0xff]  ;;  %v19080_v62 = vld [vmem:[#allocation69_spill] sm:$0xff] }
0x22bf   :  { %v16739_v56 = vadd.f32 %v4678_v37, %v4677_v24  ;;  %v19081_v37 = vld [vmem:[#allocation70_spill] sm:$0xff] }
0x22c1   :  { %v4982_v12 = vsel %vm348_vm5, %v4832_v54, %v16739_v56  ;;  %5206 = vrot.lane.b32.xlu0 %v16739_v56, %s18949_s27  ;;  %v19082_v54 = vld [vmem:[#allocation71_spill] sm:$0xff] }
0x22c2   :  { %13294 = vmatmul.mubr.msk.f32.vlgmr.msra.gmra.mxu0 %vm591_vm6, %v4982_v12 }
0x22c3   :  { %13319 = vmatpush3.msra.mxu0 %v16251_v50  ;;  %13326 = vmatprep.mubr.msk.f32.mxu0 %vm15032_vm0, %v18939_v35 }
0x22c4   :  { %13320 = vmatprep.subr.mxu0 %v18939_v35 }
0x22c5   :  { %13321 = vmatpush3.msra.mxu0 %v16258_v44 }
0x22c6   :  { %13322 = vmatprep.subr.mxu0 %v18939_v35 }
0x22c7   :  { %13323 = vmatpush3.msra.mxu0 %v16263_v14 }
0x22c8   :  { %13324 = vmatprep.subr.mxu0 %v18939_v35 }
0x22c9   :  { %13325 = vmatpush3.msra.mxu0 %v16268_v15 }
0x22ca   :  { %13340 = vmatprep.subr.mxu0 %v18939_v35 }
0x22e5   :  { %v16770_v59 = vpop.f32.mrf.mxu1 }
0x22e7   :  { %v13276_v45 = vpop.f32.mrf.mxu1 }
0x2333   :  { %v5207_v7 = vpop.permute.xlu0 %5206 }
0x2334   :  { %13327 = vmatmul.mubr.msk.f32.vlgmr.msra.gmra.mxu0 %vm348_vm5, %v5207_v7 }
0x2335   :  { %13341 = vmatpush3.msra.mxu0 %v16274_v18  ;;  %13348 = vmatprep.mubr.msk.f32.mxu0 %vm15032_vm0, %v18939_v35 }
0x2336   :  { %13342 = vmatprep.subr.mxu0 %v18939_v35 }
0x2337   :  { %13343 = vmatpush3.msra.mxu0 %v16281_v19 }
0x2338   :  { %13344 = vmatprep.subr.mxu0 %v18939_v35 }
0x2339   :  { %13345 = vmatpush3.msra.mxu0 %v16286_v20 }
0x233a   :  { %13346 = vmatprep.subr.mxu0 %v18939_v35 }
0x233b   :  { %13347 = vmatpush3.msra.mxu0 %v16291_v1 }
0x233c   :  { %13356 = vmatprep.subr.mxu0 %v18939_v35 }
0x2382   :  { %v5052_v48 = vpop.f32.mrf.mxu0 }
0x2383   :  { %v5053_v49 = vadd.f32 %v16298_v38, %v5052_v48  ;;  %v19083_v48 = vld [vmem:[#allocation72_spill] sm:$0xff] }
0x2384   :  { %v13295_v50 = vpop.f32.mrf.mxu0 }
0x2385   :  { %v5056_v44 = vmax.f32 %v5053_v49, 0.0  ;;  %v19084_v49 = vld [vmem:[#allocation73_spill] sm:$0xff]  ;;  %v19085_v50 = vld [vmem:[#allocation74_spill] sm:$0xff] }
0x2387   :  { %13305 = vmatmul.mubr.msk.f32.vlgmr.msra.gmra.mxu1 %vm348_vm5, %v5056_v44  ;;  %v19086_v44 = vld [vmem:[#allocation75_spill] sm:$0xff] }
0x2388   :  { %13308 = vmatpush3.msra.mxu1 %v16303_v26  ;;  %13315 = vmatprep.mubr.msk.f32.mxu1 %vm15032_vm0, %v18939_v35 }
0x2389   :  { %13309 = vmatprep.subr.mxu1 %v18939_v35 }
0x238a   :  { %13310 = vmatpush3.msra.mxu1 %v16310_v27  ;;  %v19058_v27 = vld [vmem:[#allocation51_spill] sm:$0xff] }
0x238b   :  { %13311 = vmatprep.subr.mxu1 %v18939_v35 }
0x238c   :  { %13312 = vmatpush3.msra.mxu1 %v16315_v2  ;;  %v19059_v2 = vld [vmem:[#allocation52_spill] sm:$0xff] }
0x238d   :  { %13313 = vmatprep.subr.mxu1 %v18939_v35 }
0x238e   :  { %13314 = vmatpush3.msra.mxu1 %v16320_v52 }
0x238f   :  { %13329 = vmatprep.subr.mxu1 %v18939_v35 }
0x23f4   :  { %v5276_v14 = vpop.f32.mrf.mxu0 }
0x23f5   :  { %v5277_v38 = vadd.f32 %v16334_v58, %v5276_v14 }
0x23f6   :  { %v13328_v15 = vpop.f32.mrf.mxu0 }
0x23f7   :  { %v5280_v26 = vmax.f32 %v5277_v38, 0.0  ;;  %v19087_v15 = vld [vmem:[#allocation76_spill] sm:$0xff]  ;;  %v19089_v38 = vld [vmem:[#allocation78_spill] sm:$0xff] }
0x2447   :  { %v5126_v18 = vpop.f32.mrf.mxu1 }
0x2448   :  { %v5127_v19 = vadd.f32 %v16324_v10, %v5126_v18  ;;  %v19060_v10 = vld [vmem:[#allocation53_spill] sm:$0xff] }
0x2449   :  { %v13306_v20 = vpop.f32.mrf.mxu1 }
0x244a   :  { %v5130_v1 = vmax.f32 %v5127_v19, 0.0 }
0x244c   :  { %13316 = vmatmul.mubr.msk.f32.vlgmr.msra.gmra.mxu1 %vm348_vm5, %v5130_v1  ;;  %v19088_v1 = vld [vmem:[#allocation77_spill] sm:$0xff] }
0x244d   :  { %13330 = vmatpush3.msra.mxu1 %v16329_v47  ;;  %13337 = vmatprep.mubr.msk.f32.mxu1 %vm15032_vm0, %v18939_v35 }
0x244e   :  { %13331 = vmatprep.subr.mxu1 %v18939_v35 }
0x244f   :  { %13332 = vmatpush3.msra.mxu1 %v16339_v16 }
0x2450   :  { %13333 = vmatprep.subr.mxu1 %v18939_v35 }
0x2451   :  { %13334 = vmatpush3.msra.mxu1 %v16344_v31 }
0x2452   :  { %13335 = vmatprep.subr.mxu1 %v18939_v35 }
0x2453   :  { %13336 = vmatpush3.msra.mxu1 %v19058_v27  ;;  %v19091_v27 = vld [vmem:[#allocation80_spill] sm:$0xff] }
0x2454   :  { %13338 = vmatmul.mubr.msk.f32.vlgmr.msra.gmra.mxu1 %vm348_vm5, %v5280_v26  ;;  %13351 = vmatprep.subr.mxu1 %v18939_v35  ;;  %v19090_v26 = vld [vmem:[#allocation79_spill] sm:$0xff] }
0x2455   :  { %13352 = vmatpush3.msk.msra.mxu1 %vm1075_vm7, %v19059_v2  ;;  %13353 = vmatprep.mubr.msk.f32.mxu1 %vm15032_vm0, %v18939_v35 }
0x2456   :  { %13367 = vmatprep.subr.mxu1 %v18939_v35 }
0x250c   :  { %v5200_v52 = vpop.f32.mrf.mxu1 }
0x250d   :  { %v16804_v47 = vadd.f32 %v19060_v10, %v5200_v52  ;;  %v19092_v52 = vld [vmem:[#allocation85_spill] sm:$0xff] }
0x250e   :  { %v13317_v58 = vpop.f32.mrf.mxu1 }
0x250f   :  { %19061 = vst [vmem:[#allocation51_spill] sm:$0xff] %v16804_v47  ;;  %v16807_v16 = vmax.f32 %v16804_v47, 0.0 }
0x2511   :  { %19062 = vst [vmem:[#allocation52_spill] sm:$0xff] %v16807_v16  ;;  %v5428_v31 = vmul.f32 0.5, %v16807_v16 }
0x2513   :  { %v5429_v8 = vmul.f32 1.442695, %v5428_v31 }
0x2514   :  { %v5350_v61 = vpop.f32.mrf.mxu1 }
0x2515   :  { %14390 = vpow2.f32 %v5429_v8  ;;  %v5351_v30 = vadd.f32 %v19063_v40, %v5350_v61  ;;  %v19093_v8 = vld [vmem:[#allocation87_spill] sm:$0xff]  ;;  %v19094_v61 = vld [vmem:[#allocation88_spill] sm:$0xff]  ;;  %v19095_v40 = vld [vmem:[#allocation89_spill] sm:$0xff] }
0x2516   :  { %v13339_v0 = vpop.f32.mrf.mxu1 }
0x2517   :  { %13349 = vmatmul.mubr.msk.f32.vlgmr.msra.gmra.mxu0 %vm348_vm5, %v5351_v30  ;;  %v19096_v30 = vld [vmem:[#allocation90_spill] sm:$0xff]  ;;  %v19097_v0 = vld [vmem:[#allocation91_spill] sm:$0xff] }
0x2518   :  { %13357 = vmatpush3.msra.mxu0 %v19064_v63  ;;  %13364 = vmatprep.mubr.msk.f32.mxu0 %vm15032_vm0, %v18939_v35  ;;  %v19098_v63 = vld [vmem:[#allocation92_spill] sm:$0xff] }
0x2519   :  { %13358 = vmatprep.subr.mxu0 %v18939_v35 }
0x251a   :  { %13359 = vmatpush3.msra.mxu0 %v19065_v3  ;;  %v19099_v3 = vld [vmem:[#allocation93_spill] sm:$0xff] }
0x251b   :  { %13360 = vmatprep.subr.mxu0 %v18939_v35 }
0x251c   :  { %13361 = vmatpush3.msra.mxu0 %v19066_v13  ;;  %v19100_v13 = vld [vmem:[#allocation86_spill] sm:$0xff] }
0x251d   :  { %13362 = vmatprep.subr.mxu0 %v18939_v35 }
0x251e   :  { %13363 = vmatpush3.msra.mxu0 %v19067_v36 }
0x251f   :  { %13386 = vmatprep.subr.mxu0 %v18939_v35 }
0x2522   :  { %v14391_v33 = vpop.eup %14390 }
0x2523   :  { %5432 = vrot.lane.b32.xlu1 %v14391_v33, %s18952_s6  ;;  %v19101_v33 = vld [vmem:[#allocation96_spill] sm:$0xff] }
0x2527   :  { %5913 = vrot.lane.b32.xlu1 %v16661_v57, %s18947_s17 }
0x2595   :  { %v5433_v4 = vpop.permute.xlu1 %5432 }
0x2596   :  { %v5435_v39 = vmul.f32 %v11681_v55, %v5433_v4  ;;  %v19102_v55 = vld [vmem:[#allocation97_spill] sm:$0xff] }
0x2597   :  { %v4979_v4 = vadd.f32 %v19102_v55, %v16770_v59  ;;  %v16920_v59 = vld [vmem:[#allocation5] sm:$0x3]  ;;  %v16987_v55 = vld [vmem:[%s15073_s25 + $0x10] sm:$0xff] }
0x2598   :  { %v5436_v41 = vadd.f32 %v5435_v39, %v16804_v47  ;;  %v19103_v39 = vld [vmem:[#allocation98_spill] sm:$0xff] }
0x259a   :  { %13354 = vmatmul.mubr.msk.f32.vlgmr.msra.gmra.mxu1 %vm1071_vm8, %v5436_v41 }
0x259b   :  { %13368 = vmatpush3.msra.mxu1 %v19068_v5  ;;  %13383 = vmatprep.mubr.msk.f32.mxu1 %vm15032_vm0, %v18939_v35  ;;  %v19104_v5 = vld [vmem:[#allocation99_spill] sm:$0xff] }
0x259c   :  { %13369 = vmatprep.subr.mxu1 %v18939_v35 }
0x259d   :  { %13370 = vmatpush3.msra.mxu1 %v19069_v6  ;;  %v5914_v6 = vpop.permute.xlu1 %5913 }
0x259e   :  { %13371 = vmatprep.subr.mxu1 %v18939_v35 }
0x259f   :  { %13372 = vmatpush3.msra.mxu1 %v19070_v9 }
0x25a0   :  { %13373 = vmatprep.subr.mxu1 %v18939_v35 }
0x25a1   :  { %13374 = vmatpush3.msra.mxu1 %v19071_v17  ;;  %v19105_v17 = vld [vmem:[#allocation100_spill] sm:$0xff] }
0x25a2   :  { %13375 = vmatprep.subr.mxu1 %v18939_v35 }
0x25a3   :  { %13376 = vmatpush3.msra.mxu1 %v19072_v21 }
0x25a4   :  { %13377 = vmatprep.subr.mxu1 %v18939_v35 }
0x25a5   :  { %13378 = vmatpush3.msra.mxu1 %v19073_v22 }
0x25a6   :  { %13379 = vmatprep.subr.mxu1 %v18939_v35 }
0x25a7   :  { %13380 = vmatpush3.msra.mxu1 %v19074_v23 }
0x25a8   :  { %13381 = vmatprep.subr.mxu1 %v18939_v35 }
0x25a9   :  { %13382 = vmatpush3.msra.mxu1 %v19075_v11 }
0x25aa   :  { %13408 = vmatprep.subr.mxu1 %v18939_v35 }
0x25d7   :  { %v16846_v60 = vpop.f32.mrf.mxu0 }
0x25d8   :  { %19076 = vst [vmem:[#allocation53_spill] sm:$0xff] %v16846_v60 }
0x25d9   :  { %v13350_v25 = vpop.f32.mrf.mxu0 }
0x265a   :  { %v5506_v28 = vpop.f32.mrf.mxu1 }
0x265b   :  { %v5507_v42 = vadd.f32 %v19077_v34, %v5506_v28 }
0x265c   :  { %v13355_v43 = vpop.f32.mrf.mxu1 }
0x265d   :  { %v5510_v53 = vmax.f32 %v5507_v42, 0.0 }
0x265f   :  { %13365 = vmatmul.mubr.msk.f32.vlgmr.msra.gmra.mxu0 %vm348_vm5, %v5510_v53  ;;  %v19106_v53 = vld [vmem:[#allocation101_spill] sm:$0xff] }
0x2660   :  { %13387 = vmatpush3.msra.mxu0 %v19078_v32  ;;  %13394 = vmatprep.mubr.msk.f32.mxu0 %vm15032_vm0, %v18939_v35 }
0x2661   :  { %13388 = vmatprep.subr.mxu0 %v18939_v35 }
0x2662   :  { %13389 = vmatpush3.msra.mxu0 %v19079_v51 }
0x2663   :  { %13390 = vmatprep.subr.mxu0 %v18939_v35 }
0x2664   :  { %13391 = vmatpush3.msra.mxu0 %v19080_v62 }
0x2665   :  { %13392 = vmatprep.subr.mxu0 %v18939_v35 }
0x2666   :  { %13393 = vmatpush3.msra.mxu0 %v19081_v37 }
0x2667   :  { %13397 = vmatprep.subr.mxu0 %v18939_v35 }
0x271f   :  { %v5580_v24 = vpop.f32.mrf.mxu0 }
0x2720   :  { %v5581_v12 = vadd.f32 %v19082_v54, %v5580_v24 }
0x2721   :  { %v13366_v7 = vpop.f32.mrf.mxu0 }
0x2722   :  { %v5584_v45 = vsel %vm348_vm5, %v5581_v12, %v16739_v56  ;;  %5909 = vrot.lane.b32.xlu0 %v5581_v12, %s18947_s17  ;;  %v19107_v12 = vld [vmem:[#allocation102_spill] sm:$0xff]  ;;  %v19108_v7 = vld [vmem:[#allocation103_spill] sm:$0xff] }
0x2723   :  { %13384 = vmatmul.mubr.msk.f32.vlgmr.msra.gmra.mxu1 %vm591_vm6, %v5584_v45  ;;  %v19109_v45 = vld [vmem:[#allocation104_spill] sm:$0xff] }
0x2724   :  { %13409 = vmatpush3.msra.mxu1 %v19083_v48  ;;  %13416 = vmatprep.mubr.msk.f32.mxu1 %vm15032_vm0, %v18939_v35  ;;  %v19110_v48 = vld [vmem:[#allocation105_spill] sm:$0xff] }
0x2725   :  { %13410 = vmatprep.subr.mxu1 %v18939_v35 }
0x2726   :  { %13411 = vmatpush3.msra.mxu1 %v19084_v49  ;;  %v19111_v49 = vld [vmem:[#allocation106_spill] sm:$0xff] }
0x2727   :  { %13412 = vmatprep.subr.mxu1 %v18939_v35 }
0x2728   :  { %13413 = vmatpush3.msra.mxu1 %v19085_v50 }
0x2729   :  { %13414 = vmatprep.subr.mxu1 %v18939_v35 }
0x272a   :  { %13415 = vmatpush3.msra.mxu1 %v19086_v44  ;;  %v19112_v44 = vld [vmem:[#allocation107_spill] sm:$0xff] }
0x272b   :  { %13446 = vmatprep.subr.mxu1 %v18939_v35 }
0x2794   :  { %v5910_v36 = vpop.permute.xlu0 %5909 }
0x2795   :  { %v5912_v41 = vsel %vm348_vm5, %v4979_v4, %v5910_v36  ;;  %v16992_v4 = vld [vmem:[%s15073_s25 + $0x8] sm:$0xff] }
0x2796   :  { %v5916_v9 = vsel %vm591_vm6, %v5912_v41, %v5914_v6 }
0x27e3   :  { %v5654_v14 = vpop.f32.mrf.mxu1 }
0x27e4   :  { %v5655_v18 = vadd.f32 %v19087_v15, %v5654_v14  ;;  %v19113_v14 = vld [vmem:[#allocation108_spill] sm:$0xff]  ;;  %v19114_v15 = vld [vmem:[#allocation109_spill] sm:$0xff] }
0x27e5   :  { %v13385_v19 = vpop.f32.mrf.mxu1 }
0x27e6   :  { %v5658_v20 = vmax.f32 %v5655_v18, 0.0 }
0x27e8   :  { %13395 = vmatmul.mubr.msk.f32.vlgmr.msra.gmra.mxu0 %vm348_vm5, %v5658_v20 }
0x27e9   :  { %13398 = vmatpush3.msra.mxu0 %v19088_v1  ;;  %13405 = vmatprep.mubr.msk.f32.mxu0 %vm15032_vm0, %v18939_v35 }
0x27ea   :  { %13399 = vmatprep.subr.mxu0 %v18939_v35 }
0x27eb   :  { %13400 = vmatpush3.msra.mxu0 %v19089_v38 }
0x27ec   :  { %13401 = vmatprep.subr.mxu0 %v18939_v35 }
0x27ed   :  { %13402 = vmatpush3.msra.mxu0 %v19090_v26 }
0x27ee   :  { %13403 = vmatprep.subr.mxu0 %v18939_v35 }
0x27ef   :  { %13404 = vmatpush3.msra.mxu0 %v19091_v27 }
0x27f0   :  { %13419 = vmatprep.subr.mxu0 %v18939_v35 }
0x28a8   :  { %v5728_v2 = vpop.f32.mrf.mxu0 }
0x28a9   :  { %v5729_v10 = vadd.f32 %v19092_v52, %v5728_v2  ;;  %v16957_v52 = vld [vmem:[%s15218_s14] sm:$0xff] }
0x28aa   :  { %v13396_v58 = vpop.f32.mrf.mxu0 }
0x28ab   :  { %v5732_v31 = vmax.f32 %v5729_v10, 0.0 }
0x28ad   :  { %13406 = vmatmul.mubr.msk.f32.vlgmr.msra.gmra.mxu0 %vm348_vm5, %v5732_v31 }
0x28ae   :  { %13420 = vmatpush3.msra.mxu0 %v19093_v8  ;;  %13443 = vmatprep.mubr.msk.f32.mxu0 %vm15032_vm0, %v18939_v35 }
0x28af   :  { %13421 = vmatprep.subr.mxu0 %v18939_v35 }
0x28b0   :  { %13422 = vmatpush3.msra.mxu0 %v19094_v61 }
0x28b1   :  { %13423 = vmatprep.subr.mxu0 %v18939_v35 }
0x28b2   :  { %13424 = vmatpush3.msra.mxu0 %v19095_v40 }
0x28b3   :  { %13425 = vmatprep.subr.mxu0 %v18939_v35 }
0x28b4   :  { %13426 = vmatpush3.msra.mxu0 %v19096_v30 }
0x28b5   :  { %13427 = vmatprep.subr.mxu0 %v18939_v35 }
0x28b6   :  { %13428 = vmatpush3.msra.mxu0 %v19097_v0 }
0x28b7   :  { %13429 = vmatprep.subr.mxu0 %v18939_v35 }
0x28b8   :  { %13430 = vmatpush3.msra.mxu0 %v19098_v63 }
0x28b9   :  { %13431 = vmatprep.subr.mxu0 %v18939_v35 }
0x28ba   :  { %13432 = vmatpush3.msra.mxu0 %v19099_v3 }
0x28bb   :  { %13433 = vmatprep.subr.mxu0 %v18939_v35 }
0x28bc   :  { %13434 = vmatpush3.msra.mxu0 %v19100_v13 }
0x28bd   :  { %13435 = vmatprep.subr.mxu0 %v18939_v35 }
0x28be   :  { %13436 = vmatpush3.msra.mxu0 %v19101_v33  ;;  %v16974_v33 = vld [vmem:[%s15048_s5 + $0x20] sm:$0xff] }
0x28bf   :  { %13437 = vmatprep.subr.mxu0 %v18939_v35 }
0x28c0   :  { %13438 = vmatpush3.msra.mxu0 %v19103_v39  ;;  %v16997_v39 = vld [vmem:[%s15073_s25] sm:$0xff] }
0x28c1   :  { %13439 = vmatprep.subr.mxu0 %v18939_v35 }
0x28c2   :  { %13440 = vmatpush3.msra.mxu0 %v19104_v5 }
0x28c3   :  { %13441 = vmatprep.subr.mxu0 %v18939_v35 }
0x28c4   :  { %13442 = vmatpush3.msra.mxu0 %v19105_v17 }
0x28c5   :  { %13444 = vmatmul.mubr.msk.f32.vlgmr.msra.gmra.mxu0 %vm1594_vm9, %v5916_v9  ;;  %13481 = vmatprep.subr.mxu0 %v18939_v35  ;;  %v17003_v9 = vld [vmem:[%s15068_s21] sm:$0xff] }
0x28c6   :  { %13482 = vmatpush3.msk.msra.mxu0 %vm428_vm3, %v16920_v59  ;;  %13483 = vmatprep.mubr.msk.f32.mxu0 %vm15032_vm0, %v18939_v35 }
0x28c7   :  { %13486 = vmatprep.subr.mxu0 %v18939_v35 }
0x296d   :  { %v5802_v21 = vpop.f32.mrf.mxu0 }
0x296e   :  { %v5803_v32 = vadd.f32 %v19106_v53, %v5802_v21  ;;  %v17045_v53 = vld [vmem:[%s15123_s20] sm:$0xff] }
0x296f   :  { %v13407_v22 = vpop.f32.mrf.mxu0 }
0x2970   :  { %v5806_v62 = vmax.f32 %v5803_v32, 0.0 }
0x2972   :  { %v5887_v26 = vsub.f32 0.0, %v5806_v62  ;;  %v5882_v8 = vmul.f32 0.5, %v5806_v62 }
0x2974   :  { %v5888_v27 = vmul.f32 1.442695, %v5887_v26  ;;  %v5883_v30 = vsub.f32 -0.9189385, %v5882_v8 }
0x2985   :  { %v5986_v23 = vpop.f32.mrf.mxu0 }
0x2986   :  { %5997 = vrot.lane.b32.xlu0 %v5986_v23, %s18947_s17  ;;  %v11703_v25 = vmul.f32 -1.442695, %v5986_v23 }
0x2987   :  { %v13445_v11 = vpop.f32.mrf.mxu0 }
0x2988   :  { %14392 = vpow2.f32 %v11703_v25  ;;  %v17015_v11 = vld [vmem:[%s15123_s20 + $0x30] sm:$0xff]  ;;  %v17020_v25 = vld [vmem:[%s15123_s20 + $0x28] sm:$0xff] }
0x2995   :  { %v14393_v28 = vpop.eup %14392 }
0x2996   :  { %v5993_v34 = vadd.f32 1.0, %v14393_v28  ;;  %v17025_v28 = vld [vmem:[%s15123_s20 + $0x20] sm:$0xff] }
0x2998   :  { %14394 = vrcp.f32 %v5993_v34  ;;  %v17030_v34 = vld [vmem:[%s15123_s20 + $0x18] sm:$0xff] }
0x29a5   :  { %v14395_v42 = vpop.eup %14394 }
0x29a6   :  { %v6007_v18 = vsub.f32 1.0, %v14395_v42  ;;  %v6013_v20 = vmul.f32 %v14395_v42, %v16661_v57 }
0x29f8   :  { %v5998_v43 = vpop.permute.xlu0 %5997 }
0x29f9   :  { %v6000_v51 = vmul.f32 %v14395_v42, %v5998_v43  ;;  %v17035_v42 = vld [vmem:[%s15123_s20 + $0x10] sm:$0xff]  ;;  %v17040_v43 = vld [vmem:[%s15123_s20 + $0x8] sm:$0xff] }
0x29fb   :  { %6002 = vrot.lane.b32.xlu1 %v6000_v51, %s18948_s4 }
0x29ff   :  { %5808 = vrot.lane.b32.xlu1 %v5806_v62, %s18990_s22 }
0x2a6d   :  { %v6003_v37 = vpop.permute.xlu1 %6002 }
0x2a6e   :  { %v6005_v24 = vadd.f32 %v6003_v37, %v5986_v23  ;;  %v17008_v23 = vld [vmem:[%s15123_s20 + $0x38] sm:$0xff] }
0x2a70   :  { %14396 = vtanh.f32 %v6005_v24 }
0x2a71   :  { %v5809_v54 = vpop.permute.xlu1 %5808  ;;  %14398 = vpow2.f32 %v5888_v27 }
0x2a72   :  { %13417 = vmatmul.mubr.msk.f32.vlgmr.msra.gmra.mxu1 %vm348_vm5, %v5809_v54 }
0x2a73   :  { %13447 = vmatpush3.msra.mxu1 %v19107_v12  ;;  %13462 = vmatprep.mubr.msk.f32.mxu1 %vm15032_vm0, %v18939_v35  ;;  %v11707_v12 = vld [vmem:[%s15053_s9 + $0x20] sm:$0xff] }
0x2a74   :  { %13448 = vmatprep.subr.mxu1 %v18939_v35  ;;  %13484 = vmatmul.mubr.msk.f32.vlgmr.msra.gmra.mxu0 %vm424_vm4, %v11707_v12 }
0x2a75   :  { %13449 = vmatpush3.msra.mxu1 %v19108_v7  ;;  %v17053_v7 = vld [vmem:[%s18879_s29 + $0x18] sm:$0xff]  ;;  %13494 = vmatprep.mubr.msk.f32.mxu0 %vm15032_vm0, %v18939_v35 }
0x2a76   :  { %13450 = vmatprep.subr.mxu1 %v18939_v35  ;;  %13487 = vmatpush3.msra.mxu0 %v17053_v7 }
0x2a77   :  { %13451 = vmatpush3.msra.mxu1 %v19109_v45  ;;  %13488 = vmatprep.subr.mxu0 %v18939_v35  ;;  %v17060_v45 = vld [vmem:[%s18879_s29 + $0x10] sm:$0xff] }
0x2a78   :  { %13452 = vmatprep.subr.mxu1 %v18939_v35  ;;  %13489 = vmatpush3.msra.mxu0 %v17060_v45 }
0x2a79   :  { %13453 = vmatpush3.msra.mxu1 %v19110_v48  ;;  %13490 = vmatprep.subr.mxu0 %v18939_v35  ;;  %v17065_v48 = vld [vmem:[%s18879_s29 + $0x8] sm:$0xff] }
0x2a7a   :  { %13454 = vmatprep.subr.mxu1 %v18939_v35  ;;  %13491 = vmatpush3.msra.mxu0 %v17065_v48 }
0x2a7b   :  { %13455 = vmatpush3.msra.mxu1 %v19111_v49  ;;  %13492 = vmatprep.subr.mxu0 %v18939_v35  ;;  %v17070_v49 = vld [vmem:[%s18879_s29] sm:$0xff] }
0x2a7c   :  { %13456 = vmatprep.subr.mxu1 %v18939_v35  ;;  %13493 = vmatpush3.msra.mxu0 %v17070_v49 }
0x2a7d   :  { %v14397_v50 = vpop.eup %14396  ;;  %13457 = vmatpush3.msra.mxu1 %v19112_v44  ;;  %13516 = vmatprep.subr.mxu0 %v18939_v35 }
0x2a7e   :  { %6009 = vrot.lane.b32.xlu0 %v14397_v50, %s18949_s27  ;;  %13458 = vmatprep.subr.mxu1 %v18939_v35  ;;  %v14399_v40 = vpop.eup %14398 }
0x2a7f   :  { %13459 = vmatpush3.msra.mxu1 %v19113_v14 }
0x2a80   :  { %13460 = vmatprep.subr.mxu1 %v18939_v35 }
0x2a81   :  { %13461 = vmatpush3.msra.mxu1 %v19114_v15 }
0x2a82   :  { %13465 = vmatprep.subr.mxu1 %v18939_v35 }
0x2af0   :  { %v6010_v19 = vpop.permute.xlu0 %6009 }
0x2af1   :  { %v6012_v1 = vmul.f32 %v6010_v19, %v6007_v18 }
0x2af3   :  { %v16952_v38 = vadd.f32 %v6013_v20, %v6012_v1  ;;  %v17076_v20 = vld [vmem:[%s18880_s8] sm:$0xff] }
0x2af5   :  { %6016 = vrot.lane.b32.xlu0 %v16952_v38, %s18949_s27 }
0x2b32   :  { %v5878_v2 = vpop.f32.mrf.mxu1 }
0x2b33   :  { %v5879_v10 = vadd.f32 %v16957_v52, %v5878_v2  ;;  %v17081_v2 = vld [vmem:[%s18881_s12 + $0x18] sm:$0xff] }
0x2b34   :  { %v13418_v58 = vpop.f32.mrf.mxu1  ;;  %v6342_v19 = vpop.f32.mrf.mxu0 }
0x2b35   :  { %v5884_v31 = vsub.f32 %v16678_v46, %v5879_v10  ;;  %v16967_v46 = vld [vmem:[#allocation2] sm:$0x7]  ;;  %v6343_v1 = vadd.f32 %v17076_v20, %v6342_v19 }
0x2b36   :  { %v13485_v26 = vpop.f32.mrf.mxu0 }
0x2b37   :  { %v5885_v57 = vmul.f32 %v5884_v31, %v5884_v31  ;;  %v6346_v27 = vmax.f32 %v6343_v1, 0.0  ;;  %v17088_v31 = vld [vmem:[%s18881_s12 + $0x10] sm:$0xff] }
0x2b39   :  { %v5886_v61 = vmul.f32 0.5, %v5885_v57  ;;  %13495 = vmatmul.mubr.msk.f32.vlgmr.msra.gmra.mxu0 %vm348_vm5, %v6346_v27  ;;  %v17188_v27 = vld [vmem:[#allocation11] sm:$0xff] }
0x2b3a   :  { %13517 = vmatpush3.msra.mxu0 %v17081_v2  ;;  %13524 = vmatprep.mubr.msk.f32.mxu0 %vm15032_vm0, %v18939_v35 }
0x2b3b   :  { %v5890_v0 = vmul.f32 %v14399_v40, %v5886_v61  ;;  %13518 = vmatprep.subr.mxu0 %v18939_v35  ;;  %v17093_v61 = vld [vmem:[%s18882_s23] sm:$0xff] }
0x2b3c   :  { %13519 = vmatpush3.msra.mxu0 %v17088_v31 }
0x2b3d   :  { %v5891_v63 = vsub.f32 %v5883_v30, %v5890_v0  ;;  %13520 = vmatprep.subr.mxu0 %v18939_v35  ;;  %v17098_v30 = vld [vmem:[%s18881_s12 + $0x8] sm:$0xff] }
0x2b3e   :  { %13521 = vmatpush3.msra.mxu0 %v17098_v30 }
0x2b3f   :  { %v16962_v3 = vadd.f32 %v5891_v63, %v16668_v29  ;;  %v16980_v29 = vld [vmem:[%s15073_s25 + $0x18] sm:$0xff]  ;;  %13522 = vmatprep.subr.mxu0 %v18939_v35  ;;  %v17105_v63 = vld [vmem:[%s18881_s12] sm:$0xff] }
0x2b40   :  { %13523 = vmatpush3.msra.mxu0 %v17105_v63 }
0x2b41   :  { %13527 = vmatprep.subr.mxu0 %v18939_v35 }
0x2b67   :  { %v6017_v13 = vpop.permute.xlu0 %6016 }
0x2b68   :  { %v6019_v36 = vsel %vm348_vm5, %v6017_v13, %v16739_v56  ;;  %v17115_v13 = vld [vmem:[%s18883_s26 + $0x18] sm:$0xff] }
0x2b69   :  { %13463 = vmatmul.mubr.msk.f32.vlgmr.msra.gmra.mxu1 %vm591_vm6, %v6019_v36  ;;  %v17122_v36 = vld [vmem:[%s18883_s26 + $0x10] sm:$0xff] }
0x2b6a   :  { %13466 = vmatpush3.msk.msra.mxu1 %vm268_vm1, %v16967_v46  ;;  %13467 = vmatprep.mubr.msk.f32.mxu1 %vm15032_vm0, %v18939_v35 }
0x2b6b   :  { %13470 = vmatprep.subr.mxu1 %v18939_v35 }
0x2b6d   :  { %13468 = vmatmul.mubr.msk.f32.vlgmr.msra.gmra.mxu1 %vm264_vm2, %v16974_v33 }
0x2b6e   :  { %13471 = vmatpush3.msra.mxu1 %v16980_v29  ;;  %13478 = vmatprep.mubr.msk.f32.mxu1 %vm15032_vm0, %v18939_v35 }
0x2b6f   :  { %13472 = vmatprep.subr.mxu1 %v18939_v35 }
0x2b70   :  { %13473 = vmatpush3.msra.mxu1 %v16987_v55 }
0x2b71   :  { %13474 = vmatprep.subr.mxu1 %v18939_v35 }
0x2b72   :  { %13475 = vmatpush3.msra.mxu1 %v16992_v4 }
0x2b73   :  { %13476 = vmatprep.subr.mxu1 %v18939_v35 }
0x2b74   :  { %13477 = vmatpush3.msra.mxu1 %v16997_v39 }
0x2b75   :  { %13497 = vmatprep.subr.mxu1 %v18939_v35 }
0x2c29   :  { %v6089_v41 = vpop.f32.mrf.mxu1 }
0x2c2a   :  { %6100 = vrot.lane.b32.xlu1 %v6089_v41, %s18947_s17  ;;  %v11705_v32 = vmul.f32 -1.442695, %v6089_v41 }
0x2c2b   :  { %v13464_v5 = vpop.f32.mrf.mxu1 }
0x2c2c   :  { %14400 = vpow2.f32 %v11705_v32  ;;  %v17132_v5 = vld [vmem:[%s18883_s26] sm:$0xff] }
0x2c2d   :  { %v6195_v6 = vpop.f32.mrf.mxu1  ;;  %v17155_v32 = vld [vmem:[%s18887_s1] sm:$0xff] }
0x2c2e   :  { %v6196_v17 = vadd.f32 %v17003_v9, %v6195_v6 }
0x2c2f   :  { %v13469_v21 = vpop.f32.mrf.mxu1 }
0x2c30   :  { %v6199_v22 = vmax.f32 %v6196_v17, 0.0  ;;  %v17138_v17 = vld [vmem:[%s18887_s1 + $0x18] sm:$0xff]  ;;  %v17145_v21 = vld [vmem:[%s18887_s1 + $0x10] sm:$0xff] }
0x2c32   :  { %13479 = vmatmul.mubr.msk.f32.vlgmr.msra.gmra.mxu1 %vm348_vm5, %v6199_v22  ;;  %v17150_v22 = vld [vmem:[%s18887_s1 + $0x8] sm:$0xff] }
0x2c33   :  { %13498 = vmatpush3.msra.mxu1 %v17008_v23  ;;  %13513 = vmatprep.mubr.msk.f32.mxu1 %vm15032_vm0, %v18939_v35 }
0x2c34   :  { %13499 = vmatprep.subr.mxu1 %v18939_v35 }
0x2c35   :  { %13500 = vmatpush3.msra.mxu1 %v17015_v11 }
0x2c36   :  { %13501 = vmatprep.subr.mxu1 %v18939_v35 }
0x2c37   :  { %13502 = vmatpush3.msra.mxu1 %v17020_v25 }
0x2c38   :  { %13503 = vmatprep.subr.mxu1 %v18939_v35 }
0x2c39   :  { %13504 = vmatpush3.msra.mxu1 %v17025_v28  ;;  %v14401_v51 = vpop.eup %14400 }
0x2c3a   :  { %13505 = vmatprep.subr.mxu1 %v18939_v35  ;;  %v6096_v62 = vadd.f32 1.0, %v14401_v51  ;;  %v17159_v51 = vpop.f32.mrf.mxu0 }
0x2c3b   :  { %13506 = vmatpush3.msra.mxu1 %v17030_v34 }
0x2c3c   :  { %13507 = vmatprep.subr.mxu1 %v18939_v35  ;;  %14402 = vrcp.f32 %v6096_v62  ;;  %v13496_v62 = vpop.f32.mrf.mxu0 }
0x2c3d   :  { %13508 = vmatpush3.msra.mxu1 %v17035_v42  ;;  %v17208_v62 = vld [vmem:[%s18886_s24 + $0x8] sm:$0xff] }
0x2c3e   :  { %13509 = vmatprep.subr.mxu1 %v18939_v35 }
0x2c3f   :  { %13510 = vmatpush3.msra.mxu1 %v17040_v43 }
0x2c40   :  { %13511 = vmatprep.subr.mxu1 %v18939_v35 }
0x2c41   :  { %13512 = vmatpush3.msra.mxu1 %v17045_v53 }
0x2c42   :  { %13538 = vmatprep.subr.mxu1 %v18939_v35 }
0x2c49   :  { %v14403_v37 = vpop.eup %14402 }
0x2c4a   :  { %v6110_v10 = vsub.f32 1.0, %v14403_v37  ;;  %v6116_v8 = vmul.f32 %v14403_v37, %v16739_v56 }
0x2c9c   :  { %v6101_v24 = vpop.permute.xlu1 %6100 }
0x2c9d   :  { %v6103_v54 = vmul.f32 %v14403_v37, %v6101_v24  ;;  %v17162_v24 = vld [vmem:[%s18884_s28] sm:$0xff] }
0x2c9f   :  { %6105 = vrot.lane.b32.xlu0 %v6103_v54, %s18948_s4 }
0x2cf2   :  { %v6269_v14 = vpop.f32.mrf.mxu1 }
0x2cf3   :  { %v6270_v40 = vadd.f32 %v17093_v61, %v6269_v14  ;;  %v17174_v14 = vld [vmem:[%s18885_s3 + $0x10] sm:$0xff] }
0x2cf4   :  { %v13480_v15 = vpop.f32.mrf.mxu1 }
0x2cf5   :  { %v17179_v15 = vld [vmem:[%s18885_s3 + $0x8] sm:$0xff] }
0x2d11   :  { %v6106_v50 = vpop.permute.xlu0 %6105 }
0x2d12   :  { %v6108_v44 = vadd.f32 %v6106_v50, %v6089_v41  ;;  %v17127_v41 = vld [vmem:[%s18883_s26 + $0x8] sm:$0xff] }
0x2d14   :  { %14404 = vtanh.f32 %v6108_v44  ;;  %v17167_v44 = vld [vmem:[%s18885_s3 + $0x18] sm:$0xff] }
0x2d21   :  { %v14405_v18 = vpop.eup %14404 }
0x2d22   :  { %6112 = vrot.lane.b32.xlu1 %v14405_v18, %s18949_s27  ;;  %v17184_v18 = vld [vmem:[%s18885_s3] sm:$0xff] }
0x2d94   :  { %v6113_v58 = vpop.permute.xlu1 %6112 }
0x2d95   :  { %v6115_v57 = vmul.f32 %v6113_v58, %v6110_v10 }
0x2d97   :  { %v17101_v0 = vadd.f32 %v6116_v8, %v6115_v57  ;;  %v17193_v57 = vld [vmem:[%s18886_s24 + $0x18] sm:$0xff] }
0x2d99   :  { %v6420_v56 = vsel %vm348_vm5, %v6270_v40, %v17101_v0  ;;  %6644 = vrot.lane.b32.xlu0 %v17101_v0, %s18949_s27  ;;  %v17198_v40 = vld [vmem:[#allocation13] sm:$0xff] }
0x2d9a   :  { %13514 = vmatmul.mubr.msk.f32.vlgmr.msra.gmra.mxu1 %vm591_vm6, %v6420_v56 }
0x2d9b   :  { %13539 = vmatpush3.msra.mxu1 %v17115_v13  ;;  %13546 = vmatprep.mubr.msk.f32.mxu1 %vm15032_vm0, %v18939_v35 }
0x2d9c   :  { %13540 = vmatprep.subr.mxu1 %v18939_v35 }
0x2d9d   :  { %13541 = vmatpush3.msra.mxu1 %v17122_v36 }
0x2d9e   :  { %13542 = vmatprep.subr.mxu1 %v18939_v35 }
0x2d9f   :  { %13543 = vmatpush3.msra.mxu1 %v17127_v41 }
0x2da0   :  { %13544 = vmatprep.subr.mxu1 %v18939_v35 }
0x2da1   :  { %13545 = vmatpush3.msra.mxu1 %v17132_v5 }
0x2da2   :  { %13560 = vmatprep.subr.mxu1 %v18939_v35 }
0x2e0b   :  { %v6645_v6 = vpop.permute.xlu0 %6644 }
0x2e0c   :  { %13547 = vmatmul.mubr.msk.f32.vlgmr.msra.gmra.mxu1 %vm348_vm5, %v6645_v6  ;;  %v17203_v6 = vld [vmem:[%s18886_s24 + $0x10] sm:$0xff] }
0x2e0d   :  { %13561 = vmatpush3.msra.mxu1 %v17138_v17  ;;  %13568 = vmatprep.mubr.msk.f32.mxu1 %vm15032_vm0, %v18939_v35 }
0x2e0e   :  { %13562 = vmatprep.subr.mxu1 %v18939_v35 }
0x2e0f   :  { %13563 = vmatpush3.msra.mxu1 %v17145_v21 }
0x2e10   :  { %13564 = vmatprep.subr.mxu1 %v18939_v35 }
0x2e11   :  { %13565 = vmatpush3.msra.mxu1 %v17150_v22 }
0x2e12   :  { %13566 = vmatprep.subr.mxu1 %v18939_v35 }
0x2e13   :  { %13567 = vmatpush3.msra.mxu1 %v17155_v32 }
0x2e14   :  { %13576 = vmatprep.subr.mxu1 %v18939_v35 }
0x2e5a   :  { %v6490_v37 = vpop.f32.mrf.mxu1 }
0x2e5b   :  { %v6491_v54 = vadd.f32 %v17162_v24, %v6490_v37 }
0x2e5c   :  { %v13515_v12 = vpop.f32.mrf.mxu1 }
0x2e5d   :  { %v6494_v50 = vmax.f32 %v6491_v54, 0.0  ;;  %v17213_v54 = vld [vmem:[%s18886_s24] sm:$0xff]  ;;  %v17218_v12 = vld [vmem:[#allocation8] sm:$0xf] }
0x2e5e   :  { %19115 = vst [vmem:[#allocation54_spill] sm:$0xff] %v17213_v54  ;;  %19116 = vst [vmem:[#allocation57_spill] sm:$0xff] %v17218_v12 }
0x2e5f   :  { %13525 = vmatmul.mubr.msk.f32.vlgmr.msra.gmra.mxu0 %vm348_vm5, %v6494_v50 }
0x2e60   :  { %13528 = vmatpush3.msra.mxu0 %v17167_v44  ;;  %13535 = vmatprep.mubr.msk.f32.mxu0 %vm15032_vm0, %v18939_v35 }
0x2e61   :  { %13529 = vmatprep.subr.mxu0 %v18939_v35 }
0x2e62   :  { %13530 = vmatpush3.msra.mxu0 %v17174_v14 }
0x2e63   :  { %13531 = vmatprep.subr.mxu0 %v18939_v35 }
0x2e64   :  { %13532 = vmatpush3.msra.mxu0 %v17179_v15 }
0x2e65   :  { %13533 = vmatprep.subr.mxu0 %v18939_v35 }
0x2e66   :  { %13534 = vmatpush3.msra.mxu0 %v17184_v18 }
0x2e67   :  { %13549 = vmatprep.subr.mxu0 %v18939_v35 }
0x2ecc   :  { %v6714_v19 = vpop.f32.mrf.mxu1 }
0x2ecd   :  { %v6715_v56 = vadd.f32 %v17198_v40, %v6714_v19  ;;  %v17226_v19 = vld [vmem:[%s18888_s2] sm:$0xff] }
0x2ece   :  { %v13548_v1 = vpop.f32.mrf.mxu1  ;;  %19117 = vst [vmem:[#allocation59_spill] sm:$0xff] %v17226_v19 }
0x2ecf   :  { %v6718_v37 = vmax.f32 %v6715_v56, 0.0 }
0x2f1f   :  { %v6564_v26 = vpop.f32.mrf.mxu0 }
0x2f20   :  { %v6565_v10 = vadd.f32 %v17188_v27, %v6564_v26 }
0x2f21   :  { %v13526_v58 = vpop.f32.mrf.mxu0 }
0x2f22   :  { %v6568_v8 = vmax.f32 %v6565_v10, 0.0 }
0x2f24   :  { %13536 = vmatmul.mubr.msk.f32.vlgmr.msra.gmra.mxu0 %vm348_vm5, %v6568_v8 }
0x2f25   :  { %13550 = vmatpush3.msra.mxu0 %v17193_v57  ;;  %13557 = vmatprep.mubr.msk.f32.mxu0 %vm15032_vm0, %v18939_v35 }
0x2f26   :  { %13551 = vmatprep.subr.mxu0 %v18939_v35 }
0x2f27   :  { %13552 = vmatpush3.msra.mxu0 %v17203_v6 }
0x2f28   :  { %13553 = vmatprep.subr.mxu0 %v18939_v35 }
0x2f29   :  { %13554 = vmatpush3.msra.mxu0 %v17208_v62 }
0x2f2a   :  { %13555 = vmatprep.subr.mxu0 %v18939_v35 }
0x2f2b   :  { %13556 = vmatpush3.msra.mxu0 %v17213_v54 }
0x2f2c   :  { %13558 = vmatmul.mubr.msk.f32.vlgmr.msra.gmra.mxu0 %vm348_vm5, %v6718_v37  ;;  %13571 = vmatprep.subr.mxu0 %v18939_v35  ;;  %v17236_v37 = vld [vmem:[%s18889_s7] sm:$0xff] }
0x2f2d   :  { %13572 = vmatpush3.msk.msra.mxu0 %vm1075_vm7, %v17218_v12  ;;  %13573 = vmatprep.mubr.msk.f32.mxu0 %vm15032_vm0, %v18939_v35  ;;  %19120 = vst [vmem:[#allocation58_spill] sm:$0xff] %v17236_v37 }
0x2f2e   :  { %13587 = vmatprep.subr.mxu0 %v18939_v35 }
0x2fe4   :  { %v6638_v50 = vpop.f32.mrf.mxu0 }
0x2fe5   :  { %v17229_v1 = vadd.f32 %v17226_v19, %v6638_v50  ;;  %v17241_v50 = vld [vmem:[%s18892_s10 + $0x18] sm:$0xff] }
0x2fe6   :  { %v13537_v26 = vpop.f32.mrf.mxu0  ;;  %19121 = vst [vmem:[#allocation81_spill] sm:$0xff] %v17241_v50 }
0x2fe7   :  { %19118 = vst [vmem:[#allocation60_spill] sm:$0xff] %v17229_v1  ;;  %v17232_v10 = vmax.f32 %v17229_v1, 0.0  ;;  %v17248_v26 = vld [vmem:[%s18892_s10 + $0x10] sm:$0xff] }
0x2fe8   :  { %19122 = vst [vmem:[#allocation82_spill] sm:$0xff] %v17248_v26 }
0x2fe9   :  { %19119 = vst [vmem:[#allocation61_spill] sm:$0xff] %v17232_v10  ;;  %v6866_v58 = vmul.f32 0.5, %v17232_v10 }
0x2feb   :  { %v6867_v8 = vmul.f32 1.442695, %v6866_v58 }
0x2fec   :  { %v6788_v56 = vpop.f32.mrf.mxu0 }
0x2fed   :  { %14406 = vpow2.f32 %v6867_v8  ;;  %v6789_v16 = vadd.f32 %v17236_v37, %v6788_v56  ;;  %v11708_v8 = vld [vmem:[%s18893_s30 + $0x20] sm:$0xff] }
0x2fee   :  { %v13559_v47 = vpop.f32.mrf.mxu0 }
0x2fef   :  { %13569 = vmatmul.mubr.msk.f32.vlgmr.msra.gmra.mxu1 %vm348_vm5, %v6789_v16  ;;  %v17253_v47 = vld [vmem:[%s18892_s10 + $0x8] sm:$0xff]  ;;  %v17258_v16 = vld [vmem:[%s18892_s10] sm:$0xff] }
0x2ff0   :  { %13577 = vmatpush3.msra.mxu1 %v17241_v50  ;;  %13584 = vmatprep.mubr.msk.f32.mxu1 %vm15032_vm0, %v18939_v35  ;;  %19123 = vst [vmem:[#allocation83_spill] sm:$0xff] %v17253_v47  ;;  %19124 = vst [vmem:[#allocation84_spill] sm:$0xff] %v17258_v16 }
0x2ff1   :  { %13578 = vmatprep.subr.mxu1 %v18939_v35 }
0x2ff2   :  { %13579 = vmatpush3.msra.mxu1 %v17248_v26  ;;  %v17318_v26 = vld [vmem:[%s18901_s16 + $0x18] sm:$0xff] }
0x2ff3   :  { %13580 = vmatprep.subr.mxu1 %v18939_v35  ;;  %19135 = vst [vmem:[#allocation73_spill] sm:$0xff] %v17318_v26 }
0x2ff4   :  { %13581 = vmatpush3.msra.mxu1 %v17253_v47  ;;  %v17269_v47 = vld [vmem:[%s18894_s11 + $0x38] sm:$0xff] }
0x2ff5   :  { %13582 = vmatprep.subr.mxu1 %v18939_v35  ;;  %19125 = vst [vmem:[#allocation62_spill] sm:$0xff] %v17269_v47 }
0x2ff6   :  { %13583 = vmatpush3.msra.mxu1 %v17258_v16 }
0x2ff7   :  { %13606 = vmatprep.subr.mxu1 %v18939_v35 }
0x2ffa   :  { %v14407_v58 = vpop.eup %14406 }
0x2ffb   :  { %6870 = vrot.lane.b32.xlu1 %v14407_v58, %s18952_s6  ;;  %v17276_v58 = vld [vmem:[%s18894_s11 + $0x30] sm:$0xff] }
0x2ffc   :  { %19126 = vst [vmem:[#allocation63_spill] sm:$0xff] %v17276_v58 }
0x2fff   :  { %7351 = vrot.lane.b32.xlu1 %v16952_v38, %s18947_s17 }
0x306d   :  { %v6871_v56 = vpop.permute.xlu1 %6870 }
0x306e   :  { %v6873_v10 = vmul.f32 %v11708_v8, %v6871_v56  ;;  %v17291_v8 = vld [vmem:[%s18894_s11 + $0x18] sm:$0xff]  ;;  %v17296_v56 = vld [vmem:[%s18894_s11 + $0x10] sm:$0xff] }
0x306f   :  { %19129 = vst [vmem:[#allocation67_spill] sm:$0xff] %v17291_v8  ;;  %19130 = vst [vmem:[#allocation68_spill] sm:$0xff] %v17296_v56 }
0x3070   :  { %v6874_v60 = vadd.f32 %v6873_v10, %v17229_v1  ;;  %v17281_v10 = vld [vmem:[%s18894_s11 + $0x28] sm:$0xff] }
0x3071   :  { %19127 = vst [vmem:[#allocation64_spill] sm:$0xff] %v17281_v10  ;;  %v17301_v1 = vld [vmem:[%s18894_s11 + $0x8] sm:$0xff] }
0x3072   :  { %13574 = vmatmul.mubr.msk.f32.vlgmr.msra.gmra.mxu0 %vm1071_vm8, %v6874_v60  ;;  %v17286_v60 = vld [vmem:[%s18894_s11 + $0x20] sm:$0xff]  ;;  %19131 = vst [vmem:[#allocation69_spill] sm:$0xff] %v17301_v1 }
0x3073   :  { %13588 = vmatpush3.msra.mxu0 %v17269_v47  ;;  %13603 = vmatprep.mubr.msk.f32.mxu0 %vm15032_vm0, %v18939_v35  ;;  %19128 = vst [vmem:[#allocation66_spill] sm:$0xff] %v17286_v60 }
0x3074   :  { %13589 = vmatprep.subr.mxu0 %v18939_v35 }
0x3075   :  { %13590 = vmatpush3.msra.mxu0 %v17276_v58  ;;  %v17313_v58 = vld [vmem:[%s18896_s15] sm:$0xff] }
0x3076   :  { %13591 = vmatprep.subr.mxu0 %v18939_v35  ;;  %19134 = vst [vmem:[#allocation72_spill] sm:$0xff] %v17313_v58 }
0x3077   :  { %13592 = vmatpush3.msra.mxu0 %v17281_v10 }
0x3078   :  { %13593 = vmatprep.subr.mxu0 %v18939_v35 }
0x3079   :  { %13594 = vmatpush3.msra.mxu0 %v17286_v60  ;;  %v17306_v60 = vld [vmem:[%s18894_s11] sm:$0xff] }
0x307a   :  { %13595 = vmatprep.subr.mxu0 %v18939_v35  ;;  %19132 = vst [vmem:[#allocation70_spill] sm:$0xff] %v17306_v60 }
0x307b   :  { %13596 = vmatpush3.msra.mxu0 %v17291_v8 }
0x307c   :  { %13597 = vmatprep.subr.mxu0 %v18939_v35 }
0x307d   :  { %13598 = vmatpush3.msra.mxu0 %v17296_v56 }
0x307e   :  { %13599 = vmatprep.subr.mxu0 %v18939_v35 }
0x307f   :  { %13600 = vmatpush3.msra.mxu0 %v17301_v1 }
0x3080   :  { %13601 = vmatprep.subr.mxu0 %v18939_v35 }
0x3081   :  { %13602 = vmatpush3.msra.mxu0 %v17306_v60 }
0x3082   :  { %13628 = vmatprep.subr.mxu0 %v18939_v35 }
0x30af   :  { %v17310_v8 = vpop.f32.mrf.mxu1 }
0x30b0   :  { %19133 = vst [vmem:[#allocation71_spill] sm:$0xff] %v17310_v8 }
0x30b1   :  { %v13570_v56 = vpop.f32.mrf.mxu1 }
0x30b2   :  { %v17325_v56 = vld [vmem:[%s18901_s16 + $0x10] sm:$0xff] }
0x30b3   :  { %19136 = vst [vmem:[#allocation74_spill] sm:$0xff] %v17325_v56 }
0x3132   :  { %v6944_v10 = vpop.f32.mrf.mxu0 }
0x3133   :  { %v6945_v47 = vadd.f32 %v17313_v58, %v6944_v10  ;;  %v17339_v10 = vld [vmem:[#allocation10] sm:$0xff] }
0x3134   :  { %v13575_v1 = vpop.f32.mrf.mxu0  ;;  %19139 = vst [vmem:[#allocation77_spill] sm:$0xff] %v17339_v10 }
0x3135   :  { %v6948_v16 = vmax.f32 %v6945_v47, 0.0  ;;  %v17330_v1 = vld [vmem:[%s18901_s16 + $0x8] sm:$0xff]  ;;  %v17335_v47 = vld [vmem:[%s18901_s16] sm:$0xff]  ;;  %s19141_s16 = sld [smem:[#allocation41_spill]] }
0x3136   :  { %19137 = vst [vmem:[#allocation75_spill] sm:$0xff] %v17330_v1  ;;  %19138 = vst [vmem:[#allocation76_spill] sm:$0xff] %v17335_v47 }
0x3137   :  { %13585 = vmatmul.mubr.msk.f32.vlgmr.msra.gmra.mxu1 %vm348_vm5, %v6948_v16 }
0x3138   :  { %13607 = vmatpush3.msra.mxu1 %v17318_v26  ;;  %13614 = vmatprep.mubr.msk.f32.mxu1 %vm15032_vm0, %v18939_v35  ;;  %v17347_v26 = vld [vmem:[%s18930_s18 + $0x18] sm:$0xff] }
0x3139   :  { %13608 = vmatprep.subr.mxu1 %v18939_v35  ;;  %19140 = vst [vmem:[#allocation78_spill] sm:$0xff] %v17347_v26 }
0x313a   :  { %13609 = vmatpush3.msra.mxu1 %v17325_v56 }
0x313b   :  { %13610 = vmatprep.subr.mxu1 %v18939_v35 }
0x313c   :  { %13611 = vmatpush3.msra.mxu1 %v17330_v1 }
0x313d   :  { %13612 = vmatprep.subr.mxu1 %v18939_v35 }
0x313e   :  { %13613 = vmatpush3.msra.mxu1 %v17335_v47 }
0x313f   :  { %13617 = vmatprep.subr.mxu1 %v18939_v35 }
0x31f7   :  { %v7018_v16 = vpop.f32.mrf.mxu1 }
0x31f8   :  { %v7019_v8 = vadd.f32 %v17339_v10, %v7018_v16  ;;  %v17354_v16 = vld [vmem:[%s18930_s18 + $0x10] sm:$0xff] }
0x31f9   :  { %v13586_v56 = vpop.f32.mrf.mxu1  ;;  %19142 = vst [vmem:[#allocation79_spill] sm:$0xff] %v17354_v16 }
0x31fa   :  { %v7022_v1 = vsel %vm348_vm5, %v7019_v8, %v17101_v0  ;;  %7347 = vrot.lane.b32.xlu0 %v7019_v8, %s18947_s17  ;;  %v17359_v8 = vld [vmem:[%s18930_s18 + $0x8] sm:$0xff]  ;;  %v17364_v56 = vld [vmem:[%s18930_s18] sm:$0xff]  ;;  %s19147_s18 = sld [smem:[#allocation44_spill]] }
0x31fb   :  { %13604 = vmatmul.mubr.msk.f32.vlgmr.msra.gmra.mxu0 %vm591_vm6, %v7022_v1  ;;  %19143 = vst [vmem:[#allocation80_spill] sm:$0xff] %v17359_v8  ;;  %19144 = vst [vmem:[#allocation85_spill] sm:$0xff] %v17364_v56 }
0x31fc   :  { %13629 = vmatpush3.msra.mxu0 %v17347_v26  ;;  %13636 = vmatprep.mubr.msk.f32.mxu0 %vm15032_vm0, %v18939_v35  ;;  %v17369_v26 = vld [vmem:[%s18907_s0] sm:$0xff] }
0x31fd   :  { %13630 = vmatprep.subr.mxu0 %v18939_v35  ;;  %19145 = vst [vmem:[#allocation87_spill] sm:$0xff] %v17369_v26 }
0x31fe   :  { %13631 = vmatpush3.msra.mxu0 %v17354_v16 }
0x31ff   :  { %13632 = vmatprep.subr.mxu0 %v18939_v35 }
0x3200   :  { %13633 = vmatpush3.msra.mxu0 %v17359_v8  ;;  %v17374_v8 = vld [vmem:[%s19141_s16 + $0x18] sm:$0xff] }
0x3201   :  { %13634 = vmatprep.subr.mxu0 %v18939_v35  ;;  %19146 = vst [vmem:[#allocation88_spill] sm:$0xff] %v17374_v8 }
0x3202   :  { %13635 = vmatpush3.msra.mxu0 %v17364_v56  ;;  %v17381_v56 = vld [vmem:[%s19141_s16 + $0x10] sm:$0xff] }
0x3203   :  { %13666 = vmatprep.subr.mxu0 %v18939_v35  ;;  %19148 = vst [vmem:[#allocation89_spill] sm:$0xff] %v17381_v56 }
0x32bb   :  { %v7092_v1 = vpop.f32.mrf.mxu0 }
0x32bc   :  { %v7093_v16 = vadd.f32 %v17369_v26, %v7092_v1  ;;  %v17395_v1 = vld [vmem:[#allocation16] sm:$0xff] }
0x32bd   :  { %v13605_v10 = vpop.f32.mrf.mxu0  ;;  %19151 = vst [vmem:[#allocation92_spill] sm:$0xff] %v17395_v1 }
0x32be   :  { %v7096_v47 = vmax.f32 %v7093_v16, 0.0  ;;  %v17386_v10 = vld [vmem:[%s19141_s16 + $0x8] sm:$0xff] }
0x32bf   :  { %19149 = vst [vmem:[#allocation90_spill] sm:$0xff] %v17386_v10 }
0x32c0   :  { %13615 = vmatmul.mubr.msk.f32.vlgmr.msra.gmra.mxu1 %vm348_vm5, %v7096_v47  ;;  %v17391_v47 = vld [vmem:[%s19141_s16] sm:$0xff] }
0x32c1   :  { %13618 = vmatpush3.msra.mxu1 %v17374_v8  ;;  %13625 = vmatprep.mubr.msk.f32.mxu1 %vm15032_vm0, %v18939_v35  ;;  %19150 = vst [vmem:[#allocation91_spill] sm:$0xff] %v17391_v47 }
0x32c2   :  { %13619 = vmatprep.subr.mxu1 %v18939_v35 }
0x32c3   :  { %13620 = vmatpush3.msra.mxu1 %v17381_v56 }
0x32c4   :  { %13621 = vmatprep.subr.mxu1 %v18939_v35 }
0x32c5   :  { %13622 = vmatpush3.msra.mxu1 %v17386_v10  ;;  %v17400_v10 = vld [vmem:[%s19147_s18 + $0x58] sm:$0xff] }
0x32c6   :  { %13623 = vmatprep.subr.mxu1 %v18939_v35  ;;  %19152 = vst [vmem:[#allocation93_spill] sm:$0xff] %v17400_v10 }
0x32c7   :  { %13624 = vmatpush3.msra.mxu1 %v17391_v47  ;;  %v17407_v47 = vld [vmem:[%s19147_s18 + $0x50] sm:$0xff] }
0x32c8   :  { %13639 = vmatprep.subr.mxu1 %v18939_v35  ;;  %19153 = vst [vmem:[#allocation86_spill] sm:$0xff] %v17407_v47 }
0x3380   :  { %v7166_v16 = vpop.f32.mrf.mxu1 }
0x3381   :  { %v7167_v56 = vadd.f32 %v17395_v1, %v7166_v16  ;;  %v17427_v16 = vld [vmem:[%s19147_s18 + $0x30] sm:$0xff]  ;;  %v17457_v1 = vld [vmem:[%s19147_s18 + $0x8] sm:$0xff] }
0x3382   :  { %v13616_v8 = vpop.f32.mrf.mxu1  ;;  %19157 = vst [vmem:[#allocation99_spill] sm:$0xff] %v17427_v16  ;;  %19163 = vst [vmem:[#allocation105_spill] sm:$0xff] %v17457_v1 }
0x3383   :  { %v7170_v26 = vmax.f32 %v7167_v56, 0.0  ;;  %v17412_v8 = vld [vmem:[%s19147_s18 + $0x48] sm:$0xff]  ;;  %v17422_v56 = vld [vmem:[%s19147_s18 + $0x38] sm:$0xff] }
0x3384   :  { %19154 = vst [vmem:[#allocation96_spill] sm:$0xff] %v17412_v8  ;;  %19156 = vst [vmem:[#allocation98_spill] sm:$0xff] %v17422_v56 }
0x3385   :  { %13626 = vmatmul.mubr.msk.f32.vlgmr.msra.gmra.mxu1 %vm348_vm5, %v7170_v26  ;;  %v17417_v26 = vld [vmem:[%s19147_s18 + $0x40] sm:$0xff] }
0x3386   :  { %13640 = vmatpush3.msra.mxu1 %v17400_v10  ;;  %13663 = vmatprep.mubr.msk.f32.mxu1 %vm15032_vm0, %v18939_v35  ;;  %19155 = vst [vmem:[#allocation97_spill] sm:$0xff] %v17417_v26 }
0x3387   :  { %13641 = vmatprep.subr.mxu1 %v18939_v35 }
0x3388   :  { %13642 = vmatpush3.msra.mxu1 %v17407_v47  ;;  %v17442_v47 = vld [vmem:[%s19147_s18 + $0x18] sm:$0xff] }
0x3389   :  { %13643 = vmatprep.subr.mxu1 %v18939_v35  ;;  %19160 = vst [vmem:[#allocation102_spill] sm:$0xff] %v17442_v47 }
0x338a   :  { %13644 = vmatpush3.msra.mxu1 %v17412_v8  ;;  %v17432_v8 = vld [vmem:[%s19147_s18 + $0x28] sm:$0xff] }
0x338b   :  { %13645 = vmatprep.subr.mxu1 %v18939_v35  ;;  %19158 = vst [vmem:[#allocation100_spill] sm:$0xff] %v17432_v8 }
0x338c   :  { %13646 = vmatpush3.msra.mxu1 %v17417_v26  ;;  %v17437_v26 = vld [vmem:[%s19147_s18 + $0x20] sm:$0xff] }
0x338d   :  { %13647 = vmatprep.subr.mxu1 %v18939_v35  ;;  %19159 = vst [vmem:[#allocation101_spill] sm:$0xff] %v17437_v26 }
0x338e   :  { %13648 = vmatpush3.msra.mxu1 %v17422_v56  ;;  %v7348_v56 = vpop.permute.xlu0 %7347 }
0x338f   :  { %13649 = vmatprep.subr.mxu1 %v18939_v35 }
0x3390   :  { %13650 = vmatpush3.msra.mxu1 %v17427_v16  ;;  %v17445_v16 = vld [vmem:[#allocation7] sm:$0xff] }
0x3391   :  { %13651 = vmatprep.subr.mxu1 %v18939_v35  ;;  %19161 = vst [vmem:[#allocation103_spill] sm:$0xff] %v17445_v16  ;;  %v6417_v10 = vadd.f32 %v17445_v16, %v17159_v51  ;;  %v17463_v51 = vld [vmem:[%s19147_s18] sm:$0xff] }
0x3392   :  { %13652 = vmatpush3.msra.mxu1 %v17432_v8  ;;  %v17451_v8 = vld [vmem:[%s19147_s18 + $0x10] sm:$0xff]  ;;  %19164 = vst [vmem:[#allocation106_spill] sm:$0xff] %v17463_v51 }
0x3393   :  { %13653 = vmatprep.subr.mxu1 %v18939_v35  ;;  %19162 = vst [vmem:[#allocation104_spill] sm:$0xff] %v17451_v8 }
0x3394   :  { %13654 = vmatpush3.msra.mxu1 %v17437_v26  ;;  %v7350_v26 = vsel %vm348_vm5, %v6417_v10, %v7348_v56 }
0x3395   :  { %13655 = vmatprep.subr.mxu1 %v18939_v35 }
0x3396   :  { %13656 = vmatpush3.msra.mxu1 %v17442_v47  ;;  %v7352_v47 = vpop.permute.xlu1 %7351 }
0x3397   :  { %13657 = vmatprep.subr.mxu1 %v18939_v35  ;;  %v7354_v58 = vsel %vm591_vm6, %v7350_v26, %v7352_v47 }
0x3398   :  { %13658 = vmatpush3.msra.mxu1 %v17451_v8 }
0x3399   :  { %13659 = vmatprep.subr.mxu1 %v18939_v35 }
0x339a   :  { %13660 = vmatpush3.msra.mxu1 %v17457_v1 }
0x339b   :  { %13661 = vmatprep.subr.mxu1 %v18939_v35 }
0x339c   :  { %13662 = vmatpush3.msra.mxu1 %v17463_v51 }
0x339d   :  { %13664 = vmatmul.mubr.msk.f32.vlgmr.msra.gmra.mxu1 %vm1594_vm9, %v7354_v58  ;;  %13701 = vmatprep.subr.mxu1 %v18939_v35 }
0x339e   :  { %13702 = vmatpush3.msk.msra.mxu1 %vm428_vm3, %v16920_v59  ;;  %13703 = vmatprep.mubr.msk.f32.mxu1 %vm15032_vm0, %v18939_v35  ;;  %v17475_v59 = vld [vmem:[%s19047_s19] sm:$0xff] }
0x339f   :  { %13706 = vmatprep.subr.mxu1 %v18939_v35  ;;  %19165 = vst [vmem:[#allocation107_spill] sm:$0xff] %v17475_v59 }
0x3445   :  { %v7240_v10 = vpop.f32.mrf.mxu1 }
0x3446   :  { %v7241_v60 = vadd.f32 %v17475_v59, %v7240_v10  ;;  %v17504_v10 = vld [vmem:[%s19048_s13 + $0x18] sm:$0xff] }
0x3447   :  { %v13627_v56 = vpop.f32.mrf.mxu1  ;;  %19170 = vst [vmem:[#allocation112_spill] sm:$0xff] %v17504_v10 }
0x3448   :  { %v7244_v56 = vmax.f32 %v7241_v60, 0.0  ;;  %v17494_v60 = vld [vmem:[%s19048_s13 + $0x28] sm:$0xff] }
0x3449   :  { %19168 = vst [vmem:[#allocation110_spill] sm:$0xff] %v17494_v60 }
0x344a   :  { %v7320_v19 = vmul.f32 0.5, %v7244_v56 }
0x345d   :  { %v7424_v47 = vpop.f32.mrf.mxu1 }
0x345e   :  { %7435 = vrot.lane.b32.xlu0 %v7424_v47, %s18947_s17  ;;  %v11730_v51 = vmul.f32 -1.442695, %v7424_v47 }
0x345f   :  { %v13665_v26 = vpop.f32.mrf.mxu1 }
0x3460   :  { %14408 = vpow2.f32 %v11730_v51 }
0x346d   :  { %v14409_v58 = vpop.eup %14408 }
0x346e   :  { %v7431_v1 = vadd.f32 1.0, %v14409_v58  ;;  %v17482_v58 = vld [vmem:[%s19048_s13 + $0x38] sm:$0xff] }
0x346f   :  { %19166 = vst [vmem:[#allocation108_spill] sm:$0xff] %v17482_v58 }
0x3470   :  { %14410 = vrcp.f32 %v7431_v1 }
0x347d   :  { %v14411_v8 = vpop.eup %14410 }
0x34d0   :  { %v7436_v16 = vpop.permute.xlu0 %7435 }
0x34d1   :  { %v7438_v50 = vmul.f32 %v14411_v8, %v7436_v16  ;;  %v17499_v16 = vld [vmem:[%s19048_s13 + $0x20] sm:$0xff] }
0x34d2   :  { %19169 = vst [vmem:[#allocation111_spill] sm:$0xff] %v17499_v16 }
0x34d3   :  { %7440 = vrot.lane.b32.xlu1 %v7438_v50, %s18948_s4  ;;  %v17489_v50 = vld [vmem:[%s19048_s13 + $0x30] sm:$0xff] }
0x34d4   :  { %19167 = vst [vmem:[#allocation109_spill] sm:$0xff] %v17489_v50 }
0x34d7   :  { %7246 = vrot.lane.b32.xlu1 %v7244_v56, %s18990_s22 }
0x3545   :  { %v7441_v51 = vpop.permute.xlu1 %7440 }
0x3546   :  { %v7443_v26 = vadd.f32 %v7441_v51, %v7424_v47  ;;  %v17509_v51 = vld [vmem:[%s19048_s13 + $0x10] sm:$0xff] }
0x3547   :  { %19171 = vst [vmem:[#allocation113_spill] sm:$0xff] %v17509_v51 }
0x3548   :  { %14412 = vtanh.f32 %v7443_v26  ;;  %v17515_v26 = vld [vmem:[%s19048_s13 + $0x8] sm:$0xff] }
0x3549   :  { %v7247_v1 = vpop.permute.xlu1 %7246  ;;  %19172 = vst [vmem:[#allocation114_spill] sm:$0xff] %v17515_v26 }
0x354a   :  { %13637 = vmatmul.mubr.msk.f32.vlgmr.msra.gmra.mxu0 %vm348_vm5, %v7247_v1  ;;  %v17520_v1 = vld [vmem:[%s19048_s13] sm:$0xff] }
0x354b   :  { %13667 = vmatpush3.msra.mxu0 %v17482_v58  ;;  %13682 = vmatprep.mubr.msk.f32.mxu0 %vm15032_vm0, %v18939_v35  ;;  %19173 = vst [vmem:[#allocation115_spill] sm:$0xff] %v17520_v1 }
0x354c   :  { %13668 = vmatprep.subr.mxu0 %v18939_v35 }
0x354d   :  { %13669 = vmatpush3.msra.mxu0 %v17489_v50  ;;  %v7325_v50 = vsub.f32 0.0, %v7244_v56 }
0x354e   :  { %13670 = vmatprep.subr.mxu0 %v18939_v35 }
0x354f   :  { %13671 = vmatpush3.msra.mxu0 %v17494_v60 }
0x3550   :  { %13672 = vmatprep.subr.mxu0 %v18939_v35 }
0x3551   :  { %13673 = vmatpush3.msra.mxu0 %v17499_v16 }
0x3552   :  { %13674 = vmatprep.subr.mxu0 %v18939_v35 }
0x3553   :  { %13675 = vmatpush3.msra.mxu0 %v17504_v10  ;;  %v7445_v10 = vsub.f32 1.0, %v14411_v8 }
0x3554   :  { %13676 = vmatprep.subr.mxu0 %v18939_v35 }
0x3555   :  { %v14413_v47 = vpop.eup %14412  ;;  %13677 = vmatpush3.msra.mxu0 %v17509_v51  ;;  %v7451_v51 = vmul.f32 %v14411_v8, %v16952_v38  ;;  %v7321_v8 = vsub.f32 -0.9189385, %v7320_v19 }
0x3556   :  { %7447 = vrot.lane.b32.xlu0 %v14413_v47, %s18949_s27  ;;  %13678 = vmatprep.subr.mxu0 %v18939_v35 }
0x3557   :  { %13679 = vmatpush3.msra.mxu0 %v17515_v26  ;;  %v7326_v26 = vmul.f32 1.442695, %v7325_v50 }
0x3558   :  { %13680 = vmatprep.subr.mxu0 %v18939_v35 }
0x3559   :  { %13681 = vmatpush3.msra.mxu0 %v17520_v1  ;;  %14414 = vpow2.f32 %v7326_v26 }
0x355a   :  { %13685 = vmatprep.subr.mxu0 %v18939_v35 }
0x3566   :  { %v14415_v38 = vpop.eup %14414 }
0x35c8   :  { %v7448_v16 = vpop.permute.xlu0 %7447 }
0x35c9   :  { %v7450_v60 = vmul.f32 %v7448_v16, %v7445_v10 }
0x35cb   :  { %v17525_v47 = vadd.f32 %v7451_v51, %v7450_v60 }
0x35cd   :  { %7454 = vrot.lane.b32.xlu0 %v17525_v47, %s18949_s27 }
0x360a   :  { %v7316_v58 = vpop.f32.mrf.mxu0 }
0x360b   :  { %v7317_v59 = vadd.f32 %v16957_v52, %v7316_v58  ;;  %v17542_v52 = vld [vmem:[%s15048_s5 + $0x28] sm:$0xff] }
0x360c   :  { %v13638_v1 = vpop.f32.mrf.mxu0 }
0x360d   :  { %v7322_v37 = vsub.f32 %v16974_v33, %v7317_v59 }
0x360f   :  { %v7323_v12 = vmul.f32 %v7322_v37, %v7322_v37 }
0x3611   :  { %v7324_v54 = vmul.f32 0.5, %v7323_v12 }
0x3613   :  { %v7328_v60 = vmul.f32 %v14415_v38, %v7324_v54  ;;  %v19179_v38 = vld [vmem:[#allocation58_spill] sm:$0xff] }
0x3615   :  { %v7329_v16 = vsub.f32 %v7321_v8, %v7328_v60 }
0x3617   :  { %v17532_v10 = vadd.f32 %v7329_v16, %v16962_v3  ;;  %v19180_v16 = vld [vmem:[#allocation81_spill] sm:$0xff] }
0x363f   :  { %v7455_v51 = vpop.permute.xlu0 %7454 }
0x3640   :  { %v7457_v50 = vsel %vm348_vm5, %v7455_v51, %v17101_v0  ;;  %v19181_v51 = vld [vmem:[#allocation82_spill] sm:$0xff] }
0x3641   :  { %13683 = vmatmul.mubr.msk.f32.vlgmr.msra.gmra.mxu0 %vm591_vm6, %v7457_v50  ;;  %v19182_v50 = vld [vmem:[#allocation83_spill] sm:$0xff] }
0x3642   :  { %13686 = vmatpush3.msk.msra.mxu0 %vm268_vm1, %v16967_v46  ;;  %13687 = vmatprep.mubr.msk.f32.mxu0 %vm15032_vm0, %v18939_v35 }
0x3643   :  { %13690 = vmatprep.subr.mxu0 %v18939_v35 }
0x3645   :  { %13688 = vmatmul.mubr.msk.f32.vlgmr.msra.gmra.mxu0 %vm264_vm2, %v17542_v52 }
0x3646   :  { %13691 = vmatpush3.msra.mxu0 %v16980_v29  ;;  %13698 = vmatprep.mubr.msk.f32.mxu0 %vm15032_vm0, %v18939_v35 }
0x3647   :  { %13692 = vmatprep.subr.mxu0 %v18939_v35 }
0x3648   :  { %13693 = vmatpush3.msra.mxu0 %v16987_v55 }
0x3649   :  { %13694 = vmatprep.subr.mxu0 %v18939_v35 }
0x364a   :  { %13695 = vmatpush3.msra.mxu0 %v16992_v4 }
0x364b   :  { %13696 = vmatprep.subr.mxu0 %v18939_v35 }
0x364c   :  { %13697 = vmatpush3.msra.mxu0 %v16997_v39 }
0x364d   :  { %13717 = vmatprep.subr.mxu0 %v18939_v35 }
0x3701   :  { %v7527_v3 = vpop.f32.mrf.mxu0 }
0x3702   :  { %7538 = vrot.lane.b32.xlu1 %v7527_v3, %s18947_s17  ;;  %v11732_v55 = vmul.f32 -1.442695, %v7527_v3 }
0x3703   :  { %v13684_v46 = vpop.f32.mrf.mxu0 }
0x3704   :  { %14416 = vpow2.f32 %v11732_v55  ;;  %v19184_v55 = vld [vmem:[#allocation62_spill] sm:$0xff] }
0x3705   :  { %v7633_v33 = vpop.f32.mrf.mxu0 }
0x3706   :  { %v7634_v29 = vadd.f32 %v17003_v9, %v7633_v33  ;;  %v11735_v33 = vld [vmem:[%s18893_s30 + $0x28] sm:$0xff] }
0x3707   :  { %v13689_v54 = vpop.f32.mrf.mxu0 }
0x3708   :  { %v7637_v12 = vmax.f32 %v7634_v29, 0.0 }
0x370a   :  { %13699 = vmatmul.mubr.msk.f32.vlgmr.msra.gmra.mxu0 %vm348_vm5, %v7637_v12 }
0x370b   :  { %13718 = vmatpush3.msra.mxu0 %v17008_v23  ;;  %13733 = vmatprep.mubr.msk.f32.mxu0 %vm15032_vm0, %v18939_v35 }
0x370c   :  { %13719 = vmatprep.subr.mxu0 %v18939_v35 }
0x370d   :  { %13720 = vmatpush3.msra.mxu0 %v17015_v11 }
0x370e   :  { %13721 = vmatprep.subr.mxu0 %v18939_v35 }
0x370f   :  { %13722 = vmatpush3.msra.mxu0 %v17020_v25  ;;  %v11734_v25 = vld [vmem:[%s15053_s9 + $0x28] sm:$0xff] }
0x3710   :  { %13723 = vmatprep.subr.mxu0 %v18939_v35  ;;  %13704 = vmatmul.mubr.msk.f32.vlgmr.msra.gmra.mxu1 %vm424_vm4, %v11734_v25  ;;  %v19190_v25 = vld [vmem:[#allocation69_spill] sm:$0xff] }
0x3711   :  { %13724 = vmatpush3.msra.mxu0 %v17025_v28  ;;  %v14417_v4 = vpop.eup %14416  ;;  %13707 = vmatpush3.msra.mxu1 %v17053_v7 }
0x3712   :  { %13725 = vmatprep.subr.mxu0 %v18939_v35  ;;  %v7534_v39 = vadd.f32 1.0, %v14417_v4  ;;  %13714 = vmatprep.mubr.msk.f32.mxu1 %vm15032_vm0, %v18939_v35  ;;  %v19185_v4 = vld [vmem:[#allocation63_spill] sm:$0xff] }
0x3713   :  { %13726 = vmatpush3.msra.mxu0 %v17030_v34  ;;  %13708 = vmatprep.subr.mxu1 %v18939_v35 }
0x3714   :  { %13727 = vmatprep.subr.mxu0 %v18939_v35  ;;  %14418 = vrcp.f32 %v7534_v39  ;;  %13709 = vmatpush3.msra.mxu1 %v17060_v45  ;;  %v19186_v39 = vld [vmem:[#allocation64_spill] sm:$0xff] }
0x3715   :  { %13728 = vmatpush3.msra.mxu0 %v17035_v42  ;;  %13710 = vmatprep.subr.mxu1 %v18939_v35 }
0x3716   :  { %13729 = vmatprep.subr.mxu0 %v18939_v35  ;;  %13711 = vmatpush3.msra.mxu1 %v17065_v48 }
0x3717   :  { %13730 = vmatpush3.msra.mxu0 %v17040_v43  ;;  %13712 = vmatprep.subr.mxu1 %v18939_v35 }
0x3718   :  { %13731 = vmatprep.subr.mxu0 %v18939_v35  ;;  %13713 = vmatpush3.msra.mxu1 %v17070_v49 }
0x3719   :  { %13732 = vmatpush3.msra.mxu0 %v17045_v53  ;;  %13736 = vmatprep.subr.mxu1 %v18939_v35 }
0x371a   :  { %13758 = vmatprep.subr.mxu0 %v18939_v35 }
0x3721   :  { %v14419_v9 = vpop.eup %14418 }
0x3722   :  { %v7548_v48 = vsub.f32 1.0, %v14419_v9  ;;  %v7554_v59 = vmul.f32 %v14419_v9, %v17101_v0 }
0x3774   :  { %v7539_v23 = vpop.permute.xlu1 %7538 }
0x3775   :  { %v7541_v11 = vmul.f32 %v14419_v9, %v7539_v23  ;;  %v19187_v9 = vld [vmem:[#allocation66_spill] sm:$0xff]  ;;  %v19188_v23 = vld [vmem:[#allocation67_spill] sm:$0xff] }
0x3777   :  { %7543 = vrot.lane.b32.xlu0 %v7541_v11, %s18948_s4  ;;  %v19189_v11 = vld [vmem:[#allocation68_spill] sm:$0xff] }
0x37ca   :  { %v7707_v42 = vpop.f32.mrf.mxu0 }
0x37cc   :  { %v13700_v43 = vpop.f32.mrf.mxu0 }
0x37d0   :  { %v7780_v7 = vpop.f32.mrf.mxu1 }
0x37d1   :  { %v7781_v45 = vadd.f32 %v17076_v20, %v7780_v7  ;;  %v7708_v20 = vadd.f32 %v17093_v61, %v7707_v42 }
0x37d2   :  { %v13705_v19 = vpop.f32.mrf.mxu1 }
0x37d3   :  { %v7784_v37 = vmax.f32 %v7781_v45, 0.0 }
0x37d5   :  { %13715 = vmatmul.mubr.msk.f32.vlgmr.msra.gmra.mxu1 %vm348_vm5, %v7784_v37  ;;  %v19194_v37 = vld [vmem:[#allocation73_spill] sm:$0xff] }
0x37d6   :  { %13737 = vmatpush3.msra.mxu1 %v17081_v2  ;;  %13744 = vmatprep.mubr.msk.f32.mxu1 %vm15032_vm0, %v18939_v35 }
0x37d7   :  { %13738 = vmatprep.subr.mxu1 %v18939_v35 }
0x37d8   :  { %13739 = vmatpush3.msra.mxu1 %v17088_v31 }
0x37d9   :  { %13740 = vmatprep.subr.mxu1 %v18939_v35 }
0x37da   :  { %13741 = vmatpush3.msra.mxu1 %v17098_v30 }
0x37db   :  { %13742 = vmatprep.subr.mxu1 %v18939_v35 }
0x37dc   :  { %13743 = vmatpush3.msra.mxu1 %v17105_v63 }
0x37dd   :  { %13747 = vmatprep.subr.mxu1 %v18939_v35 }
0x37e9   :  { %v7544_v28 = vpop.permute.xlu0 %7543 }
0x37ea   :  { %v7546_v34 = vadd.f32 %v7544_v28, %v7527_v3  ;;  %v19183_v3 = vld [vmem:[#allocation84_spill] sm:$0xff]  ;;  %v19191_v28 = vld [vmem:[#allocation70_spill] sm:$0xff] }
0x37ec   :  { %14420 = vtanh.f32 %v7546_v34 }
0x37f9   :  { %v14421_v53 = vpop.eup %14420 }
0x37fa   :  { %7550 = vrot.lane.b32.xlu1 %v14421_v53, %s18949_s27  ;;  %v19193_v53 = vld [vmem:[#allocation72_spill] sm:$0xff] }
0x386c   :  { %v7551_v49 = vpop.permute.xlu1 %7550 }
0x386d   :  { %v7553_v56 = vmul.f32 %v7551_v49, %v7548_v48  ;;  %v19195_v48 = vld [vmem:[#allocation74_spill] sm:$0xff]  ;;  %v19196_v49 = vld [vmem:[#allocation75_spill] sm:$0xff] }
0x386f   :  { %v17603_v58 = vadd.f32 %v7554_v59, %v7553_v56  ;;  %v19197_v59 = vld [vmem:[#allocation76_spill] sm:$0xff] }
0x3871   :  { %v7858_v2 = vsel %vm348_vm5, %v7708_v20, %v17603_v58  ;;  %8082 = vrot.lane.b32.xlu0 %v17603_v58, %s18949_s27  ;;  %v19198_v20 = vld [vmem:[#allocation77_spill] sm:$0xff] }
0x3872   :  { %13734 = vmatmul.mubr.msk.f32.vlgmr.msra.gmra.mxu0 %vm591_vm6, %v7858_v2 }
0x3873   :  { %13759 = vmatpush3.msra.mxu0 %v17115_v13  ;;  %13766 = vmatprep.mubr.msk.f32.mxu0 %vm15032_vm0, %v18939_v35 }
0x3874   :  { %13760 = vmatprep.subr.mxu0 %v18939_v35 }
0x3875   :  { %13761 = vmatpush3.msra.mxu0 %v17122_v36 }
0x3876   :  { %13762 = vmatprep.subr.mxu0 %v18939_v35 }
0x3877   :  { %13763 = vmatpush3.msra.mxu0 %v17127_v41 }
0x3878   :  { %13764 = vmatprep.subr.mxu0 %v18939_v35 }
0x3879   :  { %13765 = vmatpush3.msra.mxu0 %v17132_v5 }
0x387a   :  { %13780 = vmatprep.subr.mxu0 %v18939_v35 }
0x3895   :  { %v17634_v61 = vpop.f32.mrf.mxu1 }
0x3897   :  { %v13716_v30 = vpop.f32.mrf.mxu1 }
0x38e3   :  { %v8083_v31 = vpop.permute.xlu0 %8082 }
0x38e4   :  { %13767 = vmatmul.mubr.msk.f32.vlgmr.msra.gmra.mxu0 %vm348_vm5, %v8083_v31 }
0x38e5   :  { %13781 = vmatpush3.msra.mxu0 %v17138_v17  ;;  %13788 = vmatprep.mubr.msk.f32.mxu0 %vm15032_vm0, %v18939_v35 }
0x38e6   :  { %13782 = vmatprep.subr.mxu0 %v18939_v35 }
0x38e7   :  { %13783 = vmatpush3.msra.mxu0 %v17145_v21 }
0x38e8   :  { %13784 = vmatprep.subr.mxu0 %v18939_v35 }
0x38e9   :  { %13785 = vmatpush3.msra.mxu0 %v17150_v22 }
0x38ea   :  { %13786 = vmatprep.subr.mxu0 %v18939_v35 }
0x38eb   :  { %13787 = vmatpush3.msra.mxu0 %v17155_v32 }
0x38ec   :  { %13796 = vmatprep.subr.mxu0 %v18939_v35 }
0x3932   :  { %v7928_v0 = vpop.f32.mrf.mxu0 }
0x3933   :  { %v7929_v63 = vadd.f32 %v17162_v24, %v7928_v0  ;;  %v19199_v0 = vld [vmem:[#allocation78_spill] sm:$0xff] }
0x3934   :  { %v13735_v13 = vpop.f32.mrf.mxu0 }
0x3935   :  { %v7932_v36 = vmax.f32 %v7929_v63, 0.0  ;;  %v19200_v63 = vld [vmem:[#allocation79_spill] sm:$0xff]  ;;  %v19201_v13 = vld [vmem:[#allocation80_spill] sm:$0xff] }
0x3937   :  { %13745 = vmatmul.mubr.msk.f32.vlgmr.msra.gmra.mxu1 %vm348_vm5, %v7932_v36  ;;  %v19202_v36 = vld [vmem:[#allocation85_spill] sm:$0xff] }
0x3938   :  { %13748 = vmatpush3.msra.mxu1 %v17167_v44  ;;  %13755 = vmatprep.mubr.msk.f32.mxu1 %vm15032_vm0, %v18939_v35 }
0x3939   :  { %13749 = vmatprep.subr.mxu1 %v18939_v35 }
0x393a   :  { %13750 = vmatpush3.msra.mxu1 %v17174_v14  ;;  %v19174_v14 = vld [vmem:[#allocation54_spill] sm:$0xff] }
0x393b   :  { %13751 = vmatprep.subr.mxu1 %v18939_v35 }
0x393c   :  { %13752 = vmatpush3.msra.mxu1 %v17179_v15  ;;  %v19175_v15 = vld [vmem:[#allocation57_spill] sm:$0xff] }
0x393d   :  { %13753 = vmatprep.subr.mxu1 %v18939_v35 }
0x393e   :  { %13754 = vmatpush3.msra.mxu1 %v17184_v18 }
0x393f   :  { %13769 = vmatprep.subr.mxu1 %v18939_v35 }
0x39a4   :  { %v8152_v41 = vpop.f32.mrf.mxu0 }
0x39a5   :  { %v8153_v24 = vadd.f32 %v17198_v40, %v8152_v41 }
0x39a6   :  { %v13768_v5 = vpop.f32.mrf.mxu0 }
0x39a7   :  { %v8156_v44 = vmax.f32 %v8153_v24, 0.0  ;;  %v19203_v5 = vld [vmem:[#allocation87_spill] sm:$0xff]  ;;  %v19205_v24 = vld [vmem:[#allocation89_spill] sm:$0xff] }
0x39f7   :  { %v8002_v17 = vpop.f32.mrf.mxu1 }
0x39f8   :  { %v8003_v21 = vadd.f32 %v17188_v27, %v8002_v17  ;;  %v19176_v27 = vld [vmem:[#allocation59_spill] sm:$0xff] }
0x39f9   :  { %v13746_v22 = vpop.f32.mrf.mxu1 }
0x39fa   :  { %v8006_v32 = vmax.f32 %v8003_v21, 0.0 }
0x39fc   :  { %13756 = vmatmul.mubr.msk.f32.vlgmr.msra.gmra.mxu1 %vm348_vm5, %v8006_v32  ;;  %v19204_v32 = vld [vmem:[#allocation88_spill] sm:$0xff] }
0x39fd   :  { %13770 = vmatpush3.msra.mxu1 %v17193_v57  ;;  %13777 = vmatprep.mubr.msk.f32.mxu1 %vm15032_vm0, %v18939_v35 }
0x39fe   :  { %13771 = vmatprep.subr.mxu1 %v18939_v35 }
0x39ff   :  { %13772 = vmatpush3.msra.mxu1 %v17203_v6 }
0x3a00   :  { %13773 = vmatprep.subr.mxu1 %v18939_v35 }
0x3a01   :  { %13774 = vmatpush3.msra.mxu1 %v17208_v62 }
0x3a02   :  { %13775 = vmatprep.subr.mxu1 %v18939_v35 }
0x3a03   :  { %13776 = vmatpush3.msra.mxu1 %v19174_v14  ;;  %v19207_v14 = vld [vmem:[#allocation91_spill] sm:$0xff] }
0x3a04   :  { %13778 = vmatmul.mubr.msk.f32.vlgmr.msra.gmra.mxu1 %vm348_vm5, %v8156_v44  ;;  %13791 = vmatprep.subr.mxu1 %v18939_v35  ;;  %v19206_v44 = vld [vmem:[#allocation90_spill] sm:$0xff] }
0x3a05   :  { %13792 = vmatpush3.msk.msra.mxu1 %vm1075_vm7, %v19175_v15  ;;  %13793 = vmatprep.mubr.msk.f32.mxu1 %vm15032_vm0, %v18939_v35 }
0x3a06   :  { %13807 = vmatprep.subr.mxu1 %v18939_v35 }
0x3abc   :  { %v8076_v18 = vpop.f32.mrf.mxu1 }
0x3abd   :  { %v17668_v57 = vadd.f32 %v19176_v27, %v8076_v18  ;;  %v19208_v18 = vld [vmem:[#allocation92_spill] sm:$0xff] }
0x3abe   :  { %v13757_v40 = vpop.f32.mrf.mxu1 }
0x3abf   :  { %19177 = vst [vmem:[#allocation54_spill] sm:$0xff] %v17668_v57  ;;  %v17671_v6 = vmax.f32 %v17668_v57, 0.0 }
0x3ac1   :  { %19178 = vst [vmem:[#allocation57_spill] sm:$0xff] %v17671_v6  ;;  %v8304_v62 = vmul.f32 0.5, %v17671_v6  ;;  %v18152_v6 = vld [vmem:[%s18894_s11] sm:$0xff] }
0x3ac2   :  { %19240 = vst [vmem:[#allocation66_spill] sm:$0xff] %v18152_v6 }
0x3ac3   :  { %v8305_v26 = vmul.f32 1.442695, %v8304_v62 }
0x3ac4   :  { %v8226_v1 = vpop.f32.mrf.mxu1 }
0x3ac5   :  { %14422 = vpow2.f32 %v8305_v26  ;;  %v8227_v8 = vadd.f32 %v19179_v38, %v8226_v1  ;;  %v19209_v26 = vld [vmem:[#allocation93_spill] sm:$0xff]  ;;  %v19210_v1 = vld [vmem:[#allocation86_spill] sm:$0xff]  ;;  %v19211_v38 = vld [vmem:[#allocation96_spill] sm:$0xff] }
0x3ac6   :  { %v13779_v60 = vpop.f32.mrf.mxu1 }
0x3ac7   :  { %13789 = vmatmul.mubr.msk.f32.vlgmr.msra.gmra.mxu0 %vm348_vm5, %v8227_v8  ;;  %v19212_v8 = vld [vmem:[#allocation97_spill] sm:$0xff]  ;;  %v19213_v60 = vld [vmem:[#allocation98_spill] sm:$0xff] }
0x3ac8   :  { %13797 = vmatpush3.msra.mxu0 %v19180_v16  ;;  %13804 = vmatprep.mubr.msk.f32.mxu0 %vm15032_vm0, %v18939_v35  ;;  %v19214_v16 = vld [vmem:[#allocation99_spill] sm:$0xff] }
0x3ac9   :  { %13798 = vmatprep.subr.mxu0 %v18939_v35 }
0x3aca   :  { %13799 = vmatpush3.msra.mxu0 %v19181_v51  ;;  %v19215_v51 = vld [vmem:[#allocation100_spill] sm:$0xff] }
0x3acb   :  { %13800 = vmatprep.subr.mxu0 %v18939_v35 }
0x3acc   :  { %13801 = vmatpush3.msra.mxu0 %v19182_v50  ;;  %v19216_v50 = vld [vmem:[#allocation101_spill] sm:$0xff] }
0x3acd   :  { %13802 = vmatprep.subr.mxu0 %v18939_v35 }
0x3ace   :  { %13803 = vmatpush3.msra.mxu0 %v19183_v3 }
0x3acf   :  { %13826 = vmatprep.subr.mxu0 %v18939_v35 }
0x3ad2   :  { %v14423_v46 = vpop.eup %14422 }
0x3ad3   :  { %8308 = vrot.lane.b32.xlu1 %v14423_v46, %s18952_s6  ;;  %v19217_v46 = vld [vmem:[#allocation102_spill] sm:$0xff] }
0x3ad7   :  { %8789 = vrot.lane.b32.xlu1 %v17525_v47, %s18947_s17 }
0x3b45   :  { %v8309_v29 = vpop.permute.xlu1 %8308 }
0x3b46   :  { %v8311_v54 = vmul.f32 %v11735_v33, %v8309_v29  ;;  %v19218_v33 = vld [vmem:[#allocation103_spill] sm:$0xff] }
0x3b47   :  { %v7855_v29 = vadd.f32 %v19218_v33, %v17634_v61  ;;  %v14686_v61 = vld [vmem:[#allocation5] sm:$0x3]  ;;  %v17848_v33 = vld [vmem:[%s15073_s25 + $0x10] sm:$0xff] }
0x3b48   :  { %v8312_v12 = vadd.f32 %v8311_v54, %v17668_v57  ;;  %v19219_v54 = vld [vmem:[#allocation104_spill] sm:$0xff] }
0x3b4a   :  { %13794 = vmatmul.mubr.msk.f32.vlgmr.msra.gmra.mxu1 %vm1071_vm8, %v8312_v12 }
0x3b4b   :  { %13808 = vmatpush3.msra.mxu1 %v19184_v55  ;;  %13823 = vmatprep.mubr.msk.f32.mxu1 %vm15032_vm0, %v18939_v35  ;;  %v19220_v55 = vld [vmem:[#allocation105_spill] sm:$0xff] }
0x3b4c   :  { %13809 = vmatprep.subr.mxu1 %v18939_v35 }
0x3b4d   :  { %13810 = vmatpush3.msra.mxu1 %v19185_v4  ;;  %v8790_v4 = vpop.permute.xlu1 %8789 }
0x3b4e   :  { %13811 = vmatprep.subr.mxu1 %v18939_v35 }
0x3b4f   :  { %13812 = vmatpush3.msra.mxu1 %v19186_v39 }
0x3b50   :  { %13813 = vmatprep.subr.mxu1 %v18939_v35 }
0x3b51   :  { %13814 = vmatpush3.msra.mxu1 %v19187_v9  ;;  %v19221_v9 = vld [vmem:[#allocation106_spill] sm:$0xff] }
0x3b52   :  { %13815 = vmatprep.subr.mxu1 %v18939_v35 }
0x3b53   :  { %13816 = vmatpush3.msra.mxu1 %v19188_v23 }
0x3b54   :  { %13817 = vmatprep.subr.mxu1 %v18939_v35 }
0x3b55   :  { %13818 = vmatpush3.msra.mxu1 %v19189_v11 }
0x3b56   :  { %13819 = vmatprep.subr.mxu1 %v18939_v35 }
0x3b57   :  { %13820 = vmatpush3.msra.mxu1 %v19190_v25 }
0x3b58   :  { %13821 = vmatprep.subr.mxu1 %v18939_v35 }
0x3b59   :  { %13822 = vmatpush3.msra.mxu1 %v19191_v28 }
0x3b5a   :  { %13848 = vmatprep.subr.mxu1 %v18939_v35 }
0x3b87   :  { %v17710_v34 = vpop.f32.mrf.mxu0 }
0x3b88   :  { %19192 = vst [vmem:[#allocation59_spill] sm:$0xff] %v17710_v34 }
0x3b89   :  { %v13790_v42 = vpop.f32.mrf.mxu0 }
0x3c0a   :  { %v8382_v43 = vpop.f32.mrf.mxu1 }
0x3c0b   :  { %v8383_v7 = vadd.f32 %v19193_v53, %v8382_v43 }
0x3c0c   :  { %v13795_v45 = vpop.f32.mrf.mxu1 }
0x3c0d   :  { %v8386_v19 = vmax.f32 %v8383_v7, 0.0 }
0x3c0f   :  { %13805 = vmatmul.mubr.msk.f32.vlgmr.msra.gmra.mxu0 %vm348_vm5, %v8386_v19  ;;  %v19222_v19 = vld [vmem:[#allocation107_spill] sm:$0xff] }
0x3c10   :  { %13827 = vmatpush3.msra.mxu0 %v19194_v37  ;;  %13834 = vmatprep.mubr.msk.f32.mxu0 %vm15032_vm0, %v18939_v35 }
0x3c11   :  { %13828 = vmatprep.subr.mxu0 %v18939_v35 }
0x3c12   :  { %13829 = vmatpush3.msra.mxu0 %v19195_v48 }
0x3c13   :  { %13830 = vmatprep.subr.mxu0 %v18939_v35 }
0x3c14   :  { %13831 = vmatpush3.msra.mxu0 %v19196_v49 }
0x3c15   :  { %13832 = vmatprep.subr.mxu0 %v18939_v35 }
0x3c16   :  { %13833 = vmatpush3.msra.mxu0 %v19197_v59 }
0x3c17   :  { %13837 = vmatprep.subr.mxu0 %v18939_v35 }
0x3ccf   :  { %v8456_v56 = vpop.f32.mrf.mxu0 }
0x3cd0   :  { %v8457_v2 = vadd.f32 %v19198_v20, %v8456_v56 }
0x3cd1   :  { %v13806_v31 = vpop.f32.mrf.mxu0 }
0x3cd2   :  { %v8460_v30 = vsel %vm348_vm5, %v8457_v2, %v17603_v58  ;;  %8785 = vrot.lane.b32.xlu0 %v8457_v2, %s18947_s17  ;;  %v19223_v2 = vld [vmem:[#allocation108_spill] sm:$0xff]  ;;  %v19224_v31 = vld [vmem:[#allocation109_spill] sm:$0xff] }
0x3cd3   :  { %13824 = vmatmul.mubr.msk.f32.vlgmr.msra.gmra.mxu1 %vm591_vm6, %v8460_v30  ;;  %v19225_v30 = vld [vmem:[#allocation110_spill] sm:$0xff] }
0x3cd4   :  { %13849 = vmatpush3.msra.mxu1 %v19199_v0  ;;  %13856 = vmatprep.mubr.msk.f32.mxu1 %vm15032_vm0, %v18939_v35  ;;  %v19226_v0 = vld [vmem:[#allocation111_spill] sm:$0xff] }
0x3cd5   :  { %13850 = vmatprep.subr.mxu1 %v18939_v35 }
0x3cd6   :  { %13851 = vmatpush3.msra.mxu1 %v19200_v63  ;;  %v19227_v63 = vld [vmem:[#allocation112_spill] sm:$0xff] }
0x3cd7   :  { %13852 = vmatprep.subr.mxu1 %v18939_v35 }
0x3cd8   :  { %13853 = vmatpush3.msra.mxu1 %v19201_v13 }
0x3cd9   :  { %13854 = vmatprep.subr.mxu1 %v18939_v35 }
0x3cda   :  { %13855 = vmatpush3.msra.mxu1 %v19202_v36  ;;  %v19228_v36 = vld [vmem:[#allocation113_spill] sm:$0xff] }
0x3cdb   :  { %13886 = vmatprep.subr.mxu1 %v18939_v35 }
0x3d44   :  { %v8786_v3 = vpop.permute.xlu0 %8785 }
0x3d45   :  { %v8788_v12 = vsel %vm348_vm5, %v7855_v29, %v8786_v3  ;;  %v17853_v29 = vld [vmem:[%s15073_s25 + $0x8] sm:$0xff] }
0x3d46   :  { %v8792_v39 = vsel %vm591_vm6, %v8788_v12, %v8790_v4 }
0x3d93   :  { %v8530_v41 = vpop.f32.mrf.mxu1 }
0x3d94   :  { %v8531_v17 = vadd.f32 %v19203_v5, %v8530_v41  ;;  %v19229_v41 = vld [vmem:[#allocation114_spill] sm:$0xff]  ;;  %v19230_v5 = vld [vmem:[#allocation115_spill] sm:$0xff] }
0x3d95   :  { %v13825_v21 = vpop.f32.mrf.mxu1 }
0x3d96   :  { %v8534_v22 = vmax.f32 %v8531_v17, 0.0 }
0x3d98   :  { %13835 = vmatmul.mubr.msk.f32.vlgmr.msra.gmra.mxu0 %vm348_vm5, %v8534_v22 }
0x3d99   :  { %13838 = vmatpush3.msra.mxu0 %v19204_v32  ;;  %13845 = vmatprep.mubr.msk.f32.mxu0 %vm15032_vm0, %v18939_v35 }
0x3d9a   :  { %13839 = vmatprep.subr.mxu0 %v18939_v35 }
0x3d9b   :  { %13840 = vmatpush3.msra.mxu0 %v19205_v24 }
0x3d9c   :  { %13841 = vmatprep.subr.mxu0 %v18939_v35 }
0x3d9d   :  { %13842 = vmatpush3.msra.mxu0 %v19206_v44 }
0x3d9e   :  { %13843 = vmatprep.subr.mxu0 %v18939_v35 }
0x3d9f   :  { %13844 = vmatpush3.msra.mxu0 %v19207_v14 }
0x3da0   :  { %13859 = vmatprep.subr.mxu0 %v18939_v35 }
0x3e58   :  { %v8604_v15 = vpop.f32.mrf.mxu0 }
0x3e59   :  { %v8605_v27 = vadd.f32 %v19208_v18, %v8604_v15  ;;  %v17818_v18 = vld [vmem:[%s15218_s14] sm:$0xff] }
0x3e5a   :  { %v13836_v40 = vpop.f32.mrf.mxu0 }
0x3e5b   :  { %v8608_v62 = vmax.f32 %v8605_v27, 0.0 }
0x3e5d   :  { %13846 = vmatmul.mubr.msk.f32.vlgmr.msra.gmra.mxu0 %vm348_vm5, %v8608_v62 }
0x3e5e   :  { %13860 = vmatpush3.msra.mxu0 %v19209_v26  ;;  %13883 = vmatprep.mubr.msk.f32.mxu0 %vm15032_vm0, %v18939_v35 }
0x3e5f   :  { %13861 = vmatprep.subr.mxu0 %v18939_v35 }
0x3e60   :  { %13862 = vmatpush3.msra.mxu0 %v19210_v1 }
0x3e61   :  { %13863 = vmatprep.subr.mxu0 %v18939_v35 }
0x3e62   :  { %13864 = vmatpush3.msra.mxu0 %v19211_v38 }
0x3e63   :  { %13865 = vmatprep.subr.mxu0 %v18939_v35 }
0x3e64   :  { %13866 = vmatpush3.msra.mxu0 %v19212_v8 }
0x3e65   :  { %13867 = vmatprep.subr.mxu0 %v18939_v35 }
0x3e66   :  { %13868 = vmatpush3.msra.mxu0 %v19213_v60 }
0x3e67   :  { %13869 = vmatprep.subr.mxu0 %v18939_v35 }
0x3e68   :  { %13870 = vmatpush3.msra.mxu0 %v19214_v16 }
0x3e69   :  { %13871 = vmatprep.subr.mxu0 %v18939_v35 }
0x3e6a   :  { %13872 = vmatpush3.msra.mxu0 %v19215_v51 }
0x3e6b   :  { %13873 = vmatprep.subr.mxu0 %v18939_v35 }
0x3e6c   :  { %13874 = vmatpush3.msra.mxu0 %v19216_v50 }
0x3e6d   :  { %13875 = vmatprep.subr.mxu0 %v18939_v35 }
0x3e6e   :  { %13876 = vmatpush3.msra.mxu0 %v19217_v46  ;;  %v17835_v46 = vld [vmem:[%s15048_s5 + $0x30] sm:$0xff] }
0x3e6f   :  { %13877 = vmatprep.subr.mxu0 %v18939_v35 }
0x3e70   :  { %13878 = vmatpush3.msra.mxu0 %v19219_v54  ;;  %v17858_v54 = vld [vmem:[%s15073_s25] sm:$0xff] }
0x3e71   :  { %13879 = vmatprep.subr.mxu0 %v18939_v35 }
0x3e72   :  { %13880 = vmatpush3.msra.mxu0 %v19220_v55 }
0x3e73   :  { %13881 = vmatprep.subr.mxu0 %v18939_v35 }
0x3e74   :  { %13882 = vmatpush3.msra.mxu0 %v19221_v9 }
0x3e75   :  { %13884 = vmatmul.mubr.msk.f32.vlgmr.msra.gmra.mxu0 %vm1594_vm9, %v8792_v39  ;;  %13921 = vmatprep.subr.mxu0 %v18939_v35  ;;  %v17864_v39 = vld [vmem:[%s15068_s21] sm:$0xff]  ;;  %s19244_s21 = sld [smem:[#allocation43_spill]] }
0x3e76   :  { %13922 = vmatpush3.msk.msra.mxu0 %vm428_vm3, %v14686_v61  ;;  %13923 = vmatprep.mubr.msk.f32.mxu0 %vm15032_vm0, %v18939_v35 }
0x3e77   :  { %13926 = vmatprep.subr.mxu0 %v18939_v35 }
0x3f1d   :  { %v8678_v23 = vpop.f32.mrf.mxu0 }
0x3f1e   :  { %v8679_v37 = vadd.f32 %v19222_v19, %v8678_v23 }
0x3f1f   :  { %v13847_v11 = vpop.f32.mrf.mxu0 }
0x3f20   :  { %v8682_v49 = vmax.f32 %v8679_v37, 0.0  ;;  %v17869_v11 = vld [vmem:[%s15123_s20 + $0x38] sm:$0xff] }
0x3f22   :  { %v8763_v44 = vsub.f32 0.0, %v8682_v49  ;;  %v8758_v26 = vmul.f32 0.5, %v8682_v49 }
0x3f24   :  { %v8764_v14 = vmul.f32 1.442695, %v8763_v44  ;;  %v8759_v8 = vsub.f32 -0.9189385, %v8758_v26 }
0x3f35   :  { %v8862_v25 = vpop.f32.mrf.mxu0 }
0x3f36   :  { %8873 = vrot.lane.b32.xlu0 %v8862_v25, %s18947_s17  ;;  %v11757_v42 = vmul.f32 -1.442695, %v8862_v25 }
0x3f37   :  { %v13885_v28 = vpop.f32.mrf.mxu0 }
0x3f38   :  { %14424 = vpow2.f32 %v11757_v42  ;;  %v17881_v28 = vld [vmem:[%s15123_s20 + $0x28] sm:$0xff]  ;;  %v17886_v42 = vld [vmem:[%s15123_s20 + $0x20] sm:$0xff] }
0x3f45   :  { %v14425_v43 = vpop.eup %14424 }
0x3f46   :  { %v8869_v53 = vadd.f32 1.0, %v14425_v43  ;;  %v17891_v43 = vld [vmem:[%s15123_s20 + $0x18] sm:$0xff] }
0x3f48   :  { %14426 = vrcp.f32 %v8869_v53  ;;  %v17896_v53 = vld [vmem:[%s15123_s20 + $0x10] sm:$0xff] }
0x3f55   :  { %v14427_v7 = vpop.eup %14426 }
0x3f56   :  { %v8883_v17 = vsub.f32 1.0, %v14427_v7  ;;  %v8889_v22 = vmul.f32 %v14427_v7, %v17525_v47 }
0x3fa8   :  { %v8874_v45 = vpop.permute.xlu0 %8873 }
0x3fa9   :  { %v8876_v48 = vmul.f32 %v14427_v7, %v8874_v45  ;;  %v17901_v7 = vld [vmem:[%s15123_s20 + $0x8] sm:$0xff]  ;;  %v17906_v45 = vld [vmem:[%s15123_s20] sm:$0xff] }
0x3fab   :  { %8878 = vrot.lane.b32.xlu1 %v8876_v48, %s18948_s4 }
0x3faf   :  { %8684 = vrot.lane.b32.xlu1 %v8682_v49, %s18990_s22 }
0x401d   :  { %v8879_v59 = vpop.permute.xlu1 %8878 }
0x401e   :  { %v8881_v56 = vadd.f32 %v8879_v59, %v8862_v25  ;;  %v17876_v25 = vld [vmem:[%s15123_s20 + $0x30] sm:$0xff] }
0x4020   :  { %14428 = vtanh.f32 %v8881_v56 }
0x4021   :  { %v8685_v20 = vpop.permute.xlu1 %8684  ;;  %14430 = vpow2.f32 %v8764_v14  ;;  %v17927_v14 = vld [vmem:[%s18881_s12 + $0x18] sm:$0xff] }
0x4022   :  { %13857 = vmatmul.mubr.msk.f32.vlgmr.msra.gmra.mxu1 %vm348_vm5, %v8685_v20  ;;  %v11761_v20 = vld [vmem:[%s15053_s9 + $0x30] sm:$0xff]  ;;  %s19238_s9 = sld [smem:[#allocation40_spill]] }
0x4023   :  { %13887 = vmatpush3.msra.mxu1 %v19223_v2  ;;  %13902 = vmatprep.mubr.msk.f32.mxu1 %vm15032_vm0, %v18939_v35  ;;  %v14702_v2 = vld [vmem:[%s18879_s29 + $0x18] sm:$0xff] }
0x4024   :  { %13888 = vmatprep.subr.mxu1 %v18939_v35  ;;  %13924 = vmatmul.mubr.msk.f32.vlgmr.msra.gmra.mxu0 %vm424_vm4, %v11761_v20 }
0x4025   :  { %13889 = vmatpush3.msra.mxu1 %v19224_v31  ;;  %13927 = vmatpush3.msra.mxu0 %v14702_v2  ;;  %v14703_v31 = vld [vmem:[%s18879_s29 + $0x10] sm:$0xff]  ;;  %v18013_v2 = vld [vmem:[%s18885_s3 + $0x18] sm:$0xff] }
0x4026   :  { %13890 = vmatprep.subr.mxu1 %v18939_v35  ;;  %13934 = vmatprep.mubr.msk.f32.mxu0 %vm15032_vm0, %v18939_v35 }
0x4027   :  { %13891 = vmatpush3.msra.mxu1 %v19225_v30  ;;  %13928 = vmatprep.subr.mxu0 %v18939_v35  ;;  %v14704_v30 = vld [vmem:[%s18879_s29 + $0x8] sm:$0xff] }
0x4028   :  { %13892 = vmatprep.subr.mxu1 %v18939_v35  ;;  %13929 = vmatpush3.msra.mxu0 %v14703_v31  ;;  %v18020_v31 = vld [vmem:[%s18885_s3 + $0x10] sm:$0xff] }
0x4029   :  { %13893 = vmatpush3.msra.mxu1 %v19226_v0  ;;  %13930 = vmatprep.subr.mxu0 %v18939_v35  ;;  %v14705_v0 = vld [vmem:[%s18879_s29] sm:$0xff]  ;;  %s15039_s29 = smov [#allocation17]  }
0x402a   :  { %13894 = vmatprep.subr.mxu1 %v18939_v35  ;;  %13931 = vmatpush3.msra.mxu0 %v14704_v30  ;;  %v18025_v30 = vld [vmem:[%s18885_s3 + $0x8] sm:$0xff] }
0x402b   :  { %13895 = vmatpush3.msra.mxu1 %v19227_v63  ;;  %13932 = vmatprep.subr.mxu0 %v18939_v35 }
0x402c   :  { %13896 = vmatprep.subr.mxu1 %v18939_v35  ;;  %13933 = vmatpush3.msra.mxu0 %v14705_v0  ;;  %v18030_v0 = vld [vmem:[%s18885_s3] sm:$0xff] }
0x402d   :  { %v14429_v13 = vpop.eup %14428  ;;  %13897 = vmatpush3.msra.mxu1 %v19228_v36  ;;  %13956 = vmatprep.subr.mxu0 %v18939_v35 }
0x402e   :  { %8885 = vrot.lane.b32.xlu0 %v14429_v13, %s18949_s27  ;;  %13898 = vmatprep.subr.mxu1 %v18939_v35  ;;  %v14431_v38 = vpop.eup %14430 }
0x402f   :  { %13899 = vmatpush3.msra.mxu1 %v19229_v41 }
0x4030   :  { %13900 = vmatprep.subr.mxu1 %v18939_v35 }
0x4031   :  { %13901 = vmatpush3.msra.mxu1 %v19230_v5 }
0x4032   :  { %13905 = vmatprep.subr.mxu1 %v18939_v35 }
0x40a0   :  { %v8886_v21 = vpop.permute.xlu0 %8885 }
0x40a1   :  { %v8888_v32 = vmul.f32 %v8886_v21, %v8883_v17  ;;  %v14706_v21 = vld [vmem:[%s18880_s8] sm:$0xff] }
0x40a3   :  { %v17813_v24 = vadd.f32 %v8889_v22, %v8888_v32 }
0x40a5   :  { %8892 = vrot.lane.b32.xlu0 %v17813_v24, %s18949_s27 }
0x40e2   :  { %v8754_v15 = vpop.f32.mrf.mxu1 }
0x40e3   :  { %v8755_v27 = vadd.f32 %v17818_v18, %v8754_v15 }
0x40e4   :  { %v13858_v40 = vpop.f32.mrf.mxu1  ;;  %v9218_v17 = vpop.f32.mrf.mxu0 }
0x40e5   :  { %v8760_v62 = vsub.f32 %v17542_v52, %v8755_v27  ;;  %v17828_v52 = vld [vmem:[#allocation2] sm:$0x7]  ;;  %v9219_v22 = vadd.f32 %v14706_v21, %v9218_v17  ;;  %v17934_v40 = vld [vmem:[%s18881_s12 + $0x10] sm:$0xff] }
0x40e6   :  { %v13925_v32 = vpop.f32.mrf.mxu0 }
0x40e7   :  { %v8761_v47 = vmul.f32 %v8760_v62, %v8760_v62  ;;  %v9222_v44 = vmax.f32 %v9219_v22, 0.0  ;;  %v18039_v22 = vld [vmem:[%s18886_s24 + $0x18] sm:$0xff]  ;;  %v18044_v32 = vld [vmem:[#allocation13] sm:$0xff] }
0x40e9   :  { %v8762_v1 = vmul.f32 0.5, %v8761_v47  ;;  %13935 = vmatmul.mubr.msk.f32.vlgmr.msra.gmra.mxu0 %vm348_vm5, %v9222_v44  ;;  %v17939_v47 = vld [vmem:[%s18882_s23] sm:$0xff] }
0x40ea   :  { %13957 = vmatpush3.msra.mxu0 %v17927_v14  ;;  %13964 = vmatprep.mubr.msk.f32.mxu0 %vm15032_vm0, %v18939_v35 }
0x40eb   :  { %v8766_v60 = vmul.f32 %v14431_v38, %v8762_v1  ;;  %13958 = vmatprep.subr.mxu0 %v18939_v35  ;;  %v17944_v38 = vld [vmem:[%s18881_s12 + $0x8] sm:$0xff] }
0x40ec   :  { %13959 = vmatpush3.msra.mxu0 %v17934_v40 }
0x40ed   :  { %v8767_v16 = vsub.f32 %v8759_v8, %v8766_v60  ;;  %13960 = vmatprep.subr.mxu0 %v18939_v35  ;;  %v17951_v60 = vld [vmem:[%s18881_s12] sm:$0xff] }
0x40ee   :  { %13961 = vmatpush3.msra.mxu0 %v17944_v38 }
0x40ef   :  { %v17823_v51 = vadd.f32 %v8767_v16, %v17532_v10  ;;  %v17841_v10 = vld [vmem:[%s15073_s25 + $0x18] sm:$0xff]  ;;  %13962 = vmatprep.subr.mxu0 %v18939_v35 }
0x40f0   :  { %13963 = vmatpush3.msra.mxu0 %v17951_v60  ;;  %v17961_v16 = vld [vmem:[%s18883_s26 + $0x18] sm:$0xff] }
0x40f1   :  { %13967 = vmatprep.subr.mxu0 %v18939_v35 }
0x4117   :  { %v8893_v50 = vpop.permute.xlu0 %8892 }
0x4118   :  { %v8895_v3 = vsel %vm348_vm5, %v8893_v50, %v17603_v58  ;;  %v17968_v50 = vld [vmem:[%s18883_s26 + $0x10] sm:$0xff] }
0x4119   :  { %13903 = vmatmul.mubr.msk.f32.vlgmr.msra.gmra.mxu1 %vm591_vm6, %v8895_v3  ;;  %v17973_v3 = vld [vmem:[%s18883_s26 + $0x8] sm:$0xff] }
0x411a   :  { %13906 = vmatpush3.msk.msra.mxu1 %vm268_vm1, %v17828_v52  ;;  %13907 = vmatprep.mubr.msk.f32.mxu1 %vm15032_vm0, %v18939_v35 }
0x411b   :  { %13910 = vmatprep.subr.mxu1 %v18939_v35 }
0x411d   :  { %13908 = vmatmul.mubr.msk.f32.vlgmr.msra.gmra.mxu1 %vm264_vm2, %v17835_v46 }
0x411e   :  { %13911 = vmatpush3.msra.mxu1 %v17841_v10  ;;  %13918 = vmatprep.mubr.msk.f32.mxu1 %vm15032_vm0, %v18939_v35 }
0x411f   :  { %13912 = vmatprep.subr.mxu1 %v18939_v35 }
0x4120   :  { %13913 = vmatpush3.msra.mxu1 %v17848_v33 }
0x4121   :  { %13914 = vmatprep.subr.mxu1 %v18939_v35 }
0x4122   :  { %13915 = vmatpush3.msra.mxu1 %v17853_v29 }
0x4123   :  { %13916 = vmatprep.subr.mxu1 %v18939_v35 }
0x4124   :  { %13917 = vmatpush3.msra.mxu1 %v17858_v54 }
0x4125   :  { %13937 = vmatprep.subr.mxu1 %v18939_v35 }
0x41d9   :  { %v8965_v12 = vpop.f32.mrf.mxu1 }
0x41da   :  { %8976 = vrot.lane.b32.xlu1 %v8965_v12, %s18947_s17  ;;  %v11759_v19 = vmul.f32 -1.442695, %v8965_v12 }
0x41db   :  { %v13904_v55 = vpop.f32.mrf.mxu1 }
0x41dc   :  { %14432 = vpow2.f32 %v11759_v19  ;;  %v18005_v19 = vpop.f32.mrf.mxu0 }
0x41dd   :  { %v9071_v4 = vpop.f32.mrf.mxu1 }
0x41de   :  { %v9072_v9 = vadd.f32 %v17864_v39, %v9071_v4  ;;  %v17984_v4 = vld [vmem:[%s18887_s1 + $0x18] sm:$0xff] }
0x41df   :  { %v13909_v61 = vpop.f32.mrf.mxu1 }
0x41e0   :  { %v9075_v23 = vmax.f32 %v9072_v9, 0.0  ;;  %v17991_v9 = vld [vmem:[%s18887_s1 + $0x10] sm:$0xff]  ;;  %v17996_v61 = vld [vmem:[%s18887_s1 + $0x8] sm:$0xff] }
0x41e2   :  { %13919 = vmatmul.mubr.msk.f32.vlgmr.msra.gmra.mxu1 %vm348_vm5, %v9075_v23  ;;  %v18001_v23 = vld [vmem:[%s18887_s1] sm:$0xff] }
0x41e3   :  { %13938 = vmatpush3.msra.mxu1 %v17869_v11  ;;  %13953 = vmatprep.mubr.msk.f32.mxu1 %vm15032_vm0, %v18939_v35 }
0x41e4   :  { %13939 = vmatprep.subr.mxu1 %v18939_v35 }
0x41e5   :  { %13940 = vmatpush3.msra.mxu1 %v17876_v25 }
0x41e6   :  { %13941 = vmatprep.subr.mxu1 %v18939_v35 }
0x41e7   :  { %13942 = vmatpush3.msra.mxu1 %v17881_v28 }
0x41e8   :  { %13943 = vmatprep.subr.mxu1 %v18939_v35 }
0x41e9   :  { %13944 = vmatpush3.msra.mxu1 %v17886_v42  ;;  %v14433_v37 = vpop.eup %14432 }
0x41ea   :  { %13945 = vmatprep.subr.mxu1 %v18939_v35  ;;  %v8972_v48 = vadd.f32 1.0, %v14433_v37  ;;  %v13936_v37 = vpop.f32.mrf.mxu0 }
0x41eb   :  { %13946 = vmatpush3.msra.mxu1 %v17891_v43 }
0x41ec   :  { %13947 = vmatprep.subr.mxu1 %v18939_v35  ;;  %14434 = vrcp.f32 %v8972_v48 }
0x41ed   :  { %13948 = vmatpush3.msra.mxu1 %v17896_v53 }
0x41ee   :  { %13949 = vmatprep.subr.mxu1 %v18939_v35 }
0x41ef   :  { %13950 = vmatpush3.msra.mxu1 %v17901_v7 }
0x41f0   :  { %13951 = vmatprep.subr.mxu1 %v18939_v35 }
0x41f1   :  { %13952 = vmatpush3.msra.mxu1 %v17906_v45 }
0x41f2   :  { %13978 = vmatprep.subr.mxu1 %v18939_v35 }
0x41f9   :  { %v14435_v49 = vpop.eup %14434 }
0x41fa   :  { %v8986_v15 = vsub.f32 1.0, %v14435_v49  ;;  %v8992_v62 = vmul.f32 %v14435_v49, %v17603_v58 }
0x424c   :  { %v8977_v59 = vpop.permute.xlu1 %8976 }
0x424d   :  { %v8979_v56 = vmul.f32 %v14435_v49, %v8977_v59  ;;  %v18008_v49 = vld [vmem:[%s18884_s28] sm:$0xff] }
0x424f   :  { %8981 = vrot.lane.b32.xlu0 %v8979_v56, %s18948_s4 }
0x42a2   :  { %v9145_v36 = vpop.f32.mrf.mxu1 }
0x42a3   :  { %v9146_v1 = vadd.f32 %v17939_v47, %v9145_v36 }
0x42a4   :  { %v13920_v41 = vpop.f32.mrf.mxu1 }
0x42a5   :  { %v18034_v41 = vld [vmem:[#allocation11] sm:$0xff] }
0x42c1   :  { %v8982_v63 = vpop.permute.xlu0 %8981 }
0x42c2   :  { %v8984_v13 = vadd.f32 %v8982_v63, %v8965_v12  ;;  %v17978_v12 = vld [vmem:[%s18883_s26] sm:$0xff] }
0x42c4   :  { %14436 = vtanh.f32 %v8984_v13 }
0x42d1   :  { %v14437_v5 = vpop.eup %14436 }
0x42d2   :  { %8988 = vrot.lane.b32.xlu1 %v14437_v5, %s18949_s27 }
0x4344   :  { %v8989_v27 = vpop.permute.xlu1 %8988 }
0x4345   :  { %v8991_v26 = vmul.f32 %v8989_v27, %v8986_v15  ;;  %v18049_v15 = vld [vmem:[%s18886_s24 + $0x10] sm:$0xff]  ;;  %v18054_v27 = vld [vmem:[%s18886_s24 + $0x8] sm:$0xff] }
0x4347   :  { %v17947_v8 = vadd.f32 %v8992_v62, %v8991_v26  ;;  %v18059_v26 = vld [vmem:[%s18886_s24] sm:$0xff] }
0x4349   :  { %v9296_v58 = vsel %vm348_vm5, %v9146_v1, %v17947_v8  ;;  %9520 = vrot.lane.b32.xlu0 %v17947_v8, %s18949_s27  ;;  %v18064_v1 = vld [vmem:[#allocation8] sm:$0xf] }
0x434a   :  { %13954 = vmatmul.mubr.msk.f32.vlgmr.msra.gmra.mxu1 %vm591_vm6, %v9296_v58 }
0x434b   :  { %13979 = vmatpush3.msra.mxu1 %v17961_v16  ;;  %13986 = vmatprep.mubr.msk.f32.mxu1 %vm15032_vm0, %v18939_v35 }
0x434c   :  { %13980 = vmatprep.subr.mxu1 %v18939_v35 }
0x434d   :  { %13981 = vmatpush3.msra.mxu1 %v17968_v50 }
0x434e   :  { %13982 = vmatprep.subr.mxu1 %v18939_v35 }
0x434f   :  { %13983 = vmatpush3.msra.mxu1 %v17973_v3 }
0x4350   :  { %13984 = vmatprep.subr.mxu1 %v18939_v35 }
0x4351   :  { %13985 = vmatpush3.msra.mxu1 %v17978_v12 }
0x4352   :  { %14000 = vmatprep.subr.mxu1 %v18939_v35 }
0x43bb   :  { %v9521_v55 = vpop.permute.xlu0 %9520 }
0x43bc   :  { %13987 = vmatmul.mubr.msk.f32.vlgmr.msra.gmra.mxu1 %vm348_vm5, %v9521_v55  ;;  %v18072_v55 = vld [vmem:[%s18888_s2] sm:$0xff] }
0x43bd   :  { %14001 = vmatpush3.msra.mxu1 %v17984_v4  ;;  %14008 = vmatprep.mubr.msk.f32.mxu1 %vm15032_vm0, %v18939_v35 }
0x43be   :  { %14002 = vmatprep.subr.mxu1 %v18939_v35 }
0x43bf   :  { %14003 = vmatpush3.msra.mxu1 %v17991_v9 }
0x43c0   :  { %14004 = vmatprep.subr.mxu1 %v18939_v35 }
0x43c1   :  { %14005 = vmatpush3.msra.mxu1 %v17996_v61 }
0x43c2   :  { %14006 = vmatprep.subr.mxu1 %v18939_v35 }
0x43c3   :  { %14007 = vmatpush3.msra.mxu1 %v18001_v23 }
0x43c4   :  { %14016 = vmatprep.subr.mxu1 %v18939_v35 }
0x440a   :  { %v9366_v48 = vpop.f32.mrf.mxu1 }
0x440b   :  { %v9367_v59 = vadd.f32 %v18008_v49, %v9366_v48 }
0x440c   :  { %v13955_v56 = vpop.f32.mrf.mxu1 }
0x440d   :  { %v9370_v20 = vmax.f32 %v9367_v59, 0.0 }
0x440f   :  { %13965 = vmatmul.mubr.msk.f32.vlgmr.msra.gmra.mxu0 %vm348_vm5, %v9370_v20 }
0x4410   :  { %13968 = vmatpush3.msra.mxu0 %v18013_v2  ;;  %13975 = vmatprep.mubr.msk.f32.mxu0 %vm15032_vm0, %v18939_v35 }
0x4411   :  { %13969 = vmatprep.subr.mxu0 %v18939_v35 }
0x4412   :  { %13970 = vmatpush3.msra.mxu0 %v18020_v31 }
0x4413   :  { %13971 = vmatprep.subr.mxu0 %v18939_v35 }
0x4414   :  { %13972 = vmatpush3.msra.mxu0 %v18025_v30 }
0x4415   :  { %13973 = vmatprep.subr.mxu0 %v18939_v35 }
0x4416   :  { %13974 = vmatpush3.msra.mxu0 %v18030_v0 }
0x4417   :  { %13989 = vmatprep.subr.mxu0 %v18939_v35 }
0x447c   :  { %v9590_v63 = vpop.f32.mrf.mxu1 }
0x447d   :  { %v9591_v44 = vadd.f32 %v18044_v32, %v9590_v63 }
0x447e   :  { %v13988_v13 = vpop.f32.mrf.mxu1 }
0x447f   :  { %v9594_v62 = vmax.f32 %v9591_v44, 0.0  ;;  %v18082_v13 = vld [vmem:[%s18889_s7] sm:$0xff]  ;;  %v18099_v44 = vld [vmem:[%s18892_s10 + $0x8] sm:$0xff] }
0x44cf   :  { %v9440_v36 = vpop.f32.mrf.mxu0 }
0x44d0   :  { %v9441_v5 = vadd.f32 %v18034_v41, %v9440_v36 }
0x44d1   :  { %v13966_v17 = vpop.f32.mrf.mxu0 }
0x44d2   :  { %v9444_v21 = vmax.f32 %v9441_v5, 0.0  ;;  %v18087_v17 = vld [vmem:[%s18892_s10 + $0x18] sm:$0xff] }
0x44d4   :  { %13976 = vmatmul.mubr.msk.f32.vlgmr.msra.gmra.mxu0 %vm348_vm5, %v9444_v21  ;;  %v18094_v21 = vld [vmem:[%s18892_s10 + $0x10] sm:$0xff] }
0x44d5   :  { %13990 = vmatpush3.msra.mxu0 %v18039_v22  ;;  %13997 = vmatprep.mubr.msk.f32.mxu0 %vm15032_vm0, %v18939_v35 }
0x44d6   :  { %13991 = vmatprep.subr.mxu0 %v18939_v35 }
0x44d7   :  { %13992 = vmatpush3.msra.mxu0 %v18049_v15 }
0x44d8   :  { %13993 = vmatprep.subr.mxu0 %v18939_v35 }
0x44d9   :  { %13994 = vmatpush3.msra.mxu0 %v18054_v27 }
0x44da   :  { %13995 = vmatprep.subr.mxu0 %v18939_v35 }
0x44db   :  { %13996 = vmatpush3.msra.mxu0 %v18059_v26 }
0x44dc   :  { %13998 = vmatmul.mubr.msk.f32.vlgmr.msra.gmra.mxu0 %vm348_vm5, %v9594_v62  ;;  %14011 = vmatprep.subr.mxu0 %v18939_v35  ;;  %v18104_v62 = vld [vmem:[%s18892_s10] sm:$0xff] }
0x44dd   :  { %14012 = vmatpush3.msk.msra.mxu0 %vm1075_vm7, %v18064_v1  ;;  %14013 = vmatprep.mubr.msk.f32.mxu0 %vm15032_vm0, %v18939_v35 }
0x44de   :  { %14027 = vmatprep.subr.mxu0 %v18939_v35 }
0x4594   :  { %v9514_v58 = vpop.f32.mrf.mxu0 }
0x4595   :  { %v18075_v37 = vadd.f32 %v18072_v55, %v9514_v58 }
0x4596   :  { %v13977_v48 = vpop.f32.mrf.mxu0 }
0x4597   :  { %v18078_v59 = vmax.f32 %v18075_v37, 0.0  ;;  %v11762_v48 = vld [vmem:[%s18893_s30 + $0x30] sm:$0xff] }
0x4599   :  { %19231 = vst [vmem:[#allocation58_spill] sm:$0xff] %v18078_v59  ;;  %v9742_v56 = vmul.f32 0.5, %v18078_v59 }
0x459b   :  { %v9743_v20 = vmul.f32 1.442695, %v9742_v56 }
0x459c   :  { %v9664_v63 = vpop.f32.mrf.mxu0 }
0x459d   :  { %14438 = vpow2.f32 %v9743_v20  ;;  %v9665_v36 = vadd.f32 %v18082_v13, %v9664_v63 }
0x459e   :  { %v13999_v5 = vpop.f32.mrf.mxu0 }
0x459f   :  { %14009 = vmatmul.mubr.msk.f32.vlgmr.msra.gmra.mxu1 %vm348_vm5, %v9665_v36  ;;  %v18115_v36 = vld [vmem:[%s18894_s11 + $0x38] sm:$0xff]  ;;  %v18122_v5 = vld [vmem:[%s18894_s11 + $0x30] sm:$0xff] }
0x45a0   :  { %14017 = vmatpush3.msra.mxu1 %v18087_v17  ;;  %14024 = vmatprep.mubr.msk.f32.mxu1 %vm15032_vm0, %v18939_v35  ;;  %19232 = vst [vmem:[#allocation81_spill] sm:$0xff] %v18115_v36  ;;  %19233 = vst [vmem:[#allocation82_spill] sm:$0xff] %v18122_v5 }
0x45a1   :  { %14018 = vmatprep.subr.mxu1 %v18939_v35 }
0x45a2   :  { %14019 = vmatpush3.msra.mxu1 %v18094_v21 }
0x45a3   :  { %14020 = vmatprep.subr.mxu1 %v18939_v35 }
0x45a4   :  { %14021 = vmatpush3.msra.mxu1 %v18099_v44 }
0x45a5   :  { %14022 = vmatprep.subr.mxu1 %v18939_v35 }
0x45a6   :  { %14023 = vmatpush3.msra.mxu1 %v18104_v62 }
0x45a7   :  { %14046 = vmatprep.subr.mxu1 %v18939_v35 }
0x45aa   :  { %v14439_v58 = vpop.eup %14438 }
0x45ab   :  { %9746 = vrot.lane.b32.xlu1 %v14439_v58, %s18952_s6  ;;  %v18127_v58 = vld [vmem:[%s18894_s11 + $0x28] sm:$0xff] }
0x45ac   :  { %19234 = vst [vmem:[#allocation83_spill] sm:$0xff] %v18127_v58 }
0x45af   :  { %10227 = vrot.lane.b32.xlu1 %v17813_v24, %s18947_s17 }
0x461d   :  { %v9747_v56 = vpop.permute.xlu1 %9746 }
0x461e   :  { %v9749_v20 = vmul.f32 %v11762_v48, %v9747_v56  ;;  %v18132_v48 = vld [vmem:[%s18894_s11 + $0x20] sm:$0xff]  ;;  %v18137_v56 = vld [vmem:[%s18894_s11 + $0x18] sm:$0xff] }
0x461f   :  { %19235 = vst [vmem:[#allocation84_spill] sm:$0xff] %v18132_v48  ;;  %19236 = vst [vmem:[#allocation62_spill] sm:$0xff] %v18137_v56 }
0x4620   :  { %v9750_v63 = vadd.f32 %v9749_v20, %v18075_v37  ;;  %v18142_v20 = vld [vmem:[%s18894_s11 + $0x10] sm:$0xff] }
0x4621   :  { %19237 = vst [vmem:[#allocation63_spill] sm:$0xff] %v18142_v20 }
0x4622   :  { %14014 = vmatmul.mubr.msk.f32.vlgmr.msra.gmra.mxu0 %vm1071_vm8, %v9750_v63  ;;  %v18147_v63 = vld [vmem:[%s18894_s11 + $0x8] sm:$0xff] }
0x4623   :  { %14028 = vmatpush3.msra.mxu0 %v18115_v36  ;;  %14043 = vmatprep.mubr.msk.f32.mxu0 %vm15032_vm0, %v18939_v35  ;;  %19239 = vst [vmem:[#allocation64_spill] sm:$0xff] %v18147_v63  ;;  %v14774_v36 = vld [vmem:[%s19147_s18] sm:$0xff] }
0x4624   :  { %14029 = vmatprep.subr.mxu0 %v18939_v35 }
0x4625   :  { %14030 = vmatpush3.msra.mxu0 %v18122_v5 }
0x4626   :  { %14031 = vmatprep.subr.mxu0 %v18939_v35 }
0x4627   :  { %14032 = vmatpush3.msra.mxu0 %v18127_v58  ;;  %v18164_v58 = vld [vmem:[%s19238_s9 + $0x18] sm:$0xff] }
0x4628   :  { %14033 = vmatprep.subr.mxu0 %v18939_v35  ;;  %19242 = vst [vmem:[#allocation68_spill] sm:$0xff] %v18164_v58 }
0x4629   :  { %14034 = vmatpush3.msra.mxu0 %v18132_v48 }
0x462a   :  { %14035 = vmatprep.subr.mxu0 %v18939_v35 }
0x462b   :  { %14036 = vmatpush3.msra.mxu0 %v18137_v56 }
0x462c   :  { %14037 = vmatprep.subr.mxu0 %v18939_v35 }
0x462d   :  { %14038 = vmatpush3.msra.mxu0 %v18142_v20  ;;  %v18159_v20 = vld [vmem:[%s18896_s15] sm:$0xff] }
0x462e   :  { %14039 = vmatprep.subr.mxu0 %v18939_v35  ;;  %19241 = vst [vmem:[#allocation67_spill] sm:$0xff] %v18159_v20 }
0x462f   :  { %14040 = vmatpush3.msra.mxu0 %v18147_v63 }
0x4630   :  { %14041 = vmatprep.subr.mxu0 %v18939_v35 }
0x4631   :  { %14042 = vmatpush3.msra.mxu0 %v18152_v6 }
0x4632   :  { %14068 = vmatprep.subr.mxu0 %v18939_v35 }
0x465f   :  { %v18156_v59 = vpop.f32.mrf.mxu1 }
0x4661   :  { %v14010_v57 = vpop.f32.mrf.mxu1 }
0x4662   :  { %v18171_v57 = vld [vmem:[%s19238_s9 + $0x10] sm:$0xff] }
0x4663   :  { %19243 = vst [vmem:[#allocation69_spill] sm:$0xff] %v18171_v57 }
0x46e2   :  { %v9820_v34 = vpop.f32.mrf.mxu0 }
0x46e3   :  { %v9821_v56 = vadd.f32 %v18159_v20, %v9820_v34  ;;  %v18176_v34 = vld [vmem:[%s19238_s9 + $0x8] sm:$0xff]  ;;  %v18193_v20 = vld [vmem:[%s19244_s21 + $0x18] sm:$0xff] }
0x46e4   :  { %v14015_v63 = vpop.f32.mrf.mxu0  ;;  %19245 = vst [vmem:[#allocation70_spill] sm:$0xff] %v18176_v34  ;;  %19248 = vst [vmem:[#allocation74_spill] sm:$0xff] %v18193_v20 }
0x46e5   :  { %v9824_v48 = vmax.f32 %v9821_v56, 0.0  ;;  %v18185_v63 = vld [vmem:[#allocation10] sm:$0xff] }
0x46e6   :  { %19247 = vst [vmem:[#allocation73_spill] sm:$0xff] %v18185_v63 }
0x46e7   :  { %14025 = vmatmul.mubr.msk.f32.vlgmr.msra.gmra.mxu1 %vm348_vm5, %v9824_v48  ;;  %v18181_v48 = vld [vmem:[%s19238_s9] sm:$0xff] }
0x46e8   :  { %14047 = vmatpush3.msra.mxu1 %v18164_v58  ;;  %14054 = vmatprep.mubr.msk.f32.mxu1 %vm15032_vm0, %v18939_v35  ;;  %19246 = vst [vmem:[#allocation72_spill] sm:$0xff] %v18181_v48 }
0x46e9   :  { %14048 = vmatprep.subr.mxu1 %v18939_v35 }
0x46ea   :  { %14049 = vmatpush3.msra.mxu1 %v18171_v57 }
0x46eb   :  { %14050 = vmatprep.subr.mxu1 %v18939_v35 }
0x46ec   :  { %14051 = vmatpush3.msra.mxu1 %v18176_v34 }
0x46ed   :  { %14052 = vmatprep.subr.mxu1 %v18939_v35 }
0x46ee   :  { %14053 = vmatpush3.msra.mxu1 %v18181_v48 }
0x46ef   :  { %14057 = vmatprep.subr.mxu1 %v18939_v35 }
0x47a7   :  { %v9894_v56 = vpop.f32.mrf.mxu1 }
0x47a8   :  { %v9895_v57 = vadd.f32 %v18185_v63, %v9894_v56  ;;  %v18200_v56 = vld [vmem:[%s19244_s21 + $0x10] sm:$0xff] }
0x47a9   :  { %v14026_v58 = vpop.f32.mrf.mxu1  ;;  %19249 = vst [vmem:[#allocation75_spill] sm:$0xff] %v18200_v56 }
0x47aa   :  { %v9898_v34 = vsel %vm348_vm5, %v9895_v57, %v17947_v8  ;;  %10223 = vrot.lane.b32.xlu0 %v9895_v57, %s18947_s17  ;;  %v18205_v58 = vld [vmem:[%s19244_s21 + $0x8] sm:$0xff]  ;;  %v18210_v57 = vld [vmem:[%s19244_s21] sm:$0xff] }
0x47ab   :  { %14044 = vmatmul.mubr.msk.f32.vlgmr.msra.gmra.mxu0 %vm591_vm6, %v9898_v34  ;;  %19250 = vst [vmem:[#allocation76_spill] sm:$0xff] %v18205_v58  ;;  %19251 = vst [vmem:[#allocation77_spill] sm:$0xff] %v18210_v57 }
0x47ac   :  { %14069 = vmatpush3.msra.mxu0 %v18193_v20  ;;  %14076 = vmatprep.mubr.msk.f32.mxu0 %vm15032_vm0, %v18939_v35  ;;  %v18215_v20 = vld [vmem:[%s18907_s0] sm:$0xff] }
0x47ad   :  { %14070 = vmatprep.subr.mxu0 %v18939_v35  ;;  %19252 = vst [vmem:[#allocation78_spill] sm:$0xff] %v18215_v20 }
0x47ae   :  { %14071 = vmatpush3.msra.mxu0 %v18200_v56 }
0x47af   :  { %14072 = vmatprep.subr.mxu0 %v18939_v35 }
0x47b0   :  { %14073 = vmatpush3.msra.mxu0 %v18205_v58  ;;  %v18220_v58 = vld [vmem:[%s19141_s16 + $0x18] sm:$0xff] }
0x47b1   :  { %14074 = vmatprep.subr.mxu0 %v18939_v35  ;;  %19253 = vst [vmem:[#allocation79_spill] sm:$0xff] %v18220_v58 }
0x47b2   :  { %14075 = vmatpush3.msra.mxu0 %v18210_v57  ;;  %v18227_v57 = vld [vmem:[%s19141_s16 + $0x10] sm:$0xff] }
0x47b3   :  { %14106 = vmatprep.subr.mxu0 %v18939_v35  ;;  %19254 = vst [vmem:[#allocation80_spill] sm:$0xff] %v18227_v57 }
0x486b   :  { %v9968_v34 = vpop.f32.mrf.mxu0 }
0x486c   :  { %v9969_v56 = vadd.f32 %v18215_v20, %v9968_v34  ;;  %v18241_v34 = vld [vmem:[#allocation16] sm:$0xff] }
0x486d   :  { %v14045_v63 = vpop.f32.mrf.mxu0  ;;  %19257 = vst [vmem:[#allocation88_spill] sm:$0xff] %v18241_v34 }
0x486e   :  { %v9972_v48 = vmax.f32 %v9969_v56, 0.0  ;;  %v18232_v63 = vld [vmem:[%s19141_s16 + $0x8] sm:$0xff] }
0x486f   :  { %19255 = vst [vmem:[#allocation85_spill] sm:$0xff] %v18232_v63 }
0x4870   :  { %14055 = vmatmul.mubr.msk.f32.vlgmr.msra.gmra.mxu1 %vm348_vm5, %v9972_v48  ;;  %v18237_v48 = vld [vmem:[%s19141_s16] sm:$0xff] }
0x4871   :  { %14058 = vmatpush3.msra.mxu1 %v18220_v58  ;;  %14065 = vmatprep.mubr.msk.f32.mxu1 %vm15032_vm0, %v18939_v35  ;;  %19256 = vst [vmem:[#allocation87_spill] sm:$0xff] %v18237_v48 }
0x4872   :  { %14059 = vmatprep.subr.mxu1 %v18939_v35 }
0x4873   :  { %14060 = vmatpush3.msra.mxu1 %v18227_v57 }
0x4874   :  { %14061 = vmatprep.subr.mxu1 %v18939_v35 }
0x4875   :  { %14062 = vmatpush3.msra.mxu1 %v18232_v63  ;;  %v14762_v63 = vld [vmem:[%s19147_s18 + $0x58] sm:$0xff] }
0x4876   :  { %14063 = vmatprep.subr.mxu1 %v18939_v35 }
0x4877   :  { %14064 = vmatpush3.msra.mxu1 %v18237_v48  ;;  %v14763_v48 = vld [vmem:[%s19147_s18 + $0x50] sm:$0xff] }
0x4878   :  { %14079 = vmatprep.subr.mxu1 %v18939_v35 }
0x4930   :  { %v10042_v56 = vpop.f32.mrf.mxu1 }
0x4931   :  { %v10043_v57 = vadd.f32 %v18241_v34, %v10042_v56  ;;  %v14764_v56 = vld [vmem:[%s19147_s18 + $0x48] sm:$0xff] }
0x4932   :  { %v14056_v58 = vpop.f32.mrf.mxu1 }
0x4933   :  { %v10046_v20 = vmax.f32 %v10043_v57, 0.0  ;;  %v14765_v58 = vld [vmem:[%s19147_s18 + $0x40] sm:$0xff]  ;;  %v14767_v57 = vld [vmem:[%s19147_s18 + $0x30] sm:$0xff] }
0x4935   :  { %14066 = vmatmul.mubr.msk.f32.vlgmr.msra.gmra.mxu1 %vm348_vm5, %v10046_v20  ;;  %v14766_v20 = vld [vmem:[%s19147_s18 + $0x38] sm:$0xff] }
0x4936   :  { %14080 = vmatpush3.msra.mxu1 %v14762_v63  ;;  %14103 = vmatprep.mubr.msk.f32.mxu1 %vm15032_vm0, %v18939_v35  ;;  %v14768_v63 = vld [vmem:[%s19147_s18 + $0x28] sm:$0xff] }
0x4937   :  { %14081 = vmatprep.subr.mxu1 %v18939_v35 }
0x4938   :  { %14082 = vmatpush3.msra.mxu1 %v14763_v48  ;;  %v14769_v48 = vld [vmem:[%s19147_s18 + $0x20] sm:$0xff] }
0x4939   :  { %14083 = vmatprep.subr.mxu1 %v18939_v35 }
0x493a   :  { %14084 = vmatpush3.msra.mxu1 %v14764_v56  ;;  %v10224_v56 = vpop.permute.xlu0 %10223 }
0x493b   :  { %14085 = vmatprep.subr.mxu1 %v18939_v35 }
0x493c   :  { %14086 = vmatpush3.msra.mxu1 %v14765_v58  ;;  %v14770_v58 = vld [vmem:[%s19147_s18 + $0x18] sm:$0xff] }
0x493d   :  { %14087 = vmatprep.subr.mxu1 %v18939_v35 }
0x493e   :  { %14088 = vmatpush3.msra.mxu1 %v14766_v20  ;;  %v14771_v20 = vld [vmem:[#allocation7] sm:$0xff] }
0x493f   :  { %14089 = vmatprep.subr.mxu1 %v18939_v35  ;;  %v9293_v34 = vadd.f32 %v14771_v20, %v18005_v19 }
0x4940   :  { %14090 = vmatpush3.msra.mxu1 %v14767_v57  ;;  %v14772_v57 = vld [vmem:[%s19147_s18 + $0x10] sm:$0xff] }
0x4941   :  { %14091 = vmatprep.subr.mxu1 %v18939_v35  ;;  %v10226_v6 = vsel %vm348_vm5, %v9293_v34, %v10224_v56 }
0x4942   :  { %14092 = vmatpush3.msra.mxu1 %v14768_v63  ;;  %v14773_v63 = vld [vmem:[%s19147_s18 + $0x8] sm:$0xff] }
0x4943   :  { %14093 = vmatprep.subr.mxu1 %v18939_v35 }
0x4944   :  { %14094 = vmatpush3.msra.mxu1 %v14769_v48  ;;  %v10228_v48 = vpop.permute.xlu1 %10227 }
0x4945   :  { %14095 = vmatprep.subr.mxu1 %v18939_v35  ;;  %v10230_v5 = vsel %vm591_vm6, %v10226_v6, %v10228_v48  ;;  %v14778_v48 = vld [vmem:[%s19048_s13 + $0x28] sm:$0xff] }
0x4946   :  { %14096 = vmatpush3.msra.mxu1 %v14770_v58 }
0x4947   :  { %14097 = vmatprep.subr.mxu1 %v18939_v35 }
0x4948   :  { %14098 = vmatpush3.msra.mxu1 %v14772_v57  ;;  %v14776_v57 = vld [vmem:[%s19048_s13 + $0x38] sm:$0xff] }
0x4949   :  { %14099 = vmatprep.subr.mxu1 %v18939_v35 }
0x494a   :  { %14100 = vmatpush3.msra.mxu1 %v14773_v63  ;;  %v14777_v63 = vld [vmem:[%s19048_s13 + $0x30] sm:$0xff] }
0x494b   :  { %14101 = vmatprep.subr.mxu1 %v18939_v35 }
0x494c   :  { %14102 = vmatpush3.msra.mxu1 %v14774_v36  ;;  %v18295_v36 = vld [vmem:[%s19047_s19] sm:$0xff] }
0x494d   :  { %14104 = vmatmul.mubr.msk.f32.vlgmr.msra.gmra.mxu1 %vm1594_vm9, %v10230_v5  ;;  %14141 = vmatprep.subr.mxu1 %v18939_v35 }
0x494e   :  { %14142 = vmatpush3.msra.mxu1 %v17869_v11  ;;  %14157 = vmatprep.mubr.msk.f32.mxu1 %vm15032_vm0, %v18939_v35 }
0x494f   :  { %14143 = vmatprep.subr.mxu1 %v18939_v35 }
0x4950   :  { %14144 = vmatpush3.msra.mxu1 %v17876_v25 }
0x4951   :  { %14145 = vmatprep.subr.mxu1 %v18939_v35 }
0x4952   :  { %14146 = vmatpush3.msra.mxu1 %v17881_v28 }
0x4953   :  { %14147 = vmatprep.subr.mxu1 %v18939_v35 }
0x4954   :  { %14148 = vmatpush3.msra.mxu1 %v17886_v42 }
0x4955   :  { %14149 = vmatprep.subr.mxu1 %v18939_v35 }
0x4956   :  { %14150 = vmatpush3.msra.mxu1 %v17891_v43 }
0x4957   :  { %14151 = vmatprep.subr.mxu1 %v18939_v35 }
0x4958   :  { %14152 = vmatpush3.msra.mxu1 %v17896_v53 }
0x4959   :  { %14153 = vmatprep.subr.mxu1 %v18939_v35 }
0x495a   :  { %14154 = vmatpush3.msra.mxu1 %v17901_v7 }
0x495b   :  { %14155 = vmatprep.subr.mxu1 %v18939_v35 }
0x495c   :  { %14156 = vmatpush3.msra.mxu1 %v17906_v45 }
0x495d   :  { %14182 = vmatprep.subr.mxu1 %v18939_v35 }
0x49f5   :  { %v10116_v6 = vpop.f32.mrf.mxu1 }
0x49f6   :  { %v10117_v45 = vadd.f32 %v18295_v36, %v10116_v6  ;;  %v14779_v6 = vld [vmem:[%s19048_s13 + $0x20] sm:$0xff] }
0x49f7   :  { %v14067_v11 = vpop.f32.mrf.mxu1 }
0x49f8   :  { %v10120_v34 = vmax.f32 %v10117_v45, 0.0  ;;  %v14780_v11 = vld [vmem:[%s19048_s13 + $0x18] sm:$0xff] }
0x4a0d   :  { %v10300_v25 = vpop.f32.mrf.mxu1 }
0x4a0e   :  { %10311 = vrot.lane.b32.xlu0 %v10300_v25, %s18947_s17  ;;  %v11784_v42 = vmul.f32 -1.442695, %v10300_v25 }
0x4a0f   :  { %v14105_v28 = vpop.f32.mrf.mxu1 }
0x4a10   :  { %14440 = vpow2.f32 %v11784_v42  ;;  %v14781_v28 = vld [vmem:[%s19048_s13 + $0x10] sm:$0xff]  ;;  %v14782_v42 = vld [vmem:[%s19048_s13 + $0x8] sm:$0xff] }
0x4a1d   :  { %v14441_v43 = vpop.eup %14440 }
0x4a1e   :  { %v10307_v53 = vadd.f32 1.0, %v14441_v43  ;;  %v14783_v43 = vld [vmem:[%s19048_s13] sm:$0xff]  ;;  %s19301_s13 = sld [smem:[#allocation46_spill]] }
0x4a20   :  { %14442 = vrcp.f32 %v10307_v53 }
0x4a2d   :  { %v14443_v7 = vpop.eup %14442 }
0x4a2e   :  { %v10321_v53 = vsub.f32 1.0, %v14443_v7  ;;  %v10327_v45 = vmul.f32 %v14443_v7, %v17813_v24 }
0x4a80   :  { %v10312_v19 = vpop.permute.xlu0 %10311 }
0x4a81   :  { %v10314_v5 = vmul.f32 %v14443_v7, %v10312_v19 }
0x4a83   :  { %10316 = vrot.lane.b32.xlu1 %v10314_v5, %s18948_s4 }
0x4a87   :  { %10122 = vrot.lane.b32.xlu1 %v10120_v34, %s18990_s22 }
0x4af5   :  { %v10317_v56 = vpop.permute.xlu1 %10316 }
0x4af6   :  { %v10319_v58 = vadd.f32 %v10317_v56, %v10300_v25 }
0x4af8   :  { %14444 = vtanh.f32 %v10319_v58  ;;  %v10201_v58 = vsub.f32 0.0, %v10120_v34 }
0x4af9   :  { %v10123_v20 = vpop.permute.xlu1 %10122 }
0x4afa   :  { %14077 = vmatmul.mubr.msk.f32.vlgmr.msra.gmra.mxu0 %vm348_vm5, %v10123_v20  ;;  %v10202_v20 = vmul.f32 1.442695, %v10201_v58 }
0x4afb   :  { %14107 = vmatpush3.msra.mxu0 %v14776_v57  ;;  %14122 = vmatprep.mubr.msk.f32.mxu0 %vm15032_vm0, %v18939_v35 }
0x4afc   :  { %14108 = vmatprep.subr.mxu0 %v18939_v35  ;;  %14446 = vpow2.f32 %v10202_v20 }
0x4afd   :  { %14109 = vmatpush3.msra.mxu0 %v14777_v63 }
0x4afe   :  { %14110 = vmatprep.subr.mxu0 %v18939_v35 }
0x4aff   :  { %14111 = vmatpush3.msra.mxu0 %v14778_v48 }
0x4b00   :  { %14112 = vmatprep.subr.mxu0 %v18939_v35 }
0x4b01   :  { %14113 = vmatpush3.msra.mxu0 %v14779_v6 }
0x4b02   :  { %14114 = vmatprep.subr.mxu0 %v18939_v35 }
0x4b03   :  { %14115 = vmatpush3.msra.mxu0 %v14780_v11  ;;  %v10196_v11 = vmul.f32 0.5, %v10120_v34 }
0x4b04   :  { %14116 = vmatprep.subr.mxu0 %v18939_v35 }
0x4b05   :  { %v14445_v25 = vpop.eup %14444  ;;  %14117 = vmatpush3.msra.mxu0 %v14781_v28 }
0x4b06   :  { %10323 = vrot.lane.b32.xlu0 %v14445_v25, %s18949_s27  ;;  %14118 = vmatprep.subr.mxu0 %v18939_v35 }
0x4b07   :  { %14119 = vmatpush3.msra.mxu0 %v14782_v42 }
0x4b08   :  { %14120 = vmatprep.subr.mxu0 %v18939_v35 }
0x4b09   :  { %14121 = vmatpush3.msra.mxu0 %v14783_v43  ;;  %v14447_v42 = vpop.eup %14446  ;;  %v10197_v43 = vsub.f32 -0.9189385, %v10196_v11 }
0x4b0a   :  { %14125 = vmatprep.subr.mxu0 %v18939_v35 }
0x4b78   :  { %v10324_v19 = vpop.permute.xlu0 %10323 }
0x4b79   :  { %v10326_v5 = vmul.f32 %v10324_v19, %v10321_v53 }
0x4b7b   :  { %v10328_v56 = vadd.f32 %v10327_v45, %v10326_v5 }
0x4b7d   :  { %10330 = vrot.lane.b32.xlu0 %v10328_v56, %s18949_s27 }
0x4bba   :  { %v10192_v57 = vpop.f32.mrf.mxu0 }
0x4bbb   :  { %v10193_v63 = vadd.f32 %v17818_v18, %v10192_v57  ;;  %v18335_v18 = vld [vmem:[%s15048_s5 + $0x38] sm:$0xff]  ;;  %s15038_s5 = smov 4  }
0x4bbc   :  { %v14078_v48 = vpop.f32.mrf.mxu0 }
0x4bbd   :  { %v10198_v6 = vsub.f32 %v17835_v46, %v10193_v63 }
0x4bbf   :  { %v10199_v25 = vmul.f32 %v10198_v6, %v10198_v6 }
0x4bc1   :  { %v10200_v28 = vmul.f32 0.5, %v10199_v25 }
0x4bc3   :  { %v10204_v24 = vmul.f32 %v14447_v42, %v10200_v28 }
0x4bc5   :  { %v10205_v7 = vsub.f32 %v10197_v43, %v10204_v24  ;;  %v19260_v24 = vld [vmem:[#allocation65_spill] sm:$0xff] }
0x4bc7   :  { %v18325_v53 = vadd.f32 %v10205_v7, %v17823_v51 }
0x4bef   :  { %v10331_v19 = vpop.permute.xlu0 %10330 }
0x4bf0   :  { %v10333_v45 = vsel %vm348_vm5, %v10331_v19, %v17947_v8  ;;  %v19261_v19 = vld [vmem:[#allocation55_spill] sm:$0xff] }
0x4bf1   :  { %14123 = vmatmul.mubr.msk.f32.vlgmr.msra.gmra.mxu0 %vm591_vm6, %v10333_v45 }
0x4bf2   :  { %14126 = vmatpush3.msk.msra.mxu0 %vm268_vm1, %v17828_v52  ;;  %14127 = vmatprep.mubr.msk.f32.mxu0 %vm15032_vm0, %v18939_v35 }
0x4bf3   :  { %14130 = vmatprep.subr.mxu0 %v18939_v35 }
0x4bf5   :  { %14128 = vmatmul.mubr.msk.f32.vlgmr.msra.gmra.mxu0 %vm264_vm2, %v18335_v18 }
0x4bf6   :  { %14131 = vmatpush3.msra.mxu0 %v17841_v10  ;;  %14138 = vmatprep.mubr.msk.f32.mxu0 %vm15032_vm0, %v18939_v35 }
0x4bf7   :  { %14132 = vmatprep.subr.mxu0 %v18939_v35 }
0x4bf8   :  { %14133 = vmatpush3.msra.mxu0 %v17848_v33 }
0x4bf9   :  { %14134 = vmatprep.subr.mxu0 %v18939_v35 }
0x4bfa   :  { %14135 = vmatpush3.msra.mxu0 %v17853_v29 }
0x4bfb   :  { %14136 = vmatprep.subr.mxu0 %v18939_v35 }
0x4bfc   :  { %14137 = vmatpush3.msra.mxu0 %v17858_v54 }
0x4bfd   :  { %14160 = vmatprep.subr.mxu0 %v18939_v35 }
0x4cb1   :  { %v10403_v51 = vpop.f32.mrf.mxu0 }
0x4cb2   :  { %10414 = vrot.lane.b32.xlu1 %v10403_v51, %s18947_s17  ;;  %v11786_v33 = vmul.f32 -1.442695, %v10403_v51 }
0x4cb3   :  { %v14124_v52 = vpop.f32.mrf.mxu0 }
0x4cb4   :  { %14448 = vpow2.f32 %v11786_v33 }
0x4cb5   :  { %v10507_v46 = vpop.f32.mrf.mxu0 }
0x4cb6   :  { %v10508_v10 = vadd.f32 %v17864_v39, %v10507_v46  ;;  %v19263_v46 = vld [vmem:[#allocation60_spill] sm:$0xff] }
0x4cb7   :  { %v14129_v34 = vpop.f32.mrf.mxu0 }
0x4cb8   :  { %v10511_v5 = vmax.f32 %v10508_v10, 0.0 }
0x4cba   :  { %14139 = vmatmul.mubr.msk.f32.vlgmr.msra.gmra.mxu0 %vm348_vm5, %v10511_v5 }
0x4cbb   :  { %14161 = vmatpush3.msra.mxu0 %v17927_v14  ;;  %14168 = vmatprep.mubr.msk.f32.mxu0 %vm15032_vm0, %v18939_v35 }
0x4cbc   :  { %14162 = vmatprep.subr.mxu0 %v18939_v35 }
0x4cbd   :  { %14163 = vmatpush3.msra.mxu0 %v17934_v40 }
0x4cbe   :  { %14164 = vmatprep.subr.mxu0 %v18939_v35 }
0x4cbf   :  { %14165 = vmatpush3.msra.mxu0 %v17944_v38 }
0x4cc0   :  { %14166 = vmatprep.subr.mxu0 %v18939_v35 }
0x4cc1   :  { %14167 = vmatpush3.msra.mxu0 %v17951_v60  ;;  %v14449_v29 = vpop.eup %14448 }
0x4cc2   :  { %14171 = vmatprep.subr.mxu0 %v18939_v35  ;;  %v10410_v54 = vadd.f32 1.0, %v14449_v29 }
0x4cc4   :  { %14450 = vrcp.f32 %v10410_v54  ;;  %v11788_v54 = vld [vmem:[%s18893_s30 + $0x38] sm:$0xff] }
0x4cd1   :  { %v14451_v39 = vpop.eup %14450 }
0x4cd2   :  { %v10424_v60 = vsub.f32 1.0, %v14451_v39  ;;  %v10430_v48 = vmul.f32 %v14451_v39, %v17947_v8 }
0x4d24   :  { %v10415_v14 = vpop.permute.xlu1 %10414 }
0x4d25   :  { %v10417_v56 = vmul.f32 %v14451_v39, %v10415_v14 }
0x4d27   :  { %10419 = vrot.lane.b32.xlu0 %v10417_v56, %s18948_s4 }
0x4d7a   :  { %v10581_v38 = vpop.f32.mrf.mxu0 }
0x4d7b   :  { %v10582_v11 = vadd.f32 %v17939_v47, %v10581_v38  ;;  %v19268_v38 = vld [vmem:[#allocation62_spill] sm:$0xff] }
0x4d7c   :  { %v14140_v20 = vpop.f32.mrf.mxu0 }
0x4d7d   :  { %v19269_v20 = vld [vmem:[#allocation63_spill] sm:$0xff] }
0x4d99   :  { %v10420_v40 = vpop.permute.xlu0 %10419 }
0x4d9a   :  { %v10422_v58 = vadd.f32 %v10420_v40, %v10403_v51  ;;  %v19262_v51 = vld [vmem:[#allocation71_spill] sm:$0xff] }
0x4d9b   :  { %v19266_v40 = vld [vmem:[#allocation83_spill] sm:$0xff] }
0x4d9c   :  { %14452 = vtanh.f32 %v10422_v58  ;;  %v19267_v58 = vld [vmem:[#allocation84_spill] sm:$0xff] }
0x4da9   :  { %v14453_v57 = vpop.eup %14452 }
0x4daa   :  { %10426 = vrot.lane.b32.xlu1 %v14453_v57, %s18949_s27  ;;  %v19270_v57 = vld [vmem:[#allocation64_spill] sm:$0xff] }
0x4e1c   :  { %v10427_v63 = vpop.permute.xlu1 %10426 }
0x4e1d   :  { %v10429_v6 = vmul.f32 %v10427_v63, %v10424_v60  ;;  %v19271_v60 = vld [vmem:[#allocation66_spill] sm:$0xff] }
0x4e1f   :  { %v18367_v25 = vadd.f32 %v10430_v48, %v10429_v6 }
0x4e21   :  { %v10585_v28 = vsel %vm348_vm5, %v10582_v11, %v18367_v25  ;;  %10809 = vrot.lane.b32.xlu0 %v18367_v25, %s18949_s27  ;;  %v19272_v11 = vld [vmem:[#allocation67_spill] sm:$0xff] }
0x4e22   :  { %14158 = vmatmul.mubr.msk.f32.vlgmr.msra.gmra.mxu1 %vm591_vm6, %v10585_v28 }
0x4e23   :  { %14183 = vmatpush3.msra.mxu1 %v17961_v16  ;;  %14190 = vmatprep.mubr.msk.f32.mxu1 %vm15032_vm0, %v18939_v35 }
0x4e24   :  { %14184 = vmatprep.subr.mxu1 %v18939_v35 }
0x4e25   :  { %14185 = vmatpush3.msra.mxu1 %v17968_v50 }
0x4e26   :  { %14186 = vmatprep.subr.mxu1 %v18939_v35 }
0x4e27   :  { %14187 = vmatpush3.msra.mxu1 %v17973_v3 }
0x4e28   :  { %14188 = vmatprep.subr.mxu1 %v18939_v35 }
0x4e29   :  { %14189 = vmatpush3.msra.mxu1 %v17978_v12 }
0x4e2a   :  { %14204 = vmatprep.subr.mxu1 %v18939_v35 }
0x4e93   :  { %v10810_v47 = vpop.permute.xlu0 %10809 }
0x4e94   :  { %14191 = vmatmul.mubr.msk.f32.vlgmr.msra.gmra.mxu1 %vm348_vm5, %v10810_v47 }
0x4e95   :  { %14205 = vmatpush3.msra.mxu1 %v17984_v4  ;;  %14212 = vmatprep.mubr.msk.f32.mxu1 %vm15032_vm0, %v18939_v35 }
0x4e96   :  { %14206 = vmatprep.subr.mxu1 %v18939_v35 }
0x4e97   :  { %14207 = vmatpush3.msra.mxu1 %v17991_v9 }
0x4e98   :  { %14208 = vmatprep.subr.mxu1 %v18939_v35 }
0x4e99   :  { %14209 = vmatpush3.msra.mxu1 %v17996_v61 }
0x4e9a   :  { %14210 = vmatprep.subr.mxu1 %v18939_v35 }
0x4e9b   :  { %14211 = vmatpush3.msra.mxu1 %v18001_v23 }
0x4e9c   :  { %14220 = vmatprep.subr.mxu1 %v18939_v35 }
0x4ee2   :  { %v10655_v8 = vpop.f32.mrf.mxu1 }
0x4ee3   :  { %v10656_v16 = vadd.f32 %v18008_v49, %v10655_v8 }
0x4ee4   :  { %v14159_v50 = vpop.f32.mrf.mxu1 }
0x4ee5   :  { %v10659_v3 = vmax.f32 %v10656_v16, 0.0  ;;  %v19273_v16 = vld [vmem:[#allocation68_spill] sm:$0xff]  ;;  %v19274_v50 = vld [vmem:[#allocation69_spill] sm:$0xff] }
0x4ee7   :  { %14169 = vmatmul.mubr.msk.f32.vlgmr.msra.gmra.mxu0 %vm348_vm5, %v10659_v3  ;;  %v19275_v3 = vld [vmem:[#allocation70_spill] sm:$0xff] }
0x4ee8   :  { %14172 = vmatpush3.msra.mxu0 %v18013_v2  ;;  %14179 = vmatprep.mubr.msk.f32.mxu0 %vm15032_vm0, %v18939_v35 }
0x4ee9   :  { %14173 = vmatprep.subr.mxu0 %v18939_v35 }
0x4eea   :  { %14174 = vmatpush3.msra.mxu0 %v18020_v31 }
0x4eeb   :  { %14175 = vmatprep.subr.mxu0 %v18939_v35 }
0x4eec   :  { %14176 = vmatpush3.msra.mxu0 %v18025_v30 }
0x4eed   :  { %14177 = vmatprep.subr.mxu0 %v18939_v35 }
0x4eee   :  { %14178 = vmatpush3.msra.mxu0 %v18030_v0 }
0x4eef   :  { %14193 = vmatprep.subr.mxu0 %v18939_v35 }
0x4f54   :  { %v10879_v12 = vpop.f32.mrf.mxu1 }
0x4f55   :  { %v10880_v2 = vadd.f32 %v18044_v32, %v10879_v12  ;;  %v19276_v12 = vld [vmem:[#allocation72_spill] sm:$0xff] }
0x4f56   :  { %v14192_v4 = vpop.f32.mrf.mxu1 }
0x4f57   :  { %v10883_v31 = vmax.f32 %v10880_v2, 0.0  ;;  %v19278_v2 = vld [vmem:[#allocation74_spill] sm:$0xff] }
0x4fa7   :  { %v10729_v9 = vpop.f32.mrf.mxu0 }
0x4fa8   :  { %v10730_v61 = vadd.f32 %v18034_v41, %v10729_v9  ;;  %v19277_v9 = vld [vmem:[#allocation73_spill] sm:$0xff] }
0x4fa9   :  { %v14170_v23 = vpop.f32.mrf.mxu0 }
0x4faa   :  { %v10733_v49 = vmax.f32 %v10730_v61, 0.0 }
0x4fac   :  { %14180 = vmatmul.mubr.msk.f32.vlgmr.msra.gmra.mxu0 %vm348_vm5, %v10733_v49 }
0x4fad   :  { %14194 = vmatpush3.msra.mxu0 %v18039_v22  ;;  %14201 = vmatprep.mubr.msk.f32.mxu0 %vm15032_vm0, %v18939_v35 }
0x4fae   :  { %14195 = vmatprep.subr.mxu0 %v18939_v35 }
0x4faf   :  { %14196 = vmatpush3.msra.mxu0 %v18049_v15 }
0x4fb0   :  { %14197 = vmatprep.subr.mxu0 %v18939_v35 }
0x4fb1   :  { %14198 = vmatpush3.msra.mxu0 %v18054_v27 }
0x4fb2   :  { %14199 = vmatprep.subr.mxu0 %v18939_v35 }
0x4fb3   :  { %14200 = vmatpush3.msra.mxu0 %v18059_v26 }
0x4fb4   :  { %14202 = vmatmul.mubr.msk.f32.vlgmr.msra.gmra.mxu0 %vm348_vm5, %v10883_v31  ;;  %14215 = vmatprep.subr.mxu0 %v18939_v35  ;;  %v19279_v31 = vld [vmem:[#allocation75_spill] sm:$0xff] }
0x4fb5   :  { %14216 = vmatpush3.msk.msra.mxu0 %vm1075_vm7, %v18064_v1  ;;  %14217 = vmatprep.mubr.msk.f32.mxu0 %vm15032_vm0, %v18939_v35 }
0x4fb6   :  { %14231 = vmatprep.subr.mxu0 %v18939_v35 }
0x506c   :  { %v10803_v30 = vpop.f32.mrf.mxu0 }
0x506d   :  { %v18427_v0 = vadd.f32 %v18072_v55, %v10803_v30  ;;  %v18439_v55 = vld [vmem:[#allocation14] sm:$0xff]  ;;  %v19280_v30 = vld [vmem:[#allocation76_spill] sm:$0xff] }
0x506e   :  { %v14181_v41 = vpop.f32.mrf.mxu0  ;;  %v18469_v34 = vadd.f32 %v18156_v59, %v18439_v55  ;;  %v19264_v59 = vld [vmem:[#allocation81_spill] sm:$0xff] }
0x506f   :  { %v18430_v22 = vmax.f32 %v18427_v0, 0.0  ;;  %v19281_v41 = vld [vmem:[#allocation77_spill] sm:$0xff] }
0x5070   :  { %v10210_v33 = vsub.f32 %v18075_v37, %v18469_v34  ;;  %v19265_v37 = vld [vmem:[#allocation82_spill] sm:$0xff] }
0x5071   :  { %v11031_v32 = vmul.f32 0.5, %v18430_v22 }
0x5072   :  { %v10211_v29 = vmul.f32 %v10210_v33, %v10210_v33  ;;  %v19289_v33 = vld [vmem:[#allocation94_spill] sm:$0xff] }
0x5073   :  { %v11032_v15 = vmul.f32 1.442695, %v11031_v32  ;;  %v19282_v32 = vld [vmem:[#allocation78_spill] sm:$0xff] }
0x5074   :  { %v10953_v27 = vpop.f32.mrf.mxu0 }
0x5075   :  { %14454 = vpow2.f32 %v11032_v15  ;;  %v10954_v26 = vadd.f32 %v18082_v13, %v10953_v27  ;;  %v19258_v13 = vld [vmem:[#allocation49_spill] sm:$0xff] }
0x5076   :  { %v14203_v1 = vpop.f32.mrf.mxu0  ;;  %v18446_v42 = vadd.f32 %v19258_v13, %v18439_v55  ;;  %v19284_v13 = vld [vmem:[#allocation80_spill] sm:$0xff] }
0x5077   :  { %14213 = vmatmul.mubr.msk.f32.vlgmr.msra.gmra.mxu1 %vm348_vm5, %v10954_v26  ;;  %v19283_v1 = vld [vmem:[#allocation79_spill] sm:$0xff] }
0x5078   :  { %14221 = vmatpush3.msra.mxu1 %v18087_v17  ;;  %14228 = vmatprep.mubr.msk.f32.mxu1 %vm15032_vm0, %v18939_v35  ;;  %v19259_v17 = vld [vmem:[#allocation47_spill] sm:$0xff] }
0x5079   :  { %14222 = vmatprep.subr.mxu1 %v18939_v35  ;;  %v1564_v43 = vsub.f32 %v19259_v17, %v18446_v42  ;;  %v19285_v17 = vld [vmem:[#allocation85_spill] sm:$0xff] }
0x507a   :  { %14223 = vmatpush3.msra.mxu1 %v18094_v21  ;;  %v18455_v21 = vadd.f32 %v19260_v24, %v18439_v55 }
0x507b   :  { %14224 = vmatprep.subr.mxu1 %v18939_v35 }
0x507c   :  { %14225 = vmatpush3.msra.mxu1 %v18099_v44  ;;  %v1565_v44 = vmul.f32 %v1564_v43, %v1564_v43  ;;  %v4458_v45 = vsub.f32 %v19261_v19, %v18455_v21  ;;  %v19286_v43 = vld [vmem:[#allocation87_spill] sm:$0xff] }
0x507d   :  { %14226 = vmatprep.subr.mxu1 %v18939_v35 }
0x507e   :  { %14227 = vmatpush3.msra.mxu1 %v18104_v62  ;;  %v18462_v62 = vadd.f32 %v19262_v51, %v18439_v55  ;;  %v4459_v52 = vmul.f32 %v4458_v45, %v4458_v45  ;;  %v19288_v51 = vld [vmem:[#allocation50_spill] sm:$0xff] }
0x507f   :  { %14250 = vmatprep.subr.mxu1 %v18939_v35 }
0x5080   :  { %v7334_v10 = vsub.f32 %v19263_v46, %v18462_v62 }
0x5082   :  { %v14455_v7 = vpop.eup %14454  ;;  %v7335_v5 = vmul.f32 %v7334_v10, %v7334_v10 }
0x5083   :  { %11035 = vrot.lane.b32.xlu1 %v14455_v7, %s18952_s6  ;;  %v19287_v7 = vld [vmem:[#allocation88_spill] sm:$0xff] }
0x5087   :  { %1567 = vrot.lane.b32.xlu1 %v1565_v44, %s15038_s5 }
0x508b   :  { %4461 = vrot.lane.b32.xlu1 %v4459_v52, %s15038_s5  ;;  %v18537_v52 = vadd.f32 %v19288_v51, %v18439_v55 }
0x508f   :  { %7337 = vrot.lane.b32.xlu1 %v7335_v5, %s15038_s5 }
0x5093   :  { %10213 = vrot.lane.b32.xlu1 %v10211_v29, %s15038_s5  ;;  %v19290_v29 = vld [vmem:[#allocation53_spill] sm:$0xff] }
0x50f5   :  { %v11036_v39 = vpop.permute.xlu1 %11035 }
0x50f6   :  { %v11038_v14 = vmul.f32 %v11788_v54, %v11036_v39  ;;  %v18544_v54 = vadd.f32 %v19290_v29, %v18439_v55 }
0x50f8   :  { %v11039_v56 = vadd.f32 %v11038_v14, %v18427_v0 }
0x50fa   :  { %14218 = vmatmul.mubr.msk.f32.vlgmr.msra.gmra.mxu0 %vm1071_vm8, %v11039_v56  ;;  %v19291_v56 = vld [vmem:[#allocation51_spill] sm:$0xff] }
0x50fb   :  { %14232 = vmatpush3.msra.mxu0 %v19264_v59  ;;  %14247 = vmatprep.mubr.msk.f32.mxu0 %vm15032_vm0, %v18939_v35  ;;  %v5896_v59 = vsub.f32 %v19291_v56, %v18544_v54 }
0x50fc   :  { %14233 = vmatprep.subr.mxu0 %v18939_v35 }
0x50fd   :  { %14234 = vmatpush3.msra.mxu0 %v19265_v37  ;;  %v19292_v37 = vld [vmem:[#allocation59_spill] sm:$0xff] }
0x50fe   :  { %14235 = vmatprep.subr.mxu0 %v18939_v35 }
0x50ff   :  { %14236 = vmatpush3.msra.mxu0 %v19266_v40  ;;  %v5897_v40 = vmul.f32 %v5896_v59, %v5896_v59 }
0x5100   :  { %14237 = vmatprep.subr.mxu0 %v18939_v35 }
0x5101   :  { %14238 = vmatpush3.msra.mxu0 %v19267_v58  ;;  %v19293_v58 = vld [vmem:[#allocation54_spill] sm:$0xff] }
0x5102   :  { %14239 = vmatprep.subr.mxu0 %v18939_v35 }
0x5103   :  { %14240 = vmatpush3.msra.mxu0 %v19268_v38 }
0x5104   :  { %14241 = vmatprep.subr.mxu0 %v18939_v35 }
0x5105   :  { %14242 = vmatpush3.msra.mxu0 %v19269_v20 }
0x5106   :  { %14243 = vmatprep.subr.mxu0 %v18939_v35 }
0x5107   :  { %14244 = vmatpush3.msra.mxu0 %v19270_v57 }
0x5108   :  { %14245 = vmatprep.subr.mxu0 %v18939_v35 }
0x5109   :  { %14246 = vmatpush3.msra.mxu0 %v19271_v60 }
0x510a   :  { %14272 = vmatprep.subr.mxu0 %v18939_v35 }
0x5137   :  { %v11026_v63 = vpop.f32.mrf.mxu1 }
0x5138   :  { %v18560_v20 = vadd.f32 %v11026_v63, %v18439_v55 }
0x5139   :  { %v14214_v48 = vpop.f32.mrf.mxu1 }
0x513a   :  { %v11499_v60 = vsub.f32 %v18427_v0, %v18560_v20  ;;  %v6865_v0 = vmax.f32 %v18462_v62, 0.0 }
0x513c   :  { %v11500_v48 = vmul.f32 %v11499_v60, %v11499_v60 }
0x51ba   :  { %v11109_v6 = vpop.f32.mrf.mxu0 }
0x51bb   :  { %v11110_v28 = vadd.f32 %v19272_v11, %v11109_v6  ;;  %v1059_v6 = vmax.f32 %v18446_v42, 0.0  ;;  %v2551_v11 = vmax.f32 %v18537_v52, 0.0 }
0x51bc   :  { %v14219_v47 = vpop.f32.mrf.mxu0 }
0x51bd   :  { %v11113_v8 = vmax.f32 %v11110_v28, 0.0  ;;  %v1571_v28 = vsub.f32 0.0, %v1059_v6  ;;  %v3989_v47 = vmax.f32 %v18455_v21, 0.0  ;;  %v7341_v21 = vsub.f32 0.0, %v6865_v0 }
0x51bf   :  { %14229 = vmatmul.mubr.msk.f32.vlgmr.msra.gmra.mxu1 %vm348_vm5, %v11113_v8  ;;  %v3027_v8 = vsub.f32 0.0, %v2551_v11 }
0x51c0   :  { %14251 = vmatpush3.msra.mxu1 %v19273_v16  ;;  %14258 = vmatprep.mubr.msk.f32.mxu1 %vm15032_vm0, %v18939_v35  ;;  %v5427_v16 = vmax.f32 %v18544_v54, 0.0 }
0x51c1   :  { %14252 = vmatprep.subr.mxu1 %v18939_v35  ;;  %v3028_v42 = vmul.f32 1.442695, %v3027_v8 }
0x51c2   :  { %14253 = vmatpush3.msra.mxu1 %v19274_v50  ;;  %v1572_v50 = vmul.f32 1.442695, %v1571_v28 }
0x51c3   :  { %14254 = vmatprep.subr.mxu1 %v18939_v35 }
0x51c4   :  { %14255 = vmatpush3.msra.mxu1 %v19275_v3  ;;  %v19295_v3 = vld [vmem:[#allocation56_spill] sm:$0xff] }
0x51c5   :  { %14256 = vmatprep.subr.mxu1 %v18939_v35  ;;  %v4454_v60 = vsub.f32 %v3989_v47, %v19295_v3 }
0x51c6   :  { %14257 = vmatpush3.msra.mxu1 %v19276_v12  ;;  %v4456_v12 = vmul.f32 1.442695, %v19295_v3 }
0x51c7   :  { %14261 = vmatprep.subr.mxu1 %v18939_v35  ;;  %v11674_v3 = vadd.f32 -1.0, %v4454_v60 }
0x527f   :  { %v11183_v4 = vpop.f32.mrf.mxu1 }
0x5280   :  { %v11184_v61 = vadd.f32 %v19277_v9, %v11183_v4  ;;  %v4465_v4 = vsub.f32 0.0, %v3989_v47  ;;  %v19296_v9 = vld [vmem:[#allocation95_spill] sm:$0xff] }
0x5281   :  { %v14230_v23 = vpop.f32.mrf.mxu1 }
0x5282   :  { %v11187_v49 = vsel %vm348_vm5, %v11184_v61, %v18367_v25  ;;  %v3018_v61 = vmul.f32 1.442695, %v19296_v9  ;;  %v5903_v23 = vsub.f32 0.0, %v5427_v16 }
0x5283   :  { %14248 = vmatmul.mubr.msk.f32.vlgmr.msra.gmra.mxu0 %vm591_vm6, %v11187_v49  ;;  %v19297_v49 = vld [vmem:[#allocation61_spill] sm:$0xff] }
0x5284   :  { %14273 = vmatpush3.msra.mxu0 %v19278_v2  ;;  %14280 = vmatprep.mubr.msk.f32.mxu0 %vm15032_vm0, %v18939_v35  ;;  %v7332_v2 = vmul.f32 1.442695, %v19297_v49 }
0x5285   :  { %14274 = vmatprep.subr.mxu0 %v18939_v35 }
0x5286   :  { %14275 = vmatpush3.msra.mxu0 %v19279_v31 }
0x5287   :  { %14276 = vmatprep.subr.mxu0 %v18939_v35 }
0x5288   :  { %14277 = vmatpush3.msra.mxu0 %v19280_v30  ;;  %v4466_v30 = vmul.f32 1.442695, %v4465_v4 }
0x5289   :  { %14278 = vmatprep.subr.mxu0 %v18939_v35 }
0x528a   :  { %14279 = vmatpush3.msra.mxu0 %v19281_v41  ;;  %v9741_v41 = vmax.f32 %v18469_v34, 0.0 }
0x5343   :  { %v11257_v25 = vpop.f32.mrf.mxu0 }
0x5344   :  { %v11258_v15 = vadd.f32 %v19282_v32, %v11257_v25  ;;  %v19298_v25 = vld [vmem:[#allocation52_spill] sm:$0xff] }
0x5345   :  { %v14249_v27 = vpop.f32.mrf.mxu0  ;;  %v5894_v32 = vmul.f32 1.442695, %v19298_v25  ;;  %v5892_v8 = vsub.f32 %v5427_v16, %v19298_v25 }
0x5346   :  { %v11261_v26 = vmax.f32 %v11258_v15, 0.0  ;;  %v1568_v15 = vpop.permute.xlu1 %1567  ;;  %v5904_v27 = vmul.f32 1.442695, %v5903_v23 }
0x5347   :  { %v11701_v16 = vadd.f32 -1.0, %v5892_v8  ;;  %v14784_v8 = vld [vmem:[%s15218_s14] sm:$0xff] }
0x5348   :  { %14259 = vmatmul.mubr.msk.f32.vlgmr.msra.gmra.mxu1 %vm348_vm5, %v11261_v26  ;;  %v7342_v26 = vmul.f32 1.442695, %v7341_v21 }
0x5349   :  { %14262 = vmatpush3.msra.mxu1 %v19283_v1  ;;  %14269 = vmatprep.mubr.msk.f32.mxu1 %vm15032_vm0, %v18939_v35 }
0x534a   :  { %14263 = vmatprep.subr.mxu1 %v18939_v35 }
0x534b   :  { %14264 = vmatpush3.msra.mxu1 %v19284_v13  ;;  %v19299_v13 = vld [vmem:[#allocation58_spill] sm:$0xff] }
0x534c   :  { %14265 = vmatprep.subr.mxu1 %v18939_v35 }
0x534d   :  { %14266 = vmatpush3.msra.mxu1 %v19285_v17  ;;  %v10208_v17 = vmul.f32 1.442695, %v19299_v13 }
0x534e   :  { %14267 = vmatprep.subr.mxu1 %v18939_v35  ;;  %v3020_v35 = vsub.f32 %v19289_v33, %v18537_v52 }
0x534f   :  { %14268 = vmatpush3.msra.mxu1 %v19286_v43  ;;  %v10217_v43 = vsub.f32 0.0, %v9741_v41 }
0x5350   :  { %v3021_v14 = vmul.f32 %v3020_v35, %v3020_v35 }
0x5351   :  { %v10218_v51 = vmul.f32 1.442695, %v10217_v43 }
0x5408   :  { %v11331_v24 = vpop.f32.mrf.mxu1 }
0x5409   :  { %v11332_v44 = vadd.f32 %v19287_v7, %v11331_v24  ;;  %v11030_v24 = vmax.f32 %v18560_v20, 0.0  ;;  %v19300_v7 = vld [vmem:[#allocation57_spill] sm:$0xff] }
0x540a   :  { %v14260_v19 = vpop.f32.mrf.mxu1 }
0x540b   :  { %v11335_v45 = vmax.f32 %v11332_v44, 0.0  ;;  %v8770_v44 = vmul.f32 1.442695, %v19300_v7  ;;  %v11506_v52 = vsub.f32 0.0, %v11030_v24 }
0x540d   :  { %14270 = vmatmul.mubr.msk.f32.vlgmr.msra.gmra.mxu1 %vm348_vm5, %v11335_v45  ;;  %v4462_v45 = vpop.permute.xlu1 %4461  ;;  %v11507_v29 = vmul.f32 1.442695, %v11506_v52 }
0x54cd   :  { %v11405_v46 = vpop.f32.mrf.mxu1 }
0x54ce   :  { %v11406_v10 = vadd.f32 %v18295_v36, %v11405_v46  ;;  %v18554_v36 = vadd.f32 %v19292_v37, %v18439_v55  ;;  %v19294_v55 = vld [vmem:[#allocation48_spill] sm:$0xff]  ;;  %v11497_v46 = vmul.f32 1.442695, %v18430_v22  ;;  %v3016_v37 = vsub.f32 %v2551_v11, %v19296_v9 }
0x54cf   :  { %v14271_v5 = vpop.f32.mrf.mxu1  ;;  %v1562_v63 = vmul.f32 1.442695, %v19294_v55  ;;  %v1560_v59 = vsub.f32 %v1059_v6, %v19294_v55  ;;  %v7330_v9 = vsub.f32 %v6865_v0, %v19297_v49 }
0x54d0   :  { %v18546_v39 = vmax.f32 %v11406_v10, 0.0  ;;  %v8772_v38 = vsub.f32 %v19293_v58, %v18554_v36  ;;  %v8303_v31 = vmax.f32 %v18554_v36, 0.0 }
0x54d1   :  { %14456 = vpow2.f32 %v1562_v63  ;;  %v11620_v4 = vadd.f32 -1.0, %v1560_v59  ;;  %v11728_v0 = vadd.f32 -1.0, %v7330_v9 }
0x54d2   :  { %11411 = vrot.lane.b32.xlu0 %v18546_v39, %s18990_s22  ;;  %v8773_v57 = vmul.f32 %v8772_v38, %v8772_v38  ;;  %14458 = vpow2.f32 %v1572_v50  ;;  %v8779_v1 = vsub.f32 0.0, %v8303_v31  ;;  %v8768_v25 = vsub.f32 %v8303_v31, %v19300_v7 }
0x54d3   :  { %14460 = vpow2.f32 %v4456_v12  ;;  %v11513_v31 = vlaneseq }
0x54d4   :  { %14462 = vpow2.f32 %v3018_v61  ;;  %v8780_v19 = vmul.f32 1.442695, %v8779_v1  ;;  %v11647_v61 = vadd.f32 -1.0, %v3016_v37 }
0x54d5   :  { %14464 = vpow2.f32 %v3028_v42 }
0x54d6   :  { %3023 = vrot.lane.b32.xlu0 %v3021_v14, %s15038_s5  ;;  %14466 = vpow2.f32 %v7332_v2  ;;  %v7338_v14 = vpop.permute.xlu1 %7337 }
0x54d7   :  { %14468 = vpow2.f32 %v4466_v30 }
0x54d8   :  { %14470 = vpow2.f32 %v5894_v32 }
0x54d9   :  { %14472 = vpow2.f32 %v5904_v27 }
0x54da   :  { %5899 = vrot.lane.b32.xlu0 %v5897_v40, %s15038_s5  ;;  %14474 = vpow2.f32 %v7342_v26  ;;  %v10214_v42 = vpop.permute.xlu1 %10213 }
0x54db   :  { %14476 = vpow2.f32 %v10208_v17 }
0x54dc   :  { %14478 = vpow2.f32 %v8770_v44  ;;  %v10206_v44 = vsub.f32 %v9741_v41, %v19299_v13 }
0x54dd   :  { %14480 = vpow2.f32 %v8780_v19 }
0x54de   :  { %8775 = vrot.lane.b32.xlu0 %v8773_v57, %s15038_s5  ;;  %v14457_v10 = vpop.eup %14456  ;;  %14482 = vpow2.f32 %v10218_v51 }
0x54df   :  { %v14459_v33 = vpop.eup %14458  ;;  %v1570_v35 = vadd.f32 %v14457_v10, %v1568_v15  ;;  %14484 = vpow2.f32 %v11497_v46  ;;  %v11755_v46 = vadd.f32 -1.0, %v8768_v25  ;;  %v11495_v10 = vsub.f32 %v11030_v24, %v18430_v22 }
0x54e0   :  { %v14461_v54 = vpop.eup %14460  ;;  %14486 = vpow2.f32 %v11507_v29 }
0x54e1   :  { %v14463_v56 = vpop.eup %14462  ;;  %v4464_v40 = vadd.f32 %v14461_v54, %v4462_v45  ;;  %v11782_v54 = vadd.f32 -1.0, %v10206_v44  ;;  %v11805_v37 = vadd.f32 -1.0, %v11495_v10 }
0x54e2   :  { %11502 = vrot.lane.b32.xlu0 %v11500_v48, %s15038_s5  ;;  %v14465_v58 = vpop.eup %14464  ;;  %v1574_v48 = vmul.f32 %v14459_v33, %v1570_v35 }
0x54e3   :  { %v14467_v57 = vpop.eup %14466 }
0x54e4   :  { %v14469_v63 = vpop.eup %14468  ;;  %v7340_v50 = vadd.f32 %v14467_v57, %v7338_v14  ;;  %v1575_v2 = vadd.f32 %v11620_v4, %v1574_v48  ;;  %v11490_v48 = vsub.f32 0.0, %v18546_v39 }
0x54e5   :  { %v14471_v12 = vpop.eup %14470  ;;  %v4468_v6 = vmul.f32 %v14469_v63, %v4464_v40 }
0x54e6   :  { %v14473_v11 = vpop.eup %14472 }
0x54e7   :  { %v14475_v47 = vpop.eup %14474  ;;  %v4469_v27 = vadd.f32 %v11674_v3, %v4468_v6 }
0x54e8   :  { %v14477_v32 = vpop.eup %14476  ;;  %v7344_v15 = vmul.f32 %v14475_v47, %v7340_v50 }
0x54e9   :  { %v10216_v26 = vadd.f32 %v14477_v32, %v10214_v42  ;;  %v14479_v62 = vpop.eup %14478 }
0x54ea   :  { %v14481_v43 = vpop.eup %14480  ;;  %v7345_v36 = vadd.f32 %v11728_v0, %v7344_v15 }
0x54eb   :  { %v14483_v52 = vpop.eup %14482 }
0x54ec   :  { %v10220_v7 = vmul.f32 %v14483_v52, %v10216_v26  ;;  %v14485_v35 = vpop.eup %14484 }
0x54ed   :  { %v14487_v13 = vpop.eup %14486 }
0x54ee   :  { %v10221_v59 = vadd.f32 %v11782_v54, %v10220_v7 }
0x5544   :  { %v11412_v5 = vpop.permute.xlu0 %11411 }
0x5545   :  { %14281 = vmatmul.mubr.msk.f32.vlgmr.msra.gmra.mxu0 %vm348_vm5, %v11412_v5 }
0x5548   :  { %v3024_v38 = vpop.permute.xlu0 %3023 }
0x5549   :  { %v3026_v28 = vadd.f32 %v14463_v56, %v3024_v38  ;;  %v11514_v56 = vshrl.u32 %v11513_v31, 7 }
0x554b   :  { %v3030_v55 = vmul.f32 %v14465_v58, %v3026_v28  ;;  %vm11515_vm10 = vcmp.lt.s32.totalorder %v11514_v56, 4  ;;  %v11491_v28 = vmul.f32 1.442695, %v11490_v48 }
0x554c   :  { %v5900_v23 = vpop.permute.xlu0 %5899 }
0x554d   :  { %v3031_v21 = vadd.f32 %v11647_v61, %v3030_v55  ;;  %v5902_v30 = vadd.f32 %v14471_v12, %v5900_v23  ;;  %14488 = vpow2.f32 %v11491_v28  ;;  %v11485_v61 = vmul.f32 0.5, %v18546_v39 }
0x554f   :  { %v3243_v1 = vadd.f32 %v3031_v21, %v1575_v2  ;;  %v5906_v17 = vmul.f32 %v14473_v11, %v5902_v30  ;;  %v11486_v9 = vsub.f32 -0.9189385, %v11485_v61 }
0x5550   :  { %v8776_v49 = vpop.permute.xlu0 %8775 }
0x5551   :  { %v4681_v19 = vadd.f32 %v4469_v27, %v3243_v1  ;;  %v5907_v45 = vadd.f32 %v11701_v16, %v5906_v17  ;;  %v8778_v51 = vadd.f32 %v14479_v62, %v8776_v49 }
0x5553   :  { %v6119_v5 = vadd.f32 %v5907_v45, %v4681_v19  ;;  %v8782_v33 = vmul.f32 %v14481_v43, %v8778_v51 }
0x5554   :  { %v11503_v29 = vpop.permute.xlu0 %11502 }
0x5555   :  { %v7557_v14 = vadd.f32 %v7345_v36, %v6119_v5  ;;  %v8783_v34 = vadd.f32 %v11755_v46, %v8782_v33  ;;  %v11505_v41 = vadd.f32 %v14485_v35, %v11503_v29 }
0x5557   :  { %v8995_v40 = vadd.f32 %v8783_v34, %v7557_v14  ;;  %v11509_v58 = vmul.f32 %v14487_v13, %v11505_v41 }
0x5559   :  { %v11510_v38 = vadd.f32 %v11805_v37, %v11509_v58  ;;  %v10433_v57 = vadd.f32 %v10221_v59, %v8995_v40 }
0x555a   :  { %v14489_v11 = vpop.eup %14488 }
0x555b   :  { %v11512_v20 = vadd.f32 %v11510_v38, %v10433_v57 }
0x555d   :  { %v11527_v22 = vsel %vm11515_vm10, %v11512_v20, 0.0 }
0x555e   :  { %11529 = vrot.lane.b32.xlu1 %v11527_v22, %s18952_s6 }
0x55d0   :  { %v11530_v24 = vpop.permute.xlu1 %11529 }
0x55d1   :  { %v11532_v60 = vsel %vm1071_vm8, %v11530_v24, 0.0 }
0x55d2   :  { %11533 = vadd.xlane.f32.xlu1 %v11532_v60 }
0x5605   :  { %v11481_v63 = vpop.f32.mrf.mxu0 }
0x5606   :  { %v11482_v50 = vadd.f32 %v14784_v8, %v11481_v63 }
0x5607   :  { %v14282_v12 = vpop.f32.mrf.mxu0 }
0x5608   :  { %v11487_v4 = vsub.f32 %v18335_v18, %v11482_v50 }
0x560a   :  { %v11488_v6 = vmul.f32 %v11487_v4, %v11487_v4 }
0x560c   :  { %v11489_v55 = vmul.f32 0.5, %v11488_v6 }
0x560e   :  { %v11493_v42 = vmul.f32 %v14489_v11, %v11489_v55 }
0x5610   :  { %v11494_v23 = vsub.f32 %v11486_v9, %v11493_v42 }
0x5612   :  { %v11511_v47 = vadd.f32 %v11494_v23, %v18325_v53 }
0x5614   :  { %v11516_v3 = vsel %vm11515_vm10, %v11511_v47, 0.0 }
0x5615   :  { %v11517_v2 = vsel %vm264_vm2, %v11516_v3, 0.0 }
0x5616   :  { %11518 = vadd.xlane.f32.xlu0 %v11517_v2 }
0x565b   :  { %v11534_v21 = vpop.xlane.xlu1 %11533 }
0x565c   :  { %v11535_v30 = vrot.slane %v11534_v21, 4 }
0x565e   :  { %v11536_v32 = vadd.f32 %v11535_v30, %v11534_v21 }
0x5660   :  { %v11537_v16 = vrot.slane %v11536_v32, 2 }
0x5662   :  { %v11538_v15 = vadd.f32 %v11537_v16, %v11536_v32 }
0x5664   :  { %v11539_v1 = vrot.slane %v11538_v15, 1 }
0x5666   :  { %v11540_v53 = vadd.f32 %v11539_v1, %v11538_v15 }
0x569f   :  { %v11519_v18 = vpop.xlane.xlu0 %11518 }
0x56a0   :  { %v11520_v25 = vrot.slane %v11519_v18, 4 }
0x56a2   :  { %v11521_v39 = vadd.f32 %v11520_v25, %v11519_v18 }
0x56a4   :  { %v11522_v27 = vrot.slane %v11521_v39, 2 }
0x56a6   :  { %v11523_v26 = vadd.f32 %v11522_v27, %v11521_v39 }
0x56a8   :  { %v11524_v17 = vrot.slane %v11523_v26, 1 }
0x56aa   :  { %v11525_v62 = vadd.f32 %v11524_v17, %v11523_v26 }
0x56ac   :  { %14283 = vpush %v11525_v62 }
0x56ad   :  { %14285 = vpush %v11540_v53 }
0x56dd   :  { %s14284_s25 = spop %14283 }
0x56de   :  { %s11542_s14 = ssub.f32 0.0, %s14284_s25  ;;  %s14286_s6 = spop %14285 }
0x56df   :  { %s11543_s20 = smul.f32 0.5, %s14286_s6 }
0x56e1   :  { %s11544_s27 = sadd.f32 %s11543_s20, %s11542_s14 }
0x56e3   :  { %11546 = sst [smem:[#allocation17]] %s11544_s27 }
0x56e4   :  { %11554 = dma.smem_to_hbm %s15039_s29, 16, %s19301_s13, [#allocation4]  }
0x56e5   :  { %14983 = dma.done.wait [#allocation4], 16  }
0x56e6   :  { %14984 = vsyncadd [#allocation4], 4294967280 }
0x56e7   :  { %11558 = sfence }
0x56e8   :  { %11559 = vsyncpa [#allocation3], 1 }
0x56e9   :  { %11560 = vsyncpa [#allocation6], 1 }
0x56ea   :  { %11561 = vsyncpa [#allocation9], 1 }
0x56eb   :  { %11562 = vsyncpa [#allocation12], 1 }
0x56ec   :  { %11563 = vsyncpa [#allocation15], 1 }
0x56ed   :  { %11564 = vsyncpa [#allocation4], 1 }

</bundles_post_ra>
